<compile_context>
chip_gen: v6e
topology: v6e:2x2x1
jax: 0.10.0
libtpu: 0.0.40
codegen_flags: <defaults>
</compile_context>

<pallas_src>
import functools

import jax
import jax.numpy as jnp
from jax.experimental import pallas as pl
from jax.experimental.pallas import tpu as pltpu

VMEM_SPEC = pl.BlockSpec(memory_space=pltpu.MemorySpace.VMEM)

LEAKY_SLOPE = 0.2
BN_EPS_DEFAULT = 1e-5
BN_EPS_08 = 0.8   # nn.BatchNorm2d(C, 0.8): the positional arg is eps (DAFL quirk)


# ------------------------------ small helpers ------------------------------- #

def _pick_chunk(h, w, batch, max_rows=128):
    """Largest divisor `c` of h with batch*c*w <= max_rows so the f32 conv
    accumulator stays ~<= (128, Cout).  Falls back to 1 (bigger accumulator,
    may spill) when even a single row exceeds the budget."""
    best = 1
    for c in range(1, h + 1):
        if h % c == 0 and batch * c * w <= max_rows:
            best = c
    return best


def _nbytes(shape, dtype):
    n = 1
    for d in shape:
        n *= int(d)
    return n * jnp.dtype(dtype).itemsize


def _vmem_params(byte_counts):
    need = sum(byte_counts)
    limit = min(max(int(need * 1.5) + (8 << 20), 32 << 20), 100 << 20)
    return pltpu.CompilerParams(vmem_limit_bytes=limit)


# ------------------------------ kernel helpers ------------------------------ #

def _upsample2x_im2col(src_ref, scr, imc, *, row_chunk, scale=None, shift=None):
    """Nearest-2x upsample of src (B,H,W,C) (+ optional per-channel affine),
    zero pad=1, into scr (B,2H+2,2W+2,C) f32, and its 3x3-conv width-im2col
    (columns ordered (dx, cin)) into imc (B,2H+2,2W,3C) bf16 — all in VMEM."""
    B, H, W, C = src_ref.shape
    Hp, Wp, Wo = 2 * H + 2, 2 * W + 2, 2 * W

    # Zero borders first (the main loop re-reads freshly written rows,
    # including the W padding, to derive their im2col).
    scr[:, :, 0:1, :] = jnp.zeros((B, Hp, 1, C), jnp.float32)
    scr[:, :, Wp - 1:Wp, :] = jnp.zeros((B, Hp, 1, C), jnp.float32)
    scr[:, 0:1, :, :] = jnp.zeros((B, 1, Wp, C), jnp.float32)
    scr[:, Hp - 1:Hp, :, :] = jnp.zeros((B, 1, Wp, C), jnp.float32)
    zrow = jnp.zeros((B, 1, Wo, 3 * C), imc.dtype)
    imc[:, 0:1, :, :] = zrow
    imc[:, Hp - 1:Hp, :, :] = zrow

    def body(i, _):
        h0 = pl.multiple_of(i * row_chunk, row_chunk)
        xv = src_ref[:, pl.ds(h0, row_chunk), :, :].astype(jnp.float32)
        if scale is not None:
            xv = xv * scale + shift
        # Height doubling in registers: leading-dim interleave, (W, C) untouched
        # so the reshape is a free re-index of the tile array.
        xh = jnp.concatenate([xv[:, :, None, :, :], xv[:, :, None, :, :]],
                             axis=2).reshape(B, 2 * row_chunk, W, C)
        nr = 2 * row_chunk
        r0 = 1 + 2 * h0
        # Width doubling: two sublane-strided stores (odd / even target columns).
        scr[:, pl.ds(r0, nr), pl.ds(1, W, 2), :] = xh
        scr[:, pl.ds(r0, nr), pl.ds(2, W, 2), :] = xh
        # Width-im2col of the freshly written rows; the bf16 cast happens here,
        # once, instead of inside the conv inner loop.
        rows = scr[:, pl.ds(r0, nr), :, :]
        for dx in range(3):
            imc[:, pl.ds(r0, nr), :, dx * C:(dx + 1) * C] = (
                rows[:, :, dx:dx + Wo, :].astype(imc.dtype))
        return 0

    jax.lax.fori_loop(0, H // row_chunk, body, 0)


def _conv3x3(imc, w_ref, h0, rows, w_out):
    """3x3 conv (stride 1) for output rows [h0, h0+rows) from the width-im2col
    scratch: one K=3*Cin bf16 matmul per dy, f32 accumulation."""
    B = imc.shape[0]
    K = imc.shape[3]
    cout = w_ref.shape[2]
    m = B * rows * w_out
    acc = jnp.zeros((m, cout), jnp.float32)
    for dy in range(3):
        blk = imc[:, pl.ds(h0 + dy, rows), :, :].reshape(m, K)
        acc = acc + jnp.dot(blk, w_ref[dy], preferred_element_type=jnp.float32)
    return acc


# --------------------------------- kernels ---------------------------------- #

def _linear_kernel(z_ref, w_ref, b_ref, o_ref):
    # z: (B, L) f32, w: (L, N) bf16 (columns pre-permuted to NHWC), b: (1, N) f32
    o_ref[...] = jnp.dot(z_ref[...].astype(jnp.bfloat16), w_ref[...],
                         preferred_element_type=jnp.float32) + b_ref[...]


def _block1_kernel(x_ref, g0_ref, b0_ref, w1_ref, cb1_ref, g1_ref, bb1_ref,
                   o_ref, scr, imc, *, chunk, up_chunk):
    B, Hs, Ws, C = x_ref.shape
    H1 = W1 = 2 * Hs

    # conv_blocks0: BatchNorm2d(128), eps=1e-5, batch stats (biased variance).
    # The affine is folded into the upsample pass below (scale / shift).
    x2 = x_ref[...].reshape(B * Hs * Ws, C)
    mu0 = jnp.mean(x2, axis=0, keepdims=True)
    var0 = jnp.mean((x2 - mu0) ** 2, axis=0, keepdims=True)
    scale0 = jax.lax.rsqrt(var0 + BN_EPS_DEFAULT) * g0_ref[...]
    shift0 = b0_ref[...] - mu0 * scale0

    # nearest-2x upsample + pad + conv1 width-im2col, entirely in VMEM.
    _upsample2x_im2col(x_ref, scr, imc, row_chunk=up_chunk,
                       scale=scale0.reshape(1, 1, 1, C),
                       shift=shift0.reshape(1, 1, 1, C))

    # Conv2d(128,128,3,p1), row-chunked; one-pass BN1 statistics; raw conv
    # output parked (bf16) in o_ref.
    bias1 = cb1_ref[...]

    def conv_body(i, carry):
        s, ss = carry
        h0 = pl.multiple_of(i * chunk, chunk)
        acc = _conv3x3(imc, w1_ref, h0, chunk, W1) + bias1
        o_ref[:, pl.ds(h0, chunk), :, :] = (
            acc.reshape(B, chunk, W1, C).astype(o_ref.dtype))
        return (s + jnp.sum(acc, axis=0, keepdims=True),
                ss + jnp.sum(acc * acc, axis=0, keepdims=True))

    s1, ss1 = jax.lax.fori_loop(
        0, H1 // chunk, conv_body,
        (jnp.zeros((1, C), jnp.float32), jnp.zeros((1, C), jnp.float32)))

    # BatchNorm2d(128, 0.8) (eps=0.8!) + LeakyReLU(0.2), in place on o_ref.
    cnt = float(B * H1 * W1)
    mean1 = s1 / cnt
    var1 = jnp.maximum(ss1 / cnt - mean1 * mean1, 0.0)
    scale1 = jax.lax.rsqrt(var1 + BN_EPS_08) * g1_ref[...]
    shift1 = bb1_ref[...] - mean1 * scale1

    def bn_body(i, _):
        h0 = pl.multiple_of(i * chunk, chunk)
        v = o_ref[:, pl.ds(h0, chunk), :, :].astype(jnp.float32)
        v = v.reshape(B * chunk * W1, C)
        y = v * scale1 + shift1
        y = jnp.where(y >= 0.0, y, LEAKY_SLOPE * y)
        o_ref[:, pl.ds(h0, chunk), :, :] = (
            y.reshape(B, chunk, W1, C).astype(o_ref.dtype))
        return 0

    jax.lax.fori_loop(0, H1 // chunk, bn_body, 0)


def _block2_kernel(y_ref, w2_ref, cb2_ref, g2_ref, bb2_ref, w3_ref, cb3_ref,
                   o_ref, scr, imc2, a2raw, imc3, tpad,
                   *, chunk, up_chunk, nc):
    B, H1, W1, _ = y_ref.shape
    H2, W2 = 2 * H1, 2 * W1
    C2 = w2_ref.shape[2]          # 64
    C3 = w3_ref.shape[2]          # 128 (conv3 padded to a lane-dense width)
    cnt = float(B * H2 * W2)

    # nearest-2x upsample + pad + conv2 width-im2col (VMEM only).
    _upsample2x_im2col(y_ref, scr, imc2, row_chunk=up_chunk)

    # Conv2d(128,64,3,p1): raw output parked (bf16) + one-pass BN2 statistics.
    bias2 = cb2_ref[...]

    def conv2_body(i, carry):
        s, ss = carry
        h0 = pl.multiple_of(i * chunk, chunk)
        acc = _conv3x3(imc2, w2_ref, h0, chunk, W2) + bias2
        a2raw[:, pl.ds(h0, chunk), :, :] = (
            acc.reshape(B, chunk, W2, C2).astype(a2raw.dtype))
        return (s + jnp.sum(acc, axis=0, keepdims=True),
                ss + jnp.sum(acc * acc, axis=0, keepdims=True))

    s2, ss2 = jax.lax.fori_loop(
        0, H2 // chunk, conv2_body,
        (jnp.zeros((1, C2), jnp.float32), jnp.zeros((1, C2), jnp.float32)))

    mean2 = s2 / cnt
    var2 = jnp.maximum(ss2 / cnt - mean2 * mean2, 0.0)
    scale2 = jax.lax.rsqrt(var2 + BN_EPS_08) * g2_ref[...]
    shift2 = bb2_ref[...] - mean2 * scale2

    # BatchNorm2d(64, 0.8) + LeakyReLU(0.2); the normalized activation goes
    # straight into conv3's width-im2col scratch (padding=1 folded in), so it
    # never needs a separate padded buffer or an extra read-back pass.
    imc3[:, 0:1, :, :] = jnp.zeros((B, 1, W2, 3 * C2), imc3.dtype)
    imc3[:, H2 + 1:H2 + 2, :, :] = jnp.zeros((B, 1, W2, 3 * C2), imc3.dtype)

    def bn2_body(i, _):
        h0 = pl.multiple_of(i * chunk, chunk)
        v = a2raw[:, pl.ds(h0, chunk), :, :].astype(jnp.float32)
        v = v.reshape(B * chunk * W2, C2)
        y = v * scale2 + shift2
        y = jnp.where(y >= 0.0, y, LEAKY_SLOPE * y)
        yb = y.reshape(B, chunk, W2, C2).astype(imc3.dtype)
        r0 = 1 + h0
        # dx = 1 tap: the activation itself
        imc3[:, pl.ds(r0, chunk), :, C2:2 * C2] = yb
        # dx = 0 tap: shifted right by one column, zero at the left edge
        imc3[:, pl.ds(r0, chunk), 1:W2, 0:C2] = yb[:, :, 0:W2 - 1, :]
        imc3[:, pl.ds(r0, chunk), 0:1, 0:C2] = jnp.zeros(
            (B, chunk, 1, C2), imc3.dtype)
        # dx = 2 tap: shifted left by one column, zero at the right edge
        imc3[:, pl.ds(r0, chunk), 0:W2 - 1, 2 * C2:3 * C2] = yb[:, :, 1:W2, :]
        imc3[:, pl.ds(r0, chunk), W2 - 1:W2, 2 * C2:3 * C2] = jnp.zeros(
            (B, chunk, 1, C2), imc3.dtype)
        return 0

    jax.lax.fori_loop(0, H2 // chunk, bn2_body, 0)

    # Conv2d(64, nc, 3, p1) padded to 128 output lanes + Tanh; one-pass BN3
    # statistics of the tanh output (padded lanes are identically zero).
    bias3 = cb3_ref[...]

    def conv3_body(i, carry):
        s, ss = carry
        h0 = pl.multiple_of(i * chunk, chunk)
        acc = _conv3x3(imc3, w3_ref, h0, chunk, W2) + bias3
        t = jnp.tanh(acc)
        tpad[:, pl.ds(h0, chunk), :, :] = t.reshape(B, chunk, W2, C3)
        return (s + jnp.sum(t, axis=0, keepdims=True),
                ss + jnp.sum(t * t, axis=0, keepdims=True))

    s3, ss3 = jax.lax.fori_loop(
        0, H2 // chunk, conv3_body,
        (jnp.zeros((1, C3), jnp.float32), jnp.zeros((1, C3), jnp.float32)))

    # BatchNorm2d(nc, affine=False), eps=1e-5.  Normalize the 128-wide tile,
    # transpose per batch and keep the nc real channels -> lane-dense NCHW-flat
    # (B, nc, H2*W2) output (no masked 3/128-lane epilogue passes).
    mean3 = s3 / cnt
    var3 = jnp.maximum(ss3 / cnt - mean3 * mean3, 0.0)
    inv3 = jax.lax.rsqrt(var3 + BN_EPS_DEFAULT)

    def out_body(b, _):
        v = tpad[b].reshape(H2 * W2, C3)
        yn = (v - mean3) * inv3
        o_ref[b] = yn.T[0:nc, :]
        return 0

    jax.lax.fori_loop(0, B, out_body, 0)


# --------------------------- parameters & forward --------------------------- #

def _merge_conv_weight(w):
    """(3, 3, Cin, Cout) f32 -> (3, 3*Cin, Cout) bf16 (per-dy rows ordered (dx, cin))."""
    kh, kw, cin, cout = w.shape
    return w.reshape(kh, kw * cin, cout).astype(jnp.bfloat16)


def init_generator_params(key, img_size, n_channels, latent_dim):
    init_size = img_size // 4
    n_l1 = 128 * init_size ** 2
    ks = jax.random.split(key, 8)

    def nrm(k, shape, scale=0.05):
        return scale * jax.random.normal(k, shape, jnp.float32)

    # l1 generated in the PyTorch (c, h, w) column order, then permuted once so
    # the kernel's (B, N) output reshapes for free to NHWC (B, h, w, c).
    l1_w = nrm(ks[0], (latent_dim, n_l1))
    l1_b = nrm(ks[1], (n_l1,))
    l1_w = l1_w.reshape(latent_dim, 128, init_size, init_size)
    l1_w = l1_w.transpose(0, 2, 3, 1).reshape(latent_dim, n_l1)
    l1_b = l1_b.reshape(128, init_size, init_size).transpose(1, 2, 0).reshape(1, n_l1)

    conv1_w = nrm(ks[2], (3, 3, 128, 128))       # (kh, kw, Cin, Cout), NHWC kernels
    conv2_w = nrm(ks[4], (3, 3, 128, 64))
    conv3_w = nrm(ks[6], (3, 3, 64, n_channels))
    # Pad conv3 Cout -> 128 so conv3 / Tanh / BN3 run on full-width lanes.
    c3pad = 128
    conv3_w = jnp.pad(conv3_w, ((0, 0), (0, 0), (0, 0), (0, c3pad - n_channels)))
    conv3_b = jnp.pad(nrm(ks[7], (1, n_channels)),
                      ((0, 0), (0, c3pad - n_channels)))

    return {
        "l1_w": l1_w.astype(jnp.bfloat16),
        "l1_b": l1_b,
        "bn0_g": jnp.ones((1, 128), jnp.float32),
        "bn0_b": jnp.zeros((1, 128), jnp.float32),
        "conv1_w": _merge_conv_weight(conv1_w),
        "conv1_b": nrm(ks[3], (1, 128)),
        "bn1_g": jnp.ones((1, 128), jnp.float32),
        "bn1_b": jnp.zeros((1, 128), jnp.float32),
        "conv2_w": _merge_conv_weight(conv2_w),
        "conv2_b": nrm(ks[5], (1, 64)),
        "bn2_g": jnp.ones((1, 64), jnp.float32),
        "bn2_b": jnp.zeros((1, 64), jnp.float32),
        "conv3_w": _merge_conv_weight(conv3_w),
        "conv3_b": conv3_b,
    }


def generator_forward(params, z, *, img_size, n_channels):
    ii = img_size // 4
    B = z.shape[0]
    n_l1 = 128 * ii * ii
    H1 = W1 = 2 * ii
    H2 = W2 = 4 * ii

    # l1: Linear(latent, 128*ii*ii), bf16 MXU operands / f32 accumulation.
    l1_bytes = [_nbytes(z.shape, z.dtype),
                _nbytes(params["l1_w"].shape, jnp.bfloat16),
                _nbytes(params["l1_b"].shape, jnp.float32),
                _nbytes((B, n_l1), jnp.float32)]
    out = pl.pallas_call(
        _linear_kernel,
        out_shape=jax.ShapeDtypeStruct((B, n_l1), jnp.float32),
        in_specs=[VMEM_SPEC] * 3,
        out_specs=VMEM_SPEC,
        compiler_params=_vmem_params(l1_bytes),
    )(z, params["l1_w"], params["l1_b"])
    x = out.reshape(B, ii, ii, 128)   # free reshape: columns pre-permuted to NHWC

    # fused block1: BN(128) -> up2x -> Conv(128,128) -> BN(128, eps=0.8) -> LeakyReLU
    up1 = _pick_chunk(ii, ii, B, 64)
    ch1 = _pick_chunk(H1, W1, B, 128)
    scr1_shape = (B, H1 + 2, W1 + 2, 128)
    imc1_shape = (B, H1 + 2, W1, 384)
    b1_in = (x, params["bn0_g"], params["bn0_b"], params["conv1_w"],
             params["conv1_b"], params["bn1_g"], params["bn1_b"])
    b1_out = jax.ShapeDtypeStruct((B, H1, W1, 128), jnp.bfloat16)
    b1_bytes = ([_nbytes(a.shape, a.dtype) for a in b1_in]
                + [_nbytes(b1_out.shape, b1_out.dtype),
                   _nbytes(scr1_shape, jnp.float32),
                   _nbytes(imc1_shape, jnp.bfloat16)])
    y = pl.pallas_call(
        functools.partial(_block1_kernel, chunk=ch1, up_chunk=up1),
        out_shape=b1_out,
        in_specs=[VMEM_SPEC] * len(b1_in),
        out_specs=VMEM_SPEC,
        scratch_shapes=[pltpu.VMEM(scr1_shape, jnp.float32),
                        pltpu.VMEM(imc1_shape, jnp.bfloat16)],
        compiler_params=_vmem_params(b1_bytes),
    )(*b1_in)

    # fused block2: up2x -> Conv(128,64) -> BN(64,0.8) -> LeakyReLU
    #               -> Conv(64,nc) -> Tanh -> BN(nc, no affine)
    up2 = _pick_chunk(H1, W1, B, 64)
    ch2 = _pick_chunk(H2, W2, B, 128)
    scr2_shape = (B, H2 + 2, W2 + 2, 128)
    imc2_shape = (B, H2 + 2, W2, 384)
    a2_shape = (B, H2, W2, 64)
    imc3_shape = (B, H2 + 2, W2, 192)
    tpad_shape = (B, H2, W2, 128)
    b2_in = (y, params["conv2_w"], params["conv2_b"], params["bn2_g"],
             params["bn2_b"], params["conv3_w"], params["conv3_b"])
    b2_out = jax.ShapeDtypeStruct((B, n_channels, H2 * W2), jnp.float32)
    b2_bytes = ([_nbytes(a.shape, a.dtype) for a in b2_in]
                + [_nbytes(b2_out.shape, b2_out.dtype),
                   _nbytes(scr2_shape, jnp.float32),
                   _nbytes(imc2_shape, jnp.bfloat16),
                   _nbytes(a2_shape, jnp.bfloat16),
                   _nbytes(imc3_shape, jnp.bfloat16),
                   _nbytes(tpad_shape, jnp.float32)])
    img = pl.pallas_call(
        functools.partial(_block2_kernel, chunk=ch2, up_chunk=up2, nc=n_channels),
        out_shape=b2_out,
        in_specs=[VMEM_SPEC] * len(b2_in),
        out_specs=VMEM_SPEC,
        scratch_shapes=[pltpu.VMEM(scr2_shape, jnp.float32),
                        pltpu.VMEM(imc2_shape, jnp.bfloat16),
                        pltpu.VMEM(a2_shape, jnp.bfloat16),
                        pltpu.VMEM(imc3_shape, jnp.bfloat16),
                        pltpu.VMEM(tpad_shape, jnp.float32)],
        compiler_params=_vmem_params(b2_bytes),
    )(*b2_in)

    # Kernel already emits NCHW-flat (B, nc, H*W); only a free reshape remains.
    return img.reshape(B, n_channels, H2, W2)


if __name__ == "__main__":
    # Small, module-consistent shapes: img_size=16 -> init_size=4, latent_dim=64.
    IMG_SIZE, N_CHANNELS, LATENT_DIM, BATCH = 16, 3, 64, 2

    key = jax.random.PRNGKey(0)
    pkey, zkey = jax.random.split(key)
    params = init_generator_params(pkey, IMG_SIZE, N_CHANNELS, LATENT_DIM)
    z = jax.random.normal(zkey, (BATCH, LATENT_DIM), jnp.float32)

    fwd = jax.jit(functools.partial(generator_forward,
                                    img_size=IMG_SIZE, n_channels=N_CHANNELS))
    img = jax.block_until_ready(fwd(params, z))

    assert img.shape == (BATCH, N_CHANNELS, IMG_SIZE, IMG_SIZE), img.shape
    assert bool(jnp.all(jnp.isfinite(img)))
    print("KERNEL_OK")
</pallas_src>

<mosaic_0001>
module attributes {stable_mosaic.version = 11 : i64} {
  func.func @_linear_kernel(%arg0: memref<2x64xf32, #tpu.memory_space<vmem>>, %arg1: memref<64x2048xbf16, #tpu.memory_space<vmem>>, %arg2: memref<1x2048xf32, #tpu.memory_space<vmem>>, %arg3: memref<2x2048xf32, #tpu.memory_space<vmem>>) attributes {dimension_semantics = [], scalar_prefetch = 0 : i64, scratch_operands = 0 : i64, tpu.core_type = #tpu.core_type<tc>} {
    %c0 = arith.constant 0 : index
    %c0_0 = arith.constant 0 : index
    %0 = vector.load %arg0[%c0, %c0_0] : memref<2x64xf32, #tpu.memory_space<vmem>>, vector<2x64xf32>
    %1 = arith.truncf %0 : vector<2x64xf32> to vector<2x64xbf16>
    %c0_1 = arith.constant 0 : index
    %c0_2 = arith.constant 0 : index
    %2 = vector.load %arg1[%c0_1, %c0_2] : memref<64x2048xbf16, #tpu.memory_space<vmem>>, vector<64x2048xbf16>
    %cst = arith.constant dense<0.000000e+00> : vector<2x2048xf32>
    %3 = tpu.matmul %1, %2, %cst {dimension_numbers = #tpu.dot_dimension_numbers<[1], [0], [0], [1], [0, 0, 1, 1], [], []>} : vector<2x64xbf16>, vector<64x2048xbf16>, vector<2x2048xf32> -> vector<2x2048xf32>
    %c0_3 = arith.constant 0 : index
    %c0_4 = arith.constant 0 : index
    %4 = vector.load %arg2[%c0_3, %c0_4] : memref<1x2048xf32, #tpu.memory_space<vmem>>, vector<1x2048xf32>
    %5 = vector.broadcast %4 : vector<1x2048xf32> to vector<2x2048xf32>
    %6 = arith.addf %3, %5 : vector<2x2048xf32>
    %c0_5 = arith.constant 0 : index
    %c0_6 = arith.constant 0 : index
    %7 = vector.load %arg3[%c0_5, %c0_6] : memref<2x2048xf32, #tpu.memory_space<vmem>>, vector<2x2048xf32>
    tpu.vector_store %arg3[%c0_5, %c0_6], %6 {strides = array<i32>} : memref<2x2048xf32, #tpu.memory_space<vmem>>, vector<2x2048xf32>,
    return
  }
}

module attributes {stable_mosaic.version = 11 : i64} {
  func.func @_block1_kernel(%arg0: memref<2x4x4x128xf32, #tpu.memory_space<vmem>>, %arg1: memref<1x128xf32, #tpu.memory_space<vmem>>, %arg2: memref<1x128xf32, #tpu.memory_space<vmem>>, %arg3: memref<3x384x128xbf16, #tpu.memory_space<vmem>>, %arg4: memref<1x128xf32, #tpu.memory_space<vmem>>, %arg5: memref<1x128xf32, #tpu.memory_space<vmem>>, %arg6: memref<1x128xf32, #tpu.memory_space<vmem>>, %arg7: memref<2x8x8x128xbf16, #tpu.memory_space<vmem>>, %arg8: memref<2x10x10x128xf32, #tpu.memory_space<vmem>>, %arg9: memref<2x10x8x384xbf16, #tpu.memory_space<vmem>>) attributes {dimension_semantics = [], scalar_prefetch = 0 : i64, scratch_operands = 2 : i64, tpu.core_type = #tpu.core_type<tc>} {
    %c0 = arith.constant 0 : index
    %c0_0 = arith.constant 0 : index
    %c0_1 = arith.constant 0 : index
    %c0_2 = arith.constant 0 : index
    %0 = vector.load %arg0[%c0, %c0_0, %c0_1, %c0_2] : memref<2x4x4x128xf32, #tpu.memory_space<vmem>>, vector<2x4x4x128xf32>
    %1 = vector.shape_cast %0 : vector<2x4x4x128xf32> to vector<32x128xf32>
    %cst = arith.constant dense<0.000000e+00> : vector<128xf32>
    %2 = vector.multi_reduction <add>, %1, %cst [0] : vector<32x128xf32> to vector<128xf32>
    %3 = vector.shape_cast %2 : vector<128xf32> to vector<1x128xf32>
    %cst_3 = arith.constant 3.200000e+01 : f32
    %4 = vector.broadcast %cst_3 : f32 to vector<1x128xf32>
    %5 = arith.divf %3, %4 : vector<1x128xf32>
    %6 = vector.broadcast %5 : vector<1x128xf32> to vector<32x128xf32>
    %7 = arith.subf %1, %6 : vector<32x128xf32>
    %8 = arith.mulf %7, %7 : vector<32x128xf32>
    %cst_4 = arith.constant dense<0.000000e+00> : vector<128xf32>
    %9 = vector.multi_reduction <add>, %8, %cst_4 [0] : vector<32x128xf32> to vector<128xf32>
    %10 = vector.shape_cast %9 : vector<128xf32> to vector<1x128xf32>
    %cst_5 = arith.constant 3.200000e+01 : f32
    %11 = vector.broadcast %cst_5 : f32 to vector<1x128xf32>
    %12 = arith.divf %10, %11 : vector<1x128xf32>
    %cst_6 = arith.constant 9.99999974E-6 : f32
    %13 = vector.broadcast %cst_6 : f32 to vector<1x128xf32>
    %14 = arith.addf %12, %13 : vector<1x128xf32>
    %15 = math.rsqrt %14 : vector<1x128xf32>
    %c0_7 = arith.constant 0 : index
    %c0_8 = arith.constant 0 : index
    %16 = vector.load %arg1[%c0_7, %c0_8] : memref<1x128xf32, #tpu.memory_space<vmem>>, vector<1x128xf32>
    %17 = arith.mulf %15, %16 : vector<1x128xf32>
    %c0_9 = arith.constant 0 : index
    %c0_10 = arith.constant 0 : index
    %18 = vector.load %arg2[%c0_9, %c0_10] : memref<1x128xf32, #tpu.memory_space<vmem>>, vector<1x128xf32>
    %19 = arith.mulf %5, %17 : vector<1x128xf32>
    %20 = arith.subf %18, %19 : vector<1x128xf32>
    %21 = vector.shape_cast %17 : vector<1x128xf32> to vector<1x1x1x128xf32>
    %22 = vector.shape_cast %20 : vector<1x128xf32> to vector<1x1x1x128xf32>
    %cst_11 = arith.constant 0.000000e+00 : f32
    %23 = vector.broadcast %cst_11 : f32 to vector<2x10x1x128xf32>
    %c0_12 = arith.constant 0 : index
    %c0_13 = arith.constant 0 : index
    %c0_14 = arith.constant 0 : index
    %c0_15 = arith.constant 0 : index
    %24 = vector.load %arg8[%c0_12, %c0_13, %c0_14, %c0_15] : memref<2x10x10x128xf32, #tpu.memory_space<vmem>>, vector<2x10x1x128xf32>
    tpu.vector_store %arg8[%c0_12, %c0_13, %c0_14, %c0_15], %23 {strides = array<i32>} : memref<2x10x10x128xf32, #tpu.memory_space<vmem>>, vector<2x10x1x128xf32>,
    %cst_16 = arith.constant 0.000000e+00 : f32
    %25 = vector.broadcast %cst_16 : f32 to vector<2x10x1x128xf32>
    %c0_17 = arith.constant 0 : index
    %c0_18 = arith.constant 0 : index
    %c9 = arith.constant 9 : index
    %c0_19 = arith.constant 0 : index
    %26 = vector.load %arg8[%c0_17, %c0_18, %c9, %c0_19] : memref<2x10x10x128xf32, #tpu.memory_space<vmem>>, vector<2x10x1x128xf32>
    tpu.vector_store %arg8[%c0_17, %c0_18, %c9, %c0_19], %25 {strides = array<i32>} : memref<2x10x10x128xf32, #tpu.memory_space<vmem>>, vector<2x10x1x128xf32>,
    %cst_20 = arith.constant 0.000000e+00 : f32
    %27 = vector.broadcast %cst_20 : f32 to vector<2x1x10x128xf32>
    %c0_21 = arith.constant 0 : index
    %c0_22 = arith.constant 0 : index
    %c0_23 = arith.constant 0 : index
    %c0_24 = arith.constant 0 : index
    %28 = vector.load %arg8[%c0_21, %c0_22, %c0_23, %c0_24] : memref<2x10x10x128xf32, #tpu.memory_space<vmem>>, vector<2x1x10x128xf32>
    tpu.vector_store %arg8[%c0_21, %c0_22, %c0_23, %c0_24], %27 {strides = array<i32>} : memref<2x10x10x128xf32, #tpu.memory_space<vmem>>, vector<2x1x10x128xf32>,
    %cst_25 = arith.constant 0.000000e+00 : f32
    %29 = vector.broadcast %cst_25 : f32 to vector<2x1x10x128xf32>
    %c0_26 = arith.constant 0 : index
    %c9_27 = arith.constant 9 : index
    %c0_28 = arith.constant 0 : index
    %c0_29 = arith.constant 0 : index
    %30 = vector.load %arg8[%c0_26, %c9_27, %c0_28, %c0_29] : memref<2x10x10x128xf32, #tpu.memory_space<vmem>>, vector<2x1x10x128xf32>
    tpu.vector_store %arg8[%c0_26, %c9_27, %c0_28, %c0_29], %29 {strides = array<i32>} : memref<2x10x10x128xf32, #tpu.memory_space<vmem>>, vector<2x1x10x128xf32>,
    %cst_30 = arith.constant 0.000000e+00 : bf16
    %31 = vector.broadcast %cst_30 : bf16 to vector<2x1x8x384xbf16>
    %c0_31 = arith.constant 0 : index
    %c0_32 = arith.constant 0 : index
    %c0_33 = arith.constant 0 : index
    %c0_34 = arith.constant 0 : index
    %32 = vector.load %arg9[%c0_31, %c0_32, %c0_33, %c0_34] : memref<2x10x8x384xbf16, #tpu.memory_space<vmem>>, vector<2x1x8x384xbf16>
    tpu.vector_store %arg9[%c0_31, %c0_32, %c0_33, %c0_34], %31 {strides = array<i32>} : memref<2x10x8x384xbf16, #tpu.memory_space<vmem>>, vector<2x1x8x384xbf16>,
    %c0_35 = arith.constant 0 : index
    %c9_36 = arith.constant 9 : index
    %c0_37 = arith.constant 0 : index
    %c0_38 = arith.constant 0 : index
    %33 = vector.load %arg9[%c0_35, %c9_36, %c0_37, %c0_38] : memref<2x10x8x384xbf16, #tpu.memory_space<vmem>>, vector<2x1x8x384xbf16>
    tpu.vector_store %arg9[%c0_35, %c9_36, %c0_37, %c0_38], %31 {strides = array<i32>} : memref<2x10x8x384xbf16, #tpu.memory_space<vmem>>, vector<2x1x8x384xbf16>,
    %c0_i32 = arith.constant 0 : i32
    %c4_i32 = arith.constant 4 : i32
    %34 = arith.muli %c0_i32, %c4_i32 : i32
    %35 = tpu.assume_multiple %34, 4 : i32
    %c0_39 = arith.constant 0 : index
    %36 = arith.index_cast %35 : i32 to index
    %c0_40 = arith.constant 0 : index
    %c0_41 = arith.constant 0 : index
    %37 = vector.load %arg0[%c0_39, %36, %c0_40, %c0_41] : memref<2x4x4x128xf32, #tpu.memory_space<vmem>>, vector<2x4x4x128xf32>
    %38 = vector.broadcast %21 : vector<1x1x1x128xf32> to vector<2x4x4x128xf32>
    %39 = arith.mulf %37, %38 : vector<2x4x4x128xf32>
    %40 = vector.broadcast %22 : vector<1x1x1x128xf32> to vector<2x4x4x128xf32>
    %41 = arith.addf %39, %40 : vector<2x4x4x128xf32>
    %42 = vector.shape_cast %41 : vector<2x4x4x128xf32> to vector<2x4x1x4x128xf32>
    %43 = vector.shape_cast %41 : vector<2x4x4x128xf32> to vector<2x4x1x4x128xf32>
    %44 = tpu.concatenate %42, %43 in 2 : vector<2x4x1x4x128xf32>, vector<2x4x1x4x128xf32> -> vector<2x4x2x4x128xf32>
    %45 = vector.shape_cast %44 : vector<2x4x2x4x128xf32> to vector<2x8x4x128xf32>
    %c2_i32 = arith.constant 2 : i32
    %46 = arith.muli %c2_i32, %35 : i32
    %c1_i32 = arith.constant 1 : i32
    %47 = arith.addi %c1_i32, %46 : i32
    %c0_42 = arith.constant 0 : index
    %48 = arith.index_cast %47 : i32 to index
    %c1 = arith.constant 1 : index
    %c0_43 = arith.constant 0 : index
    %49 = tpu.strided_load %arg8[%c0_42, %48, %c1, %c0_43] {strides = array<i32: 1, 1, 2, 1>} : memref<2x10x10x128xf32, #tpu.memory_space<vmem>>, vector<2x8x4x128xf32>
    tpu.strided_store %arg8[%c0_42, %48, %c1, %c0_43], %45 {strides = array<i32: 1, 1, 2, 1>} : memref<2x10x10x128xf32, #tpu.memory_space<vmem>>, vector<2x8x4x128xf32>
    %c0_44 = arith.constant 0 : index
    %50 = arith.index_cast %47 : i32 to index
    %c2 = arith.constant 2 : index
    %c0_45 = arith.constant 0 : index
    %51 = tpu.strided_load %arg8[%c0_44, %50, %c2, %c0_45] {strides = array<i32: 1, 1, 2, 1>} : memref<2x10x10x128xf32, #tpu.memory_space<vmem>>, vector<2x8x4x128xf32>
    tpu.strided_store %arg8[%c0_44, %50, %c2, %c0_45], %45 {strides = array<i32: 1, 1, 2, 1>} : memref<2x10x10x128xf32, #tpu.memory_space<vmem>>, vector<2x8x4x128xf32>
    %c0_46 = arith.constant 0 : index
    %52 = arith.index_cast %47 : i32 to index
    %c0_47 = arith.constant 0 : index
    %c0_48 = arith.constant 0 : index
    %53 = vector.load %arg8[%c0_46, %52, %c0_47, %c0_48] : memref<2x10x10x128xf32, #tpu.memory_space<vmem>>, vector<2x8x10x128xf32>
    %54 = vector.extract_strided_slice %53 {offsets = [0, 0, 0, 0], sizes = [2, 8, 8, 128], strides = [1, 1, 1, 1]} : vector<2x8x10x128xf32> to vector<2x8x8x128xf32>
    %55 = arith.truncf %54 : vector<2x8x8x128xf32> to vector<2x8x8x128xbf16>
    %c0_49 = arith.constant 0 : index
    %56 = arith.index_cast %47 : i32 to index
    %c0_50 = arith.constant 0 : index
    %c0_51 = arith.constant 0 : index
    %57 = vector.load %arg9[%c0_49, %56, %c0_50, %c0_51] : memref<2x10x8x384xbf16, #tpu.memory_space<vmem>>, vector<2x8x8x128xbf16>
    tpu.vector_store %arg9[%c0_49, %56, %c0_50, %c0_51], %55 {strides = array<i32>} : memref<2x10x8x384xbf16, #tpu.memory_space<vmem>>, vector<2x8x8x128xbf16>,
    %58 = vector.extract_strided_slice %53 {offsets = [0, 0, 1, 0], sizes = [2, 8, 8, 128], strides = [1, 1, 1, 1]} : vector<2x8x10x128xf32> to vector<2x8x8x128xf32>
    %59 = arith.truncf %58 : vector<2x8x8x128xf32> to vector<2x8x8x128xbf16>
    %c0_52 = arith.constant 0 : index
    %60 = arith.index_cast %47 : i32 to index
    %c0_53 = arith.constant 0 : index
    %c128 = arith.constant 128 : index
    %61 = vector.load %arg9[%c0_52, %60, %c0_53, %c128] : memref<2x10x8x384xbf16, #tpu.memory_space<vmem>>, vector<2x8x8x128xbf16>
    tpu.vector_store %arg9[%c0_52, %60, %c0_53, %c128], %59 {strides = array<i32>} : memref<2x10x8x384xbf16, #tpu.memory_space<vmem>>, vector<2x8x8x128xbf16>,
    %62 = vector.extract_strided_slice %53 {offsets = [0, 0, 2, 0], sizes = [2, 8, 8, 128], strides = [1, 1, 1, 1]} : vector<2x8x10x128xf32> to vector<2x8x8x128xf32>
    %63 = arith.truncf %62 : vector<2x8x8x128xf32> to vector<2x8x8x128xbf16>
    %c0_54 = arith.constant 0 : index
    %64 = arith.index_cast %47 : i32 to index
    %c0_55 = arith.constant 0 : index
    %c256 = arith.constant 256 : index
    %65 = vector.load %arg9[%c0_54, %64, %c0_55, %c256] : memref<2x10x8x384xbf16, #tpu.memory_space<vmem>>, vector<2x8x8x128xbf16>
    tpu.vector_store %arg9[%c0_54, %64, %c0_55, %c256], %63 {strides = array<i32>} : memref<2x10x8x384xbf16, #tpu.memory_space<vmem>>, vector<2x8x8x128xbf16>,
    %c1_i32_56 = arith.constant 1 : i32
    %c0_57 = arith.constant 0 : index
    %c0_58 = arith.constant 0 : index
    %66 = vector.load %arg4[%c0_57, %c0_58] : memref<1x128xf32, #tpu.memory_space<vmem>>, vector<1x128xf32>
    %cst_59 = arith.constant 0.000000e+00 : f32
    %67 = vector.broadcast %cst_59 : f32 to vector<1x128xf32>
    %cst_60 = arith.constant 0.000000e+00 : f32
    %68 = vector.broadcast %cst_60 : f32 to vector<1x128xf32>
    %c0_i32_61 = arith.constant 0 : i32
    %c8_i32 = arith.constant 8 : i32
    %69 = arith.muli %c0_i32_61, %c8_i32 : i32
    %70 = tpu.assume_multiple %69, 8 : i32
    %cst_62 = arith.constant 0.000000e+00 : f32
    %71 = vector.broadcast %cst_62 : f32 to vector<128x128xf32>
    %c0_i32_63 = arith.constant 0 : i32
    %72 = arith.addi %70, %c0_i32_63 : i32
    %c0_64 = arith.constant 0 : index
    %73 = arith.index_cast %72 : i32 to index
    %c0_65 = arith.constant 0 : index
    %c0_66 = arith.constant 0 : index
    %74 = vector.load %arg9[%c0_64, %73, %c0_65, %c0_66] : memref<2x10x8x384xbf16, #tpu.memory_space<vmem>>, vector<2x8x8x384xbf16>
    %75 = vector.shape_cast %74 : vector<2x8x8x384xbf16> to vector<128x384xbf16>
    %c0_67 = arith.constant 0 : index
    %c0_68 = arith.constant 0 : index
    %c0_69 = arith.constant 0 : index
    %76 = vector.load %arg3[%c0_67, %c0_68, %c0_69] : memref<3x384x128xbf16, #tpu.memory_space<vmem>>, vector<1x384x128xbf16>
    %77 = vector.shape_cast %76 : vector<1x384x128xbf16> to vector<384x128xbf16>
    %cst_70 = arith.constant dense<0.000000e+00> : vector<128x128xf32>
    %78 = tpu.matmul %75, %77, %cst_70 {dimension_numbers = #tpu.dot_dimension_numbers<[1], [0], [0], [1], [0, 0, 1, 1], [], []>} : vector<128x384xbf16>, vector<384x128xbf16>, vector<128x128xf32> -> vector<128x128xf32>
    %79 = arith.addf %71, %78 : vector<128x128xf32>
    %c1_i32_71 = arith.constant 1 : i32
    %80 = arith.addi %70, %c1_i32_71 : i32
    %c0_72 = arith.constant 0 : index
    %81 = arith.index_cast %80 : i32 to index
    %c0_73 = arith.constant 0 : index
    %c0_74 = arith.constant 0 : index
    %82 = vector.load %arg9[%c0_72, %81, %c0_73, %c0_74] : memref<2x10x8x384xbf16, #tpu.memory_space<vmem>>, vector<2x8x8x384xbf16>
    %83 = vector.shape_cast %82 : vector<2x8x8x384xbf16> to vector<128x384xbf16>
    %c1_75 = arith.constant 1 : index
    %c0_76 = arith.constant 0 : index
    %c0_77 = arith.constant 0 : index
    %84 = vector.load %arg3[%c1_75, %c0_76, %c0_77] : memref<3x384x128xbf16, #tpu.memory_space<vmem>>, vector<1x384x128xbf16>
    %85 = vector.shape_cast %84 : vector<1x384x128xbf16> to vector<384x128xbf16>
    %cst_78 = arith.constant dense<0.000000e+00> : vector<128x128xf32>
    %86 = tpu.matmul %83, %85, %cst_78 {dimension_numbers = #tpu.dot_dimension_numbers<[1], [0], [0], [1], [0, 0, 1, 1], [], []>} : vector<128x384xbf16>, vector<384x128xbf16>, vector<128x128xf32> -> vector<128x128xf32>
    %87 = arith.addf %79, %86 : vector<128x128xf32>
    %c2_i32_79 = arith.constant 2 : i32
    %88 = arith.addi %70, %c2_i32_79 : i32
    %c0_80 = arith.constant 0 : index
    %89 = arith.index_cast %88 : i32 to index
    %c0_81 = arith.constant 0 : index
    %c0_82 = arith.constant 0 : index
    %90 = vector.load %arg9[%c0_80, %89, %c0_81, %c0_82] : memref<2x10x8x384xbf16, #tpu.memory_space<vmem>>, vector<2x8x8x384xbf16>
    %91 = vector.shape_cast %90 : vector<2x8x8x384xbf16> to vector<128x384xbf16>
    %c2_83 = arith.constant 2 : index
    %c0_84 = arith.constant 0 : index
    %c0_85 = arith.constant 0 : index
    %92 = vector.load %arg3[%c2_83, %c0_84, %c0_85] : memref<3x384x128xbf16, #tpu.memory_space<vmem>>, vector<1x384x128xbf16>
    %93 = vector.shape_cast %92 : vector<1x384x128xbf16> to vector<384x128xbf16>
    %cst_86 = arith.constant dense<0.000000e+00> : vector<128x128xf32>
    %94 = tpu.matmul %91, %93, %cst_86 {dimension_numbers = #tpu.dot_dimension_numbers<[1], [0], [0], [1], [0, 0, 1, 1], [], []>} : vector<128x384xbf16>, vector<384x128xbf16>, vector<128x128xf32> -> vector<128x128xf32>
    %95 = arith.addf %87, %94 : vector<128x128xf32>
    %96 = vector.broadcast %66 : vector<1x128xf32> to vector<128x128xf32>
    %97 = arith.addf %95, %96 : vector<128x128xf32>
    %98 = vector.shape_cast %97 : vector<128x128xf32> to vector<2x8x8x128xf32>
    %99 = arith.truncf %98 : vector<2x8x8x128xf32> to vector<2x8x8x128xbf16>
    %c0_87 = arith.constant 0 : index
    %100 = arith.index_cast %70 : i32 to index
    %c0_88 = arith.constant 0 : index
    %c0_89 = arith.constant 0 : index
    %101 = vector.load %arg7[%c0_87, %100, %c0_88, %c0_89] : memref<2x8x8x128xbf16, #tpu.memory_space<vmem>>, vector<2x8x8x128xbf16>
    tpu.vector_store %arg7[%c0_87, %100, %c0_88, %c0_89], %99 {strides = array<i32>} : memref<2x8x8x128xbf16, #tpu.memory_space<vmem>>, vector<2x8x8x128xbf16>,
    %cst_90 = arith.constant dense<0.000000e+00> : vector<128xf32>
    %102 = vector.multi_reduction <add>, %97, %cst_90 [0] : vector<128x128xf32> to vector<128xf32>
    %103 = vector.shape_cast %102 : vector<128xf32> to vector<1x128xf32>
    %104 = arith.addf %67, %103 : vector<1x128xf32>
    %105 = arith.mulf %97, %97 : vector<128x128xf32>
    %cst_91 = arith.constant dense<0.000000e+00> : vector<128xf32>
    %106 = vector.multi_reduction <add>, %105, %cst_91 [0] : vector<128x128xf32> to vector<128xf32>
    %107 = vector.shape_cast %106 : vector<128xf32> to vector<1x128xf32>
    %108 = arith.addf %68, %107 : vector<1x128xf32>
    %c1_i32_92 = arith.constant 1 : i32
    %cst_93 = arith.constant 1.280000e+02 : f32
    %109 = vector.broadcast %cst_93 : f32 to vector<1x128xf32>
    %110 = arith.divf %104, %109 : vector<1x128xf32>
    %cst_94 = arith.constant 1.280000e+02 : f32
    %111 = vector.broadcast %cst_94 : f32 to vector<1x128xf32>
    %112 = arith.divf %108, %111 : vector<1x128xf32>
    %113 = arith.mulf %110, %110 : vector<1x128xf32>
    %114 = arith.subf %112, %113 : vector<1x128xf32>
    %cst_95 = arith.constant 0.000000e+00 : f32
    %115 = vector.broadcast %cst_95 : f32 to vector<1x128xf32>
    %116 = arith.maximumf %114, %115 : vector<1x128xf32>
    %cst_96 = arith.constant 8.000000e-01 : f32
    %117 = vector.broadcast %cst_96 : f32 to vector<1x128xf32>
    %118 = arith.addf %116, %117 : vector<1x128xf32>
    %119 = math.rsqrt %118 : vector<1x128xf32>
    %c0_97 = arith.constant 0 : index
    %c0_98 = arith.constant 0 : index
    %120 = vector.load %arg5[%c0_97, %c0_98] : memref<1x128xf32, #tpu.memory_space<vmem>>, vector<1x128xf32>
    %121 = arith.mulf %119, %120 : vector<1x128xf32>
    %c0_99 = arith.constant 0 : index
    %c0_100 = arith.constant 0 : index
    %122 = vector.load %arg6[%c0_99, %c0_100] : memref<1x128xf32, #tpu.memory_space<vmem>>, vector<1x128xf32>
    %123 = arith.mulf %110, %121 : vector<1x128xf32>
    %124 = arith.subf %122, %123 : vector<1x128xf32>
    %c0_i32_101 = arith.constant 0 : i32
    %c8_i32_102 = arith.constant 8 : i32
    %125 = arith.muli %c0_i32_101, %c8_i32_102 : i32
    %126 = tpu.assume_multiple %125, 8 : i32
    %c0_103 = arith.constant 0 : index
    %127 = arith.index_cast %126 : i32 to index
    %c0_104 = arith.constant 0 : index
    %c0_105 = arith.constant 0 : index
    %128 = vector.load %arg7[%c0_103, %127, %c0_104, %c0_105] : memref<2x8x8x128xbf16, #tpu.memory_space<vmem>>, vector<2x8x8x128xbf16>
    %129 = arith.extf %128 : vector<2x8x8x128xbf16> to vector<2x8x8x128xf32>
    %130 = vector.shape_cast %129 : vector<2x8x8x128xf32> to vector<128x128xf32>
    %131 = vector.broadcast %121 : vector<1x128xf32> to vector<128x128xf32>
    %132 = arith.mulf %130, %131 : vector<128x128xf32>
    %133 = vector.broadcast %124 : vector<1x128xf32> to vector<128x128xf32>
    %134 = arith.addf %132, %133 : vector<128x128xf32>
    %cst_106 = arith.constant 0.000000e+00 : f32
    %135 = vector.broadcast %cst_106 : f32 to vector<128x128xf32>
    %136 = arith.cmpf oge, %134, %135 : vector<128x128xf32>
    %cst_107 = arith.constant 2.000000e-01 : f32
    %137 = vector.broadcast %cst_107 : f32 to vector<128x128xf32>
    %138 = arith.mulf %137, %134 : vector<128x128xf32>
    %139 = arith.select %136, %134, %138 : vector<128x128xi1>, vector<128x128xf32>
    %140 = vector.shape_cast %139 : vector<128x128xf32> to vector<2x8x8x128xf32>
    %141 = arith.truncf %140 : vector<2x8x8x128xf32> to vector<2x8x8x128xbf16>
    %c0_108 = arith.constant 0 : index
    %142 = arith.index_cast %126 : i32 to index
    %c0_109 = arith.constant 0 : index
    %c0_110 = arith.constant 0 : index
    %143 = vector.load %arg7[%c0_108, %142, %c0_109, %c0_110] : memref<2x8x8x128xbf16, #tpu.memory_space<vmem>>, vector<2x8x8x128xbf16>
    tpu.vector_store %arg7[%c0_108, %142, %c0_109, %c0_110], %141 {strides = array<i32>} : memref<2x8x8x128xbf16, #tpu.memory_space<vmem>>, vector<2x8x8x128xbf16>,
    %c1_i32_111 = arith.constant 1 : i32
    return
  }
}

module attributes {stable_mosaic.version = 11 : i64} {
  func.func @_block2_kernel(%arg0: memref<2x8x8x128xbf16, #tpu.memory_space<vmem>>, %arg1: memref<3x384x64xbf16, #tpu.memory_space<vmem>>, %arg2: memref<1x64xf32, #tpu.memory_space<vmem>>, %arg3: memref<1x64xf32, #tpu.memory_space<vmem>>, %arg4: memref<1x64xf32, #tpu.memory_space<vmem>>, %arg5: memref<3x192x128xbf16, #tpu.memory_space<vmem>>, %arg6: memref<1x128xf32, #tpu.memory_space<vmem>>, %arg7: memref<2x3x256xf32, #tpu.memory_space<vmem>>, %arg8: memref<2x18x18x128xf32, #tpu.memory_space<vmem>>, %arg9: memref<2x18x16x384xbf16, #tpu.memory_space<vmem>>, %arg10: memref<2x16x16x64xbf16, #tpu.memory_space<vmem>>, %arg11: memref<2x18x16x192xbf16, #tpu.memory_space<vmem>>, %arg12: memref<2x16x16x128xf32, #tpu.memory_space<vmem>>) attributes {dimension_semantics = [], scalar_prefetch = 0 : i64, scratch_operands = 5 : i64, tpu.core_type = #tpu.core_type<tc>} {
    %cst = arith.constant 0.000000e+00 : f32
    %0 = vector.broadcast %cst : f32 to vector<2x18x1x128xf32>
    %c0 = arith.constant 0 : index
    %c0_0 = arith.constant 0 : index
    %c0_1 = arith.constant 0 : index
    %c0_2 = arith.constant 0 : index
    %1 = vector.load %arg8[%c0, %c0_0, %c0_1, %c0_2] : memref<2x18x18x128xf32, #tpu.memory_space<vmem>>, vector<2x18x1x128xf32>
    tpu.vector_store %arg8[%c0, %c0_0, %c0_1, %c0_2], %0 {strides = array<i32>} : memref<2x18x18x128xf32, #tpu.memory_space<vmem>>, vector<2x18x1x128xf32>,
    %cst_3 = arith.constant 0.000000e+00 : f32
    %2 = vector.broadcast %cst_3 : f32 to vector<2x18x1x128xf32>
    %c0_4 = arith.constant 0 : index
    %c0_5 = arith.constant 0 : index
    %c17 = arith.constant 17 : index
    %c0_6 = arith.constant 0 : index
    %3 = vector.load %arg8[%c0_4, %c0_5, %c17, %c0_6] : memref<2x18x18x128xf32, #tpu.memory_space<vmem>>, vector<2x18x1x128xf32>
    tpu.vector_store %arg8[%c0_4, %c0_5, %c17, %c0_6], %2 {strides = array<i32>} : memref<2x18x18x128xf32, #tpu.memory_space<vmem>>, vector<2x18x1x128xf32>,
    %cst_7 = arith.constant 0.000000e+00 : f32
    %4 = vector.broadcast %cst_7 : f32 to vector<2x1x18x128xf32>
    %c0_8 = arith.constant 0 : index
    %c0_9 = arith.constant 0 : index
    %c0_10 = arith.constant 0 : index
    %c0_11 = arith.constant 0 : index
    %5 = vector.load %arg8[%c0_8, %c0_9, %c0_10, %c0_11] : memref<2x18x18x128xf32, #tpu.memory_space<vmem>>, vector<2x1x18x128xf32>
    tpu.vector_store %arg8[%c0_8, %c0_9, %c0_10, %c0_11], %4 {strides = array<i32>} : memref<2x18x18x128xf32, #tpu.memory_space<vmem>>, vector<2x1x18x128xf32>,
    %cst_12 = arith.constant 0.000000e+00 : f32
    %6 = vector.broadcast %cst_12 : f32 to vector<2x1x18x128xf32>
    %c0_13 = arith.constant 0 : index
    %c17_14 = arith.constant 17 : index
    %c0_15 = arith.constant 0 : index
    %c0_16 = arith.constant 0 : index
    %7 = vector.load %arg8[%c0_13, %c17_14, %c0_15, %c0_16] : memref<2x18x18x128xf32, #tpu.memory_space<vmem>>, vector<2x1x18x128xf32>
    tpu.vector_store %arg8[%c0_13, %c17_14, %c0_15, %c0_16], %6 {strides = array<i32>} : memref<2x18x18x128xf32, #tpu.memory_space<vmem>>, vector<2x1x18x128xf32>,
    %cst_17 = arith.constant 0.000000e+00 : bf16
    %8 = vector.broadcast %cst_17 : bf16 to vector<2x1x16x384xbf16>
    %c0_18 = arith.constant 0 : index
    %c0_19 = arith.constant 0 : index
    %c0_20 = arith.constant 0 : index
    %c0_21 = arith.constant 0 : index
    %9 = vector.load %arg9[%c0_18, %c0_19, %c0_20, %c0_21] : memref<2x18x16x384xbf16, #tpu.memory_space<vmem>>, vector<2x1x16x384xbf16>
    tpu.vector_store %arg9[%c0_18, %c0_19, %c0_20, %c0_21], %8 {strides = array<i32>} : memref<2x18x16x384xbf16, #tpu.memory_space<vmem>>, vector<2x1x16x384xbf16>,
    %c0_22 = arith.constant 0 : index
    %c17_23 = arith.constant 17 : index
    %c0_24 = arith.constant 0 : index
    %c0_25 = arith.constant 0 : index
    %10 = vector.load %arg9[%c0_22, %c17_23, %c0_24, %c0_25] : memref<2x18x16x384xbf16, #tpu.memory_space<vmem>>, vector<2x1x16x384xbf16>
    tpu.vector_store %arg9[%c0_22, %c17_23, %c0_24, %c0_25], %8 {strides = array<i32>} : memref<2x18x16x384xbf16, #tpu.memory_space<vmem>>, vector<2x1x16x384xbf16>,
    %c0_i32 = arith.constant 0 : i32
    %c2_i32 = arith.constant 2 : i32
    %11 = arith.addi %c0_i32, %c2_i32 : i32
    %c1_i32 = arith.constant 1 : i32
    scf.for %arg13 = %c0_i32 to %11 step %c1_i32  : i32 {
      %c4_i32_72 = arith.constant 4 : i32
      %55 = arith.muli %arg13, %c4_i32_72 : i32
      %56 = tpu.assume_multiple %55, 4 : i32
      %c0_73 = arith.constant 0 : index
      %57 = arith.index_cast %56 : i32 to index
      %c0_74 = arith.constant 0 : index
      %c0_75 = arith.constant 0 : index
      %58 = vector.load %arg0[%c0_73, %57, %c0_74, %c0_75] : memref<2x8x8x128xbf16, #tpu.memory_space<vmem>>, vector<2x4x8x128xbf16>
      %59 = arith.extf %58 : vector<2x4x8x128xbf16> to vector<2x4x8x128xf32>
      %60 = vector.shape_cast %59 : vector<2x4x8x128xf32> to vector<2x4x1x8x128xf32>
      %61 = vector.shape_cast %59 : vector<2x4x8x128xf32> to vector<2x4x1x8x128xf32>
      %62 = tpu.concatenate %60, %61 in 2 : vector<2x4x1x8x128xf32>, vector<2x4x1x8x128xf32> -> vector<2x4x2x8x128xf32>
      %63 = vector.shape_cast %62 : vector<2x4x2x8x128xf32> to vector<2x8x8x128xf32>
      %c2_i32_76 = arith.constant 2 : i32
      %64 = arith.muli %c2_i32_76, %56 : i32
      %c1_i32_77 = arith.constant 1 : i32
      %65 = arith.addi %c1_i32_77, %64 : i32
      %c0_78 = arith.constant 0 : index
      %66 = arith.index_cast %65 : i32 to index
      %c1 = arith.constant 1 : index
      %c0_79 = arith.constant 0 : index
      %67 = tpu.strided_load %arg8[%c0_78, %66, %c1, %c0_79] {strides = array<i32: 1, 1, 2, 1>} : memref<2x18x18x128xf32, #tpu.memory_space<vmem>>, vector<2x8x8x128xf32>
      tpu.strided_store %arg8[%c0_78, %66, %c1, %c0_79], %63 {strides = array<i32: 1, 1, 2, 1>} : memref<2x18x18x128xf32, #tpu.memory_space<vmem>>, vector<2x8x8x128xf32>
      %c0_80 = arith.constant 0 : index
      %68 = arith.index_cast %65 : i32 to index
      %c2 = arith.constant 2 : index
      %c0_81 = arith.constant 0 : index
      %69 = tpu.strided_load %arg8[%c0_80, %68, %c2, %c0_81] {strides = array<i32: 1, 1, 2, 1>} : memref<2x18x18x128xf32, #tpu.memory_space<vmem>>, vector<2x8x8x128xf32>
      tpu.strided_store %arg8[%c0_80, %68, %c2, %c0_81], %63 {strides = array<i32: 1, 1, 2, 1>} : memref<2x18x18x128xf32, #tpu.memory_space<vmem>>, vector<2x8x8x128xf32>
      %c0_82 = arith.constant 0 : index
      %70 = arith.index_cast %65 : i32 to index
      %c0_83 = arith.constant 0 : index
      %c0_84 = arith.constant 0 : index
      %71 = vector.load %arg8[%c0_82, %70, %c0_83, %c0_84] : memref<2x18x18x128xf32, #tpu.memory_space<vmem>>, vector<2x8x18x128xf32>
      %72 = vector.extract_strided_slice %71 {offsets = [0, 0, 0, 0], sizes = [2, 8, 16, 128], strides = [1, 1, 1, 1]} : vector<2x8x18x128xf32> to vector<2x8x16x128xf32>
      %73 = arith.truncf %72 : vector<2x8x16x128xf32> to vector<2x8x16x128xbf16>
      %c0_85 = arith.constant 0 : index
      %74 = arith.index_cast %65 : i32 to index
      %c0_86 = arith.constant 0 : index
      %c0_87 = arith.constant 0 : index
      %75 = vector.load %arg9[%c0_85, %74, %c0_86, %c0_87] : memref<2x18x16x384xbf16, #tpu.memory_space<vmem>>, vector<2x8x16x128xbf16>
      tpu.vector_store %arg9[%c0_85, %74, %c0_86, %c0_87], %73 {strides = array<i32>} : memref<2x18x16x384xbf16, #tpu.memory_space<vmem>>, vector<2x8x16x128xbf16>,
      %76 = vector.extract_strided_slice %71 {offsets = [0, 0, 1, 0], sizes = [2, 8, 16, 128], strides = [1, 1, 1, 1]} : vector<2x8x18x128xf32> to vector<2x8x16x128xf32>
      %77 = arith.truncf %76 : vector<2x8x16x128xf32> to vector<2x8x16x128xbf16>
      %c0_88 = arith.constant 0 : index
      %78 = arith.index_cast %65 : i32 to index
      %c0_89 = arith.constant 0 : index
      %c128 = arith.constant 128 : index
      %79 = vector.load %arg9[%c0_88, %78, %c0_89, %c128] : memref<2x18x16x384xbf16, #tpu.memory_space<vmem>>, vector<2x8x16x128xbf16>
      tpu.vector_store %arg9[%c0_88, %78, %c0_89, %c128], %77 {strides = array<i32>} : memref<2x18x16x384xbf16, #tpu.memory_space<vmem>>, vector<2x8x16x128xbf16>,
      %80 = vector.extract_strided_slice %71 {offsets = [0, 0, 2, 0], sizes = [2, 8, 16, 128], strides = [1, 1, 1, 1]} : vector<2x8x18x128xf32> to vector<2x8x16x128xf32>
      %81 = arith.truncf %80 : vector<2x8x16x128xf32> to vector<2x8x16x128xbf16>
      %c0_90 = arith.constant 0 : index
      %82 = arith.index_cast %65 : i32 to index
      %c0_91 = arith.constant 0 : index
      %c256 = arith.constant 256 : index
      %83 = vector.load %arg9[%c0_90, %82, %c0_91, %c256] : memref<2x18x16x384xbf16, #tpu.memory_space<vmem>>, vector<2x8x16x128xbf16>
      tpu.vector_store %arg9[%c0_90, %82, %c0_91, %c256], %81 {strides = array<i32>} : memref<2x18x16x384xbf16, #tpu.memory_space<vmem>>, vector<2x8x16x128xbf16>,
    }
    %c2_i32_26 = arith.constant 2 : i32
    %c0_27 = arith.constant 0 : index
    %c0_28 = arith.constant 0 : index
    %12 = vector.load %arg2[%c0_27, %c0_28] : memref<1x64xf32, #tpu.memory_space<vmem>>, vector<1x64xf32>
    %cst_29 = arith.constant 0.000000e+00 : f32
    %13 = vector.broadcast %cst_29 : f32 to vector<1x64xf32>
    %cst_30 = arith.constant 0.000000e+00 : f32
    %14 = vector.broadcast %cst_30 : f32 to vector<1x64xf32>
    %c0_i32_31 = arith.constant 0 : i32
    %c4_i32 = arith.constant 4 : i32
    %15 = arith.addi %c0_i32_31, %c4_i32 : i32
    %c1_i32_32 = arith.constant 1 : i32
    %16:2 = scf.for %arg13 = %c0_i32_31 to %15 step %c1_i32_32 iter_args(%arg14 = %13, %arg15 = %14) -> (vector<1x64xf32>, vector<1x64xf32>)  : i32 {
      %c4_i32_72 = arith.constant 4 : i32
      %55 = arith.muli %arg13, %c4_i32_72 : i32
      %56 = tpu.assume_multiple %55, 4 : i32
      %cst_73 = arith.constant 0.000000e+00 : f32
      %57 = vector.broadcast %cst_73 : f32 to vector<128x64xf32>
      %c0_i32_74 = arith.constant 0 : i32
      %58 = arith.addi %56, %c0_i32_74 : i32
      %c0_75 = arith.constant 0 : index
      %59 = arith.index_cast %58 : i32 to index
      %c0_76 = arith.constant 0 : index
      %c0_77 = arith.constant 0 : index
      %60 = vector.load %arg9[%c0_75, %59, %c0_76, %c0_77] : memref<2x18x16x384xbf16, #tpu.memory_space<vmem>>, vector<2x4x16x384xbf16>
      %61 = vector.shape_cast %60 : vector<2x4x16x384xbf16> to vector<128x384xbf16>
      %c0_78 = arith.constant 0 : index
      %c0_79 = arith.constant 0 : index
      %c0_80 = arith.constant 0 : index
      %62 = vector.load %arg1[%c0_78, %c0_79, %c0_80] : memref<3x384x64xbf16, #tpu.memory_space<vmem>>, vector<1x384x64xbf16>
      %63 = vector.shape_cast %62 : vector<1x384x64xbf16> to vector<384x64xbf16>
      %cst_81 = arith.constant dense<0.000000e+00> : vector<128x64xf32>
      %64 = tpu.matmul %61, %63, %cst_81 {dimension_numbers = #tpu.dot_dimension_numbers<[1], [0], [0], [1], [0, 0, 1, 1], [], []>} : vector<128x384xbf16>, vector<384x64xbf16>, vector<128x64xf32> -> vector<128x64xf32>
      %65 = arith.addf %57, %64 : vector<128x64xf32>
      %c1_i32_82 = arith.constant 1 : i32
      %66 = arith.addi %56, %c1_i32_82 : i32
      %c0_83 = arith.constant 0 : index
      %67 = arith.index_cast %66 : i32 to index
      %c0_84 = arith.constant 0 : index
      %c0_85 = arith.constant 0 : index
      %68 = vector.load %arg9[%c0_83, %67, %c0_84, %c0_85] : memref<2x18x16x384xbf16, #tpu.memory_space<vmem>>, vector<2x4x16x384xbf16>
      %69 = vector.shape_cast %68 : vector<2x4x16x384xbf16> to vector<128x384xbf16>
      %c1 = arith.constant 1 : index
      %c0_86 = arith.constant 0 : index
      %c0_87 = arith.constant 0 : index
      %70 = vector.load %arg1[%c1, %c0_86, %c0_87] : memref<3x384x64xbf16, #tpu.memory_space<vmem>>, vector<1x384x64xbf16>
      %71 = vector.shape_cast %70 : vector<1x384x64xbf16> to vector<384x64xbf16>
      %cst_88 = arith.constant dense<0.000000e+00> : vector<128x64xf32>
      %72 = tpu.matmul %69, %71, %cst_88 {dimension_numbers = #tpu.dot_dimension_numbers<[1], [0], [0], [1], [0, 0, 1, 1], [], []>} : vector<128x384xbf16>, vector<384x64xbf16>, vector<128x64xf32> -> vector<128x64xf32>
      %73 = arith.addf %65, %72 : vector<128x64xf32>
      %c2_i32_89 = arith.constant 2 : i32
      %74 = arith.addi %56, %c2_i32_89 : i32
      %c0_90 = arith.constant 0 : index
      %75 = arith.index_cast %74 : i32 to index
      %c0_91 = arith.constant 0 : index
      %c0_92 = arith.constant 0 : index
      %76 = vector.load %arg9[%c0_90, %75, %c0_91, %c0_92] : memref<2x18x16x384xbf16, #tpu.memory_space<vmem>>, vector<2x4x16x384xbf16>
      %77 = vector.shape_cast %76 : vector<2x4x16x384xbf16> to vector<128x384xbf16>
      %c2 = arith.constant 2 : index
      %c0_93 = arith.constant 0 : index
      %c0_94 = arith.constant 0 : index
      %78 = vector.load %arg1[%c2, %c0_93, %c0_94] : memref<3x384x64xbf16, #tpu.memory_space<vmem>>, vector<1x384x64xbf16>
      %79 = vector.shape_cast %78 : vector<1x384x64xbf16> to vector<384x64xbf16>
      %cst_95 = arith.constant dense<0.000000e+00> : vector<128x64xf32>
      %80 = tpu.matmul %77, %79, %cst_95 {dimension_numbers = #tpu.dot_dimension_numbers<[1], [0], [0], [1], [0, 0, 1, 1], [], []>} : vector<128x384xbf16>, vector<384x64xbf16>, vector<128x64xf32> -> vector<128x64xf32>
      %81 = arith.addf %73, %80 : vector<128x64xf32>
      %82 = vector.broadcast %12 : vector<1x64xf32> to vector<128x64xf32>
      %83 = arith.addf %81, %82 : vector<128x64xf32>
      %84 = vector.shape_cast %83 : vector<128x64xf32> to vector<2x4x16x64xf32>
      %85 = arith.truncf %84 : vector<2x4x16x64xf32> to vector<2x4x16x64xbf16>
      %c0_96 = arith.constant 0 : index
      %86 = arith.index_cast %56 : i32 to index
      %c0_97 = arith.constant 0 : index
      %c0_98 = arith.constant 0 : index
      %87 = vector.load %arg10[%c0_96, %86, %c0_97, %c0_98] : memref<2x16x16x64xbf16, #tpu.memory_space<vmem>>, vector<2x4x16x64xbf16>
      tpu.vector_store %arg10[%c0_96, %86, %c0_97, %c0_98], %85 {strides = array<i32>} : memref<2x16x16x64xbf16, #tpu.memory_space<vmem>>, vector<2x4x16x64xbf16>,
      %cst_99 = arith.constant dense<0.000000e+00> : vector<64xf32>
      %88 = vector.multi_reduction <add>, %83, %cst_99 [0] : vector<128x64xf32> to vector<64xf32>
      %89 = vector.shape_cast %88 : vector<64xf32> to vector<1x64xf32>
      %90 = arith.addf %arg14, %89 : vector<1x64xf32>
      %91 = arith.mulf %83, %83 : vector<128x64xf32>
      %cst_100 = arith.constant dense<0.000000e+00> : vector<64xf32>
      %92 = vector.multi_reduction <add>, %91, %cst_100 [0] : vector<128x64xf32> to vector<64xf32>
      %93 = vector.shape_cast %92 : vector<64xf32> to vector<1x64xf32>
      %94 = arith.addf %arg15, %93 : vector<1x64xf32>
      scf.yield %90, %94 : vector<1x64xf32>, vector<1x64xf32>
    }
    %c4_i32_33 = arith.constant 4 : i32
    %cst_34 = arith.constant 5.120000e+02 : f32
    %17 = vector.broadcast %cst_34 : f32 to vector<1x64xf32>
    %18 = arith.divf %16#0, %17 : vector<1x64xf32>
    %cst_35 = arith.constant 5.120000e+02 : f32
    %19 = vector.broadcast %cst_35 : f32 to vector<1x64xf32>
    %20 = arith.divf %16#1, %19 : vector<1x64xf32>
    %21 = arith.mulf %18, %18 : vector<1x64xf32>
    %22 = arith.subf %20, %21 : vector<1x64xf32>
    %cst_36 = arith.constant 0.000000e+00 : f32
    %23 = vector.broadcast %cst_36 : f32 to vector<1x64xf32>
    %24 = arith.maximumf %22, %23 : vector<1x64xf32>
    %cst_37 = arith.constant 8.000000e-01 : f32
    %25 = vector.broadcast %cst_37 : f32 to vector<1x64xf32>
    %26 = arith.addf %24, %25 : vector<1x64xf32>
    %27 = math.rsqrt %26 : vector<1x64xf32>
    %c0_38 = arith.constant 0 : index
    %c0_39 = arith.constant 0 : index
    %28 = vector.load %arg3[%c0_38, %c0_39] : memref<1x64xf32, #tpu.memory_space<vmem>>, vector<1x64xf32>
    %29 = arith.mulf %27, %28 : vector<1x64xf32>
    %c0_40 = arith.constant 0 : index
    %c0_41 = arith.constant 0 : index
    %30 = vector.load %arg4[%c0_40, %c0_41] : memref<1x64xf32, #tpu.memory_space<vmem>>, vector<1x64xf32>
    %31 = arith.mulf %18, %29 : vector<1x64xf32>
    %32 = arith.subf %30, %31 : vector<1x64xf32>
    %cst_42 = arith.constant 0.000000e+00 : bf16
    %33 = vector.broadcast %cst_42 : bf16 to vector<2x1x16x192xbf16>
    %c0_43 = arith.constant 0 : index
    %c0_44 = arith.constant 0 : index
    %c0_45 = arith.constant 0 : index
    %c0_46 = arith.constant 0 : index
    %34 = vector.load %arg11[%c0_43, %c0_44, %c0_45, %c0_46] : memref<2x18x16x192xbf16, #tpu.memory_space<vmem>>, vector<2x1x16x192xbf16>
    tpu.vector_store %arg11[%c0_43, %c0_44, %c0_45, %c0_46], %33 {strides = array<i32>} : memref<2x18x16x192xbf16, #tpu.memory_space<vmem>>, vector<2x1x16x192xbf16>,
    %cst_47 = arith.constant 0.000000e+00 : bf16
    %35 = vector.broadcast %cst_47 : bf16 to vector<2x1x16x192xbf16>
    %c0_48 = arith.constant 0 : index
    %c17_49 = arith.constant 17 : index
    %c0_50 = arith.constant 0 : index
    %c0_51 = arith.constant 0 : index
    %36 = vector.load %arg11[%c0_48, %c17_49, %c0_50, %c0_51] : memref<2x18x16x192xbf16, #tpu.memory_space<vmem>>, vector<2x1x16x192xbf16>
    tpu.vector_store %arg11[%c0_48, %c17_49, %c0_50, %c0_51], %35 {strides = array<i32>} : memref<2x18x16x192xbf16, #tpu.memory_space<vmem>>, vector<2x1x16x192xbf16>,
    %c0_i32_52 = arith.constant 0 : i32
    %c4_i32_53 = arith.constant 4 : i32
    %37 = arith.addi %c0_i32_52, %c4_i32_53 : i32
    %c1_i32_54 = arith.constant 1 : i32
    scf.for %arg13 = %c0_i32_52 to %37 step %c1_i32_54  : i32 {
      %c4_i32_72 = arith.constant 4 : i32
      %55 = arith.muli %arg13, %c4_i32_72 : i32
      %56 = tpu.assume_multiple %55, 4 : i32
      %c0_73 = arith.constant 0 : index
      %57 = arith.index_cast %56 : i32 to index
      %c0_74 = arith.constant 0 : index
      %c0_75 = arith.constant 0 : index
      %58 = vector.load %arg10[%c0_73, %57, %c0_74, %c0_75] : memref<2x16x16x64xbf16, #tpu.memory_space<vmem>>, vector<2x4x16x64xbf16>
      %59 = arith.extf %58 : vector<2x4x16x64xbf16> to vector<2x4x16x64xf32>
      %60 = vector.shape_cast %59 : vector<2x4x16x64xf32> to vector<128x64xf32>
      %61 = vector.broadcast %29 : vector<1x64xf32> to vector<128x64xf32>
      %62 = arith.mulf %60, %61 : vector<128x64xf32>
      %63 = vector.broadcast %32 : vector<1x64xf32> to vector<128x64xf32>
      %64 = arith.addf %62, %63 : vector<128x64xf32>
      %cst_76 = arith.constant 0.000000e+00 : f32
      %65 = vector.broadcast %cst_76 : f32 to vector<128x64xf32>
      %66 = arith.cmpf oge, %64, %65 : vector<128x64xf32>
      %cst_77 = arith.constant 2.000000e-01 : f32
      %67 = vector.broadcast %cst_77 : f32 to vector<128x64xf32>
      %68 = arith.mulf %67, %64 : vector<128x64xf32>
      %69 = arith.select %66, %64, %68 : vector<128x64xi1>, vector<128x64xf32>
      %70 = vector.shape_cast %69 : vector<128x64xf32> to vector<2x4x16x64xf32>
      %71 = arith.truncf %70 : vector<2x4x16x64xf32> to vector<2x4x16x64xbf16>
      %c1_i32_78 = arith.constant 1 : i32
      %72 = arith.addi %c1_i32_78, %56 : i32
      %c0_79 = arith.constant 0 : index
      %73 = arith.index_cast %72 : i32 to index
      %c0_80 = arith.constant 0 : index
      %c64 = arith.constant 64 : index
      %74 = vector.load %arg11[%c0_79, %73, %c0_80, %c64] : memref<2x18x16x192xbf16, #tpu.memory_space<vmem>>, vector<2x4x16x64xbf16>
      tpu.vector_store %arg11[%c0_79, %73, %c0_80, %c64], %71 {strides = array<i32>} : memref<2x18x16x192xbf16, #tpu.memory_space<vmem>>, vector<2x4x16x64xbf16>,
      %75 = vector.extract_strided_slice %71 {offsets = [0, 0, 0, 0], sizes = [2, 4, 15, 64], strides = [1, 1, 1, 1]} : vector<2x4x16x64xbf16> to vector<2x4x15x64xbf16>
      %c0_81 = arith.constant 0 : index
      %76 = arith.index_cast %72 : i32 to index
      %c1 = arith.constant 1 : index
      %c0_82 = arith.constant 0 : index
      %77 = vector.load %arg11[%c0_81, %76, %c1, %c0_82] : memref<2x18x16x192xbf16, #tpu.memory_space<vmem>>, vector<2x4x15x64xbf16>
      tpu.vector_store %arg11[%c0_81, %76, %c1, %c0_82], %75 {strides = array<i32>} : memref<2x18x16x192xbf16, #tpu.memory_space<vmem>>, vector<2x4x15x64xbf16>,
      %cst_83 = arith.constant 0.000000e+00 : bf16
      %78 = vector.broadcast %cst_83 : bf16 to vector<2x4x1x64xbf16>
      %c0_84 = arith.constant 0 : index
      %79 = arith.index_cast %72 : i32 to index
      %c0_85 = arith.constant 0 : index
      %c0_86 = arith.constant 0 : index
      %80 = vector.load %arg11[%c0_84, %79, %c0_85, %c0_86] : memref<2x18x16x192xbf16, #tpu.memory_space<vmem>>, vector<2x4x1x64xbf16>
      tpu.vector_store %arg11[%c0_84, %79, %c0_85, %c0_86], %78 {strides = array<i32>} : memref<2x18x16x192xbf16, #tpu.memory_space<vmem>>, vector<2x4x1x64xbf16>,
      %81 = vector.extract_strided_slice %71 {offsets = [0, 0, 1, 0], sizes = [2, 4, 15, 64], strides = [1, 1, 1, 1]} : vector<2x4x16x64xbf16> to vector<2x4x15x64xbf16>
      %c0_87 = arith.constant 0 : index
      %82 = arith.index_cast %72 : i32 to index
      %c0_88 = arith.constant 0 : index
      %c128 = arith.constant 128 : index
      %83 = vector.load %arg11[%c0_87, %82, %c0_88, %c128] : memref<2x18x16x192xbf16, #tpu.memory_space<vmem>>, vector<2x4x15x64xbf16>
      tpu.vector_store %arg11[%c0_87, %82, %c0_88, %c128], %81 {strides = array<i32>} : memref<2x18x16x192xbf16, #tpu.memory_space<vmem>>, vector<2x4x15x64xbf16>,
      %cst_89 = arith.constant 0.000000e+00 : bf16
      %84 = vector.broadcast %cst_89 : bf16 to vector<2x4x1x64xbf16>
      %c0_90 = arith.constant 0 : index
      %85 = arith.index_cast %72 : i32 to index
      %c15 = arith.constant 15 : index
      %c128_91 = arith.constant 128 : index
      %86 = vector.load %arg11[%c0_90, %85, %c15, %c128_91] : memref<2x18x16x192xbf16, #tpu.memory_space<vmem>>, vector<2x4x1x64xbf16>
      tpu.vector_store %arg11[%c0_90, %85, %c15, %c128_91], %84 {strides = array<i32>} : memref<2x18x16x192xbf16, #tpu.memory_space<vmem>>, vector<2x4x1x64xbf16>,
    }
    %c4_i32_55 = arith.constant 4 : i32
    %c0_56 = arith.constant 0 : index
    %c0_57 = arith.constant 0 : index
    %38 = vector.load %arg6[%c0_56, %c0_57] : memref<1x128xf32, #tpu.memory_space<vmem>>, vector<1x128xf32>
    %cst_58 = arith.constant 0.000000e+00 : f32
    %39 = vector.broadcast %cst_58 : f32 to vector<1x128xf32>
    %cst_59 = arith.constant 0.000000e+00 : f32
    %40 = vector.broadcast %cst_59 : f32 to vector<1x128xf32>
    %c0_i32_60 = arith.constant 0 : i32
    %c4_i32_61 = arith.constant 4 : i32
    %41 = arith.addi %c0_i32_60, %c4_i32_61 : i32
    %c1_i32_62 = arith.constant 1 : i32
    %42:2 = scf.for %arg13 = %c0_i32_60 to %41 step %c1_i32_62 iter_args(%arg14 = %39, %arg15 = %40) -> (vector<1x128xf32>, vector<1x128xf32>)  : i32 {
      %c4_i32_72 = arith.constant 4 : i32
      %55 = arith.muli %arg13, %c4_i32_72 : i32
      %56 = tpu.assume_multiple %55, 4 : i32
      %cst_73 = arith.constant 0.000000e+00 : f32
      %57 = vector.broadcast %cst_73 : f32 to vector<128x128xf32>
      %c0_i32_74 = arith.constant 0 : i32
      %58 = arith.addi %56, %c0_i32_74 : i32
      %c0_75 = arith.constant 0 : index
      %59 = arith.index_cast %58 : i32 to index
      %c0_76 = arith.constant 0 : index
      %c0_77 = arith.constant 0 : index
      %60 = vector.load %arg11[%c0_75, %59, %c0_76, %c0_77] : memref<2x18x16x192xbf16, #tpu.memory_space<vmem>>, vector<2x4x16x192xbf16>
      %61 = vector.shape_cast %60 : vector<2x4x16x192xbf16> to vector<128x192xbf16>
      %c0_78 = arith.constant 0 : index
      %c0_79 = arith.constant 0 : index
      %c0_80 = arith.constant 0 : index
      %62 = vector.load %arg5[%c0_78, %c0_79, %c0_80] : memref<3x192x128xbf16, #tpu.memory_space<vmem>>, vector<1x192x128xbf16>
      %63 = vector.shape_cast %62 : vector<1x192x128xbf16> to vector<192x128xbf16>
      %cst_81 = arith.constant dense<0.000000e+00> : vector<128x128xf32>
      %64 = tpu.matmul %61, %63, %cst_81 {dimension_numbers = #tpu.dot_dimension_numbers<[1], [0], [0], [1], [0, 0, 1, 1], [], []>} : vector<128x192xbf16>, vector<192x128xbf16>, vector<128x128xf32> -> vector<128x128xf32>
      %65 = arith.addf %57, %64 : vector<128x128xf32>
      %c1_i32_82 = arith.constant 1 : i32
      %66 = arith.addi %56, %c1_i32_82 : i32
      %c0_83 = arith.constant 0 : index
      %67 = arith.index_cast %66 : i32 to index
      %c0_84 = arith.constant 0 : index
      %c0_85 = arith.constant 0 : index
      %68 = vector.load %arg11[%c0_83, %67, %c0_84, %c0_85] : memref<2x18x16x192xbf16, #tpu.memory_space<vmem>>, vector<2x4x16x192xbf16>
      %69 = vector.shape_cast %68 : vector<2x4x16x192xbf16> to vector<128x192xbf16>
      %c1 = arith.constant 1 : index
      %c0_86 = arith.constant 0 : index
      %c0_87 = arith.constant 0 : index
      %70 = vector.load %arg5[%c1, %c0_86, %c0_87] : memref<3x192x128xbf16, #tpu.memory_space<vmem>>, vector<1x192x128xbf16>
      %71 = vector.shape_cast %70 : vector<1x192x128xbf16> to vector<192x128xbf16>
      %cst_88 = arith.constant dense<0.000000e+00> : vector<128x128xf32>
      %72 = tpu.matmul %69, %71, %cst_88 {dimension_numbers = #tpu.dot_dimension_numbers<[1], [0], [0], [1], [0, 0, 1, 1], [], []>} : vector<128x192xbf16>, vector<192x128xbf16>, vector<128x128xf32> -> vector<128x128xf32>
      %73 = arith.addf %65, %72 : vector<128x128xf32>
      %c2_i32_89 = arith.constant 2 : i32
      %74 = arith.addi %56, %c2_i32_89 : i32
      %c0_90 = arith.constant 0 : index
      %75 = arith.index_cast %74 : i32 to index
      %c0_91 = arith.constant 0 : index
      %c0_92 = arith.constant 0 : index
      %76 = vector.load %arg11[%c0_90, %75, %c0_91, %c0_92] : memref<2x18x16x192xbf16, #tpu.memory_space<vmem>>, vector<2x4x16x192xbf16>
      %77 = vector.shape_cast %76 : vector<2x4x16x192xbf16> to vector<128x192xbf16>
      %c2 = arith.constant 2 : index
      %c0_93 = arith.constant 0 : index
      %c0_94 = arith.constant 0 : index
      %78 = vector.load %arg5[%c2, %c0_93, %c0_94] : memref<3x192x128xbf16, #tpu.memory_space<vmem>>, vector<1x192x128xbf16>
      %79 = vector.shape_cast %78 : vector<1x192x128xbf16> to vector<192x128xbf16>
      %cst_95 = arith.constant dense<0.000000e+00> : vector<128x128xf32>
      %80 = tpu.matmul %77, %79, %cst_95 {dimension_numbers = #tpu.dot_dimension_numbers<[1], [0], [0], [1], [0, 0, 1, 1], [], []>} : vector<128x192xbf16>, vector<192x128xbf16>, vector<128x128xf32> -> vector<128x128xf32>
      %81 = arith.addf %73, %80 : vector<128x128xf32>
      %82 = vector.broadcast %38 : vector<1x128xf32> to vector<128x128xf32>
      %83 = arith.addf %81, %82 : vector<128x128xf32>
      %84 = math.tanh %83 : vector<128x128xf32>
      %85 = vector.shape_cast %84 : vector<128x128xf32> to vector<2x4x16x128xf32>
      %c0_96 = arith.constant 0 : index
      %86 = arith.index_cast %56 : i32 to index
      %c0_97 = arith.constant 0 : index
      %c0_98 = arith.constant 0 : index
      %87 = vector.load %arg12[%c0_96, %86, %c0_97, %c0_98] : memref<2x16x16x128xf32, #tpu.memory_space<vmem>>, vector<2x4x16x128xf32>
      tpu.vector_store %arg12[%c0_96, %86, %c0_97, %c0_98], %85 {strides = array<i32>} : memref<2x16x16x128xf32, #tpu.memory_space<vmem>>, vector<2x4x16x128xf32>,
      %cst_99 = arith.constant dense<0.000000e+00> : vector<128xf32>
      %88 = vector.multi_reduction <add>, %84, %cst_99 [0] : vector<128x128xf32> to vector<128xf32>
      %89 = vector.shape_cast %88 : vector<128xf32> to vector<1x128xf32>
      %90 = arith.addf %arg14, %89 : vector<1x128xf32>
      %91 = arith.mulf %84, %84 : vector<128x128xf32>
      %cst_100 = arith.constant dense<0.000000e+00> : vector<128xf32>
      %92 = vector.multi_reduction <add>, %91, %cst_100 [0] : vector<128x128xf32> to vector<128xf32>
      %93 = vector.shape_cast %92 : vector<128xf32> to vector<1x128xf32>
      %94 = arith.addf %arg15, %93 : vector<1x128xf32>
      scf.yield %90, %94 : vector<1x128xf32>, vector<1x128xf32>
    }
    %c4_i32_63 = arith.constant 4 : i32
    %cst_64 = arith.constant 5.120000e+02 : f32
    %43 = vector.broadcast %cst_64 : f32 to vector<1x128xf32>
    %44 = arith.divf %42#0, %43 : vector<1x128xf32>
    %cst_65 = arith.constant 5.120000e+02 : f32
    %45 = vector.broadcast %cst_65 : f32 to vector<1x128xf32>
    %46 = arith.divf %42#1, %45 : vector<1x128xf32>
    %47 = arith.mulf %44, %44 : vector<1x128xf32>
    %48 = arith.subf %46, %47 : vector<1x128xf32>
    %cst_66 = arith.constant 0.000000e+00 : f32
    %49 = vector.broadcast %cst_66 : f32 to vector<1x128xf32>
    %50 = arith.maximumf %48, %49 : vector<1x128xf32>
    %cst_67 = arith.constant 9.99999974E-6 : f32
    %51 = vector.broadcast %cst_67 : f32 to vector<1x128xf32>
    %52 = arith.addf %50, %51 : vector<1x128xf32>
    %53 = math.rsqrt %52 : vector<1x128xf32>
    %c0_i32_68 = arith.constant 0 : i32
    %c2_i32_69 = arith.constant 2 : i32
    %54 = arith.addi %c0_i32_68, %c2_i32_69 : i32
    %c1_i32_70 = arith.constant 1 : i32
    scf.for %arg13 = %c0_i32_68 to %54 step %c1_i32_70  : i32 {
      %55 = arith.index_cast %arg13 : i32 to index
      %c0_72 = arith.constant 0 : index
      %c0_73 = arith.constant 0 : index
      %c0_74 = arith.constant 0 : index
      %56 = vector.load %arg12[%55, %c0_72, %c0_73, %c0_74] : memref<2x16x16x128xf32, #tpu.memory_space<vmem>>, vector<1x16x16x128xf32>
      %57 = vector.shape_cast %56 : vector<1x16x16x128xf32> to vector<16x16x128xf32>
      %58 = vector.shape_cast %57 : vector<16x16x128xf32> to vector<256x128xf32>
      %59 = vector.broadcast %44 : vector<1x128xf32> to vector<256x128xf32>
      %60 = arith.subf %58, %59 : vector<256x128xf32>
      %61 = vector.broadcast %53 : vector<1x128xf32> to vector<256x128xf32>
      %62 = arith.mulf %60, %61 : vector<256x128xf32>
      %63 = tpu.transpose %62, [1, 0] : vector<256x128xf32> -> vector<128x256xf32>
      %64 = vector.extract_strided_slice %63 {offsets = [0, 0], sizes = [3, 256], strides = [1, 1]} : vector<128x256xf32> to vector<3x256xf32>
      %65 = arith.index_cast %arg13 : i32 to index
      %c0_75 = arith.constant 0 : index
      %c0_76 = arith.constant 0 : index
      %66 = vector.load %arg7[%65, %c0_75, %c0_76] : memref<2x3x256xf32, #tpu.memory_space<vmem>>, vector<1x3x256xf32>
      %67 = vector.shape_cast %66 : vector<1x3x256xf32> to vector<3x256xf32>
      %68 = vector.shape_cast %64 : vector<3x256xf32> to vector<1x3x256xf32>
      tpu.vector_store %arg7[%65, %c0_75, %c0_76], %68 {strides = array<i32>} : memref<2x3x256xf32, #tpu.memory_space<vmem>>, vector<1x3x256xf32>,
    }
    %c2_i32_71 = arith.constant 2 : i32
    return
  }
}

</mosaic_0001>

<bundles_post_ra>
// kernel: generator_forward.3
= control target key start
LH: loop header
LB: loop body
LE: loop exit
PB: predicated region body
PF: predicated region fallthrough
CT: control target
= control target key end

     0   :  { %8 = vsyncpa [#allocation3], 0  ;;  %s1027_s12 = smov [#allocation2]   ;;  %s1123_s0 = inlined_call_operand.vmem [shape: f32[2,64], index: 0, kind: input, shape index: {}]   ;;  %s1124_s1 = inlined_call_operand.hbm [shape: bf16[64,2048], index: 1, kind: input, shape index: {}]   ;;  %s1125_s2 = inlined_call_operand.vmem [shape: f32[1,2048], index: 2, kind: input, shape index: {}]   ;;  %s1126_s3 = inlined_call_operand.vmem [shape: f32[2,2048], index: 3, kind: output, shape index: {}]  }
   0x1   :  { %s16_s13 = sshll.u32 %s1027_s12, 4  ;;  %s17_s13 = int_to_ptr.vmem [resolvable:$true] %s16_s13 }
   0x2   :  { %s1013_s14 = scalar_lea.vmem %s17_s13, 8192  ;;  %p1018_p1 = scmp.lt.s32.totalorder %s17_s13, %s17_s13 }
   0x3   :  { %p1014_p0 = scmp.ne.s32.totalorder %s17_s13, %s1013_s14  ;;  %p1019_p2 = scmp.lt.s32.totalorder %s1013_s14, %s1013_s14 }
   0x5   :  { %p1020_p3 = por %p1019_p2, %p1018_p1 }
   0x7   :  { %p1021_p4 = pnand %p1020_p3, %p1014_p0 }
   0x9   :  { %1024 = shalt.err (!%p1021_p4)
}
   0xa   :  { %s1028_s15 = smov 1024   ;;  %s1029_s16 = smov 64  }
   0xb   :  { %22 = dma.hbm_to_vmem [thread:$0]  %s1124_s1, 8192, %s17_s13, [#allocation3], %s1028_s15, %s1028_s15, %s1029_s16  }
   0xc   :  { %1025 = dma.done.wait [#allocation3], 8192  }
   0xd   :  { %1026 = vsyncadd [#allocation3], 4294959104  ;;  %v1030_v0 = vmov 0   ;;  %v79_v1 = vld [vmem:[#allocation2 + $0x180] sm:$0xff]  ;;  %v80_v3 = vld [vmem:[#allocation2 + $0x188] sm:$0xff]  ;;  %vm499_vm0 = vcmask 523264  }
   0xe   :  { %535 = vmatprep.mubr.bf16.mxu0 %v1030_v0  ;;  %576 = vmatprep.mubr.bf16.mxu1 %v1030_v0  ;;  %v87_v2 = vld [vmem:[#allocation2 + $0x1c0] sm:$0xff]  ;;  %v88_v5 = vld [vmem:[#allocation2 + $0x1c8] sm:$0xff]  ;;  %v81_v31 = vld [vmem:[#allocation2 + $0x190] sm:$0xff] }
   0xf   :  { %v977_v4 = vcombine.high %v79_v1, %v87_v2  ;;  %v976_v6 = vcombine.low %v79_v1, %v87_v2  ;;  %v63_v7 = vld [vmem:[#allocation2 + $0x100] sm:$0xff]  ;;  %v979_v9 = vcombine.high %v80_v3, %v88_v5  ;;  %v978_v10 = vcombine.low %v80_v3, %v88_v5  ;;  %v64_v12 = vld [vmem:[#allocation2 + $0x108] sm:$0xff]  ;;  %v89_v32 = vld [vmem:[#allocation2 + $0x1d0] sm:$0xff] }
  0x10   :  { %v71_v8 = vld [vmem:[#allocation2 + $0x140] sm:$0xff]  ;;  %v72_v13 = vld [vmem:[#allocation2 + $0x148] sm:$0xff]  ;;  %v82_v33 = vld [vmem:[#allocation2 + $0x198] sm:$0xff]  ;;  %v981_v38 = vcombine.high %v81_v31, %v89_v32  ;;  %v980_v45 = vcombine.low %v81_v31, %v89_v32 }
  0x11   :  { %v961_v11 = vcombine.high %v63_v7, %v71_v8  ;;  %v47_v14 = vld [vmem:[#allocation2 + $0x80] sm:$0xff]  ;;  %511 = vmatprep.subr.bf16.mxu0 %v977_v4  ;;  %v963_v15 = vcombine.high %v64_v12, %v72_v13  ;;  %v48_v17 = vld [vmem:[#allocation2 + $0x88] sm:$0xff]  ;;  %552 = vmatprep.subr.bf16.mxu1 %v979_v9  ;;  %v960_v19 = vcombine.low %v63_v7, %v71_v8  ;;  %v90_v34 = vld [vmem:[#allocation2 + $0x1d8] sm:$0xff] }
  0x12   :  { %v55_v16 = vld [vmem:[#allocation2 + $0xc0] sm:$0xff]  ;;  %v56_v18 = vld [vmem:[#allocation2 + $0xc8] sm:$0xff]  ;;  %512 = vmatpush1.bf16.msra.mxu0 %v976_v6  ;;  %553 = vmatpush1.bf16.msra.mxu1 %v978_v10  ;;  %v962_v20 = vcombine.low %v64_v12, %v72_v13  ;;  %v983_v39 = vcombine.high %v82_v33, %v90_v34  ;;  %v65_v40 = vld [vmem:[#allocation2 + $0x110] sm:$0xff]  ;;  %v982_v46 = vcombine.low %v82_v33, %v90_v34 }
  0x13   :  { %513 = vmatprep.subr.bf16.mxu0 %v961_v11  ;;  %v945_v21 = vcombine.high %v47_v14, %v55_v16  ;;  %554 = vmatprep.subr.bf16.mxu1 %v963_v15  ;;  %v947_v22 = vcombine.high %v48_v17, %v56_v18  ;;  %v31_v23 = vld [vmem:[#allocation2] sm:$0xff]  ;;  %v32_v25 = vld [vmem:[#allocation2 + $0x8] sm:$0xff]  ;;  %v944_v27 = vcombine.low %v47_v14, %v55_v16  ;;  %v73_v41 = vld [vmem:[#allocation2 + $0x150] sm:$0xff] }
  0x14   :  { %v39_v24 = vld [vmem:[#allocation2 + $0x40] sm:$0xff]  ;;  %v40_v26 = vld [vmem:[#allocation2 + $0x48] sm:$0xff]  ;;  %v946_v28 = vcombine.low %v48_v17, %v56_v18  ;;  %v66_v43 = vld [vmem:[#allocation2 + $0x118] sm:$0xff]  ;;  %v965_v47 = vcombine.high %v65_v40, %v73_v41  ;;  %v964_v53 = vcombine.low %v65_v40, %v73_v41 }
  0x15   :  { %v929_v29 = vcombine.high %v31_v23, %v39_v24  ;;  %v931_v30 = vcombine.high %v32_v25, %v40_v26  ;;  %v928_v35 = vcombine.low %v31_v23, %v39_v24  ;;  %v29_v36 = vld [vmem:[%s1123_s0] sm:$0x3]  ;;  %v930_v37 = vcombine.low %v32_v25, %v40_v26  ;;  %v74_v44 = vld [vmem:[#allocation2 + $0x158] sm:$0xff]  ;;  %v49_v49 = vld [vmem:[#allocation2 + $0x90] sm:$0xff] }
  0x16   :  { %514 = vmatpush1.bf16.msra.mxu0 %v960_v19  ;;  %555 = vmatpush1.bf16.msra.mxu1 %v962_v20  ;;  %v1060_v42 = vpack.c.bf16 %v29_v36, %v29_v36  ;;  %v967_v48 = vcombine.high %v66_v43, %v74_v44  ;;  %v57_v50 = vld [vmem:[#allocation2 + $0xd0] sm:$0xff]  ;;  %v50_v51 = vld [vmem:[#allocation2 + $0x98] sm:$0xff]  ;;  %v966_v54 = vcombine.low %v66_v43, %v74_v44  ;;  %v83_v2 = vld [vmem:[#allocation2 + $0x1a0] sm:$0xff] }
  0x17   :  { %515 = vmatprep.subr.bf16.mxu0 %v945_v21  ;;  %556 = vmatprep.subr.bf16.mxu1 %v947_v22  ;;  %v58_v52 = vld [vmem:[#allocation2 + $0xd8] sm:$0xff]  ;;  %v949_v55 = vcombine.high %v49_v49, %v57_v50  ;;  %v33_v57 = vld [vmem:[#allocation2 + $0x10] sm:$0xff]  ;;  %v948_v61 = vcombine.low %v49_v49, %v57_v50  ;;  %v91_v3 = vld [vmem:[#allocation2 + $0x1e0] sm:$0xff] }
  0x18   :  { %v951_v56 = vcombine.high %v50_v51, %v58_v52  ;;  %v41_v58 = vld [vmem:[#allocation2 + $0x50] sm:$0xff]  ;;  %v34_v59 = vld [vmem:[#allocation2 + $0x18] sm:$0xff]  ;;  %v950_v62 = vcombine.low %v50_v51, %v58_v52  ;;  %v84_v4 = vld [vmem:[#allocation2 + $0x1a8] sm:$0xff]  ;;  %v985_v8 = vcombine.high %v83_v2, %v91_v3  ;;  %v984_v14 = vcombine.low %v83_v2, %v91_v3 }
  0x19   :  { %v42_v60 = vld [vmem:[#allocation2 + $0x58] sm:$0xff]  ;;  %v933_v63 = vcombine.high %v33_v57, %v41_v58  ;;  %v92_v5 = vld [vmem:[#allocation2 + $0x1e8] sm:$0xff]  ;;  %v932_v6 = vcombine.low %v33_v57, %v41_v58  ;;  %v67_v10 = vld [vmem:[#allocation2 + $0x120] sm:$0xff] }
  0x1a   :  { %516 = vmatpush1.bf16.msra.mxu0 %v944_v27  ;;  %557 = vmatpush1.bf16.msra.mxu1 %v946_v28  ;;  %v935_v1 = vcombine.high %v34_v59, %v42_v60  ;;  %v934_v7 = vcombine.low %v34_v59, %v42_v60  ;;  %v987_v9 = vcombine.high %v84_v4, %v92_v5  ;;  %v75_v11 = vld [vmem:[#allocation2 + $0x160] sm:$0xff]  ;;  %v68_v12 = vld [vmem:[#allocation2 + $0x128] sm:$0xff]  ;;  %v85_v34 = vld [vmem:[#allocation2 + $0x1b0] sm:$0xff] }
  0x1b   :  { %517 = vmatprep.subr.bf16.mxu0 %v929_v29  ;;  %558 = vmatprep.subr.bf16.mxu1 %v931_v30  ;;  %v76_v13 = vld [vmem:[#allocation2 + $0x168] sm:$0xff]  ;;  %v986_v15 = vcombine.low %v84_v4, %v92_v5  ;;  %v969_v16 = vcombine.high %v67_v10, %v75_v11  ;;  %v51_v18 = vld [vmem:[#allocation2 + $0xa0] sm:$0xff]  ;;  %v968_v22 = vcombine.low %v67_v10, %v75_v11  ;;  %v86_v36 = vld [vmem:[#allocation2 + $0x1b8] sm:$0xff]  ;;  %v1031_v11 = vmov 1983009808  }
  0x1c   :  { %v971_v17 = vcombine.high %v68_v12, %v76_v13  ;;  %v59_v19 = vld [vmem:[#allocation2 + $0xe0] sm:$0xff]  ;;  %v52_v20 = vld [vmem:[#allocation2 + $0xa8] sm:$0xff]  ;;  %v970_v23 = vcombine.low %v68_v12, %v76_v13  ;;  %v69_v43 = vld [vmem:[#allocation2 + $0x130] sm:$0xff]  ;;  %v850_v12 = vunpack.c.l.s4 %v1031_v11 }
  0x1d   :  { %v60_v21 = vld [vmem:[#allocation2 + $0xe8] sm:$0xff]  ;;  %v953_v24 = vcombine.high %v51_v18, %v59_v19  ;;  %v35_v26 = vld [vmem:[#allocation2 + $0x20] sm:$0xff]  ;;  %v952_v30 = vcombine.low %v51_v18, %v59_v19  ;;  %v77_v44 = vld [vmem:[#allocation2 + $0x170] sm:$0xff] }
  0x1e   :  { %518 = vmatpush1.bf16.msra.mxu0 %v928_v35  ;;  %559 = vmatpush1.bf16.msra.mxu1 %v930_v37  ;;  %v955_v25 = vcombine.high %v52_v20, %v60_v21  ;;  %v43_v27 = vld [vmem:[#allocation2 + $0x60] sm:$0xff]  ;;  %v36_v28 = vld [vmem:[#allocation2 + $0x28] sm:$0xff]  ;;  %v954_v31 = vcombine.low %v52_v20, %v60_v21  ;;  %v93_v35 = vld [vmem:[#allocation2 + $0x1f0] sm:$0xff]  ;;  %v973_v49 = vcombine.high %v69_v43, %v77_v44 }
  0x1f   :  { %593 = vmatprep.subr.bf16.mxu0 %v981_v38  ;;  %634 = vmatprep.subr.bf16.mxu1 %v983_v39  ;;  %v44_v29 = vld [vmem:[#allocation2 + $0x68] sm:$0xff]  ;;  %v937_v32 = vcombine.high %v35_v26, %v43_v27  ;;  %v94_v37 = vld [vmem:[#allocation2 + $0x1f8] sm:$0xff]  ;;  %v936_v38 = vcombine.low %v35_v26, %v43_v27  ;;  %v989_v40 = vcombine.high %v85_v34, %v93_v35  ;;  %v53_v51 = vld [vmem:[#allocation2 + $0xb0] sm:$0xff] }
  0x20   :  { %v939_v33 = vcombine.high %v36_v28, %v44_v29  ;;  %v938_v39 = vcombine.low %v36_v28, %v44_v29  ;;  %v991_v41 = vcombine.high %v86_v36, %v94_v37  ;;  %v61_v52 = vld [vmem:[#allocation2 + $0xf0] sm:$0xff] }
  0x21   :  { %992 = vmatmul.mubr.msk.bf16.vlgmr.msra.gmra.mxu0 %vm499_vm0, %v1060_v42  ;;  %993 = vmatmul.mubr.msk.bf16.vlgmr.msra.gmra.mxu1 %vm499_vm0, %v1060_v42  ;;  %v957_v57 = vcombine.high %v53_v51, %v61_v52  ;;  %v37_v59 = vld [vmem:[#allocation2 + $0x30] sm:$0xff] }
  0x22   :  { %594 = vmatpush1.bf16.msra.mxu0 %v980_v45  ;;  %635 = vmatpush1.bf16.msra.mxu1 %v982_v46  ;;  %v70_v45 = vld [vmem:[#allocation2 + $0x138] sm:$0xff]  ;;  %v45_v60 = vld [vmem:[#allocation2 + $0x70] sm:$0xff] }
  0x23   :  { %595 = vmatprep.subr.bf16.mxu0 %v965_v47  ;;  %636 = vmatprep.subr.bf16.mxu1 %v967_v48  ;;  %v78_v46 = vld [vmem:[#allocation2 + $0x178] sm:$0xff]  ;;  %v988_v47 = vcombine.low %v85_v34, %v93_v35  ;;  %v990_v48 = vcombine.low %v86_v36, %v94_v37  ;;  %v941_v2 = vcombine.high %v37_v59, %v45_v60 }
  0x24   :  { %617 = vmatprep.mubr.bf16.mxu0 %v1030_v0  ;;  %658 = vmatprep.mubr.bf16.mxu1 %v1030_v0  ;;  %v975_v50 = vcombine.high %v70_v45, %v78_v46  ;;  %v940_v4 = vcombine.low %v37_v59, %v45_v60 }
  0x26   :  { %596 = vmatpush1.bf16.msra.mxu0 %v964_v53  ;;  %637 = vmatpush1.bf16.msra.mxu1 %v966_v54  ;;  %v54_v53 = vld [vmem:[#allocation2 + $0xb8] sm:$0xff] }
  0x27   :  { %597 = vmatprep.subr.bf16.mxu0 %v949_v55  ;;  %638 = vmatprep.subr.bf16.mxu1 %v951_v56  ;;  %v62_v54 = vld [vmem:[#allocation2 + $0xf8] sm:$0xff]  ;;  %v972_v55 = vcombine.low %v69_v43, %v77_v44  ;;  %v974_v56 = vcombine.low %v70_v45, %v78_v46 }
  0x28   :  { %v959_v58 = vcombine.high %v54_v53, %v62_v54 }
  0x2a   :  { %598 = vmatpush1.bf16.msra.mxu0 %v948_v61  ;;  %639 = vmatpush1.bf16.msra.mxu1 %v950_v62  ;;  %v38_v61 = vld [vmem:[#allocation2 + $0x38] sm:$0xff] }
  0x2b   :  { %599 = vmatprep.subr.bf16.mxu0 %v933_v63  ;;  %640 = vmatprep.subr.bf16.mxu1 %v935_v1  ;;  %v46_v62 = vld [vmem:[#allocation2 + $0x78] sm:$0xff]  ;;  %v956_v63 = vcombine.low %v53_v51, %v61_v52  ;;  %v958_v1 = vcombine.low %v54_v53, %v62_v54 }
  0x2c   :  { %v943_v3 = vcombine.high %v38_v61, %v46_v62  ;;  %v942_v5 = vcombine.low %v38_v61, %v46_v62  ;;  %v96_v62 = vld [vmem:[%s1125_s2 + $0x8] sm:$0xff] }
  0x2e   :  { %600 = vmatpush1.bf16.msra.mxu0 %v932_v6  ;;  %641 = vmatpush1.bf16.msra.mxu1 %v934_v7 }
  0x2f   :  { %675 = vmatprep.subr.bf16.mxu0 %v985_v8  ;;  %716 = vmatprep.subr.bf16.mxu1 %v987_v9  ;;  %v95_v8 = vld [vmem:[%s1125_s2] sm:$0xff] }
  0x31   :  { %994 = vmatmul.mubr.msk.bf16.vlgmr.msra.gmra.mxu0 %vm499_vm0, %v1060_v42  ;;  %995 = vmatmul.mubr.msk.bf16.vlgmr.msra.gmra.mxu1 %vm499_vm0, %v1060_v42 }
  0x32   :  { %676 = vmatpush1.bf16.msra.mxu0 %v984_v14  ;;  %717 = vmatpush1.bf16.msra.mxu1 %v986_v15 }
  0x33   :  { %677 = vmatprep.subr.bf16.mxu0 %v969_v16  ;;  %718 = vmatprep.subr.bf16.mxu1 %v971_v17  ;;  %v851_v16 = vunpack.c.0.s8 %v850_v12 }
  0x34   :  { %699 = vmatprep.mubr.bf16.mxu0 %v1030_v0  ;;  %740 = vmatprep.mubr.bf16.mxu1 %v1030_v0 }
  0x36   :  { %678 = vmatpush1.bf16.msra.mxu0 %v968_v22  ;;  %719 = vmatpush1.bf16.msra.mxu1 %v970_v23 }
  0x37   :  { %679 = vmatprep.subr.bf16.mxu0 %v953_v24  ;;  %720 = vmatprep.subr.bf16.mxu1 %v955_v25 }
  0x3a   :  { %680 = vmatpush1.bf16.msra.mxu0 %v952_v30  ;;  %721 = vmatpush1.bf16.msra.mxu1 %v954_v31 }
  0x3b   :  { %681 = vmatprep.subr.bf16.mxu0 %v937_v32  ;;  %722 = vmatprep.subr.bf16.mxu1 %v939_v33 }
  0x3e   :  { %682 = vmatpush1.bf16.msra.mxu0 %v936_v38  ;;  %723 = vmatpush1.bf16.msra.mxu1 %v938_v39 }
  0x3f   :  { %757 = vmatprep.subr.bf16.mxu0 %v989_v40  ;;  %798 = vmatprep.subr.bf16.mxu1 %v991_v41 }
  0x41   :  { %996 = vmatmul.mubr.msk.bf16.vlgmr.msra.gmra.mxu0 %vm499_vm0, %v1060_v42  ;;  %997 = vmatmul.mubr.msk.bf16.vlgmr.msra.gmra.mxu1 %vm499_vm0, %v1060_v42 }
  0x42   :  { %758 = vmatpush1.bf16.msra.mxu0 %v988_v47  ;;  %799 = vmatpush1.bf16.msra.mxu1 %v990_v48 }
  0x43   :  { %759 = vmatprep.subr.bf16.mxu0 %v973_v49  ;;  %800 = vmatprep.subr.bf16.mxu1 %v975_v50 }
  0x44   :  { %781 = vmatprep.mubr.bf16.mxu0 %v1030_v0  ;;  %822 = vmatprep.mubr.bf16.mxu1 %v1030_v0  ;;  %v99_v0 = vlaneseq }
  0x46   :  { %760 = vmatpush1.bf16.msra.mxu0 %v972_v55  ;;  %801 = vmatpush1.bf16.msra.mxu1 %v974_v56  ;;  %v1084_v6 = vshrl.u32 %v99_v0, 7 }
  0x47   :  { %761 = vmatprep.subr.bf16.mxu0 %v957_v57  ;;  %802 = vmatprep.subr.bf16.mxu1 %v959_v58 }
  0x48   :  { %v101_v7 = vsub.s32 0, %v1084_v6  ;;  %v109_v9 = vsub.s32 2, %v1084_v6  ;;  %v105_v10 = vsub.s32 1, %v1084_v6  ;;  %v113_v13 = vsub.s32 3, %v1084_v6 }
  0x49   :  { %v1094_v24 = vsub.s32 %v851_v16, %v1084_v6  ;;  %v117_v35 = vsub.s32 4, %v1084_v6  ;;  %v125_v37 = vsub.s32 6, %v1084_v6  ;;  %v121_v38 = vsub.s32 5, %v1084_v6 }
  0x4a   :  { %762 = vmatpush1.bf16.msra.mxu0 %v956_v63  ;;  %803 = vmatpush1.bf16.msra.mxu1 %v958_v1  ;;  %v102_v14 = vrot.slane %v95_v8, %v101_v7  ;;  %v110_v15 = vrot.slane %v95_v8, %v109_v9  ;;  %v114_v18 = vrot.slane %v95_v8, %v113_v13  ;;  %v129_v39 = vsub.s32 7, %v1084_v6 }
  0x4b   :  { %763 = vmatprep.subr.bf16.mxu0 %v941_v2  ;;  %804 = vmatprep.subr.bf16.mxu1 %v943_v3  ;;  %v118_v40 = vrot.slane %v95_v8, %v117_v35  ;;  %v126_v41 = vrot.slane %v95_v8, %v125_v37  ;;  %v122_v43 = vrot.slane %v95_v8, %v121_v38 }
  0x4c   :  { %v130_v45 = vrot.slane %v95_v8, %v129_v39  ;;  %v134_v63 = vrot.slane %v96_v62, %v101_v7  ;;  %v142_v1 = vrot.slane %v96_v62, %v109_v9  ;;  %v138_v2 = vrot.slane %v96_v62, %v105_v10 }
  0x4e   :  { %764 = vmatpush1.bf16.msra.mxu0 %v940_v4  ;;  %805 = vmatpush1.bf16.msra.mxu1 %v942_v5  ;;  %v146_v4 = vrot.slane %v96_v62, %v113_v13  ;;  %v154_v13 = vrot.slane %v96_v62, %v121_v38 }
  0x51   :  { %998 = vmatmul.mubr.msk.bf16.vlgmr.msra.gmra.mxu0 %vm499_vm0, %v1060_v42  ;;  %999 = vmatmul.mubr.msk.bf16.vlgmr.msra.gmra.mxu1 %vm499_vm0, %v1060_v42  ;;  %v106_v42 = vrot.slane %v95_v8, %v105_v10  ;;  %v150_v10 = vrot.slane %v96_v62, %v117_v35 }
  0xe1   :  { %v537_v17 = vpop.f32.mrf.mxu0  ;;  %v578_v20 = vpop.f32.mrf.mxu1 }
  0xe2   :  { %v538_v19 = vadd.f32 %v537_v17, %v102_v14  ;;  %v579_v21 = vadd.f32 %v578_v20, %v110_v15 }
  0xe3   :  { %v539_v22 = vpop.f32.mrf.mxu0  ;;  %v580_v25 = vpop.f32.mrf.mxu1 }
  0xe4   :  { %v540_v23 = vadd.f32 %v539_v22, %v106_v42  ;;  %v581_v26 = vadd.f32 %v580_v25, %v114_v18  ;;  %v158_v22 = vrot.slane %v96_v62, %v125_v37 }
  0xe5   :  { %v541_v27 = vpop.f32.mrf.mxu0  ;;  %v582_v29 = vpop.f32.mrf.mxu1 }
  0xe6   :  { %v847_v28 = vcombine.low %v538_v19, %v540_v23  ;;  %v848_v30 = vcombine.low %v579_v21, %v581_v26  ;;  %v162_v23 = vrot.slane %v96_v62, %v129_v39 }
  0xe7   :  { %v542_v31 = vpop.f32.mrf.mxu0  ;;  %v583_v33 = vpop.f32.mrf.mxu1 }
  0xe8   :  { %v855_v32 = vrot.slane %v847_v28, %v1094_v24  ;;  %v862_v34 = vrot.slane %v848_v30, %v1094_v24 }
  0xea   :  { %v863_v36 = vcombine.low %v855_v32, %v862_v34 }
  0xec   :  { %919 = vst [vmem:[%s1126_s3] sm:$0xff] %v863_v36 }
  0xf1   :  { %v619_v44 = vpop.f32.mrf.mxu0  ;;  %v660_v47 = vpop.f32.mrf.mxu1 }
  0xf2   :  { %v620_v46 = vadd.f32 %v619_v44, %v118_v40  ;;  %v661_v48 = vadd.f32 %v660_v47, %v126_v41 }
  0xf3   :  { %v621_v49 = vpop.f32.mrf.mxu0  ;;  %v662_v51 = vpop.f32.mrf.mxu1 }
  0xf4   :  { %v622_v50 = vadd.f32 %v621_v49, %v122_v43  ;;  %v663_v52 = vadd.f32 %v662_v51, %v130_v45 }
  0xf5   :  { %v623_v53 = vpop.f32.mrf.mxu0  ;;  %v664_v55 = vpop.f32.mrf.mxu1 }
  0xf6   :  { %v864_v54 = vcombine.low %v620_v46, %v622_v50  ;;  %v865_v56 = vcombine.low %v661_v48, %v663_v52 }
  0xf7   :  { %v624_v57 = vpop.f32.mrf.mxu0  ;;  %v665_v59 = vpop.f32.mrf.mxu1 }
  0xf8   :  { %v872_v58 = vrot.slane %v864_v54, %v1094_v24  ;;  %v879_v60 = vrot.slane %v865_v56, %v1094_v24 }
  0xfa   :  { %v880_v61 = vcombine.low %v872_v58, %v879_v60 }
  0xfc   :  { %920 = vst [vmem:[%s1126_s3 + $0x8] sm:$0xff] %v880_v61 }
 0x101   :  { %v701_v3 = vpop.f32.mrf.mxu0  ;;  %v742_v0 = vpop.f32.mrf.mxu1 }
 0x102   :  { %v702_v5 = vadd.f32 %v701_v3, %v134_v63  ;;  %v743_v6 = vadd.f32 %v742_v0, %v142_v1 }
 0x103   :  { %v703_v8 = vpop.f32.mrf.mxu0  ;;  %v744_v12 = vpop.f32.mrf.mxu1 }
 0x104   :  { %v704_v11 = vadd.f32 %v703_v8, %v138_v2  ;;  %v745_v14 = vadd.f32 %v744_v12, %v146_v4 }
 0x105   :  { %v705_v15 = vpop.f32.mrf.mxu0  ;;  %v746_v16 = vpop.f32.mrf.mxu1 }
 0x106   :  { %v881_v42 = vcombine.low %v702_v5, %v704_v11  ;;  %v882_v17 = vcombine.low %v743_v6, %v745_v14 }
 0x107   :  { %v706_v18 = vpop.f32.mrf.mxu0  ;;  %v747_v20 = vpop.f32.mrf.mxu1 }
 0x108   :  { %v889_v19 = vrot.slane %v881_v42, %v1094_v24  ;;  %v896_v7 = vrot.slane %v882_v17, %v1094_v24 }
 0x10a   :  { %v897_v9 = vcombine.low %v889_v19, %v896_v7 }
 0x10c   :  { %921 = vst [vmem:[%s1126_s3 + $0x10] sm:$0xff] %v897_v9 }
 0x111   :  { %v783_v21 = vpop.f32.mrf.mxu0  ;;  %v824_v25 = vpop.f32.mrf.mxu1 }
 0x112   :  { %v784_v27 = vadd.f32 %v783_v21, %v150_v10  ;;  %v825_v30 = vadd.f32 %v824_v25, %v158_v22 }
 0x113   :  { %v785_v26 = vpop.f32.mrf.mxu0  ;;  %v826_v29 = vpop.f32.mrf.mxu1 }
 0x114   :  { %v786_v28 = vadd.f32 %v785_v26, %v154_v13  ;;  %v827_v31 = vadd.f32 %v826_v29, %v162_v23 }
 0x115   :  { %v787_v32 = vpop.f32.mrf.mxu0  ;;  %v828_v34 = vpop.f32.mrf.mxu1 }
 0x116   :  { %v898_v33 = vcombine.low %v784_v27, %v786_v28  ;;  %v899_v36 = vcombine.low %v825_v30, %v827_v31 }
 0x117   :  { %v788_v40 = vpop.f32.mrf.mxu0  ;;  %v829_v43 = vpop.f32.mrf.mxu1 }
 0x118   :  { %v906_v41 = vrot.slane %v898_v33, %v1094_v24  ;;  %v913_v35 = vrot.slane %v899_v36, %v1094_v24 }
 0x11a   :  { %v914_v38 = vcombine.low %v906_v41, %v913_v35 }
 0x11c   :  { %922 = vst [vmem:[%s1126_s3 + $0x18] sm:$0xff] %v914_v38 }
 0x11d   :  { %927 = vsyncpa [#allocation3], 1 }

// kernel: generator_forward.4
= control target key start
LH: loop header
LB: loop body
LE: loop exit
PB: predicated region body
PF: predicated region fallthrough
CT: control target
= control target key end

     0   :  { %v3702_v1 = vmov 0.0   ;;  %v3703_v44 = vmov 0   ;;  %vm698_vm0 = vcmask 1042432   ;;  %vm699_vm1 = vcmask 1046532   ;;  %s4579_s3 = inlined_call_operand.vmem [shape: bf16[3,384,128], index: 3, kind: input, shape index: {}]   ;;  %s4580_s0 = inlined_call_operand.vmem [shape: f32[2,4,4,128], index: 0, kind: input, shape index: {}]   ;;  %s4581_s1 = inlined_call_operand.vmem [shape: f32[1,128], index: 1, kind: input, shape index: {}]   ;;  %s4582_s2 = inlined_call_operand.vmem [shape: f32[1,128], index: 2, kind: input, shape index: {}]   ;;  %s4583_s4 = inlined_call_operand.vmem [shape: f32[1,128], index: 4, kind: input, shape index: {}]   ;;  %s4584_s5 = inlined_call_operand.vmem [shape: f32[1,128], index: 5, kind: input, shape index: {}]   ;;  %s4585_s6 = inlined_call_operand.vmem [shape: f32[1,128], index: 6, kind: input, shape index: {}]   ;;  %s4586_s7 = inlined_call_operand.vmem [shape: bf16[2,8,8,128], index: 7, kind: output, shape index: {}]  }
   0x1   :  { %v3578_v0 = vld [vmem:[%s4579_s3 + $0x178] sm:$0xff]   ;;  %115 = vst [vmem:[#allocation2 + $0x10] sm:$0x1] %v3702_v1  ;;  %116 = vst [vmem:[#allocation2 + $0x20] sm:$0x1] %v3702_v1  ;;  %v3579_v2 = vld [vmem:[%s4579_s3 + $0x170] sm:$0xff]  }
   0x2   :  { %135 = vst [vmem:[#allocation2 + $0x19] sm:$0x1] %v3702_v1  ;;  %136 = vst [vmem:[#allocation2 + $0x29] sm:$0x1] %v3702_v1  ;;  %3480 = vmatprep.subr.bf16.mxu1 %v3578_v0  ;;  %v3580_v3 = vld [vmem:[%s4579_s3 + $0x138] sm:$0xff]   ;;  %v3582_v5 = vld [vmem:[%s4579_s3 + $0x168] sm:$0xff]  }
   0x3   :  { %117 = vst [vmem:[#allocation2 + $0x30] sm:$0x1] %v3702_v1  ;;  %118 = vst [vmem:[#allocation2 + $0x40] sm:$0x1] %v3702_v1  ;;  %3481 = vmatpush3.bf16.msra.mxu1 %v3578_v0  ;;  %v3581_v4 = vld [vmem:[%s4579_s3 + $0xf8] sm:$0xff]   ;;  %3240 = vmatprep.subr.bf16.mxu0 %v3580_v3  ;;  %v3583_v6 = vld [vmem:[%s4579_s3 + $0x130] sm:$0xff]  }
   0x4   :  { %119 = vst [vmem:[#allocation2 + $0x50] sm:$0x1] %v3702_v1  ;;  %120 = vst [vmem:[#allocation2 + $0x60] sm:$0x1] %v3702_v1  ;;  %3482 = vmatprep.subr.bf16.mxu1 %v3579_v2  ;;  %3241 = vmatpush3.bf16.msra.mxu0 %v3581_v4  ;;  %v3584_v7 = vld [vmem:[%s4579_s3 + $0xf0] sm:$0xff]   ;;  %v3585_v8 = vld [vmem:[%s4579_s3 + $0x160] sm:$0xff]  }
   0x5   :  { %121 = vst [vmem:[#allocation2 + $0x70] sm:$0x1] %v3702_v1  ;;  %122 = vst [vmem:[#allocation2 + $0x80] sm:$0x1] %v3702_v1  ;;  %3242 = vmatprep.subr.bf16.mxu0 %v3583_v6  ;;  %v3586_v9 = vld [vmem:[%s4579_s3 + $0x128] sm:$0xff]   ;;  %v3589_v11 = vld [vmem:[%s4579_s3 + $0x120] sm:$0xff]  }
   0x6   :  { %125 = vst [vmem:[#allocation2 + $0xb0] sm:$0x1] %v3702_v1  ;;  %126 = vst [vmem:[#allocation2 + $0xc0] sm:$0x1] %v3702_v1  ;;  %v3587_v10 = vld [vmem:[%s4579_s3 + $0xe8] sm:$0xff]   ;;  %v3588_v12 = vld [vmem:[%s4579_s3 + $0x158] sm:$0xff]  }
   0x7   :  { %127 = vst [vmem:[#allocation2 + $0xd0] sm:$0x1] %v3702_v1  ;;  %128 = vst [vmem:[#allocation2 + $0xe0] sm:$0x1] %v3702_v1  ;;  %3483 = vmatpush3.bf16.msra.mxu1 %v3579_v2  ;;  %v3590_v13 = vld [vmem:[%s4579_s3 + $0xe0] sm:$0xff]   ;;  %v3592_v14 = vld [vmem:[%s4579_s3 + $0x118] sm:$0xff]  }
   0x8   :  { %129 = vst [vmem:[#allocation2 + $0xf0] sm:$0x1] %v3702_v1  ;;  %130 = vst [vmem:[#allocation2 + $0x100] sm:$0x1] %v3702_v1  ;;  %3484 = vmatprep.subr.bf16.mxu1 %v3582_v5  ;;  %3243 = vmatpush3.bf16.msra.mxu0 %v3584_v7  ;;  %v3591_v15 = vld [vmem:[%s4579_s3 + $0x150] sm:$0xff]   ;;  %v3593_v16 = vld [vmem:[%s4579_s3 + $0xd8] sm:$0xff]  }
   0x9   :  { %131 = vst [vmem:[#allocation2 + $0x110] sm:$0x1] %v3702_v1  ;;  %132 = vst [vmem:[#allocation2 + $0x120] sm:$0x1] %v3702_v1  ;;  %3244 = vmatprep.subr.bf16.mxu0 %v3586_v9  ;;  %v3595_v17 = vld [vmem:[%s4579_s3 + $0x110] sm:$0xff]   ;;  %v3594_v18 = vld [vmem:[%s4579_s3 + $0x148] sm:$0xff]  }
   0xa   :  { %137 = vst [vmem:[#allocation2 + $0x39] sm:$0x1] %v3702_v1  ;;  %138 = vst [vmem:[#allocation2 + $0x49] sm:$0x1] %v3702_v1  ;;  %v3596_v19 = vld [vmem:[%s4579_s3 + $0xd0] sm:$0xff]   ;;  %v3598_v20 = vld [vmem:[%s4579_s3 + $0x108] sm:$0xff]  }
   0xb   :  { %139 = vst [vmem:[#allocation2 + $0x59] sm:$0x1] %v3702_v1  ;;  %140 = vst [vmem:[#allocation2 + $0x69] sm:$0x1] %v3702_v1  ;;  %3485 = vmatpush3.bf16.msra.mxu1 %v3582_v5  ;;  %v27_v21 = vld [vmem:[%s4580_s0] sm:$0xf] }
   0xc   :  { %141 = vst [vmem:[#allocation2 + $0x79] sm:$0x1] %v3702_v1  ;;  %142 = vst [vmem:[#allocation2 + $0x89] sm:$0x1] %v3702_v1  ;;  %3486 = vmatprep.subr.bf16.mxu1 %v3585_v8  ;;  %3245 = vmatpush3.bf16.msra.mxu0 %v3587_v10  ;;  %v28_v22 = vld [vmem:[%s4580_s0 + $0x4] sm:$0xf] }
   0xd   :  { %145 = vst [vmem:[#allocation2 + $0xb9] sm:$0x1] %v3702_v1  ;;  %146 = vst [vmem:[#allocation2 + $0xc9] sm:$0x1] %v3702_v1  ;;  %3246 = vmatprep.subr.bf16.mxu0 %v3589_v11  ;;  %v29_v23 = vld [vmem:[%s4580_s0 + $0x8] sm:$0xf]  ;;  %v43_v27 = vcombine.low %v27_v21, %v28_v22 }
   0xe   :  { %147 = vst [vmem:[#allocation2 + $0xd9] sm:$0x1] %v3702_v1  ;;  %148 = vst [vmem:[#allocation2 + $0xe9] sm:$0x1] %v3702_v1  ;;  %v30_v24 = vld [vmem:[%s4580_s0 + $0xc] sm:$0xf] }
   0xf   :  { %149 = vst [vmem:[#allocation2 + $0xf9] sm:$0x1] %v3702_v1  ;;  %150 = vst [vmem:[#allocation2 + $0x109] sm:$0x1] %v3702_v1  ;;  %3487 = vmatpush3.bf16.msra.mxu1 %v3585_v8  ;;  %v31_v25 = vld [vmem:[%s4580_s0 + $0x10] sm:$0xf]  ;;  %v44_v31 = vcombine.low %v29_v23, %v30_v24 }
  0x10   :  { %151 = vst [vmem:[#allocation2 + $0x119] sm:$0x1] %v3702_v1  ;;  %152 = vst [vmem:[#allocation2 + $0x129] sm:$0x1] %v3702_v1  ;;  %3488 = vmatprep.subr.bf16.mxu1 %v3588_v12  ;;  %3247 = vmatpush3.bf16.msra.mxu0 %v3590_v13  ;;  %v32_v26 = vld [vmem:[%s4580_s0 + $0x14] sm:$0xf] }
  0x11   :  { %3248 = vmatprep.subr.bf16.mxu0 %v3592_v14  ;;  %v3597_v28 = vld [vmem:[%s4579_s3 + $0x140] sm:$0xff]   ;;  %v33_v29 = vld [vmem:[%s4580_s0 + $0x18] sm:$0xf]  ;;  %v34_v30 = vld [vmem:[%s4580_s0 + $0x1c] sm:$0xf]  ;;  %v45_v32 = vcombine.low %v31_v25, %v32_v26  ;;  %v51_v35 = vadd.f32 %v44_v31, %v43_v27  ;;  %163 = vst [vmem:[#allocation3] sm:$0xff] %v3703_v44 }
  0x12   :  { %v3599_v33 = vld [vmem:[%s4579_s3 + $0xc8] sm:$0xff]   ;;  %v46_v34 = vcombine.low %v33_v29, %v34_v30  ;;  %v3606_v36 = vld [vmem:[%s4579_s3 + $0x78] sm:$0xff]   ;;  %v3607_v38 = vld [vmem:[%s4579_s3 + $0x100] sm:$0xff]   ;;  %164 = vst [vmem:[#allocation3 + $0x8] sm:$0xf] %v3703_v44 }
  0x13   :  { %3489 = vmatpush3.bf16.msra.mxu1 %v3588_v12  ;;  %v52_v37 = vadd.f32 %v51_v35, %v45_v32  ;;  %v3609_v40 = vld [vmem:[%s4579_s3 + $0xc0] sm:$0xff]   ;;  %v3846_v42 = vld [vmem:[%s4579_s3 + $0xb8] sm:$0xff]   ;;  %166 = vst [vmem:[#allocation3 + $0x80] sm:$0xf] %v3703_v44  ;;  %169 = vst [vmem:[#allocation3 + $0x74] sm:$0xf] %v3703_v44 }
  0x14   :  { %3490 = vmatprep.subr.bf16.mxu1 %v3591_v15  ;;  %3249 = vmatpush3.bf16.msra.mxu0 %v3593_v16  ;;  %171 = vst [vmem:[#allocation3 + $0xec] sm:$0xf] %v3703_v44  ;;  %v176_v27 = vld [vmem:[%s4580_s0 + $0x8] sm:$0xf]  ;;  %v178_v31 = vld [vmem:[%s4580_s0 + $0x10] sm:$0xf]  ;;  %vm3883_vm3 = vmor %vm698_vm0, %vm699_vm1 }
  0x15   :  { %3250 = vmatprep.subr.bf16.mxu0 %v3595_v17  ;;  %v53_v39 = vadd.f32 %v52_v37, %v46_v34  ;;  %v179_v32 = vld [vmem:[%s4580_s0 + $0x14] sm:$0xf]  ;;  %v181_v34 = vld [vmem:[%s4580_s0 + $0x1c] sm:$0xf]  ;;  %vm439_vm2 = vsmask.f32 3328 }
  0x16   :  { %vm440_vm4 = vsmask.f32 7440 }
  0x17   :  { %3491 = vmatpush3.bf16.msra.mxu1 %v3591_v15  ;;  %v54_v41 = vrot.slane %v53_v39, 4  ;;  %vm3915_vm5 = vmor %vm439_vm2, %vm440_vm4 }
  0x18   :  { %3492 = vmatprep.subr.bf16.mxu1 %v3594_v18  ;;  %3251 = vmatpush3.bf16.msra.mxu0 %v3596_v19 }
  0x19   :  { %3252 = vmatprep.subr.bf16.mxu0 %v3598_v20  ;;  %v55_v43 = vadd.f32 %v54_v41, %v53_v39  ;;  %v109_v20 = vld [vmem:[%s4581_s1] sm:$0x1] }
  0x1b   :  { %3493 = vmatpush3.bf16.msra.mxu1 %v3594_v18  ;;  %v56_v45 = vrot.slane %v55_v43, 2  ;;  %v182_v18 = vlaneseq }
  0x1c   :  { %3494 = vmatprep.subr.bf16.mxu1 %v3597_v28  ;;  %3253 = vmatpush3.bf16.msra.mxu0 %v3599_v33  ;;  %v180_v33 = vld [vmem:[%s4580_s0 + $0x18] sm:$0xf] }
  0x1d   :  { %3254 = vmatprep.subr.bf16.mxu0 %v3607_v38  ;;  %v57_v46 = vadd.f32 %v56_v45, %v55_v43  ;;  %v183_v19 = vshrl.u32 %v182_v18, 7 }
  0x1f   :  { %3495 = vmatpush3.bf16.msra.mxu1 %v3597_v28  ;;  %v58_v47 = vrot.slane %v57_v46, 1  ;;  %v177_v28 = vld [vmem:[%s4580_s0 + $0xc] sm:$0xf] }
  0x20   :  { %3320 = vmatprep.subr.bf16.mxu1 %v3606_v36  ;;  %3255 = vmatpush3.bf16.msra.mxu0 %v3609_v40 }
  0x21   :  { %3512 = vmatprep.subr.bf16.mxu0 %v3846_v42  ;;  %v59_v48 = vadd.f32 %v58_v47, %v57_v46 }
  0x23   :  { %v61_v49 = vmul.f32 0.03125, %v59_v48 }
  0x25   :  { %v63_v50 = vcombine.high %v61_v49, %v61_v49  ;;  %v65_v51 = vsub.f32 %v27_v21, %v61_v49  ;;  %v67_v52 = vsub.f32 %v29_v23, %v61_v49  ;;  %v69_v53 = vsub.f32 %v31_v25, %v61_v49  ;;  %v174_v25 = vld [vmem:[%s4580_s0] sm:$0xf] }
  0x26   :  { %v71_v54 = vsub.f32 %v33_v29, %v61_v49  ;;  %v3852_v21 = vsub.s32 0, %v183_v19 }
  0x27   :  { %v66_v55 = vsub.f32 %v28_v22, %v63_v50  ;;  %v68_v56 = vsub.f32 %v30_v24, %v63_v50  ;;  %v70_v57 = vsub.f32 %v32_v26, %v63_v50  ;;  %v72_v58 = vsub.f32 %v34_v30, %v63_v50  ;;  %v111_v24 = vld [vmem:[%s4582_s2] sm:$0x1]  ;;  %v175_v26 = vld [vmem:[%s4580_s0 + $0x4] sm:$0xf] }
  0x28   :  { %v73_v59 = vmul.f32 %v65_v51, %v65_v51  ;;  %v75_v60 = vmul.f32 %v67_v52, %v67_v52  ;;  %v77_v61 = vmul.f32 %v69_v53, %v69_v53  ;;  %v79_v62 = vmul.f32 %v71_v54, %v71_v54 }
  0x29   :  { %v74_v63 = vmul.f32 %v66_v55, %v66_v55  ;;  %v76_v0 = vmul.f32 %v68_v56, %v68_v56  ;;  %v78_v1 = vmul.f32 %v70_v57, %v70_v57  ;;  %v80_v2 = vmul.f32 %v72_v58, %v72_v58 }
  0x2b   :  { %v89_v3 = vcombine.low %v73_v59, %v74_v63  ;;  %v90_v4 = vcombine.low %v75_v60, %v76_v0  ;;  %v91_v5 = vcombine.low %v77_v61, %v78_v1  ;;  %v92_v6 = vcombine.low %v79_v62, %v80_v2 }
  0x2d   :  { %v97_v7 = vadd.f32 %v90_v4, %v89_v3 }
  0x2f   :  { %v98_v8 = vadd.f32 %v97_v7, %v91_v5 }
  0x31   :  { %v99_v9 = vadd.f32 %v98_v8, %v92_v6 }
  0x33   :  { %v100_v10 = vrot.slane %v99_v9, 4 }
  0x35   :  { %v101_v11 = vadd.f32 %v100_v10, %v99_v9 }
  0x37   :  { %v102_v12 = vrot.slane %v101_v11, 2 }
  0x39   :  { %v103_v13 = vadd.f32 %v102_v12, %v101_v11 }
  0x3b   :  { %v104_v14 = vrot.slane %v103_v13, 1 }
  0x3d   :  { %v105_v15 = vadd.f32 %v104_v14, %v103_v13 }
  0x3f   :  { %v106_v16 = vmul.f32 0.03125, %v105_v15 }
  0x41   :  { %v107_v17 = vadd.f32 1e-05, %v106_v16 }
  0x43   :  { %3697 = vrsqrt.f32 %v107_v17 }
  0x50   :  { %v3698_v22 = vpop.eup %3697 }
  0x51   :  { %v110_v23 = vmul.f32 %v3698_v22, %v109_v20 }
  0x53   :  { %v112_v29 = vmul.f32 %v110_v23, %v61_v49  ;;  %v185_v30 = vrot.slane %v110_v23, %v3852_v21 }
  0x55   :  { %v113_v35 = vsub.f32 %v111_v24, %v112_v29  ;;  %v186_v36 = vmul.f32 %v185_v30, %v174_v25  ;;  %v187_v37 = vmul.f32 %v185_v30, %v175_v26  ;;  %v188_v38 = vmul.f32 %v185_v30, %v176_v27 }
  0x56   :  { %v189_v39 = vmul.f32 %v185_v30, %v177_v28  ;;  %v190_v40 = vmul.f32 %v185_v30, %v178_v31  ;;  %v191_v41 = vmul.f32 %v185_v30, %v179_v32  ;;  %v192_v43 = vmul.f32 %v185_v30, %v180_v33 }
  0x57   :  { %v198_v44 = vrot.slane %v113_v35, %v3852_v21  ;;  %v193_v45 = vmul.f32 %v185_v30, %v181_v34 }
  0x59   :  { %v200_v46 = vadd.f32 %v198_v44, %v186_v36  ;;  %v201_v47 = vadd.f32 %v198_v44, %v187_v37  ;;  %v202_v48 = vadd.f32 %v198_v44, %v188_v38  ;;  %v203_v49 = vadd.f32 %v198_v44, %v189_v39 }
  0x5a   :  { %v204_v50 = vadd.f32 %v198_v44, %v190_v40  ;;  %v205_v51 = vadd.f32 %v198_v44, %v191_v41  ;;  %v206_v52 = vadd.f32 %v198_v44, %v192_v43  ;;  %v207_v53 = vadd.f32 %v198_v44, %v193_v45 }
  0x5b   :  { %213 = vst [vmem:[#allocation2 + $0x11] ss:$2 sm:$0xf] %v200_v46  ;;  %215 = vst [vmem:[#allocation2 + $0x21] ss:$2 sm:$0xf] %v200_v46 }
  0x5c   :  { %245 = vst [vmem:[#allocation2 + $0x12] ss:$2 sm:$0xf] %v200_v46  ;;  %247 = vst [vmem:[#allocation2 + $0x22] ss:$2 sm:$0xf] %v200_v46 }
  0x5d   :  { %217 = vst [vmem:[#allocation2 + $0x31] ss:$2 sm:$0xf] %v201_v47  ;;  %219 = vst [vmem:[#allocation2 + $0x41] ss:$2 sm:$0xf] %v201_v47 }
  0x5e   :  { %249 = vst [vmem:[#allocation2 + $0x32] ss:$2 sm:$0xf] %v201_v47  ;;  %251 = vst [vmem:[#allocation2 + $0x42] ss:$2 sm:$0xf] %v201_v47 }
  0x5f   :  { %221 = vst [vmem:[#allocation2 + $0x51] ss:$2 sm:$0xf] %v202_v48  ;;  %223 = vst [vmem:[#allocation2 + $0x61] ss:$2 sm:$0xf] %v202_v48 }
  0x60   :  { %253 = vst [vmem:[#allocation2 + $0x52] ss:$2 sm:$0xf] %v202_v48  ;;  %255 = vst [vmem:[#allocation2 + $0x62] ss:$2 sm:$0xf] %v202_v48 }
  0x61   :  { %225 = vst [vmem:[#allocation2 + $0x71] ss:$2 sm:$0xf] %v203_v49  ;;  %227 = vst [vmem:[#allocation2 + $0x81] ss:$2 sm:$0xf] %v203_v49 }
  0x62   :  { %257 = vst [vmem:[#allocation2 + $0x72] ss:$2 sm:$0xf] %v203_v49  ;;  %259 = vst [vmem:[#allocation2 + $0x82] ss:$2 sm:$0xf] %v203_v49 }
  0x63   :  { %229 = vst [vmem:[#allocation2 + $0xb1] ss:$2 sm:$0xf] %v204_v50  ;;  %231 = vst [vmem:[#allocation2 + $0xc1] ss:$2 sm:$0xf] %v204_v50 }
  0x64   :  { %261 = vst [vmem:[#allocation2 + $0xb2] ss:$2 sm:$0xf] %v204_v50  ;;  %263 = vst [vmem:[#allocation2 + $0xc2] ss:$2 sm:$0xf] %v204_v50 }
  0x65   :  { %233 = vst [vmem:[#allocation2 + $0xd1] ss:$2 sm:$0xf] %v205_v51  ;;  %235 = vst [vmem:[#allocation2 + $0xe1] ss:$2 sm:$0xf] %v205_v51 }
  0x66   :  { %265 = vst [vmem:[#allocation2 + $0xd2] ss:$2 sm:$0xf] %v205_v51  ;;  %267 = vst [vmem:[#allocation2 + $0xe2] ss:$2 sm:$0xf] %v205_v51 }
  0x67   :  { %237 = vst [vmem:[#allocation2 + $0xf1] ss:$2 sm:$0xf] %v206_v52  ;;  %239 = vst [vmem:[#allocation2 + $0x101] ss:$2 sm:$0xf] %v206_v52 }
  0x68   :  { %269 = vst [vmem:[#allocation2 + $0xf2] ss:$2 sm:$0xf] %v206_v52  ;;  %271 = vst [vmem:[#allocation2 + $0x102] ss:$2 sm:$0xf] %v206_v52 }
  0x69   :  { %241 = vst [vmem:[#allocation2 + $0x111] ss:$2 sm:$0xf] %v207_v53  ;;  %243 = vst [vmem:[#allocation2 + $0x121] ss:$2 sm:$0xf] %v207_v53 }
  0x6a   :  { %273 = vst [vmem:[#allocation2 + $0x112] ss:$2 sm:$0xf] %v207_v53  ;;  %275 = vst [vmem:[#allocation2 + $0x122] ss:$2 sm:$0xf] %v207_v53 }
  0x6b   :  { %v276_v54 = vld [vmem:[#allocation2 + $0x10] sm:$0xff]  ;;  %v277_v55 = vld [vmem:[#allocation2 + $0x18] sm:$0x3]  ;;  %v278_v56 = vld [vmem:[#allocation2 + $0x20] sm:$0xff] }
  0x6c   :  { %v279_v57 = vld [vmem:[#allocation2 + $0x28] sm:$0x3]  ;;  %v308_v58 = vpack.c.bf16 %v276_v54, %v276_v54  ;;  %v309_v59 = vpack.c.bf16 %v278_v56, %v278_v56  ;;  %v3076_v60 = vpack.c.bf16 %v277_v55, %v277_v55  ;;  %v280_v61 = vld [vmem:[#allocation2 + $0x30] sm:$0xff]  ;;  %v281_v62 = vld [vmem:[#allocation2 + $0x38] sm:$0x3] }
  0x6d   :  { %v3078_v63 = vpack.c.bf16 %v279_v57, %v279_v57  ;;  %v282_v1 = vld [vmem:[#allocation2 + $0x40] sm:$0xff]  ;;  %v283_v2 = vld [vmem:[#allocation2 + $0x48] sm:$0x3]  ;;  %v3887_v3 = vpack.c.bf16 %v280_v61, %v280_v61  ;;  %v3889_v4 = vpack.c.bf16 %v281_v62, %v281_v62  ;;  %v284_v17 = vld [vmem:[#allocation2 + $0x50] sm:$0xff] }
  0x6e   :  { %v2818_v5 = vrot.slane %v308_v58, 9  ;;  %v703_v6 = vrot.slane %v3076_v60, 5  ;;  %v2819_v7 = vrot.slane %v309_v59, 9  ;;  %327 = vst [vmem:[#allocation3 + $0xc] sm:$0xf] %v308_v58  ;;  %v3891_v8 = vpack.c.bf16 %v282_v1, %v282_v1  ;;  %v286_v24 = vld [vmem:[#allocation2 + $0x60] sm:$0xff] }
  0x6f   :  { %328 = vst [vmem:[#allocation3 + $0x18] sm:$0xf] %v309_v59  ;;  %v707_v9 = vrot.slane %v3078_v63, 5  ;;  %v3893_v10 = vpack.c.bf16 %v283_v2, %v283_v2  ;;  %v2820_v11 = vrot.slane %v3887_v3, 9  ;;  %v711_v12 = vrot.slane %v3889_v4, 5  ;;  %v288_v34 = vld [vmem:[#allocation2 + $0x70] sm:$0xff] }
  0x70   :  { %329 = vst [vmem:[#allocation3 + $0x24] sm:$0xf] %v3887_v3  ;;  %v704_v13 = vsel %vm3883_vm3, %v2818_v5, %v703_v6  ;;  %v2821_v14 = vrot.slane %v3891_v8, 9  ;;  %330 = vst [vmem:[#allocation3 + $0x30] sm:$0xf] %v3891_v8  ;;  %v443_v15 = vshrl.u32 %v308_v58, 16  ;;  %v3909_v33 = vpack.c.bf16 %v284_v17, %v284_v17 }
  0x71   :  { %v446_v16 = vshll.u32 %v308_v58, 16  ;;  %v708_v18 = vsel %vm3883_vm3, %v2819_v7, %v707_v9  ;;  %781 = vst [vmem:[#allocation3 + $0x14] sm:$0xf] %v704_v13  ;;  %v712_v19 = vsel %vm3883_vm3, %v2820_v11, %v711_v12  ;;  %v715_v20 = vrot.slane %v3893_v10, 5  ;;  %v285_v23 = vld [vmem:[#allocation2 + $0x58] sm:$0x3] }
  0x72   :  { %v452_v22 = vshll.u32 %v3076_v60, 16  ;;  %782 = vst [vmem:[#allocation3 + $0x20] sm:$0xf] %v708_v18  ;;  %783 = vst [vmem:[#allocation3 + $0x2c] sm:$0xf] %v712_v19  ;;  %v445_v25 = vrot.slane %v443_v15, 4  ;;  %v3911_v38 = vpack.c.bf16 %v286_v24, %v286_v24  ;;  %v3919_v44 = vpack.c.bf16 %v285_v23, %v285_v23 }
  0x73   :  { %v448_v26 = vrot.slane %v446_v16, 5  ;;  %v457_v27 = vshrl.u32 %v309_v59, 16  ;;  %v460_v28 = vshll.u32 %v309_v59, 16  ;;  %v287_v29 = vld [vmem:[#allocation2 + $0x68] sm:$0x3]  ;;  %v716_v30 = vsel %vm3883_vm3, %v2821_v14, %v715_v20  ;;  %v290_v40 = vld [vmem:[#allocation2 + $0x80] sm:$0xff] }
  0x74   :  { %v454_v31 = vrot.slane %v452_v22, 5  ;;  %v466_v32 = vshll.u32 %v3078_v63, 16  ;;  %784 = vst [vmem:[#allocation3 + $0x38] sm:$0xf] %v716_v30  ;;  %v289_v39 = vld [vmem:[#allocation2 + $0x78] sm:$0x3]  ;;  %v3921_v45 = vpack.c.bf16 %v287_v29, %v287_v29  ;;  %v3927_v51 = vpack.c.bf16 %v288_v34, %v288_v34 }
  0x75   :  { %v449_v35 = vor.u32 %v448_v26, %v445_v25  ;;  %v459_v36 = vrot.slane %v457_v27, 4  ;;  %v462_v37 = vrot.slane %v460_v28, 5  ;;  %v2822_v46 = vrot.slane %v3909_v33, 9  ;;  %331 = vst [vmem:[#allocation3 + $0x3c] sm:$0xf] %v3909_v33  ;;  %v292_v52 = vld [vmem:[#allocation2 + $0xb0] sm:$0xff] }
  0x76   :  { %v468_v43 = vrot.slane %v466_v32, 5  ;;  %v291_v47 = vld [vmem:[#allocation2 + $0x88] sm:$0x3]  ;;  %v2823_v50 = vrot.slane %v3911_v38, 9  ;;  %332 = vst [vmem:[#allocation3 + $0x48] sm:$0xf] %v3911_v38  ;;  %v3931_v56 = vpack.c.bf16 %v290_v40, %v290_v40  ;;  %v3933_v57 = vpack.c.bf16 %v289_v39, %v289_v39 }
  0x77   :  { %v450_v48 = vrot.slane %v449_v35, 4  ;;  %v463_v49 = vor.u32 %v462_v37, %v459_v36  ;;  %v294_v53 = vld [vmem:[#allocation2 + $0xc0] sm:$0xff]  ;;  %v719_v54 = vrot.slane %v3919_v44, 5  ;;  %v723_v55 = vrot.slane %v3921_v45, 5  ;;  %v293_v58 = vld [vmem:[#allocation2 + $0xb8] sm:$0x3] }
  0x78   :  { %v295_v59 = vld [vmem:[#allocation2 + $0xc8] sm:$0x3]  ;;  %v3937_v62 = vpack.c.bf16 %v291_v47, %v291_v47  ;;  %v2824_v63 = vrot.slane %v3927_v51, 9  ;;  %333 = vst [vmem:[#allocation3 + $0x54] sm:$0xf] %v3927_v51  ;;  %v3946_v6 = vpack.c.bf16 %v292_v52, %v292_v52  ;;  %v3948_v7 = vpack.c.bf16 %v294_v53, %v294_v53  ;;  %v3608_v9 = vld [vmem:[%s4579_s3 + $0x38] sm:$0xff]  }
  0x79   :  { %v455_v60 = vsel %vm3915_vm5, %v450_v48, %v454_v31  ;;  %v464_v61 = vrot.slane %v463_v49, 4  ;;  %v3604_v1 = vld [vmem:[#allocation3 + $0x14] ss:$12 sps:$4 sm:$0xff]   ;;  %v720_v2 = vsel %vm3883_vm3, %v2822_v46, %v719_v54  ;;  %v724_v5 = vsel %vm3883_vm3, %v2823_v50, %v723_v55  ;;  %334 = vst [vmem:[#allocation3 + $0x60] sm:$0xf] %v3931_v56  ;;  %v3617_v29 = vld [vmem:[%s4579_s3 + $0x68] sm:$0xff]  }
  0x7a   :  { %682 = vst [vmem:[#allocation3 + $0x10] sm:$0xf] %v455_v60  ;;  %v3610_v11 = vld [vmem:[%s4579_s3 + $0x70] sm:$0xff]   ;;  %785 = vst [vmem:[#allocation3 + $0x44] sm:$0xf] %v720_v2  ;;  %v727_v13 = vrot.slane %v3933_v57, 5  ;;  %3496 = vmatprep.mubr.bf16.mxu1 %v3604_v1  ;;  %v3963_v19 = vpack.c.bf16 %v293_v58, %v293_v58  ;;  %v3965_v20 = vpack.c.bf16 %v295_v59, %v295_v59 }
  0x7b   :  { %v469_v12 = vsel %vm3915_vm5, %v464_v61, %v468_v43  ;;  %786 = vst [vmem:[#allocation3 + $0x50] sm:$0xf] %v724_v5  ;;  %v2825_v14 = vrot.slane %v3931_v56, 9  ;;  %v731_v15 = vrot.slane %v3937_v62, 5  ;;  %v3605_v16 = vld [vmem:[#allocation3 + $0x2c] ss:$12 sps:$4 sm:$0xff]  }
  0x7c   :  { %683 = vst [vmem:[#allocation3 + $0x1c] sm:$0xf] %v469_v12  ;;  %v471_v17 = vshrl.u32 %v3887_v3, 16  ;;  %v474_v18 = vshll.u32 %v3887_v3, 16  ;;  %335 = vst [vmem:[#allocation3 + $0x84] sm:$0xf] %v3946_v6  ;;  %v728_v24 = vsel %vm3883_vm3, %v2824_v63, %v727_v13  ;;  %3497 = vmatmul.mubr.bf16.vlgmr.msra.gmra.mxu1 %v3605_v16 }
  0x7d   :  { %336 = vst [vmem:[#allocation3 + $0x90] sm:$0xf] %v3948_v7  ;;  %v296_v22 = vld [vmem:[#allocation2 + $0xd0] sm:$0xff]  ;;  %v732_v25 = vsel %vm3883_vm3, %v2825_v14, %v731_v15  ;;  %v480_v3 = vshll.u32 %v3889_v4, 16  ;;  %v485_v26 = vshrl.u32 %v3891_v8, 16  ;;  %v488_v32 = vshll.u32 %v3891_v8, 16  ;;  %3321 = vmatpush3.bf16.msra.mxu1 %v3608_v9 }
  0x7e   :  { %v3613_v23 = vld [vmem:[%s4579_s3 + $0x30] sm:$0xff]   ;;  %v297_v27 = vld [vmem:[#allocation2 + $0xd8] sm:$0x3]  ;;  %v299_v28 = vld [vmem:[#allocation2 + $0xe8] sm:$0x3]  ;;  %v473_v30 = vrot.slane %v471_v17, 4  ;;  %3322 = vmatprep.subr.bf16.mxu1 %v3610_v11  ;;  %v3991_v53 = vpack.c.bf16 %v296_v22, %v296_v22 }
  0x7f   :  { %787 = vst [vmem:[#allocation3 + $0x5c] sm:$0xf] %v728_v24  ;;  %788 = vst [vmem:[#allocation3 + $0x68] sm:$0xf] %v732_v25  ;;  %v476_v31 = vrot.slane %v474_v18, 5  ;;  %v494_v34 = vshll.u32 %v3893_v10, 16  ;;  %v3998_v61 = vpack.c.bf16 %v297_v27, %v297_v27  ;;  %v4000_v63 = vpack.c.bf16 %v299_v28, %v299_v28 }
  0x80   :  { %v298_v35 = vld [vmem:[#allocation2 + $0xe0] sm:$0xff]  ;;  %v300_v36 = vld [vmem:[#allocation2 + $0xf0] sm:$0xff]  ;;  %v482_v4 = vrot.slane %v480_v3, 5  ;;  %v487_v37 = vrot.slane %v485_v26, 4  ;;  %v2826_v39 = vrot.slane %v3946_v6, 9  ;;  %v735_v40 = vrot.slane %v3963_v19, 5 }
  0x81   :  { %v477_v43 = vor.u32 %v476_v31, %v473_v30  ;;  %v490_v46 = vrot.slane %v488_v32, 5  ;;  %v496_v47 = vrot.slane %v494_v34, 5  ;;  %v2827_v48 = vrot.slane %v3948_v7, 9  ;;  %v301_v49 = vld [vmem:[#allocation2 + $0xf8] sm:$0x3]  ;;  %v302_v50 = vld [vmem:[#allocation2 + $0x100] sm:$0xff]  ;;  %3323 = vmatpush3.bf16.msra.mxu1 %v3613_v23 }
  0x82   :  { %v3986_v8 = vld [vmem:[#allocation3 + $0xc] sm:$0xff]  ;;  %v736_v10 = vsel %vm3883_vm3, %v2826_v39, %v735_v40  ;;  %v739_v52 = vrot.slane %v3965_v20, 5  ;;  %v3993_v54 = vpack.c.bf16 %v298_v35, %v298_v35  ;;  %v303_v55 = vld [vmem:[#allocation2 + $0x108] sm:$0x3]  ;;  %v4002_v1 = vpack.c.bf16 %v300_v36, %v300_v36  ;;  %337 = vst [vmem:[#allocation3 + $0x9c] sm:$0xf] %v3991_v53  ;;  %3324 = vmatprep.subr.bf16.mxu1 %v3617_v29 }
  0x83   :  { %v3615_v58 = vld [vmem:[#allocation3 + $0x44] ss:$12 sps:$4 sm:$0xff]   ;;  %v3618_v59 = vld [vmem:[%s4579_s3 + $0x28] sm:$0xff]   ;;  %v491_v60 = vor.u32 %v490_v46, %v487_v37  ;;  %789 = vst [vmem:[#allocation3 + $0x8c] sm:$0xf] %v736_v10  ;;  %v4004_v2 = vld [vmem:[#allocation3 + $0x18] sm:$0xff]  ;;  %v4026_v24 = vpack.c.bf16 %v302_v50, %v302_v50  ;;  %v4028_v25 = vpack.c.bf16 %v301_v49, %v301_v49  ;;  %v4030_v3 = vpack.c.bf16 %v303_v55, %v303_v55 }
  0x84   :  { %v478_v5 = vrot.slane %v477_v43, 4  ;;  %v740_v9 = vsel %vm3883_vm3, %v2827_v48, %v739_v52  ;;  %v2828_v11 = vrot.slane %v3991_v53, 9  ;;  %v2829_v12 = vrot.slane %v3993_v54, 9  ;;  %338 = vst [vmem:[#allocation3 + $0xa8] sm:$0xf] %v3993_v54  ;;  %3500 = vmatprep.mubr.bf16.mxu1 %v3615_v58  ;;  %v3619_v15 = vld [vmem:[%s4579_s3 + $0x60] sm:$0xff]  }
  0x85   :  { %v2882_v13 = vcombine.low %v3986_v8, %v4004_v2  ;;  %v2883_v14 = vcombine.high %v3986_v8, %v4004_v2  ;;  %v492_v16 = vrot.slane %v491_v60, 4  ;;  %v3622_v17 = vld [vmem:[%s4579_s3 + $0xb0] sm:$0xff]   ;;  %790 = vst [vmem:[#allocation3 + $0x98] sm:$0xf] %v740_v9  ;;  %v743_v18 = vrot.slane %v3998_v61, 5  ;;  %v3621_v27 = vld [vmem:[%s4579_s3 + $0x20] sm:$0xff]   ;;  %3325 = vmatpush3.bf16.msra.mxu1 %v3618_v59 }
  0x86   :  { %339 = vst [vmem:[#allocation3 + $0xb4] sm:$0xf] %v4002_v1  ;;  %v3616_v22 = vld [vmem:[#allocation3 + $0x5c] ss:$12 sps:$4 sm:$0xff]   ;;  %v483_v23 = vsel %vm3915_vm5, %v478_v5, %v482_v4  ;;  %v747_v29 = vrot.slane %v4000_v63, 5  ;;  %v499_v30 = vshrl.u32 %v3909_v33, 16  ;;  %3326 = vmatprep.subr.bf16.mxu1 %v3619_v15 }
  0x87   :  { %1270 = vmatprep.mubr.bf16.mxu0 %v2883_v14  ;;  %v497_v26 = vsel %vm3915_vm5, %v492_v16, %v496_v47  ;;  %684 = vst [vmem:[#allocation3 + $0x28] sm:$0xf] %v483_v23  ;;  %v744_v28 = vsel %vm3883_vm3, %v2828_v11, %v743_v18  ;;  %3501 = vmatmul.mubr.bf16.gmra.mxu1 %v3616_v22  ;;  %v3626_v31 = vld [vmem:[%s4579_s3 + $0x58] sm:$0xff]   ;;  %v502_v32 = vshll.u32 %v3909_v33, 16  ;;  %v508_v34 = vshll.u32 %v3919_v44, 16  ;;  %v304_v4 = vld [vmem:[#allocation2 + $0x110] sm:$0xff] }
  0x88   :  { %1271 = vmatmul.mubr.bf16.vlgmr.msra.gmra.mxu0 %v2882_v13  ;;  %685 = vst [vmem:[#allocation3 + $0x34] sm:$0xf] %v497_v26  ;;  %791 = vst [vmem:[#allocation3 + $0xa4] sm:$0xf] %v744_v28  ;;  %v513_v35 = vshrl.u32 %v3911_v38, 16  ;;  %v516_v36 = vshll.u32 %v3911_v38, 16  ;;  %v748_v39 = vsel %vm3883_vm3, %v2829_v12, %v747_v29  ;;  %v4060_v60 = vpack.c.bf16 %v304_v4, %v304_v4 }
  0x89   :  { %340 = vst [vmem:[#allocation3 + $0xc0] sm:$0xf] %v4026_v24  ;;  %v305_v37 = vld [vmem:[#allocation2 + $0x118] sm:$0x3]  ;;  %3513 = vmatpush3.bf16.msra.mxu0 %v3846_v42  ;;  %v501_v40 = vrot.slane %v499_v30, 4  ;;  %v522_v43 = vshll.u32 %v3921_v45, 16  ;;  %3327 = vmatpush3.bf16.msra.mxu1 %v3621_v27 }
  0x8a   :  { %v3631_v33 = vld [vmem:[%s4579_s3 + $0xa8] sm:$0xff]   ;;  %v2830_v44 = vrot.slane %v4002_v1, 9  ;;  %v306_v38 = vld [vmem:[#allocation2 + $0x120] sm:$0xff]  ;;  %3514 = vmatprep.subr.bf16.mxu0 %v3622_v17  ;;  %792 = vst [vmem:[#allocation3 + $0xb0] sm:$0xf] %v748_v39  ;;  %v504_v47 = vrot.slane %v502_v32, 5  ;;  %v4071_v13 = vpack.c.bf16 %v305_v37, %v305_v37  ;;  %3328 = vmatprep.subr.bf16.mxu1 %v3626_v31 }
  0x8b   :  { %v307_v46 = vld [vmem:[#allocation2 + $0x128] sm:$0x3]  ;;  %v510_v42 = vrot.slane %v508_v34, 5  ;;  %v515_v48 = vrot.slane %v513_v35, 4  ;;  %v518_v49 = vrot.slane %v516_v36, 5  ;;  %v524_v50 = vrot.slane %v522_v43, 5 }
  0x8c   :  { %v751_v10 = vrot.slane %v4028_v25, 5  ;;  %v2831_v45 = vrot.slane %v4026_v24, 9  ;;  %v755_v52 = vrot.slane %v4030_v3, 5  ;;  %v3624_v55 = vld [vmem:[#allocation3 + $0x8c] ss:$12 sps:$4 sm:$0xff]   ;;  %v505_v58 = vor.u32 %v504_v47, %v501_v40  ;;  %v3628_v16 = vld [vmem:[%s4579_s3 + $0x50] sm:$0xff]  }
  0x8d   :  { %v519_v59 = vor.u32 %v518_v49, %v515_v48  ;;  %v4062_v5 = vpack.c.bf16 %v306_v38, %v306_v38  ;;  %3515 = vmatpush3.bf16.msra.mxu0 %v3622_v17  ;;  %v3627_v9 = vld [vmem:[%s4579_s3 + $0x18] sm:$0xff]   ;;  %v527_v14 = vshrl.u32 %v3927_v51, 16  ;;  %3504 = vmatprep.mubr.bf16.mxu1 %v3624_v55  ;;  %v4079_v22 = vpack.c.bf16 %v307_v46, %v307_v46  ;;  %v3630_v27 = vld [vmem:[%s4579_s3 + $0x10] sm:$0xff]   ;;  %v3635_v36 = vld [vmem:[%s4579_s3 + $0x48] sm:$0xff]  }
  0x8e   :  { %v752_v11 = vsel %vm3883_vm3, %v2830_v44, %v751_v10  ;;  %v756_v12 = vsel %vm3883_vm3, %v2831_v45, %v755_v52  ;;  %v4074_v15 = vld [vmem:[#allocation3 + $0x24] sm:$0xff]  ;;  %v506_v17 = vrot.slane %v505_v58, 4  ;;  %v2832_v23 = vrot.slane %v4060_v60, 9  ;;  %341 = vst [vmem:[#allocation3 + $0xcc] sm:$0xf] %v4060_v60  ;;  %3516 = vmatprep.subr.bf16.mxu0 %v3631_v33  ;;  %v3643_v37 = vld [vmem:[%s4579_s3 + $0x98] sm:$0xff]   ;;  %3329 = vmatpush3.bf16.msra.mxu1 %v3627_v9 }
  0x8f   :  { %v520_v18 = vrot.slane %v519_v59, 4  ;;  %793 = vst [vmem:[#allocation3 + $0xbc] sm:$0xf] %v752_v11  ;;  %794 = vst [vmem:[#allocation3 + $0xc8] sm:$0xf] %v756_v12  ;;  %v4084_v26 = vld [vmem:[#allocation3 + $0x30] sm:$0xff]  ;;  %3330 = vmatprep.subr.bf16.mxu1 %v3628_v16 }
  0x90   :  { %342 = vst [vmem:[#allocation3 + $0xd8] sm:$0xf] %v4062_v5  ;;  %v759_v28 = vrot.slane %v4071_v13, 5  ;;  %v2833_v29 = vrot.slane %v4062_v5, 9  ;;  %v529_v30 = vrot.slane %v527_v14, 4  ;;  %v2886_v31 = vcombine.high %v4074_v15, %v4084_v26  ;;  %v3640_v4 = vld [vmem:[%s4579_s3 + $0xa0] sm:$0xff]  }
  0x91   :  { %v2885_v32 = vcombine.low %v4074_v15, %v4084_v26  ;;  %v511_v34 = vsel %vm3915_vm5, %v506_v17, %v510_v42  ;;  %v525_v35 = vsel %vm3915_vm5, %v520_v18, %v524_v50  ;;  %v3625_v39 = vld [vmem:[#allocation3 + $0xa4] ss:$12 sps:$4 sm:$0xff]   ;;  %3517 = vmatpush3.bf16.msra.mxu0 %v3631_v33  ;;  %v763_v43 = vrot.slane %v4079_v22, 5 }
  0x92   :  { %686 = vst [vmem:[#allocation3 + $0x40] sm:$0xf] %v511_v34  ;;  %687 = vst [vmem:[#allocation3 + $0x4c] sm:$0xf] %v525_v35  ;;  %v760_v40 = vsel %vm3883_vm3, %v2832_v23, %v759_v28  ;;  %v530_v44 = vshll.u32 %v3927_v51, 16  ;;  %1278 = vmatprep.mubr.bf16.mxu0 %v2886_v31  ;;  %v536_v38 = vshll.u32 %v3933_v57, 16  ;;  %3505 = vmatmul.mubr.bf16.gmra.mxu1 %v3625_v39 }
  0x93   :  { %795 = vst [vmem:[#allocation3 + $0xd4] sm:$0xf] %v760_v40  ;;  %v541_v46 = vshrl.u32 %v3931_v56, 16  ;;  %v544_v47 = vshll.u32 %v3931_v56, 16  ;;  %v550_v42 = vshll.u32 %v3937_v62, 16  ;;  %1279 = vmatmul.mubr.bf16.gmra.mxu0 %v2885_v32  ;;  %v764_v33 = vsel %vm3883_vm3, %v2833_v29, %v763_v43  ;;  %v3636_v57 = vld [vmem:[%s4579_s3 + $0x8] sm:$0xff]   ;;  %3518 = vmatprep.subr.bf16.mxu0 %v3640_v4 }
  0x94   :  { %v532_v48 = vrot.slane %v530_v44, 5  ;;  %v555_v49 = vshrl.u32 %v3946_v6, 16  ;;  %v558_v51 = vshll.u32 %v3946_v6, 16  ;;  %796 = vst [vmem:[#allocation3 + $0xe0] sm:$0xf] %v764_v33  ;;  %v3637_v56 = vld [vmem:[%s4579_s3 + $0x40] sm:$0xff]   ;;  %3331 = vmatpush3.bf16.msra.mxu1 %v3630_v27 }
  0x95   :  { %v538_v62 = vrot.slane %v536_v38, 5  ;;  %v543_v50 = vrot.slane %v541_v46, 4  ;;  %v546_v10 = vrot.slane %v544_v47, 5  ;;  %v552_v45 = vrot.slane %v550_v42, 5  ;;  %3519 = vmatpush3.bf16.msra.mxu0 %v3640_v4  ;;  %v4126_v55 = vld [vmem:[#allocation3] sm:$0xff]  ;;  %3332 = vmatprep.subr.bf16.mxu1 %v3635_v36  ;;  %v3646_v12 = vld [vmem:[%s4579_s3 + $0x90] sm:$0xff]  }
  0x96   :  { %v3633_v0 = vld [vmem:[#allocation3 + $0xbc] ss:$12 sps:$4 sm:$0xff]   ;;  %v533_v52 = vor.u32 %v532_v48, %v529_v30  ;;  %v2931_v6 = vcombine.high %v4126_v55, %v3986_v8  ;;  %v557_v59 = vrot.slane %v555_v49, 4  ;;  %v560_v9 = vrot.slane %v558_v51, 5  ;;  %3520 = vmatprep.subr.bf16.mxu0 %v3643_v37 }
  0x97   :  { %v547_v58 = vor.u32 %v546_v10, %v543_v50  ;;  %v564_v11 = vshll.u32 %v3963_v19, 16  ;;  %3508 = vmatprep.mubr.bf16.mxu1 %v3633_v0  ;;  %v569_v16 = vshrl.u32 %v3948_v7, 16  ;;  %v572_v17 = vshll.u32 %v3948_v7, 16  ;;  %v3639_v19 = vld [vmem:[%s4579_s3] sm:$0xff]   ;;  %v3649_v35 = vld [vmem:[%s4579_s3 + $0x88] sm:$0xff]   ;;  %v4159_v43 = vld [vmem:[%s4579_s3 + $0x238] sm:$0xff]  }
  0x98   :  { %v534_v14 = vrot.slane %v533_v52, 4  ;;  %v578_v18 = vshll.u32 %v3965_v20, 16  ;;  %v561_v29 = vor.u32 %v560_v9, %v557_v59  ;;  %v583_v31 = vshrl.u32 %v3991_v53, 16  ;;  %3333 = vmatpush3.bf16.msra.mxu1 %v3636_v57 }
  0x99   :  { %v4137_v23 = vld [vmem:[#allocation3 + $0x3c] sm:$0xff]  ;;  %v4139_v27 = vld [vmem:[#allocation3 + $0x48] sm:$0xff]  ;;  %v548_v28 = vrot.slane %v547_v58, 4  ;;  %v566_v30 = vrot.slane %v564_v11, 5  ;;  %v571_v34 = vrot.slane %v569_v16, 4  ;;  %3521 = vmatpush3.bf16.msra.mxu0 %v3643_v37  ;;  %3334 = vmatprep.subr.bf16.mxu1 %v3637_v56  ;;  %v574_v39 = vrot.slane %v572_v17, 5 }
  0x9a   :  { %v2889_v32 = vcombine.high %v4137_v23, %v4139_v27  ;;  %v2888_v7 = vcombine.low %v4137_v23, %v4139_v27  ;;  %v539_v20 = vsel %vm3915_vm5, %v534_v14, %v538_v62  ;;  %v562_v4 = vrot.slane %v561_v29, 4  ;;  %3522 = vmatprep.subr.bf16.mxu0 %v3646_v12  ;;  %v3656_v29 = vld [vmem:[%s4579_s3 + $0x1f8] sm:$0xff]  }
  0x9b   :  { %v553_v36 = vsel %vm3915_vm5, %v548_v28, %v552_v45  ;;  %688 = vst [vmem:[#allocation3 + $0x58] sm:$0xf] %v539_v20  ;;  %v580_v40 = vrot.slane %v578_v18, 5  ;;  %v3634_v37 = vld [vmem:[#allocation3 + $0xd4] ss:$12 sps:$4 sm:$0xff]   ;;  %v2930_v44 = vcombine.low %v4126_v55, %v3986_v8  ;;  %v585_v38 = vrot.slane %v583_v31, 4 }
  0x9c   :  { %1286 = vmatprep.mubr.bf16.mxu0 %v2889_v32  ;;  %689 = vst [vmem:[#allocation3 + $0x64] sm:$0xf] %v553_v36  ;;  %v586_v46 = vshll.u32 %v3991_v53, 16  ;;  %v567_v47 = vsel %vm3915_vm5, %v562_v4, %v566_v30  ;;  %v575_v42 = vor.u32 %v574_v39, %v571_v34  ;;  %v592_v33 = vshll.u32 %v3998_v61, 16  ;;  %3509 = vmatmul.mubr.bf16.gmra.mxu1 %v3634_v37  ;;  %v3652_v61 = vld [vmem:[%s4579_s3 + $0x80] sm:$0xff]  }
  0x9d   :  { %1287 = vmatmul.mubr.bf16.gmra.mxu0 %v2888_v7  ;;  %v597_v48 = vshrl.u32 %v3993_v54, 16  ;;  %690 = vst [vmem:[#allocation3 + $0x88] sm:$0xf] %v567_v47  ;;  %v600_v51 = vshll.u32 %v3993_v54, 16  ;;  %v606_v57 = vshll.u32 %v4000_v63, 16  ;;  %v611_v8 = vshrl.u32 %v4002_v1, 16  ;;  %3335 = vmatpush3.bf16.msra.mxu1 %v3639_v19 }
  0x9e   :  { %v588_v49 = vrot.slane %v586_v46, 5  ;;  %3523 = vmatpush3.bf16.msra.mxu0 %v3646_v12  ;;  %1736 = vmatprep.mubr.bf16.mxu1 %v2931_v6  ;;  %v576_v53 = vrot.slane %v575_v42, 4  ;;  %v594_v56 = vrot.slane %v592_v33, 5  ;;  %v614_v50 = vshll.u32 %v4002_v1, 16  ;;  %v3661_v7 = vld [vmem:[%s4579_s3 + $0x230] sm:$0xff]  }
  0x9f   :  { %v599_v62 = vrot.slane %v597_v48, 4  ;;  %v602_v45 = vrot.slane %v600_v51, 5  ;;  %v608_v0 = vrot.slane %v606_v57, 5  ;;  %v613_v54 = vrot.slane %v611_v8, 4  ;;  %3524 = vmatprep.subr.bf16.mxu0 %v3649_v35  ;;  %3544 = vmatprep.subr.bf16.mxu1 %v4159_v43 }
  0xa0   :  { %v589_v10 = vor.u32 %v588_v49, %v585_v38  ;;  %v581_v63 = vsel %vm3915_vm5, %v576_v53, %v580_v40  ;;  %v616_v52 = vrot.slane %v614_v50, 5  ;;  %v620_v6 = vshll.u32 %v4028_v25, 16  ;;  %v3669_v50 = vld [vmem:[%s4579_s3 + $0x220] sm:$0xff]  }
  0xa1   :  { %v625_v58 = vshrl.u32 %v4026_v24, 16  ;;  %691 = vst [vmem:[#allocation3 + $0x94] sm:$0xf] %v581_v63  ;;  %v603_v9 = vor.u32 %v602_v45, %v599_v62  ;;  %v628_v11 = vshll.u32 %v4026_v24, 16  ;;  %v634_v12 = vshll.u32 %v4030_v3, 16  ;;  %v3674_v63 = vld [vmem:[%s4579_s3 + $0x218] sm:$0xff]  }
  0xa2   :  { %v4180_v1 = vld [vmem:[#allocation3 + $0x54] sm:$0xff]  ;;  %v590_v59 = vrot.slane %v589_v10, 4  ;;  %3525 = vmatpush3.bf16.msra.mxu0 %v3649_v35  ;;  %v2934_v16 = vcombine.high %v4004_v2, %v4074_v15  ;;  %v617_v17 = vor.u32 %v616_v52, %v613_v54  ;;  %v622_v18 = vrot.slane %v620_v6, 5 }
  0xa3   :  { %v4184_v14 = vld [vmem:[#allocation3 + $0x60] sm:$0xff]  ;;  %v627_v25 = vrot.slane %v625_v58, 4  ;;  %3526 = vmatprep.subr.bf16.mxu0 %v3652_v61  ;;  %v604_v3 = vrot.slane %v603_v9, 4  ;;  %v630_v31 = vrot.slane %v628_v11, 5  ;;  %v636_v32 = vrot.slane %v634_v12, 5  ;;  %v3677_v9 = vld [vmem:[%s4579_s3 + $0x210] sm:$0xff]  }
  0xa4   :  { %v2892_v28 = vcombine.high %v4180_v1, %v4184_v14  ;;  %v2891_v19 = vcombine.low %v4180_v1, %v4184_v14  ;;  %v595_v24 = vsel %vm3915_vm5, %v590_v59, %v594_v56  ;;  %v618_v30 = vrot.slane %v617_v17, 4  ;;  %1737 = vmatmul.mubr.bf16.vlgmr.msra.gmra.mxu1 %v2930_v44  ;;  %v4200_v20 = vld [vmem:[#allocation3 + $0x84] sm:$0xff] }
  0xa5   :  { %692 = vst [vmem:[#allocation3 + $0xa0] sm:$0xf] %v595_v24  ;;  %v609_v34 = vsel %vm3915_vm5, %v604_v3, %v608_v0  ;;  %v639_v35 = vshrl.u32 %v4060_v60, 16  ;;  %v642_v36 = vshll.u32 %v4060_v60, 16  ;;  %v648_v4 = vshll.u32 %v4071_v13, 16  ;;  %1744 = vmatprep.mubr.bf16.mxu1 %v2934_v16  ;;  %3545 = vmatpush3.bf16.msra.mxu1 %v4159_v43  ;;  %v3666_v60 = vld [vmem:[%s4579_s3 + $0x228] sm:$0xff]  }
  0xa6   :  { %1294 = vmatprep.mubr.bf16.mxu0 %v2892_v28  ;;  %693 = vst [vmem:[#allocation3 + $0xac] sm:$0xf] %v609_v34  ;;  %v623_v39 = vsel %vm3915_vm5, %v618_v30, %v622_v18  ;;  %v631_v40 = vor.u32 %v630_v31, %v627_v25  ;;  %v653_v37 = vshrl.u32 %v4062_v5, 16  ;;  %v656_v44 = vshll.u32 %v4062_v5, 16  ;;  %3527 = vmatpush3.bf16.msra.mxu0 %v3652_v61  ;;  %v3682_v12 = vld [vmem:[%s4579_s3 + $0x208] sm:$0xff]   ;;  %v3685_v28 = vld [vmem:[%s4579_s3 + $0x200] sm:$0xff]  }
  0xa7   :  { %1295 = vmatmul.mubr.bf16.gmra.mxu0 %v2891_v19  ;;  %694 = vst [vmem:[#allocation3 + $0xb8] sm:$0xf] %v623_v39  ;;  %v641_v38 = vrot.slane %v639_v35, 4  ;;  %v644_v46 = vrot.slane %v642_v36, 5  ;;  %v662_v47 = vshll.u32 %v4079_v22, 16  ;;  %v2933_v42 = vcombine.low %v4004_v2, %v4074_v15  ;;  %3400 = vmatprep.subr.bf16.mxu0 %v3656_v29  ;;  %v3658_v31 = vld [vmem:[%s4579_s3 + $0x1b8] sm:$0xff]  }
  0xa8   :  { %v4216_v13 = vld [vmem:[#allocation3 + $0x90] sm:$0xff]  ;;  %v632_v33 = vrot.slane %v631_v40, 4  ;;  %v655_v48 = vrot.slane %v653_v37, 4  ;;  %v658_v5 = vrot.slane %v656_v44, 5  ;;  %3546 = vmatprep.subr.bf16.mxu1 %v3661_v7  ;;  %v2937_v43 = vcombine.high %v4084_v26, %v4137_v23  ;;  %v3657_v29 = vld [vmem:[#allocation3 + $0x20] ss:$12 sps:$4 sm:$0xff]  }
  0xa9   :  { %v2895_v22 = vcombine.high %v4200_v20, %v4216_v13  ;;  %v645_v49 = vor.u32 %v644_v46, %v641_v38  ;;  %v650_v51 = vrot.slane %v648_v4, 5  ;;  %v2894_v57 = vcombine.low %v4200_v20, %v4216_v13  ;;  %3547 = vmatpush3.bf16.msra.mxu1 %v3661_v7  ;;  %v3655_v24 = vld [vmem:[#allocation3 + $0x8] ss:$12 sps:$4 sm:$0xff]   ;;  %v3664_v36 = vld [vmem:[#allocation3 + $0x50] ss:$12 sps:$4 sm:$0xff]   ;;  %v3667_v37 = vld [vmem:[%s4579_s3 + $0x1e0] sm:$0xff]  }
  0xaa   :  { %v637_v8 = vsel %vm3915_vm5, %v632_v33, %v636_v32  ;;  %v659_v2 = vor.u32 %v658_v5, %v655_v48  ;;  %v664_v15 = vrot.slane %v662_v47, 5  ;;  %3548 = vmatprep.subr.bf16.mxu1 %v3666_v60  ;;  %v2936_v52 = vcombine.low %v4084_v26, %v4137_v23  ;;  %v3662_v32 = vld [vmem:[#allocation3 + $0x38] ss:$12 sps:$4 sm:$0xff]   ;;  %v3659_v7 = vld [vmem:[%s4579_s3 + $0x1f0] sm:$0xff]   ;;  %v3663_v34 = vld [vmem:[%s4579_s3 + $0x1e8] sm:$0xff]  }
  0xab   :  { %1302 = vmatprep.mubr.bf16.mxu0 %v2895_v22  ;;  %695 = vst [vmem:[#allocation3 + $0xc4] sm:$0xf] %v637_v8  ;;  %v646_v56 = vrot.slane %v645_v49, 4  ;;  %v4248_v41 = vcombine.high %v4139_v27, %v4180_v1  ;;  %v4262_v16 = vcombine.low %v4139_v27, %v4180_v1  ;;  %v2943_v18 = vcombine.high %v4126_v55, %v4200_v20  ;;  %v3665_v39 = vld [vmem:[%s4579_s3 + $0x1a8] sm:$0xff]   ;;  %v3668_v44 = vld [vmem:[%s4579_s3 + $0x1a0] sm:$0xff]   ;;  %v3671_v38 = vld [vmem:[%s4579_s3 + $0x1d8] sm:$0xff]  }
  0xac   :  { %v905_v53 = vld [vmem:[#allocation3 + $0x9c] sm:$0xff]  ;;  %v660_v62 = vrot.slane %v659_v2, 4  ;;  %1745 = vmatmul.mubr.bf16.gmra.mxu1 %v2933_v42  ;;  %v2942_v27 = vcombine.low %v4126_v55, %v4200_v20  ;;  %v3660_v20 = vld [vmem:[%s4579_s3 + $0x1b0] sm:$0xff]   ;;  %v3672_v47 = vld [vmem:[#allocation3 + $0x98] ss:$12 sps:$4 sm:$0xff]  }
  0xad   :  { %v4231_v61 = vld [vmem:[#allocation3 + $0xa8] sm:$0xff]  ;;  %v651_v10 = vsel %vm3915_vm5, %v646_v56, %v650_v51  ;;  %1752 = vmatprep.mubr.bf16.mxu1 %v2937_v43  ;;  %3549 = vmatpush3.bf16.msra.mxu1 %v3666_v60  ;;  %v4276_v19 = vcombine.high %v4216_v13, %v905_v53  ;;  %v4280_v3 = vcombine.low %v4216_v13, %v905_v53  ;;  %v3673_v13 = vld [vmem:[%s4579_s3 + $0x198] sm:$0xff]   ;;  %v3675_v33 = vld [vmem:[%s4579_s3 + $0x1d0] sm:$0xff]  }
  0xae   :  { %v2898_v45 = vcombine.high %v905_v53, %v4231_v61  ;;  %v665_v0 = vsel %vm3915_vm5, %v660_v62, %v664_v15  ;;  %696 = vst [vmem:[#allocation3 + $0xd0] sm:$0xf] %v651_v10  ;;  %v909_v54 = vld [vmem:[#allocation3 + $0xb4] sm:$0xff]  ;;  %3550 = vmatprep.subr.bf16.mxu1 %v3669_v50  ;;  %v2897_v6 = vcombine.low %v905_v53, %v4231_v61  ;;  %v3670_v40 = vld [vmem:[#allocation3 + $0x80] ss:$12 sps:$4 sm:$0xff]  }
  0xaf   :  { %1303 = vmatmul.mubr.bf16.gmra.mxu0 %v2894_v57  ;;  %697 = vst [vmem:[#allocation3 + $0xdc] sm:$0xf] %v665_v0  ;;  %v4283_v30 = vcombine.high %v4231_v61, %v909_v54  ;;  %v4300_v35 = vcombine.low %v4231_v61, %v909_v54  ;;  %v3689_v60 = vld [vmem:[#allocation3 + $0x20] ss:$12 sps:$4 sm:$0xff]   ;;  %v3678_v42 = vld [vmem:[#allocation3 + $0xb0] ss:$12 sps:$4 sm:$0xff]  }
  0xb0   :  { %1310 = vmatprep.mubr.bf16.mxu0 %v2898_v45  ;;  %v3676_v48 = vld [vmem:[%s4579_s3 + $0x190] sm:$0xff]   ;;  %v3679_v5 = vld [vmem:[%s4579_s3 + $0x1c8] sm:$0xff]   ;;  %v3690_v22 = vld [vmem:[#allocation3 + $0x38] ss:$12 sps:$4 sm:$0xff]  }
  0xb1   :  { %3551 = vmatpush3.bf16.msra.mxu1 %v3669_v50  ;;  %v3680_v43 = vld [vmem:[#allocation3 + $0xc8] ss:$12 sps:$4 sm:$0xff]   ;;  %v3691_v49 = vld [vmem:[#allocation3 + $0x50] ss:$12 sps:$4 sm:$0xff]   ;;  %v3683_v8 = vld [vmem:[%s4579_s3 + $0x1c0] sm:$0xff]  }
  0xb2   :  { %v4244_v58 = vld [vmem:[#allocation3 + $0xc0] sm:$0xff]  ;;  %3552 = vmatprep.subr.bf16.mxu1 %v3674_v63  ;;  %v3681_v51 = vld [vmem:[%s4579_s3 + $0x188] sm:$0xff]   ;;  %v1906_v15 = vld [vmem:[#allocation3 + $0x30] sm:$0xff] }
  0xb3   :  { %v2901_v59 = vcombine.high %v909_v54, %v4244_v58  ;;  %v2900_v17 = vcombine.low %v909_v54, %v4244_v58  ;;  %v3688_v57 = vld [vmem:[#allocation3 + $0x1c] ss:$12 sps:$4 sm:$0xff]   ;;  %v3684_v2 = vld [vmem:[%s4579_s3 + $0x180] sm:$0xff]   ;;  %v3030_v50 = vcombine.high %v1906_v15, %v4137_v23  ;;  %v3029_v10 = vcombine.low %v1906_v15, %v4137_v23 }
  0xb4   :  { %1753 = vmatmul.mubr.bf16.gmra.mxu1 %v2936_v52  ;;  %v3692_v53 = vld [vmem:[#allocation3 + $0x68] ss:$12 sps:$4 sm:$0xff]   ;;  %v3686_v56 = vld [vmem:[#allocation3 + $0x18] ss:$12 sps:$4 sm:$0xff]   ;;  %v3694_v61 = vld [vmem:[#allocation3 + $0xb0] ss:$12 sps:$4 sm:$0xff]   ;;  %v3036_v54 = vcombine.high %v4184_v14, %v4126_v55 }
  0xb5   :  { %1760 = vmatprep.mubr.bf16.mxu1 %v4248_v41  ;;  %3553 = vmatpush3.bf16.msra.mxu1 %v3674_v63  ;;  %v913_v26 = vld [vmem:[#allocation3 + $0xcc] sm:$0xff]  ;;  %v3693_v62 = vld [vmem:[#allocation3 + $0x98] ss:$12 sps:$4 sm:$0xff]   ;;  %v3695_v45 = vld [vmem:[#allocation3 + $0xc8] ss:$12 sps:$4 sm:$0xff]   ;;  %v3035_v63 = vcombine.low %v4184_v14, %v4126_v55 }
  0xb6   :  { %v4255_v11 = vld [vmem:[#allocation3 + $0xd8] sm:$0xff]  ;;  %3554 = vmatprep.subr.bf16.mxu1 %v3677_v9  ;;  %v4303_v4 = vcombine.high %v4244_v58, %v913_v26  ;;  %v2951_v46 = vcombine.low %v4244_v58, %v913_v26  ;;  %v3696_v0 = vld [vmem:[#allocation3 + $0xe0] ss:$12 sps:$4 sm:$0xff]  }
  0xb7   :  { %1311 = vmatmul.mubr.bf16.gmra.mxu0 %v2897_v6  ;;  %v2904_v25 = vcombine.high %v913_v26, %v4255_v11  ;;  %v2903_v1 = vcombine.low %v913_v26, %v4255_v11  ;;  %v3048_v23 = vcombine.high %v4255_v11, %v4126_v55  ;;  %v3047_v52 = vcombine.low %v4255_v11, %v4126_v55 }
  0xb8   :  { %1318 = vmatprep.mubr.bf16.mxu0 %v2901_v59 }
  0xb9   :  { %3555 = vmatpush3.bf16.msra.mxu1 %v3677_v9 }
  0xba   :  { %3556 = vmatprep.subr.bf16.mxu1 %v3682_v12 }
  0xbc   :  { %1761 = vmatmul.mubr.bf16.gmra.mxu1 %v4262_v16 }
  0xbd   :  { %1768 = vmatprep.mubr.bf16.mxu1 %v2943_v18  ;;  %3557 = vmatpush3.bf16.msra.mxu1 %v3682_v12 }
  0xbe   :  { %3558 = vmatprep.subr.bf16.mxu1 %v3685_v28 }
  0xbf   :  { %1319 = vmatmul.mubr.bf16.gmra.mxu0 %v2900_v17 }
  0xc0   :  { %1326 = vmatprep.mubr.bf16.mxu0 %v2904_v25 }
  0xc1   :  { %3559 = vmatpush3.bf16.msra.mxu1 %v3685_v28 }
  0xc4   :  { %1769 = vmatmul.mubr.bf16.gmra.mxu1 %v2942_v27 }
  0xc5   :  { %1776 = vmatprep.mubr.bf16.mxu1 %v4276_v19 }
  0xc7   :  { %1327 = vmatmul.mubr.bf16.gmra.mxu0 %v2903_v1 }
  0xc8   :  { %3528 = vmatprep.mubr.bf16.mxu0 %v3655_v24 }
  0xcc   :  { %1777 = vmatmul.mubr.bf16.gmra.mxu1 %v4280_v3 }
  0xcd   :  { %1784 = vmatprep.mubr.bf16.mxu1 %v4283_v30 }
  0xcf   :  { %3529 = vmatmul.mubr.bf16.vlgmr.msra.gmra.mxu0 %v3657_v29 }
  0xd0   :  { %3401 = vmatpush3.bf16.msra.mxu0 %v3658_v31  ;;  %3532 = vmatprep.mubr.bf16.mxu0 %v3662_v32 }
  0xd1   :  { %3402 = vmatprep.subr.bf16.mxu0 %v3659_v7 }
  0xd4   :  { %3403 = vmatpush3.bf16.msra.mxu0 %v3660_v20  ;;  %1785 = vmatmul.mubr.bf16.gmra.mxu1 %v4300_v35 }
  0xd5   :  { %3404 = vmatprep.subr.bf16.mxu0 %v3663_v34  ;;  %1792 = vmatprep.mubr.bf16.mxu1 %v4303_v4 }
  0xd7   :  { %3533 = vmatmul.mubr.bf16.gmra.mxu0 %v3664_v36 }
  0xd8   :  { %3405 = vmatpush3.bf16.msra.mxu0 %v3665_v39  ;;  %3536 = vmatprep.mubr.bf16.mxu0 %v3670_v40 }
  0xd9   :  { %3406 = vmatprep.subr.bf16.mxu0 %v3667_v37 }
  0xdc   :  { %3407 = vmatpush3.bf16.msra.mxu0 %v3668_v44  ;;  %1793 = vmatmul.mubr.bf16.gmra.mxu1 %v2951_v46 }
  0xdd   :  { %3408 = vmatprep.subr.bf16.mxu0 %v3671_v38  ;;  %3560 = vmatprep.mubr.bf16.mxu1 %v3689_v60 }
  0xdf   :  { %3537 = vmatmul.mubr.bf16.gmra.mxu0 %v3672_v47 }
  0xe0   :  { %3409 = vmatpush3.bf16.msra.mxu0 %v3673_v13  ;;  %3540 = vmatprep.mubr.bf16.mxu0 %v3678_v42 }
  0xe1   :  { %3410 = vmatprep.subr.bf16.mxu0 %v3675_v33 }
  0xe4   :  { %3411 = vmatpush3.bf16.msra.mxu0 %v3676_v48  ;;  %3561 = vmatmul.mubr.bf16.vlgmr.msra.gmra.mxu1 %v3690_v22 }
  0xe5   :  { %3412 = vmatprep.subr.bf16.mxu0 %v3679_v5  ;;  %3564 = vmatprep.mubr.bf16.mxu1 %v3691_v49 }
  0xe7   :  { %3541 = vmatmul.mubr.bf16.gmra.mxu0 %v3680_v43 }
  0xe8   :  { %3413 = vmatpush3.bf16.msra.mxu0 %v3681_v51  ;;  %2287 = vmatprep.mubr.bf16.mxu0 %v3688_v57 }
  0xe9   :  { %3414 = vmatprep.subr.bf16.mxu0 %v3683_v8 }
  0xec   :  { %3415 = vmatpush3.bf16.msra.mxu0 %v3684_v2  ;;  %3565 = vmatmul.mubr.bf16.gmra.mxu1 %v3692_v53 }
  0xed   :  { %3568 = vmatprep.mubr.bf16.mxu1 %v3693_v62 }
  0xef   :  { %2288 = vmatmul.mubr.bf16.vlgmr.msra.gmra.mxu0 %v3686_v56 }
  0xf0   :  { %2295 = vmatprep.mubr.bf16.mxu0 %v3030_v50 }
  0xf4   :  { %3569 = vmatmul.mubr.bf16.gmra.mxu1 %v3694_v61 }
  0xf5   :  { %3572 = vmatprep.mubr.bf16.mxu1 %v3695_v45 }
  0xf7   :  { %2296 = vmatmul.mubr.bf16.gmra.mxu0 %v3029_v10 }
  0xf8   :  { %2303 = vmatprep.mubr.bf16.mxu0 %v4248_v41 }
  0xfc   :  { %3573 = vmatmul.mubr.bf16.gmra.mxu1 %v3696_v0 }
  0xff   :  { %2304 = vmatmul.mubr.bf16.gmra.mxu0 %v4262_v16 }
 0x100   :  { %2311 = vmatprep.mubr.bf16.mxu0 %v3036_v54 }
 0x107   :  { %2312 = vmatmul.mubr.bf16.gmra.mxu0 %v3035_v63 }
 0x108   :  { %2319 = vmatprep.mubr.bf16.mxu0 %v4276_v19 }
 0x10f   :  { %2320 = vmatmul.mubr.bf16.gmra.mxu0 %v4280_v3 }
 0x110   :  { %2327 = vmatprep.mubr.bf16.mxu0 %v4283_v30 }
 0x117   :  { %2328 = vmatmul.mubr.bf16.gmra.mxu0 %v4300_v35 }
 0x118   :  { %2335 = vmatprep.mubr.bf16.mxu0 %v4303_v4 }
 0x11f   :  { %2336 = vmatmul.mubr.bf16.gmra.mxu0 %v2951_v46 }
 0x120   :  { %2343 = vmatprep.mubr.bf16.mxu0 %v3048_v23 }
 0x127   :  { %2344 = vmatmul.mubr.bf16.gmra.mxu0 %v3047_v52 }
 0x13c   :  { %v3498_v14 = vpop.f32.mrf.mxu1 }
 0x13e   :  { %v1369_v6 = vpop.f32.mrf.mxu1 }
 0x140   :  { %v3499_v58 = vpop.f32.mrf.mxu1 }
 0x142   :  { %v1372_v41 = vpop.f32.mrf.mxu1 }
 0x147   :  { %v3502_v9 = vpop.f32.mrf.mxu1 }
 0x148   :  { %v3256_v59 = vpop.f32.mrf.mxu0 }
 0x149   :  { %v1385_v12 = vpop.f32.mrf.mxu1 }
 0x14a   :  { %v3257_v26 = vpop.f32.mrf.mxu0 }
 0x14b   :  { %v3258_v16 = vadd.f32 %v3257_v26, %v3256_v59  ;;  %v3503_v18 = vpop.f32.mrf.mxu1 }
 0x14c   :  { %v3259_v17 = vpop.f32.mrf.mxu0 }
 0x14d   :  { %v1370_v25 = vadd.f32 %v3258_v16, %v1369_v6  ;;  %v1388_v1 = vpop.f32.mrf.mxu1 }
 0x14e   :  { %v3260_v28 = vpop.f32.mrf.mxu0 }
 0x14f   :  { %v3261_v27 = vadd.f32 %v3260_v28, %v3259_v17 }
 0x151   :  { %v4358_v19 = vadd.f32 %v3261_v27, %v1372_v41 }
 0x152   :  { %v3506_v55 = vpop.f32.mrf.mxu1 }
 0x153   :  { %v3262_v24 = vpop.f32.mrf.mxu0 }
 0x154   :  { %v1401_v3 = vpop.f32.mrf.mxu1 }
 0x155   :  { %v3263_v11 = vpop.f32.mrf.mxu0 }
 0x156   :  { %v3264_v29 = vadd.f32 %v3263_v11, %v3262_v24  ;;  %v3507_v31 = vpop.f32.mrf.mxu1 }
 0x157   :  { %v3265_v30 = vpop.f32.mrf.mxu0 }
 0x158   :  { %v4360_v32 = vadd.f32 %v3498_v14, %v3264_v29  ;;  %v1404_v20 = vpop.f32.mrf.mxu1 }
 0x159   :  { %v3266_v7 = vpop.f32.mrf.mxu0 }
 0x15a   :  { %v3267_v34 = vadd.f32 %v3266_v7, %v3265_v30 }
 0x15c   :  { %v4362_v35 = vadd.f32 %v3499_v58, %v3267_v34  ;;  %v4364_v4 = vpop.f32.mrf.mxu1 }
 0x15d   :  { %v3268_v36 = vpop.f32.mrf.mxu0 }
 0x15e   :  { %v1417_v37 = vpop.f32.mrf.mxu1 }
 0x15f   :  { %v3269_v39 = vpop.f32.mrf.mxu0 }
 0x160   :  { %v3270_v40 = vadd.f32 %v3269_v39, %v3268_v36  ;;  %v4368_v46 = vpop.f32.mrf.mxu1 }
 0x161   :  { %v3271_v44 = vpop.f32.mrf.mxu0 }
 0x162   :  { %v4366_v38 = vadd.f32 %v3270_v40, %v1385_v12  ;;  %v1420_v13 = vpop.f32.mrf.mxu1 }
 0x163   :  { %v3272_v47 = vpop.f32.mrf.mxu0 }
 0x164   :  { %v3273_v60 = vadd.f32 %v3272_v47, %v3271_v44  ;;  %v3336_v33 = vpop.f32.mrf.mxu1 }
 0x166   :  { %v4370_v42 = vadd.f32 %v3273_v60, %v1388_v1  ;;  %v3337_v5 = vpop.f32.mrf.mxu1 }
 0x167   :  { %v3274_v48 = vpop.f32.mrf.mxu0  ;;  %v3338_v43 = vadd.f32 %v3337_v5, %v3336_v33 }
 0x168   :  { %v4372_v51 = vpop.f32.mrf.mxu1 }
 0x169   :  { %v3275_v22 = vpop.f32.mrf.mxu0  ;;  %v4374_v8 = vadd.f32 %v3338_v43, %v1370_v25 }
 0x16a   :  { %v3276_v49 = vadd.f32 %v3275_v22, %v3274_v48  ;;  %v4378_v15 = vpop.f32.mrf.mxu1 }
 0x16b   :  { %v3277_v57 = vpop.f32.mrf.mxu0 }
 0x16c   :  { %v4376_v2 = vadd.f32 %v3502_v9, %v3276_v49  ;;  %v3342_v62 = vpop.f32.mrf.mxu1 }
 0x16d   :  { %v3278_v53 = vpop.f32.mrf.mxu0 }
 0x16e   :  { %v3279_v56 = vadd.f32 %v3278_v53, %v3277_v57  ;;  %v3343_v10 = vpop.f32.mrf.mxu1 }
 0x16f   :  { %v3280_v50 = vpop.f32.mrf.mxu0  ;;  %v3344_v48 = vadd.f32 %v3343_v10, %v3342_v62 }
 0x170   :  { %v4380_v61 = vadd.f32 %v3503_v18, %v3279_v56  ;;  %v3345_v54 = vpop.f32.mrf.mxu1 }
 0x171   :  { %v3281_v45 = vpop.f32.mrf.mxu0  ;;  %v1747_v56 = vadd.f32 %v3344_v48, %v4360_v32 }
 0x172   :  { %v3282_v0 = vadd.f32 %v3281_v45, %v3280_v50  ;;  %v3346_v52 = vpop.f32.mrf.mxu1 }
 0x173   :  { %v3283_v63 = vpop.f32.mrf.mxu0  ;;  %v3347_v57 = vadd.f32 %v3346_v52, %v3345_v54 }
 0x174   :  { %v4382_v23 = vadd.f32 %v3282_v0, %v1401_v3  ;;  %v3348_v58 = vpop.f32.mrf.mxu1 }
 0x175   :  { %v3284_v14 = vpop.f32.mrf.mxu0 }
 0x176   :  { %v3285_v6 = vadd.f32 %v3284_v14, %v3283_v63  ;;  %v3349_v9 = vpop.f32.mrf.mxu1 }
 0x177   :  { %v3286_v41 = vpop.f32.mrf.mxu0  ;;  %v3350_v54 = vadd.f32 %v3349_v9, %v3348_v58 }
 0x178   :  { %v4384_v59 = vadd.f32 %v3285_v6, %v1404_v20  ;;  %v4386_v16 = vpop.f32.mrf.mxu1 }
 0x179   :  { %v3287_v26 = vpop.f32.mrf.mxu0 }
 0x17a   :  { %v3288_v12 = vadd.f32 %v3287_v26, %v3286_v41  ;;  %v4390_v25 = vpop.f32.mrf.mxu1 }
 0x17b   :  { %v3289_v17 = vpop.f32.mrf.mxu0 }
 0x17c   :  { %v4388_v18 = vadd.f32 %v3506_v55, %v3288_v12  ;;  %v3354_v1 = vpop.f32.mrf.mxu1 }
 0x17d   :  { %v3290_v28 = vpop.f32.mrf.mxu0 }
 0x17e   :  { %v3291_v27 = vadd.f32 %v3290_v28, %v3289_v17  ;;  %v3355_v3 = vpop.f32.mrf.mxu1 }
 0x17f   :  { %v3292_v24 = vpop.f32.mrf.mxu0  ;;  %v3356_v63 = vadd.f32 %v3355_v3, %v3354_v1 }
 0x180   :  { %v4392_v11 = vadd.f32 %v3507_v31, %v3291_v27  ;;  %v3357_v7 = vpop.f32.mrf.mxu1 }
 0x181   :  { %v3293_v29 = vpop.f32.mrf.mxu0 }
 0x182   :  { %v3294_v30 = vadd.f32 %v3293_v29, %v3292_v24  ;;  %v3358_v36 = vpop.f32.mrf.mxu1 }
 0x183   :  { %v3295_v20 = vpop.f32.mrf.mxu0  ;;  %v3359_v12 = vadd.f32 %v3358_v36, %v3357_v7 }
 0x184   :  { %v4394_v34 = vadd.f32 %v3294_v30, %v1417_v37  ;;  %v3360_v55 = vpop.f32.mrf.mxu1 }
 0x185   :  { %v3296_v39 = vpop.f32.mrf.mxu0  ;;  %v1766_v58 = vadd.f32 %v3359_v12, %v4380_v61 }
 0x186   :  { %v3297_v40 = vadd.f32 %v3296_v39, %v3295_v20  ;;  %v3361_v60 = vpop.f32.mrf.mxu1 }
 0x187   :  { %v3298_v44 = vpop.f32.mrf.mxu0  ;;  %v3362_v30 = vadd.f32 %v3361_v60, %v3360_v55 }
 0x188   :  { %v4396_v47 = vadd.f32 %v3297_v40, %v1420_v13  ;;  %v4398_v31 = vpop.f32.mrf.mxu1 }
 0x189   :  { %v3299_v33 = vpop.f32.mrf.mxu0 }
 0x18a   :  { %v3300_v5 = vadd.f32 %v3299_v33, %v3298_v44  ;;  %v4401_v49 = vpop.f32.mrf.mxu1  ;;  %v1771_v33 = vadd.f32 %v3362_v30, %v4382_v23 }
 0x18b   :  { %v3301_v22 = vpop.f32.mrf.mxu0 }
 0x18c   :  { %v1426_v43 = vadd.f32 %v4364_v4, %v3300_v5  ;;  %v3366_v50 = vpop.f32.mrf.mxu1  ;;  %v1750_v4 = vadd.f32 %v3347_v57, %v4362_v35 }
 0x18d   :  { %v3302_v37 = vpop.f32.mrf.mxu0 }
 0x18e   :  { %v3303_v53 = vadd.f32 %v3302_v37, %v3301_v22  ;;  %v3367_v62 = vpop.f32.mrf.mxu1 }
 0x18f   :  { %v3530_v45 = vpop.f32.mrf.mxu0  ;;  %v3368_v35 = vadd.f32 %v3367_v62, %v3366_v50 }
 0x190   :  { %v1429_v13 = vadd.f32 %v4368_v46, %v3303_v53  ;;  %v4405_v0 = vadd.f32 %v3530_v45, %v1747_v56  ;;  %v3369_v6 = vpop.f32.mrf.mxu1  ;;  %v1763_v46 = vadd.f32 %v3356_v63, %v4376_v2 }
 0x191   :  { %v1835_v10 = vpop.f32.mrf.mxu0 }
 0x192   :  { %v4408_v14 = vadd.f32 %v1835_v10, %v4374_v8  ;;  %v3370_v32 = vpop.f32.mrf.mxu1  ;;  %v1755_v8 = vadd.f32 %v3350_v54, %v4366_v38  ;;  %v1779_v38 = vadd.f32 %v3368_v35, %v4388_v18 }
 0x193   :  { %v3531_v41 = vpop.f32.mrf.mxu0  ;;  %v3371_v36 = vadd.f32 %v3370_v32, %v3369_v6 }
 0x194   :  { %v4411_v52 = vadd.f32 %v3531_v41, %v1750_v4  ;;  %v3372_v17 = vpop.f32.mrf.mxu1 }
 0x195   :  { %v4413_v26 = vpop.f32.mrf.mxu0  ;;  %v1782_v55 = vadd.f32 %v3371_v36, %v4392_v11 }
 0x196   :  { %v3373_v1 = vpop.f32.mrf.mxu1 }
 0x197   :  { %v3534_v28 = vpop.f32.mrf.mxu0  ;;  %v3374_v57 = vadd.f32 %v3373_v1, %v3372_v17 }
 0x198   :  { %v4416_v27 = vadd.f32 %v3534_v28, %v1763_v46  ;;  %v4422_v9 = vpop.f32.mrf.mxu1  ;;  %v3341_v28 = vadd.f32 %v4378_v15, %v4372_v51 }
 0x199   :  { %v1851_v24 = vpop.f32.mrf.mxu0  ;;  %v1787_v23 = vadd.f32 %v3374_v57, %v4394_v34 }
 0x19a   :  { %v4419_v3 = vadd.f32 %v1851_v24, %v1755_v8  ;;  %v4426_v2 = vpop.f32.mrf.mxu1  ;;  %v1742_v35 = vadd.f32 %v3341_v28, %v4358_v19 }
 0x19b   :  { %v3535_v29 = vpop.f32.mrf.mxu0 }
 0x19c   :  { %v4424_v7 = vadd.f32 %v3535_v29, %v1766_v58  ;;  %v3378_v39 = vpop.f32.mrf.mxu1  ;;  %v4456_v58 = vld [vmem:[%s4583_s4] ss:$0 sm:$0xff] }
 0x19d   :  { %v4428_v20 = vpop.f32.mrf.mxu0 }
 0x19e   :  { %v3379_v61 = vpop.f32.mrf.mxu1 }
 0x19f   :  { %v3538_v40 = vpop.f32.mrf.mxu0  ;;  %v3380_v5 = vadd.f32 %v3379_v61, %v3378_v39 }
 0x1a0   :  { %v4431_v44 = vadd.f32 %v3538_v40, %v1779_v38  ;;  %v3381_v60 = vpop.f32.mrf.mxu1  ;;  %v1839_v38 = vadd.f32 %v4413_v26, %v1742_v35 }
 0x1a1   :  { %v1867_v48 = vpop.f32.mrf.mxu0  ;;  %v1795_v18 = vadd.f32 %v3380_v5, %v1426_v43 }
 0x1a2   :  { %v4434_v22 = vadd.f32 %v1867_v48, %v1771_v33  ;;  %v3382_v56 = vpop.f32.mrf.mxu1 }
 0x1a3   :  { %v3539_v37 = vpop.f32.mrf.mxu0  ;;  %v3383_v45 = vadd.f32 %v3382_v56, %v3381_v60 }
 0x1a4   :  { %v4437_v53 = vadd.f32 %v3539_v37, %v1782_v55  ;;  %v3562_v6 = vpop.f32.mrf.mxu1 }
 0x1a5   :  { %v4439_v50 = vpop.f32.mrf.mxu0  ;;  %v1798_v63 = vadd.f32 %v3383_v45, %v1429_v13 }
 0x1a6   :  { %v2386_v12 = vpop.f32.mrf.mxu1 }
 0x1a7   :  { %v3542_v62 = vpop.f32.mrf.mxu0 }
 0x1a8   :  { %v4441_v10 = vadd.f32 %v3542_v62, %v1795_v18  ;;  %v3563_v17 = vpop.f32.mrf.mxu1 }
 0x1a9   :  { %v1883_v4 = vpop.f32.mrf.mxu0 }
 0x1aa   :  { %v4444_v41 = vadd.f32 %v1883_v4, %v1787_v23  ;;  %v2389_v24 = vpop.f32.mrf.mxu1 }
 0x1ab   :  { %v3543_v11 = vpop.f32.mrf.mxu0 }
 0x1ac   :  { %v4446_v54 = vadd.f32 %v3543_v11, %v1798_v63  ;;  %v3566_v40 = vpop.f32.mrf.mxu1 }
 0x1ad   :  { %v4448_v32 = vpop.f32.mrf.mxu0 }
 0x1ae   :  { %v2402_v37 = vpop.f32.mrf.mxu1 }
 0x1af   :  { %v3416_v43 = vpop.f32.mrf.mxu0 }
 0x1b0   :  { %v3567_v11 = vpop.f32.mrf.mxu1 }
 0x1b1   :  { %v3417_v46 = vpop.f32.mrf.mxu0 }
 0x1b2   :  { %v3418_v8 = vadd.f32 %v3417_v46, %v3416_v43 }
 0x1b3   :  { %v3419_v1 = vpop.f32.mrf.mxu0 }
 0x1b4   :  { %v2387_v34 = vadd.f32 %v3418_v8, %v2386_v12 }
 0x1b5   :  { %v3420_v13 = vpop.f32.mrf.mxu0 }
 0x1b6   :  { %v2449_v29 = vadd.f32 %v2387_v34, %v4408_v14  ;;  %v3421_v30 = vadd.f32 %v3420_v13, %v3419_v1 }
 0x1b7   :  { %v3422_v36 = vpop.f32.mrf.mxu0 }
 0x1b8   :  { %v2390_v39 = vadd.f32 %v3421_v30, %v2389_v24  ;;  %v2471_v51 = vadd.f32 %v4456_v58, %v2449_v29  ;;  %v2405_v24 = vpop.f32.mrf.mxu1 }
 0x1b9   :  { %v3423_v15 = vpop.f32.mrf.mxu0 }
 0x1ba   :  { %v2450_v33 = vadd.f32 %v2390_v39, %v1839_v38  ;;  %v3424_v61 = vadd.f32 %v3423_v15, %v3422_v36  ;;  %v2541_v55 = vmul.f32 %v2471_v51, %v2471_v51 }
 0x1bb   :  { %v3425_v48 = vpop.f32.mrf.mxu0 }
 0x1bc   :  { %v2472_v19 = vadd.f32 %v4456_v58, %v2450_v33  ;;  %v2395_v5 = vadd.f32 %v3562_v6, %v3424_v61  ;;  %v3353_v6 = vadd.f32 %v4390_v25, %v4386_v16  ;;  %v3570_v33 = vpop.f32.mrf.mxu1 }
 0x1bd   :  { %v3426_v60 = vpop.f32.mrf.mxu0 }
 0x1be   :  { %v4462_v57 = vpack.c.bf16 %v2472_v19, %v2471_v51  ;;  %v2519_v14 = vadd.f32 %v2472_v19, %v2471_v51  ;;  %v2542_v56 = vmul.f32 %v2472_v19, %v2472_v19  ;;  %v2451_v26 = vadd.f32 %v2395_v5, %v4405_v0 }
 0x1bf   :  { %v3427_v18 = vadd.f32 %v3426_v60, %v3425_v48  ;;  %v3428_v45 = vpop.f32.mrf.mxu0  ;;  %v1758_v35 = vadd.f32 %v3353_v6, %v4370_v42 }
 0x1c0   :  { %v2557_v62 = vadd.f32 %v2542_v56, %v2541_v55  ;;  %v2473_v23 = vadd.f32 %v4456_v58, %v2451_v26 }
 0x1c1   :  { %v2398_v63 = vadd.f32 %v3563_v17, %v3427_v18  ;;  %v3429_v4 = vpop.f32.mrf.mxu0  ;;  %v1855_v38 = vadd.f32 %v4428_v20, %v1758_v35 }
 0x1c2   :  { %v2520_v12 = vadd.f32 %v2519_v14, %v2473_v23  ;;  %v2543_v43 = vmul.f32 %v2473_v23, %v2473_v23  ;;  %v3430_v46 = vadd.f32 %v3429_v4, %v3428_v45  ;;  %v2418_v14 = vpop.f32.mrf.mxu1 }
 0x1c3   :  { %v2452_v28 = vadd.f32 %v2398_v63, %v4411_v52  ;;  %v3431_v8 = vpop.f32.mrf.mxu0 }
 0x1c4   :  { %v2558_v1 = vadd.f32 %v2557_v62, %v2543_v43  ;;  %v2403_v34 = vadd.f32 %v3430_v46, %v2402_v37  ;;  %v3365_v43 = vadd.f32 %v4401_v49, %v4398_v31 }
 0x1c5   :  { %v2474_v0 = vadd.f32 %v4456_v58, %v2452_v28  ;;  %v3432_v13 = vpop.f32.mrf.mxu0 }
 0x1c6   :  { %v2453_v17 = vadd.f32 %v2403_v34, %v4419_v3  ;;  %v3433_v29 = vadd.f32 %v3432_v13, %v3431_v8  ;;  %v1774_v35 = vadd.f32 %v3365_v43, %v4384_v59 }
 0x1c7   :  { %v4472_v30 = vpack.c.bf16 %v2474_v0, %v2473_v23  ;;  %v2544_v16 = vmul.f32 %v2474_v0, %v2474_v0  ;;  %v2521_v25 = vadd.f32 %v2520_v12, %v2474_v0  ;;  %v3434_v36 = vpop.f32.mrf.mxu0  ;;  %v3571_v12 = vpop.f32.mrf.mxu1 }
 0x1c8   :  { %v2475_v52 = vadd.f32 %v4456_v58, %v2453_v17  ;;  %v2406_v39 = vadd.f32 %v3433_v29, %v2405_v24 }
 0x1c9   :  { %v2559_v51 = vadd.f32 %v2558_v1, %v2544_v16  ;;  %v3435_v15 = vpop.f32.mrf.mxu0  ;;  %v2421_v24 = vpop.f32.mrf.mxu1 }
 0x1ca   :  { %v2522_v61 = vadd.f32 %v2521_v25, %v2475_v52  ;;  %v2545_v48 = vmul.f32 %v2475_v52, %v2475_v52  ;;  %v2454_v19 = vadd.f32 %v2406_v39, %v1855_v38  ;;  %v3436_v42 = vadd.f32 %v3435_v15, %v3434_v36 }
 0x1cb   :  { %v3437_v5 = vpop.f32.mrf.mxu0  ;;  %v1871_v25 = vadd.f32 %v4439_v50, %v1774_v35 }
 0x1cc   :  { %v2560_v3 = vadd.f32 %v2559_v51, %v2545_v48  ;;  %v2476_v55 = vadd.f32 %v4456_v58, %v2454_v19  ;;  %v2411_v60 = vadd.f32 %v3566_v40, %v3436_v42  ;;  %v3574_v48 = vpop.f32.mrf.mxu1 }
 0x1cd   :  { %v3438_v37 = vpop.f32.mrf.mxu0 }
 0x1ce   :  { %v4477_v56 = vpack.c.bf16 %v2476_v55, %v2475_v52  ;;  %v2523_v20 = vadd.f32 %v2522_v61, %v2476_v55  ;;  %v2546_v26 = vmul.f32 %v2476_v55, %v2476_v55  ;;  %v2455_v18 = vadd.f32 %v2411_v60, %v4416_v27 }
 0x1cf   :  { %v3439_v45 = vadd.f32 %v3438_v37, %v3437_v5  ;;  %v3440_v62 = vpop.f32.mrf.mxu0 }
 0x1d0   :  { %v2561_v23 = vadd.f32 %v2560_v3, %v2546_v26  ;;  %v2477_v63 = vadd.f32 %v4456_v58, %v2455_v18 }
 0x1d1   :  { %v2414_v4 = vadd.f32 %v3567_v11, %v3439_v45  ;;  %v3441_v6 = vpop.f32.mrf.mxu0 }
 0x1d2   :  { %v2524_v40 = vadd.f32 %v2523_v20, %v2477_v63  ;;  %v2547_v46 = vmul.f32 %v2477_v63, %v2477_v63  ;;  %v3442_v28 = vadd.f32 %v3441_v6, %v3440_v62  ;;  %v2434_v20 = vpop.f32.mrf.mxu1 }
 0x1d3   :  { %v2456_v8 = vadd.f32 %v2414_v4, %v4424_v7  ;;  %v3443_v1 = vpop.f32.mrf.mxu0 }
 0x1d4   :  { %v2562_v34 = vadd.f32 %v2561_v23, %v2547_v46  ;;  %v2419_v0 = vadd.f32 %v3442_v28, %v2418_v14  ;;  %v3377_v23 = vadd.f32 %v4426_v2, %v4422_v9 }
 0x1d5   :  { %v2478_v27 = vadd.f32 %v4456_v58, %v2456_v8  ;;  %v3444_v13 = vpop.f32.mrf.mxu0 }
 0x1d6   :  { %v2457_v11 = vadd.f32 %v2419_v0, %v4434_v22  ;;  %v3445_v17 = vadd.f32 %v3444_v13, %v3443_v1  ;;  %v1790_v1 = vadd.f32 %v3377_v23, %v4396_v47 }
 0x1d7   :  { %v4487_v29 = vpack.c.bf16 %v2478_v27, %v2477_v63  ;;  %v2548_v31 = vmul.f32 %v2478_v27, %v2478_v27  ;;  %v2525_v49 = vadd.f32 %v2524_v40, %v2478_v27  ;;  %v3446_v16 = vpop.f32.mrf.mxu0  ;;  %v3575_v40 = vpop.f32.mrf.mxu1 }
 0x1d8   :  { %v2479_v7 = vadd.f32 %v4456_v58, %v2457_v11  ;;  %v2422_v36 = vadd.f32 %v3445_v17, %v2421_v24 }
 0x1d9   :  { %v2563_v38 = vadd.f32 %v2562_v34, %v2548_v31  ;;  %v3447_v52 = vpop.f32.mrf.mxu0  ;;  %v2437_v27 = vpop.f32.mrf.mxu1 }
 0x1da   :  { %v2526_v39 = vadd.f32 %v2525_v49, %v2479_v7  ;;  %v2549_v51 = vmul.f32 %v2479_v7, %v2479_v7  ;;  %v2458_v15 = vadd.f32 %v2422_v36, %v1871_v25  ;;  %v3448_v61 = vadd.f32 %v3447_v52, %v3446_v16 }
 0x1db   :  { %v3449_v59 = vpop.f32.mrf.mxu0 }
 0x1dc   :  { %v2564_v22 = vadd.f32 %v2563_v38, %v2549_v51  ;;  %v2480_v19 = vadd.f32 %v4456_v58, %v2458_v15  ;;  %v2427_v42 = vadd.f32 %v3570_v33, %v3448_v61 }
 0x1dd   :  { %v3450_v5 = vpop.f32.mrf.mxu0 }
 0x1de   :  { %v4492_v3 = vpack.c.bf16 %v2480_v19, %v2479_v7  ;;  %v2527_v55 = vadd.f32 %v2526_v39, %v2480_v19  ;;  %v2550_v50 = vmul.f32 %v2480_v19, %v2480_v19  ;;  %v2459_v60 = vadd.f32 %v2427_v42, %v4431_v44 }
 0x1df   :  { %v3451_v37 = vadd.f32 %v3450_v5, %v3449_v59  ;;  %v3452_v14 = vpop.f32.mrf.mxu0 }
 0x1e0   :  { %v2565_v26 = vadd.f32 %v2564_v22, %v2550_v50  ;;  %v2481_v18 = vadd.f32 %v4456_v58, %v2459_v60 }
 0x1e1   :  { %v2430_v45 = vadd.f32 %v3571_v12, %v3451_v37  ;;  %v3453_v62 = vpop.f32.mrf.mxu0 }
 0x1e2   :  { %v2528_v63 = vadd.f32 %v2527_v55, %v2481_v18  ;;  %v2551_v33 = vmul.f32 %v2481_v18, %v2481_v18  ;;  %v3454_v4 = vadd.f32 %v3453_v62, %v3452_v14 }
 0x1e3   :  { %v2460_v6 = vadd.f32 %v2430_v45, %v4437_v53  ;;  %v3455_v43 = vpop.f32.mrf.mxu0  ;;  %v1887_v53 = vadd.f32 %v4448_v32, %v1790_v1 }
 0x1e4   :  { %v2566_v46 = vadd.f32 %v2565_v26, %v2551_v33  ;;  %v2435_v44 = vadd.f32 %v3454_v4, %v2434_v20 }
 0x1e5   :  { %v2482_v28 = vadd.f32 %v4456_v58, %v2460_v6  ;;  %v3456_v8 = vpop.f32.mrf.mxu0 }
 0x1e6   :  { %v2461_v12 = vadd.f32 %v2435_v44, %v4444_v41  ;;  %v3457_v34 = vadd.f32 %v3456_v8, %v3455_v43  ;;  %v2587_v8 = vld [vmem:[%s4584_s5] sm:$0x1] }
 0x1e7   :  { %v4502_v0 = vpack.c.bf16 %v2482_v28, %v2481_v18  ;;  %v2552_v9 = vmul.f32 %v2482_v28, %v2482_v28  ;;  %v2529_v2 = vadd.f32 %v2528_v63, %v2482_v28  ;;  %v3458_v13 = vpop.f32.mrf.mxu0 }
 0x1e8   :  { %v2483_v24 = vadd.f32 %v4456_v58, %v2461_v12  ;;  %v2438_v35 = vadd.f32 %v3457_v34, %v2437_v27  ;;  %v3149_v12 = vunpack.c.l.bf16 %v4462_v57  ;;  %v3150_v34 = vunpack.c.h.bf16 %v4462_v57  ;;  %v2589_v57 = vld [vmem:[%s4585_s6] sm:$0x1] }
 0x1e9   :  { %v2567_v11 = vadd.f32 %v2566_v46, %v2552_v9  ;;  %v3459_v17 = vpop.f32.mrf.mxu0  ;;  %v3153_v9 = vunpack.c.l.bf16 %v4472_v30  ;;  %v3157_v27 = vunpack.c.l.bf16 %v4477_v56 }
 0x1ea   :  { %v2530_v31 = vadd.f32 %v2529_v2, %v2483_v24  ;;  %v2553_v49 = vmul.f32 %v2483_v24, %v2483_v24  ;;  %v2462_v16 = vadd.f32 %v2438_v35, %v1887_v53  ;;  %v3460_v47 = vadd.f32 %v3459_v17, %v3458_v13 }
 0x1eb   :  { %v3461_v25 = vpop.f32.mrf.mxu0  ;;  %v3154_v2 = vunpack.c.h.bf16 %v4472_v30  ;;  %v3158_v13 = vunpack.c.h.bf16 %v4477_v56  ;;  %v3162_v35 = vunpack.c.h.bf16 %v4487_v29  ;;  %v3166_v17 = vunpack.c.h.bf16 %v4492_v3 }
 0x1ec   :  { %v2568_v41 = vadd.f32 %v2567_v11, %v2553_v49  ;;  %v2484_v7 = vadd.f32 %v4456_v58, %v2462_v16  ;;  %v2443_v36 = vadd.f32 %v3574_v48, %v3460_v47  ;;  %v3165_v11 = vunpack.c.l.bf16 %v4492_v3 }
 0x1ed   :  { %v3462_v38 = vpop.f32.mrf.mxu0  ;;  %v3170_v30 = vunpack.c.h.bf16 %v4502_v0 }
 0x1ee   :  { %v4507_v52 = vpack.c.bf16 %v2484_v7, %v2483_v24  ;;  %v2531_v39 = vadd.f32 %v2530_v31, %v2484_v7  ;;  %v2554_v51 = vmul.f32 %v2484_v7, %v2484_v7  ;;  %v2463_v32 = vadd.f32 %v2443_v36, %v4441_v10 }
 0x1ef   :  { %v3463_v15 = vadd.f32 %v3462_v38, %v3461_v25  ;;  %v3161_v24 = vunpack.c.l.bf16 %v4487_v29  ;;  %v3169_v31 = vunpack.c.l.bf16 %v4502_v0 }
 0x1f0   :  { %v2569_v61 = vadd.f32 %v2568_v41, %v2554_v51  ;;  %v2485_v59 = vadd.f32 %v4456_v58, %v2463_v32  ;;  %v3173_v16 = vunpack.c.l.bf16 %v4507_v52  ;;  %v3174_v47 = vunpack.c.h.bf16 %v4507_v52 }
 0x1f1   :  { %v2446_v22 = vadd.f32 %v3575_v40, %v3463_v15 }
 0x1f2   :  { %v2532_v19 = vadd.f32 %v2531_v39, %v2485_v59  ;;  %v2555_v42 = vmul.f32 %v2485_v59, %v2485_v59 }
 0x1f3   :  { %v2464_v5 = vadd.f32 %v2446_v22, %v4446_v54 }
 0x1f4   :  { %v2570_v55 = vadd.f32 %v2569_v61, %v2555_v42 }
 0x1f5   :  { %v2486_v50 = vadd.f32 %v4456_v58, %v2464_v5 }
 0x1f7   :  { %v4513_v48 = vpack.c.bf16 %v2486_v50, %v2485_v59  ;;  %v2533_v60 = vadd.f32 %v2532_v19, %v2486_v50  ;;  %v2556_v37 = vmul.f32 %v2486_v50, %v2486_v50 }
 0x1f9   :  { %v2534_v14 = vrot.slane %v2533_v60, 4  ;;  %v2571_v20 = vadd.f32 %v2570_v55, %v2556_v37  ;;  %v3177_v29 = vunpack.c.l.bf16 %v4513_v48  ;;  %v3178_v25 = vunpack.c.h.bf16 %v4513_v48 }
 0x1fb   :  { %v2535_v26 = vadd.f32 %v2534_v14, %v2533_v60  ;;  %v2572_v10 = vrot.slane %v2571_v20, 4 }
 0x1fd   :  { %v2536_v18 = vrot.slane %v2535_v26, 2  ;;  %v2573_v45 = vadd.f32 %v2572_v10, %v2571_v20 }
 0x1ff   :  { %v2537_v62 = vadd.f32 %v2536_v18, %v2535_v26  ;;  %v2574_v23 = vrot.slane %v2573_v45, 2 }
 0x201   :  { %v2538_v63 = vrot.slane %v2537_v62, 1  ;;  %v2575_v33 = vadd.f32 %v2574_v23, %v2573_v45 }
 0x203   :  { %v2539_v4 = vadd.f32 %v2538_v63, %v2537_v62  ;;  %v2576_v6 = vrot.slane %v2575_v33, 1 }
 0x205   :  { %v2577_v54 = vadd.f32 %v2576_v6, %v2575_v33  ;;  %v2580_v43 = vmul.f32 0.0078125, %v2539_v4 }
 0x207   :  { %v2581_v40 = vmul.f32 0.0078125, %v2577_v54  ;;  %v2582_v58 = vmul.f32 %v2580_v43, %v2580_v43 }
 0x209   :  { %v2583_v46 = vsub.f32 %v2581_v40, %v2582_v58 }
 0x20b   :  { %v2584_v44 = vmax.f32 %v2583_v46, 0.0 }
 0x20d   :  { %v2585_v28 = vadd.f32 0.8, %v2584_v44 }
 0x20f   :  { %3699 = vrsqrt.f32 %v2585_v28 }
 0x21c   :  { %v3700_v1 = vpop.eup %3699 }
 0x21d   :  { %v2588_v53 = vmul.f32 %v3700_v1, %v2587_v8 }
 0x21f   :  { %v2590_v49 = vmul.f32 %v2588_v53, %v2580_v43  ;;  %v2627_v56 = vrot.slane %v2588_v53, %v3852_v21 }
 0x221   :  { %v2591_v3 = vsub.f32 %v2589_v57, %v2590_v49  ;;  %v2628_v41 = vmul.f32 %v3149_v12, %v2627_v56  ;;  %v2629_v7 = vmul.f32 %v3150_v34, %v2627_v56  ;;  %v2630_v36 = vmul.f32 %v3153_v9, %v2627_v56 }
 0x222   :  { %v2631_v38 = vmul.f32 %v3154_v2, %v2627_v56  ;;  %v2632_v39 = vmul.f32 %v3157_v27, %v2627_v56  ;;  %v2633_v51 = vmul.f32 %v3158_v13, %v2627_v56  ;;  %v2634_v32 = vmul.f32 %v3161_v24, %v2627_v56 }
 0x223   :  { %v2635_v0 = vmul.f32 %v3162_v35, %v2627_v56  ;;  %v2636_v15 = vmul.f32 %v3165_v11, %v2627_v56  ;;  %v2637_v61 = vmul.f32 %v3166_v17, %v2627_v56  ;;  %v2638_v59 = vmul.f32 %v3169_v31, %v2627_v56 }
 0x224   :  { %v2639_v22 = vmul.f32 %v3170_v30, %v2627_v56  ;;  %v2640_v19 = vmul.f32 %v3173_v16, %v2627_v56  ;;  %v2641_v42 = vmul.f32 %v3174_v47, %v2627_v56  ;;  %v2642_v52 = vmul.f32 %v3177_v29, %v2627_v56 }
 0x225   :  { %v2643_v5 = vmul.f32 %v3178_v25, %v2627_v56  ;;  %v2648_v55 = vrot.slane %v2591_v3, %v3852_v21 }
 0x227   :  { %v2650_v50 = vadd.f32 %v2648_v55, %v2628_v41  ;;  %v2651_v48 = vadd.f32 %v2648_v55, %v2629_v7  ;;  %v2652_v60 = vadd.f32 %v2648_v55, %v2630_v36  ;;  %v2653_v37 = vadd.f32 %v2648_v55, %v2631_v38 }
 0x228   :  { %v2654_v14 = vadd.f32 %v2648_v55, %v2632_v39  ;;  %v2655_v20 = vadd.f32 %v2648_v55, %v2633_v51  ;;  %v2656_v26 = vadd.f32 %v2648_v55, %v2634_v32  ;;  %v2657_v10 = vadd.f32 %v2648_v55, %v2635_v0 }
 0x229   :  { %v2658_v18 = vadd.f32 %v2648_v55, %v2636_v15  ;;  %v2659_v45 = vadd.f32 %v2648_v55, %v2637_v61  ;;  %v2660_v62 = vadd.f32 %v2648_v55, %v2638_v59  ;;  %v2661_v23 = vadd.f32 %v2648_v55, %v2639_v22 }
 0x22a   :  { %v2662_v63 = vadd.f32 %v2648_v55, %v2640_v19  ;;  %v2663_v33 = vadd.f32 %v2648_v55, %v2641_v42  ;;  %v2664_v4 = vadd.f32 %v2648_v55, %v2642_v52  ;;  %v2665_v6 = vadd.f32 %v2648_v55, %v2643_v5 }
 0x22b   :  { %vm2666_vm6 = vcmp.ge.f32.partialorder %v2650_v50, 0.0  ;;  %vm2667_vm7 = vcmp.ge.f32.partialorder %v2651_v48, 0.0  ;;  %vm2668_vm8 = vcmp.ge.f32.partialorder %v2652_v60, 0.0  ;;  %vm2669_vm9 = vcmp.ge.f32.partialorder %v2653_v37, 0.0 }
 0x22c   :  { %vm2670_vm10 = vcmp.ge.f32.partialorder %v2654_v14, 0.0  ;;  %vm2671_vm11 = vcmp.ge.f32.partialorder %v2655_v20, 0.0  ;;  %vm2672_vm12 = vcmp.ge.f32.partialorder %v2656_v26, 0.0  ;;  %vm2673_vm13 = vcmp.ge.f32.partialorder %v2657_v10, 0.0 }
 0x22d   :  { %vm2674_vm14 = vcmp.ge.f32.partialorder %v2658_v18, 0.0  ;;  %vm2675_vm15 = vcmp.ge.f32.partialorder %v2659_v45, 0.0  ;;  %vm2676_vm0 = vcmp.ge.f32.partialorder %v2660_v62, 0.0  ;;  %vm2677_vm1 = vcmp.ge.f32.partialorder %v2661_v23, 0.0 }
 0x22e   :  { %vm2678_vm2 = vcmp.ge.f32.partialorder %v2662_v63, 0.0  ;;  %vm2679_vm3 = vcmp.ge.f32.partialorder %v2663_v33, 0.0  ;;  %vm2680_vm4 = vcmp.ge.f32.partialorder %v2664_v4, 0.0  ;;  %vm2681_vm5 = vcmp.ge.f32.partialorder %v2665_v6, 0.0 }
 0x22f   :  { %v2682_v21 = vmul.f32 0.2, %v2650_v50  ;;  %v2683_v54 = vmul.f32 0.2, %v2651_v48  ;;  %v2684_v43 = vmul.f32 0.2, %v2652_v60 }
 0x230   :  { %v2685_v40 = vmul.f32 0.2, %v2653_v37  ;;  %v2686_v58 = vmul.f32 0.2, %v2654_v14  ;;  %v2687_v46 = vmul.f32 0.2, %v2655_v20 }
 0x231   :  { %v2688_v44 = vmul.f32 0.2, %v2656_v26  ;;  %v2689_v28 = vmul.f32 0.2, %v2657_v10  ;;  %v2690_v8 = vmul.f32 0.2, %v2658_v18  ;;  %v2698_v1 = vsel %vm2666_vm6, %v2650_v50, %v2682_v21 }
 0x232   :  { %v2691_v12 = vmul.f32 0.2, %v2659_v45  ;;  %v2692_v34 = vmul.f32 0.2, %v2660_v62  ;;  %v2693_v9 = vmul.f32 0.2, %v2661_v23  ;;  %v2699_v2 = vsel %vm2667_vm7, %v2651_v48, %v2683_v54 }
 0x233   :  { %v2694_v27 = vmul.f32 0.2, %v2662_v63  ;;  %v2695_v13 = vmul.f32 0.2, %v2663_v33  ;;  %v2696_v53 = vmul.f32 0.2, %v2664_v4  ;;  %v2700_v24 = vsel %vm2668_vm8, %v2652_v60, %v2684_v43 }
 0x234   :  { %v2697_v35 = vmul.f32 0.2, %v2665_v6  ;;  %v2701_v11 = vsel %vm2669_vm9, %v2653_v37, %v2685_v40  ;;  %v2702_v17 = vsel %vm2670_vm10, %v2654_v14, %v2686_v58  ;;  %v2703_v57 = vsel %vm2671_vm11, %v2655_v20, %v2687_v46 }
 0x235   :  { %v2704_v31 = vsel %vm2672_vm12, %v2656_v26, %v2688_v44  ;;  %v2705_v30 = vsel %vm2673_vm13, %v2657_v10, %v2689_v28  ;;  %v2706_v49 = vsel %vm2674_vm14, %v2658_v18, %v2690_v8  ;;  %v2707_v56 = vsel %vm2675_vm15, %v2659_v45, %v2691_v12 }
 0x236   :  { %v2708_v16 = vsel %vm2676_vm0, %v2660_v62, %v2692_v34  ;;  %v2709_v47 = vsel %vm2677_vm1, %v2661_v23, %v2693_v9  ;;  %v2710_v29 = vsel %vm2678_vm2, %v2662_v63, %v2694_v27  ;;  %v2711_v25 = vsel %vm2679_vm3, %v2663_v33, %v2695_v13 }
 0x237   :  { %v2712_v3 = vsel %vm2680_vm4, %v2664_v4, %v2696_v53  ;;  %v2713_v41 = vsel %vm2681_vm5, %v2665_v6, %v2697_v35  ;;  %v3182_v7 = vpack.c.bf16 %v2699_v2, %v2698_v1  ;;  %v3187_v36 = vpack.c.bf16 %v2701_v11, %v2700_v24 }
 0x238   :  { %v3192_v38 = vpack.c.bf16 %v2703_v57, %v2702_v17  ;;  %v3197_v39 = vpack.c.bf16 %v2705_v30, %v2704_v31  ;;  %v3202_v51 = vpack.c.bf16 %v2707_v56, %v2706_v49  ;;  %v3207_v32 = vpack.c.bf16 %v2709_v47, %v2708_v16 }
 0x239   :  { %3183 = vst [vmem:[%s4586_s7] sm:$0xff] %v3182_v7   ;;  %3233 = vst [vmem:[%s4586_s7 + $0x8] sm:$0xff] %v3187_v36   ;;  %v3212_v0 = vpack.c.bf16 %v2711_v25, %v2710_v29  ;;  %v3217_v15 = vpack.c.bf16 %v2713_v41, %v2712_v3 }
 0x23a   :  { %3234 = vst [vmem:[%s4586_s7 + $0x10] sm:$0xff] %v3192_v38   ;;  %3235 = vst [vmem:[%s4586_s7 + $0x18] sm:$0xff] %v3197_v39  }
 0x23b   :  { %3236 = vst [vmem:[%s4586_s7 + $0x20] sm:$0xff] %v3202_v51   ;;  %3237 = vst [vmem:[%s4586_s7 + $0x28] sm:$0xff] %v3207_v32  }
 0x23c   :  { %3238 = vst [vmem:[%s4586_s7 + $0x30] sm:$0xff] %v3212_v0   ;;  %3239 = vst [vmem:[%s4586_s7 + $0x38] sm:$0xff] %v3217_v15  }

// kernel: generator_forward.5
= control target key start
LH: loop header
LB: loop body
LE: loop exit
PB: predicated region body
PF: predicated region fallthrough
CT: control target
= control target key end

     0   :  { %v6800_v0 = vmov 0.0   ;;  %v9264_v1 = vmov 0   ;;  %s6944_s24 = smov 0   ;;  %s9256_s0 = inlined_call_operand.vmem [shape: bf16[2,8,8,128], index: 0, kind: input, shape index: {}]   ;;  %s9257_s1 = inlined_call_operand.vmem [shape: bf16[3,384,64], index: 1, kind: input, shape index: {}]   ;;  %s9258_s2 = inlined_call_operand.vmem [shape: f32[1,64], index: 2, kind: input, shape index: {}]   ;;  %s9259_s3 = inlined_call_operand.vmem [shape: f32[1,64], index: 3, kind: input, shape index: {}]   ;;  %s9260_s4 = inlined_call_operand.vmem [shape: f32[1,64], index: 4, kind: input, shape index: {}]   ;;  %s9261_s5 = inlined_call_operand.vmem [shape: bf16[3,192,128], index: 5, kind: input, shape index: {}]   ;;  %s9262_s6 = inlined_call_operand.vmem [shape: f32[1,128], index: 6, kind: input, shape index: {}]   ;;  %s9263_s7 = inlined_call_operand.vmem [shape: f32[2,3,256], index: 7, kind: output, shape index: {}]  }
   0x1   :  { %27 = vst [vmem:[#allocation2] sm:$0x1] %v6800_v0  ;;  %28 = vst [vmem:[#allocation2 + $0x18] sm:$0x1] %v6800_v0 }
   0x2   :  { %29 = vst [vmem:[#allocation2 + $0x30] sm:$0x1] %v6800_v0  ;;  %30 = vst [vmem:[#allocation2 + $0x48] sm:$0x1] %v6800_v0 }
   0x3   :  { %31 = vst [vmem:[#allocation2 + $0x60] sm:$0x1] %v6800_v0  ;;  %32 = vst [vmem:[#allocation2 + $0x78] sm:$0x1] %v6800_v0 }
   0x4   :  { %33 = vst [vmem:[#allocation2 + $0x90] sm:$0x1] %v6800_v0  ;;  %34 = vst [vmem:[#allocation2 + $0xa8] sm:$0x1] %v6800_v0 }
   0x5   :  { %35 = vst [vmem:[#allocation2 + $0xc0] sm:$0x1] %v6800_v0  ;;  %36 = vst [vmem:[#allocation2 + $0xd8] sm:$0x1] %v6800_v0 }
   0x6   :  { %37 = vst [vmem:[#allocation2 + $0xf0] sm:$0x1] %v6800_v0  ;;  %38 = vst [vmem:[#allocation2 + $0x108] sm:$0x1] %v6800_v0 }
   0x7   :  { %39 = vst [vmem:[#allocation2 + $0x120] sm:$0x1] %v6800_v0  ;;  %40 = vst [vmem:[#allocation2 + $0x138] sm:$0x1] %v6800_v0 }
   0x8   :  { %41 = vst [vmem:[#allocation2 + $0x150] sm:$0x1] %v6800_v0  ;;  %42 = vst [vmem:[#allocation2 + $0x168] sm:$0x1] %v6800_v0 }
   0x9   :  { %43 = vst [vmem:[#allocation2 + $0x180] sm:$0x1] %v6800_v0  ;;  %44 = vst [vmem:[#allocation2 + $0x198] sm:$0x1] %v6800_v0 }
   0xa   :  { %45 = vst [vmem:[#allocation2 + $0x1b0] sm:$0x1] %v6800_v0  ;;  %46 = vst [vmem:[#allocation2 + $0x1c8] sm:$0x1] %v6800_v0 }
   0xb   :  { %47 = vst [vmem:[#allocation2 + $0x1e0] sm:$0x1] %v6800_v0  ;;  %48 = vst [vmem:[#allocation2 + $0x1f8] sm:$0x1] %v6800_v0 }
   0xc   :  { %49 = vst [vmem:[#allocation2 + $0x210] sm:$0x1] %v6800_v0  ;;  %50 = vst [vmem:[#allocation2 + $0x228] sm:$0x1] %v6800_v0 }
   0xd   :  { %51 = vst [vmem:[#allocation2 + $0x240] sm:$0x1] %v6800_v0  ;;  %52 = vst [vmem:[#allocation2 + $0x258] sm:$0x1] %v6800_v0 }
   0xe   :  { %53 = vst [vmem:[#allocation2 + $0x270] sm:$0x1] %v6800_v0  ;;  %54 = vst [vmem:[#allocation2 + $0x288] sm:$0x1] %v6800_v0 }
   0xf   :  { %55 = vst [vmem:[#allocation2 + $0x2a0] sm:$0x1] %v6800_v0  ;;  %56 = vst [vmem:[#allocation2 + $0x2b8] sm:$0x1] %v6800_v0 }
  0x10   :  { %57 = vst [vmem:[#allocation2 + $0x2d0] sm:$0x1] %v6800_v0  ;;  %58 = vst [vmem:[#allocation2 + $0x2e8] sm:$0x1] %v6800_v0 }
  0x11   :  { %59 = vst [vmem:[#allocation2 + $0x300] sm:$0x1] %v6800_v0  ;;  %60 = vst [vmem:[#allocation2 + $0x318] sm:$0x1] %v6800_v0 }
  0x12   :  { %61 = vst [vmem:[#allocation2 + $0x330] sm:$0x1] %v6800_v0  ;;  %62 = vst [vmem:[#allocation2 + $0x348] sm:$0x1] %v6800_v0 }
  0x13   :  { %63 = vst [vmem:[#allocation2 + $0x11] sm:$0x1] %v6800_v0  ;;  %64 = vst [vmem:[#allocation2 + $0x29] sm:$0x1] %v6800_v0 }
  0x14   :  { %65 = vst [vmem:[#allocation2 + $0x41] sm:$0x1] %v6800_v0  ;;  %66 = vst [vmem:[#allocation2 + $0x59] sm:$0x1] %v6800_v0 }
  0x15   :  { %67 = vst [vmem:[#allocation2 + $0x71] sm:$0x1] %v6800_v0  ;;  %68 = vst [vmem:[#allocation2 + $0x89] sm:$0x1] %v6800_v0 }
  0x16   :  { %69 = vst [vmem:[#allocation2 + $0xa1] sm:$0x1] %v6800_v0  ;;  %70 = vst [vmem:[#allocation2 + $0xb9] sm:$0x1] %v6800_v0 }
  0x17   :  { %71 = vst [vmem:[#allocation2 + $0xd1] sm:$0x1] %v6800_v0  ;;  %72 = vst [vmem:[#allocation2 + $0xe9] sm:$0x1] %v6800_v0 }
  0x18   :  { %73 = vst [vmem:[#allocation2 + $0x101] sm:$0x1] %v6800_v0  ;;  %74 = vst [vmem:[#allocation2 + $0x119] sm:$0x1] %v6800_v0 }
  0x19   :  { %75 = vst [vmem:[#allocation2 + $0x131] sm:$0x1] %v6800_v0  ;;  %76 = vst [vmem:[#allocation2 + $0x149] sm:$0x1] %v6800_v0 }
  0x1a   :  { %77 = vst [vmem:[#allocation2 + $0x161] sm:$0x1] %v6800_v0  ;;  %78 = vst [vmem:[#allocation2 + $0x179] sm:$0x1] %v6800_v0 }
  0x1b   :  { %79 = vst [vmem:[#allocation2 + $0x191] sm:$0x1] %v6800_v0  ;;  %80 = vst [vmem:[#allocation2 + $0x1a9] sm:$0x1] %v6800_v0 }
  0x1c   :  { %81 = vst [vmem:[#allocation2 + $0x1c1] sm:$0x1] %v6800_v0  ;;  %82 = vst [vmem:[#allocation2 + $0x1d9] sm:$0x1] %v6800_v0 }
  0x1d   :  { %83 = vst [vmem:[#allocation2 + $0x1f1] sm:$0x1] %v6800_v0  ;;  %84 = vst [vmem:[#allocation2 + $0x209] sm:$0x1] %v6800_v0 }
  0x1e   :  { %85 = vst [vmem:[#allocation2 + $0x221] sm:$0x1] %v6800_v0  ;;  %86 = vst [vmem:[#allocation2 + $0x239] sm:$0x1] %v6800_v0 }
  0x1f   :  { %87 = vst [vmem:[#allocation2 + $0x251] sm:$0x1] %v6800_v0  ;;  %88 = vst [vmem:[#allocation2 + $0x269] sm:$0x1] %v6800_v0 }
  0x20   :  { %89 = vst [vmem:[#allocation2 + $0x281] sm:$0x1] %v6800_v0  ;;  %90 = vst [vmem:[#allocation2 + $0x299] sm:$0x1] %v6800_v0 }
  0x21   :  { %91 = vst [vmem:[#allocation2 + $0x2b1] sm:$0x1] %v6800_v0  ;;  %92 = vst [vmem:[#allocation2 + $0x2c9] sm:$0x1] %v6800_v0 }
  0x22   :  { %93 = vst [vmem:[#allocation2 + $0x2e1] sm:$0x1] %v6800_v0  ;;  %94 = vst [vmem:[#allocation2 + $0x2f9] sm:$0x1] %v6800_v0 }
  0x23   :  { %95 = vst [vmem:[#allocation2 + $0x311] sm:$0x1] %v6800_v0  ;;  %96 = vst [vmem:[#allocation2 + $0x329] sm:$0x1] %v6800_v0 }
  0x24   :  { %97 = vst [vmem:[#allocation2 + $0x341] sm:$0x1] %v6800_v0  ;;  %98 = vst [vmem:[#allocation2 + $0x359] sm:$0x1] %v6800_v0 }
  0x25   :  { %100 = vst [vmem:[#allocation2 + $0x8] sm:$0xff] %v6800_v0  ;;  %103 = vst [vmem:[#allocation2 + $0x1b8] sm:$0xff] %v6800_v0 }
  0x26   :  { %107 = vst [vmem:[#allocation2 + $0x1a0] sm:$0xff] %v6800_v0  ;;  %110 = vst [vmem:[#allocation2 + $0x350] sm:$0xff] %v6800_v0 }
  0x27   :  { %112 = vst [vmem:[#allocation3] sm:$0xff] %v9264_v1  ;;  %113 = vst [vmem:[#allocation3 + $0x8] sm:$0xf] %v9264_v1 }
  0x28   :  { %114 = vst [vmem:[#allocation3 + $0xc] sm:$0xff] %v9264_v1  ;;  %115 = vst [vmem:[#allocation3 + $0x14] sm:$0xf] %v9264_v1 }
  0x29   :  { %116 = vst [vmem:[#allocation3 + $0x1b0] sm:$0xff] %v9264_v1  ;;  %117 = vst [vmem:[#allocation3 + $0x1b8] sm:$0xf] %v9264_v1 }
  0x2a   :  { %118 = vst [vmem:[#allocation3 + $0x1bc] sm:$0xff] %v9264_v1  ;;  %119 = vst [vmem:[#allocation3 + $0x1c4] sm:$0xf] %v9264_v1 }
  0x2b   :  { %121 = vst [vmem:[#allocation3 + $0x198] sm:$0xff] %v9264_v1  ;;  %122 = vst [vmem:[#allocation3 + $0x1a0] sm:$0xf] %v9264_v1 }
  0x2c   :  { %123 = vst [vmem:[#allocation3 + $0x1a4] sm:$0xff] %v9264_v1  ;;  %124 = vst [vmem:[#allocation3 + $0x1ac] sm:$0xf] %v9264_v1 }
  0x2d   :  { %125 = vst [vmem:[#allocation3 + $0x348] sm:$0xff] %v9264_v1  ;;  %126 = vst [vmem:[#allocation3 + $0x350] sm:$0xf] %v9264_v1 }
  0x2e   :  { %127 = vst [vmem:[#allocation3 + $0x354] sm:$0xff] %v9264_v1  ;;  %128 = vst [vmem:[#allocation3 + $0x35c] sm:$0xf] %v9264_v1 }
  0x2f   :  { %99 = vst [vmem:[#allocation2] sm:$0xff] %v6800_v0  ;;  %101 = vst [vmem:[#allocation2 + $0x10] sm:$0x3] %v6800_v0 }
  0x30   :  { %102 = vst [vmem:[#allocation2 + $0x1b0] sm:$0xff] %v6800_v0  ;;  %104 = vst [vmem:[#allocation2 + $0x1c0] sm:$0x3] %v6800_v0 }
  0x31   :  { %106 = vst [vmem:[#allocation2 + $0x198] sm:$0xff] %v6800_v0  ;;  %108 = vst [vmem:[#allocation2 + $0x1a8] sm:$0x3] %v6800_v0 }
  0x32   :  { %109 = vst [vmem:[#allocation2 + $0x348] sm:$0xff] %v6800_v0  ;;  %111 = vst [vmem:[#allocation2 + $0x358] sm:$0x3] %v6800_v0 }
  0x33 LB: > { %s5901_s25 = sshll.u32 %s6766_s24, 4  ;;  %s5011_s26 = smul.u32 192, %s6766_s24  ;;  %vm948_vm0 = vcmask 1042432   ;;  %vm949_vm1 = vcmask 1046532   ;;  %vm497_vm3 = vsmask.f32 3328  ;;  %s6766_s24 = sphi %s6944_s24, %s134_s24  }
  0x34   : > { %s137_s29 = scalar_lea.vmem %s9256_s0, %s5901_s25  ;;  %vm6990_vm2 = vmor %vm948_vm0, %vm949_vm1  ;;  %vm498_vm4 = vsmask.f32 7440  ;;  %s134_s24 = sadd.s32 1, %s6766_s24  }
  0x35   : > { %v5995_v2 = vld [vmem:[%s137_s29] sm:$0xff]   ;;  %v6042_v3 = vld [vmem:[%s137_s29 + $0x8] sm:$0xff]   ;;  %s6956_s30 = scalar_lea.vmem [#allocation2], %s5011_s26  ;;  %s7017_s8 = scalar_lea.vmem [#allocation3], %s5011_s26  ;;  %vm7424_vm5 = vmor %vm497_vm3, %vm498_vm4 }
  0x36   : > { %v6043_v4 = vld [vmem:[%s137_s29 + $0x20] sm:$0xff]   ;;  %v5996_v5 = vunpack.c.l.bf16 %v5995_v2  ;;  %v5997_v6 = vunpack.c.h.bf16 %v5995_v2  ;;  %v6000_v7 = vunpack.c.l.bf16 %v6042_v3  ;;  %v6001_v8 = vunpack.c.h.bf16 %v6042_v3  ;;  %v6044_v9 = vld [vmem:[%s137_s29 + $0x28] sm:$0xff]   ;;  %p131_p0 = scmp.ge.s32.totalorder %s134_s24, 2  }
  0x37   : > { %v6004_v10 = vunpack.c.l.bf16 %v6043_v4  ;;  %v6005_v11 = vunpack.c.h.bf16 %v6043_v4  ;;  %v6008_v12 = vunpack.c.l.bf16 %v6044_v9  ;;  %v6009_v13 = vunpack.c.h.bf16 %v6044_v9  ;;  %s7608_s11 = smov (%p131_p0), 0  }
  0x38   : > { %5012 = vst [vmem:[%s6956_s30 + $0x19] ss:$2 sm:$0xff] %v5996_v5  ;;  %5013 = vst [vmem:[%s6956_s30 + $0x31] ss:$2 sm:$0xff] %v5996_v5 }
  0x39   : > { %5028 = vst [vmem:[%s6956_s30 + $0x1a] ss:$2 sm:$0xff] %v5996_v5  ;;  %5029 = vst [vmem:[%s6956_s30 + $0x32] ss:$2 sm:$0xff] %v5996_v5 }
  0x3a   : > { %5014 = vst [vmem:[%s6956_s30 + $0x49] ss:$2 sm:$0xff] %v5997_v6  ;;  %5015 = vst [vmem:[%s6956_s30 + $0x61] ss:$2 sm:$0xff] %v5997_v6 }
  0x3b   : > { %5030 = vst [vmem:[%s6956_s30 + $0x4a] ss:$2 sm:$0xff] %v5997_v6  ;;  %5031 = vst [vmem:[%s6956_s30 + $0x62] ss:$2 sm:$0xff] %v5997_v6 }
  0x3c   : > { %5016 = vst [vmem:[%s6956_s30 + $0x79] ss:$2 sm:$0xff] %v6000_v7  ;;  %5017 = vst [vmem:[%s6956_s30 + $0x91] ss:$2 sm:$0xff] %v6000_v7 }
  0x3d   : > { %5032 = vst [vmem:[%s6956_s30 + $0x7a] ss:$2 sm:$0xff] %v6000_v7  ;;  %5033 = vst [vmem:[%s6956_s30 + $0x92] ss:$2 sm:$0xff] %v6000_v7 }
  0x3e   : > { %5018 = vst [vmem:[%s6956_s30 + $0xa9] ss:$2 sm:$0xff] %v6001_v8  ;;  %5019 = vst [vmem:[%s6956_s30 + $0xc1] ss:$2 sm:$0xff] %v6001_v8 }
  0x3f   : > { %5034 = vst [vmem:[%s6956_s30 + $0xaa] ss:$2 sm:$0xff] %v6001_v8  ;;  %5035 = vst [vmem:[%s6956_s30 + $0xc2] ss:$2 sm:$0xff] %v6001_v8 }
  0x40   : > { %5020 = vst [vmem:[%s6956_s30 + $0x1c9] ss:$2 sm:$0xff] %v6004_v10  ;;  %5021 = vst [vmem:[%s6956_s30 + $0x1e1] ss:$2 sm:$0xff] %v6004_v10  ;;  %v5044_v15 = vld [vmem:[%s6956_s30 + $0x18] sm:$0xff]  ;;  %v5045_v16 = vld [vmem:[%s6956_s30 + $0x20] sm:$0xff] }
  0x41   : > { %5036 = vst [vmem:[%s6956_s30 + $0x1ca] ss:$2 sm:$0xff] %v6004_v10  ;;  %5037 = vst [vmem:[%s6956_s30 + $0x1e2] ss:$2 sm:$0xff] %v6004_v10  ;;  %v5047_v17 = vld [vmem:[%s6956_s30 + $0x30] sm:$0xff]  ;;  %v6997_v18 = vpack.c.bf16 %v5044_v15, %v5044_v15  ;;  %v6999_v19 = vpack.c.bf16 %v5045_v16, %v5045_v16  ;;  %v5048_v21 = vld [vmem:[%s6956_s30 + $0x38] sm:$0xff] }
  0x42   : > { %5022 = vst [vmem:[%s6956_s30 + $0x1f9] ss:$2 sm:$0xff] %v6005_v11  ;;  %5023 = vst [vmem:[%s6956_s30 + $0x211] ss:$2 sm:$0xff] %v6005_v11  ;;  %v7001_v20 = vpack.c.bf16 %v5047_v17, %v5047_v17  ;;  %v5050_v22 = vld [vmem:[%s6956_s30 + $0x48] sm:$0xff]  ;;  %v5051_v23 = vld [vmem:[%s6956_s30 + $0x50] sm:$0xff]  ;;  %v7006_v24 = vpack.c.bf16 %v5048_v21, %v5048_v21 }
  0x43   : > { %5038 = vst [vmem:[%s6956_s30 + $0x1fa] ss:$2 sm:$0xff] %v6005_v11  ;;  %5039 = vst [vmem:[%s6956_s30 + $0x212] ss:$2 sm:$0xff] %v6005_v11  ;;  %v7008_v25 = vpack.c.bf16 %v5050_v22, %v5050_v22  ;;  %v7010_v26 = vpack.c.bf16 %v5051_v23, %v5051_v23  ;;  %v5053_v27 = vld [vmem:[%s6956_s30 + $0x60] sm:$0xff]  ;;  %v5054_v28 = vld [vmem:[%s6956_s30 + $0x68] sm:$0xff] }
  0x44   : > { %5024 = vst [vmem:[%s6956_s30 + $0x229] ss:$2 sm:$0xff] %v6008_v12  ;;  %5025 = vst [vmem:[%s6956_s30 + $0x241] ss:$2 sm:$0xff] %v6008_v12  ;;  %v5056_v29 = vld [vmem:[%s6956_s30 + $0x78] sm:$0xff]  ;;  %v7025_v30 = vpack.c.bf16 %v5053_v27, %v5053_v27  ;;  %v7027_v31 = vpack.c.bf16 %v5054_v28, %v5054_v28  ;;  %v5057_v33 = vld [vmem:[%s6956_s30 + $0x80] sm:$0xff] }
  0x45   : > { %5040 = vst [vmem:[%s6956_s30 + $0x22a] ss:$2 sm:$0xff] %v6008_v12  ;;  %5041 = vst [vmem:[%s6956_s30 + $0x242] ss:$2 sm:$0xff] %v6008_v12  ;;  %v7029_v32 = vpack.c.bf16 %v5056_v29, %v5056_v29  ;;  %v5059_v34 = vld [vmem:[%s6956_s30 + $0x90] sm:$0xff]  ;;  %v5060_v35 = vld [vmem:[%s6956_s30 + $0x98] sm:$0xff]  ;;  %v7041_v37 = vpack.c.bf16 %v5057_v33, %v5057_v33 }
  0x46   : > { %5026 = vst [vmem:[%s6956_s30 + $0x259] ss:$2 sm:$0xff] %v6009_v13  ;;  %5027 = vst [vmem:[%s6956_s30 + $0x271] ss:$2 sm:$0xff] %v6009_v13  ;;  %v5206_v36 = vrot.slane %v6997_v18, 9  ;;  %v7043_v38 = vpack.c.bf16 %v5059_v34, %v5059_v34  ;;  %v7045_v39 = vpack.c.bf16 %v5060_v35, %v5060_v35  ;;  %v5062_v40 = vld [vmem:[%s6956_s30 + $0xa8] sm:$0xff] }
  0x47   : > { %5042 = vst [vmem:[%s6956_s30 + $0x25a] ss:$2 sm:$0xff] %v6009_v13  ;;  %5043 = vst [vmem:[%s6956_s30 + $0x272] ss:$2 sm:$0xff] %v6009_v13  ;;  %v5063_v41 = vld [vmem:[%s6956_s30 + $0xb0] sm:$0xff]  ;;  %v5065_v42 = vld [vmem:[%s6956_s30 + $0xc0] sm:$0xff]  ;;  %v7057_v44 = vpack.c.bf16 %v5062_v40, %v5062_v40 }
  0x48   : > { %5126 = vst [vmem:[%s7017_s8 + $0x18] sm:$0xf] %v6997_v18  ;;  %5127 = vst [vmem:[%s7017_s8 + $0x24] sm:$0xf] %v6999_v19  ;;  %v953_v43 = vrot.slane %v6999_v19, 5  ;;  %v7059_v45 = vpack.c.bf16 %v5063_v41, %v5063_v41  ;;  %v7061_v46 = vpack.c.bf16 %v5065_v42, %v5065_v42  ;;  %v5066_v47 = vld [vmem:[%s6956_s30 + $0xc8] sm:$0xff] }
  0x49   : > { %5128 = vst [vmem:[%s7017_s8 + $0x30] sm:$0xf] %v7001_v20  ;;  %5129 = vst [vmem:[%s7017_s8 + $0x3c] sm:$0xf] %v7006_v24  ;;  %v5068_v48 = vld [vmem:[%s6956_s30 + $0x1c8] sm:$0xff]  ;;  %v5069_v49 = vld [vmem:[%s6956_s30 + $0x1d0] sm:$0xff]  ;;  %v7073_v51 = vpack.c.bf16 %v5066_v47, %v5066_v47 }
  0x4a   : > { %5130 = vst [vmem:[%s7017_s8 + $0x48] sm:$0xf] %v7008_v25  ;;  %5131 = vst [vmem:[%s7017_s8 + $0x54] sm:$0xf] %v7010_v26  ;;  %v5207_v50 = vrot.slane %v7001_v20, 9  ;;  %v7075_v52 = vpack.c.bf16 %v5068_v48, %v5068_v48  ;;  %v7077_v53 = vpack.c.bf16 %v5069_v49, %v5069_v49  ;;  %v5071_v54 = vld [vmem:[%s6956_s30 + $0x1e0] sm:$0xff]  ;;  %v954_v57 = vsel %vm6990_vm2, %v5206_v36, %v953_v43 }
  0x4b   : > { %5132 = vst [vmem:[%s7017_s8 + $0x60] sm:$0xf] %v7025_v30  ;;  %5133 = vst [vmem:[%s7017_s8 + $0x6c] sm:$0xf] %v7027_v31  ;;  %v5072_v55 = vld [vmem:[%s6956_s30 + $0x1e8] sm:$0xff]  ;;  %v5074_v56 = vld [vmem:[%s6956_s30 + $0x1f8] sm:$0xff]  ;;  %v7092_v58 = vpack.c.bf16 %v5071_v54, %v5071_v54 }
  0x4c   : > { %5134 = vst [vmem:[%s7017_s8 + $0x78] sm:$0xf] %v7029_v32  ;;  %5135 = vst [vmem:[%s7017_s8 + $0x84] sm:$0xf] %v7041_v37  ;;  %v7094_v59 = vpack.c.bf16 %v5072_v55, %v5072_v55  ;;  %v7096_v60 = vpack.c.bf16 %v5074_v56, %v5074_v56  ;;  %v5075_v61 = vld [vmem:[%s6956_s30 + $0x200] sm:$0xff]  ;;  %v5077_v62 = vld [vmem:[%s6956_s30 + $0x210] sm:$0xff] }
  0x4d   : > { %5136 = vst [vmem:[%s7017_s8 + $0x90] sm:$0xf] %v7043_v38  ;;  %5137 = vst [vmem:[%s7017_s8 + $0x9c] sm:$0xf] %v7045_v39  ;;  %v5078_v63 = vld [vmem:[%s6956_s30 + $0x218] sm:$0xff]  ;;  %v960_v0 = vrot.slane %v7006_v24, 5  ;;  %v7109_v2 = vpack.c.bf16 %v5075_v61, %v5075_v61  ;;  %v7111_v3 = vpack.c.bf16 %v5077_v62, %v5077_v62 }
  0x4e   : > { %5138 = vst [vmem:[%s7017_s8 + $0xa8] sm:$0xf] %v7057_v44  ;;  %5139 = vst [vmem:[%s7017_s8 + $0xb4] sm:$0xf] %v7059_v45  ;;  %v7113_v4 = vpack.c.bf16 %v5078_v63, %v5078_v63  ;;  %v5080_v5 = vld [vmem:[%s6956_s30 + $0x228] sm:$0xff]  ;;  %v5081_v6 = vld [vmem:[%s6956_s30 + $0x230] sm:$0xff] }
  0x4f   : > { %5140 = vst [vmem:[%s7017_s8 + $0xc0] sm:$0xf] %v7061_v46  ;;  %5222 = vst [vmem:[%s7017_s8 + $0x20] sm:$0xf] %v954_v57  ;;  %v5083_v7 = vld [vmem:[%s6956_s30 + $0x240] sm:$0xff]  ;;  %v5208_v8 = vrot.slane %v7008_v25, 9  ;;  %v7125_v9 = vpack.c.bf16 %v5080_v5, %v5080_v5  ;;  %v7127_v10 = vpack.c.bf16 %v5081_v6, %v5081_v6  ;;  %v961_v16 = vsel %vm6990_vm2, %v5207_v50, %v960_v0 }
  0x50   : > { %5141 = vst [vmem:[%s7017_s8 + $0xcc] sm:$0xf] %v7073_v51  ;;  %5142 = vst [vmem:[%s7017_s8 + $0x1c8] sm:$0xf] %v7075_v52  ;;  %v7129_v11 = vpack.c.bf16 %v5083_v7, %v5083_v7  ;;  %v5084_v12 = vld [vmem:[%s6956_s30 + $0x248] sm:$0xff]  ;;  %v5086_v13 = vld [vmem:[%s6956_s30 + $0x258] sm:$0xff] }
  0x51   : > { %5143 = vst [vmem:[%s7017_s8 + $0x1d4] sm:$0xf] %v7077_v53  ;;  %5144 = vst [vmem:[%s7017_s8 + $0x1e0] sm:$0xf] %v7092_v58  ;;  %v5087_v15 = vld [vmem:[%s6956_s30 + $0x260] sm:$0xff]  ;;  %v7144_v17 = vpack.c.bf16 %v5084_v12, %v5084_v12  ;;  %v7146_v21 = vpack.c.bf16 %v5086_v13, %v5086_v13  ;;  %v5089_v23 = vld [vmem:[%s6956_s30 + $0x270] sm:$0xff] }
  0x52   : > { %5145 = vst [vmem:[%s7017_s8 + $0x1ec] sm:$0xf] %v7094_v59  ;;  %5146 = vst [vmem:[%s7017_s8 + $0x1f8] sm:$0xf] %v7096_v60  ;;  %v7148_v22 = vpack.c.bf16 %v5087_v15, %v5087_v15  ;;  %v5090_v27 = vld [vmem:[%s6956_s30 + $0x278] sm:$0xff]  ;;  %v967_v28 = vrot.slane %v7010_v26, 5  ;;  %v7160_v29 = vpack.c.bf16 %v5089_v23, %v5089_v23 }
  0x53   : > { %5147 = vst [vmem:[%s7017_s8 + $0x204] sm:$0xf] %v7109_v2  ;;  %5148 = vst [vmem:[%s7017_s8 + $0x210] sm:$0xf] %v7111_v3  ;;  %v7162_v33 = vpack.c.bf16 %v5090_v27, %v5090_v27  ;;  %v5209_v34 = vrot.slane %v7025_v30, 9  ;;  %v974_v35 = vrot.slane %v7027_v31, 5 }
  0x54   : > { %5149 = vst [vmem:[%s7017_s8 + $0x21c] sm:$0xf] %v7113_v4  ;;  %5224 = vst [vmem:[%s7017_s8 + $0x38] sm:$0xf] %v961_v16  ;;  %v968_v36 = vsel %vm6990_vm2, %v5208_v8, %v967_v28  ;;  %v5210_v40 = vrot.slane %v7029_v32, 9  ;;  %v981_v41 = vrot.slane %v7041_v37, 5 }
  0x55   : > { %5150 = vst [vmem:[%s7017_s8 + $0x228] sm:$0xf] %v7125_v9  ;;  %5151 = vst [vmem:[%s7017_s8 + $0x234] sm:$0xf] %v7127_v10  ;;  %v5211_v42 = vrot.slane %v7043_v38, 9  ;;  %v975_v47 = vsel %vm6990_vm2, %v5209_v34, %v974_v35  ;;  %v988_v48 = vrot.slane %v7045_v39, 5 }
  0x56   : > { %5152 = vst [vmem:[%s7017_s8 + $0x240] sm:$0xf] %v7129_v11  ;;  %9277 = vst [vmem:[#allocation7_spill] sm:$0xff] %v7160_v29  ;;  %v5212_v49 = vrot.slane %v7057_v44, 9  ;;  %v995_v50 = vrot.slane %v7059_v45, 5  ;;  %v982_v54 = vsel %vm6990_vm2, %v5210_v40, %v981_v41  ;;  %v5213_v55 = vrot.slane %v7061_v46, 9 }
  0x57   : > { %9278 = vst [vmem:[#allocation8_spill] sm:$0xff] %v7162_v33  ;;  %5153 = vst [vmem:[%s7017_s8 + $0x24c] sm:$0xf] %v7144_v17  ;;  %v1002_v56 = vrot.slane %v7073_v51, 5  ;;  %v5214_v57 = vrot.slane %v7075_v52, 9  ;;  %v989_v61 = vsel %vm6990_vm2, %v5211_v42, %v988_v48  ;;  %v1009_v63 = vrot.slane %v7077_v53, 5 }
  0x58   : > { %5154 = vst [vmem:[%s7017_s8 + $0x258] sm:$0xf] %v7146_v21  ;;  %5155 = vst [vmem:[%s7017_s8 + $0x264] sm:$0xf] %v7148_v22  ;;  %v996_v62 = vsel %vm6990_vm2, %v5212_v49, %v995_v50  ;;  %v5215_v5 = vrot.slane %v7092_v58, 9  ;;  %v1016_v7 = vrot.slane %v7094_v59, 5 }
  0x59   : > { %5156 = vst [vmem:[%s7017_s8 + $0x270] sm:$0xf] %v7160_v29  ;;  %5157 = vst [vmem:[%s7017_s8 + $0x27c] sm:$0xf] %v7162_v33  ;;  %v1003_v6 = vsel %vm6990_vm2, %v5213_v55, %v1002_v56  ;;  %v5216_v8 = vrot.slane %v7096_v60, 9  ;;  %v1023_v12 = vrot.slane %v7109_v2, 5  ;;  %v1010_v13 = vsel %vm6990_vm2, %v5214_v57, %v1009_v63 }
  0x5a   : > { %5226 = vst [vmem:[%s7017_s8 + $0x50] sm:$0xf] %v968_v36  ;;  %5228 = vst [vmem:[%s7017_s8 + $0x68] sm:$0xf] %v975_v47  ;;  %v5217_v15 = vrot.slane %v7111_v3, 9  ;;  %v1030_v16 = vrot.slane %v7113_v4, 5  ;;  %v1017_v34 = vsel %vm6990_vm2, %v5215_v5, %v1016_v7 }
  0x5b   : > { %5230 = vst [vmem:[%s7017_s8 + $0x80] sm:$0xf] %v982_v54  ;;  %5232 = vst [vmem:[%s7017_s8 + $0x98] sm:$0xf] %v989_v61  ;;  %v5218_v23 = vrot.slane %v7125_v9, 9  ;;  %v1024_v36 = vsel %vm6990_vm2, %v5216_v8, %v1023_v12  ;;  %v1037_v40 = vrot.slane %v7127_v10, 5 }
  0x5c   : > { %5234 = vst [vmem:[%s7017_s8 + $0xb0] sm:$0xf] %v996_v62  ;;  %5236 = vst [vmem:[%s7017_s8 + $0xc8] sm:$0xf] %v1003_v6  ;;  %v5046_v27 = vld [vmem:[%s6956_s30 + $0x28] sm:$0x3]  ;;  %v1031_v49 = vsel %vm6990_vm2, %v5217_v15, %v1030_v16 }
  0x5d   : > { %5238 = vst [vmem:[%s7017_s8 + $0x1d0] sm:$0xf] %v1010_v13  ;;  %v5219_v42 = vrot.slane %v7129_v11, 9  ;;  %v5049_v47 = vld [vmem:[%s6956_s30 + $0x40] sm:$0x3]  ;;  %v1044_v54 = vrot.slane %v7144_v17, 5  ;;  %v1038_v62 = vsel %vm6990_vm2, %v5218_v23, %v1037_v40  ;;  %v7257_v8 = vpack.c.bf16 %v5046_v27, %v5046_v27 }
  0x5e   : > { %5240 = vst [vmem:[%s7017_s8 + $0x1e8] sm:$0xf] %v1017_v34  ;;  %5242 = vst [vmem:[%s7017_s8 + $0x200] sm:$0xf] %v1024_v36  ;;  %v5220_v55 = vrot.slane %v7146_v21, 9  ;;  %v9267_v57 = vrot.slane %v7148_v22, 5  ;;  %v7271_v36 = vpack.c.bf16 %v5049_v47, %v5049_v47 }
  0x5f   : > { %v5052_v61 = vld [vmem:[%s6956_s30 + $0x58] sm:$0x3]  ;;  %5244 = vst [vmem:[%s7017_s8 + $0x218] sm:$0xf] %v1031_v49  ;;  %v5221_v5 = vrot.slane %v7160_v29, 9  ;;  %v9266_v6 = vrot.slane %v7162_v33, 5  ;;  %v1045_v15 = vsel %vm6990_vm2, %v5219_v42, %v1044_v54 }
  0x60   : > { %v5055_v13 = vld [vmem:[%s6956_s30 + $0x70] sm:$0x3]  ;;  %5246 = vst [vmem:[%s7017_s8 + $0x230] sm:$0xf] %v1038_v62  ;;  %v1052_v23 = vsel %vm6990_vm2, %v5220_v55, %v9267_v57  ;;  %v955_v34 = vrot.slane %v953_v43, 4  ;;  %v956_v49 = vrot.slane %v7257_v8, 5  ;;  %v7283_v62 = vpack.c.bf16 %v5052_v61, %v5052_v61 }
  0x61   : > { %v5058_v27 = vld [vmem:[%s6956_s30 + $0x88] sm:$0x3]  ;;  %5248 = vst [vmem:[%s7017_s8 + $0x248] sm:$0xf] %v1045_v15  ;;  %5250 = vst [vmem:[%s7017_s8 + $0x260] sm:$0xf] %v1052_v23  ;;  %v1059_v42 = vsel %vm6990_vm2, %v5221_v5, %v9266_v6  ;;  %v7290_v23 = vpack.c.bf16 %v5055_v13, %v5055_v13 }
  0x62   : > { %v962_v55 = vrot.slane %v960_v0, 4  ;;  %v5061_v43 = vld [vmem:[%s6956_s30 + $0xa0] sm:$0x3]  ;;  %5252 = vst [vmem:[%s7017_s8 + $0x278] sm:$0xf] %v1059_v42  ;;  %v963_v47 = vrot.slane %v7271_v36, 5  ;;  %v957_v0 = vsel %vm6990_vm2, %v955_v34, %v956_v49  ;;  %v7298_v42 = vpack.c.bf16 %v5058_v27, %v5058_v27 }
  0x63   : > { %v969_v15 = vrot.slane %v967_v28, 4  ;;  %v976_v5 = vrot.slane %v974_v35, 4  ;;  %v5064_v1 = vld [vmem:[%s6956_s30 + $0xb8] sm:$0x3]  ;;  %v970_v61 = vrot.slane %v7283_v62, 5  ;;  %v983_v6 = vrot.slane %v981_v41, 4 }
  0x64   : > { %v5067_v57 = vld [vmem:[%s6956_s30 + $0xd0] sm:$0x3]  ;;  %5223 = vst [vmem:[%s7017_s8 + $0x2c] sm:$0xf] %v957_v0  ;;  %v964_v28 = vsel %vm6990_vm2, %v962_v55, %v963_v47  ;;  %v977_v35 = vrot.slane %v7290_v23, 5  ;;  %v7307_v13 = vpack.c.bf16 %v5061_v43, %v5061_v43  ;;  %v990_v34 = vrot.slane %v988_v48, 4 }
  0x65   : > { %v5070_v49 = vld [vmem:[%s6956_s30 + $0x1d8] sm:$0x3]  ;;  %5225 = vst [vmem:[%s7017_s8 + $0x44] sm:$0xf] %v964_v28  ;;  %v971_v27 = vsel %vm6990_vm2, %v969_v15, %v970_v61  ;;  %v984_v41 = vrot.slane %v7298_v42, 5  ;;  %v7316_v0 = vpack.c.bf16 %v5064_v1, %v5064_v1  ;;  %v997_v55 = vrot.slane %v995_v50, 4 }
  0x66   : > { %v5073_v47 = vld [vmem:[%s6956_s30 + $0x1f0] sm:$0x3]  ;;  %5227 = vst [vmem:[%s7017_s8 + $0x5c] sm:$0xf] %v971_v27  ;;  %v978_v43 = vsel %vm6990_vm2, %v976_v5, %v977_v35  ;;  %v991_v48 = vrot.slane %v7307_v13, 5  ;;  %v7325_v28 = vpack.c.bf16 %v5067_v57, %v5067_v57  ;;  %v1004_v15 = vrot.slane %v1002_v56, 4 }
  0x67   : > { %v5076_v61 = vld [vmem:[%s6956_s30 + $0x208] sm:$0x3]  ;;  %5229 = vst [vmem:[%s7017_s8 + $0x74] sm:$0xf] %v978_v43  ;;  %v985_v1 = vsel %vm6990_vm2, %v983_v6, %v984_v41  ;;  %v998_v50 = vrot.slane %v7316_v0, 5  ;;  %v7334_v27 = vpack.c.bf16 %v5070_v49, %v5070_v49  ;;  %v1011_v5 = vrot.slane %v1009_v63, 4 }
  0x68   : > { %v5079_v35 = vld [vmem:[%s6956_s30 + $0x220] sm:$0x3]  ;;  %5231 = vst [vmem:[%s7017_s8 + $0x8c] sm:$0xf] %v985_v1  ;;  %v992_v57 = vsel %vm6990_vm2, %v990_v34, %v991_v48  ;;  %v1005_v56 = vrot.slane %v7325_v28, 5  ;;  %v7343_v43 = vpack.c.bf16 %v5073_v47, %v5073_v47  ;;  %v1018_v6 = vrot.slane %v1016_v7, 4 }
  0x69   : > { %v5082_v49 = vld [vmem:[%s6956_s30 + $0x238] sm:$0x3]  ;;  %5233 = vst [vmem:[%s7017_s8 + $0xa4] sm:$0xf] %v992_v57  ;;  %v999_v63 = vsel %vm6990_vm2, %v997_v55, %v998_v50  ;;  %v1012_v41 = vrot.slane %v7334_v27, 5  ;;  %v7352_v1 = vpack.c.bf16 %v5076_v61, %v5076_v61  ;;  %v1025_v34 = vrot.slane %v1023_v12, 4 }
  0x6a   : > { %v5085_v47 = vld [vmem:[%s6956_s30 + $0x250] sm:$0x3]  ;;  %5235 = vst [vmem:[%s7017_s8 + $0xbc] sm:$0xf] %v999_v63  ;;  %v1006_v7 = vsel %vm6990_vm2, %v1004_v15, %v1005_v56  ;;  %v1019_v48 = vrot.slane %v7343_v43, 5  ;;  %v7361_v55 = vpack.c.bf16 %v5079_v35, %v5079_v35  ;;  %v1032_v61 = vrot.slane %v1030_v16, 4 }
  0x6b   : > { %v5088_v50 = vld [vmem:[%s6956_s30 + $0x268] sm:$0x3]  ;;  %5237 = vst [vmem:[%s7017_s8 + $0xd4] sm:$0xf] %v1006_v7  ;;  %v1013_v12 = vsel %vm6990_vm2, %v1011_v5, %v1012_v41  ;;  %v1026_v57 = vrot.slane %v7352_v1, 5  ;;  %v7370_v63 = vpack.c.bf16 %v5082_v49, %v5082_v49  ;;  %v1039_v15 = vrot.slane %v1037_v40, 4 }
  0x6c   : > { %v5091_v56 = vld [vmem:[%s6956_s30 + $0x280] sm:$0x3]  ;;  %5239 = vst [vmem:[%s7017_s8 + $0x1dc] sm:$0xf] %v1013_v12  ;;  %v1020_v35 = vsel %vm6990_vm2, %v1018_v6, %v1019_v48  ;;  %v1033_v16 = vrot.slane %v7361_v55, 5  ;;  %v7379_v7 = vpack.c.bf16 %v5085_v47, %v5085_v47  ;;  %v1046_v5 = vrot.slane %v1044_v54, 4 }
  0x6d   : > { %5241 = vst [vmem:[%s7017_s8 + $0x1f4] sm:$0xf] %v1020_v35  ;;  %v1027_v49 = vsel %vm6990_vm2, %v1025_v34, %v1026_v57  ;;  %v1040_v40 = vrot.slane %v7370_v63, 5  ;;  %v7387_v41 = vpack.c.bf16 %v5088_v50, %v5088_v50  ;;  %v9279_v12 = vrot.slane %v7148_v22, 5 }
  0x6e   : > { %5243 = vst [vmem:[%s7017_s8 + $0x20c] sm:$0xf] %v1027_v49  ;;  %v1034_v6 = vsel %vm6990_vm2, %v1032_v61, %v1033_v16  ;;  %v1047_v47 = vrot.slane %v7379_v7, 5  ;;  %v7395_v54 = vpack.c.bf16 %v5091_v56, %v5091_v56  ;;  %v9281_v48 = vrot.slane %v7162_v33, 5 }
  0x6f   : > { %v1053_v29 = vrot.slane %v9279_v12, 4  ;;  %5245 = vst [vmem:[%s7017_s8 + $0x224] sm:$0xf] %v1034_v6  ;;  %v1041_v34 = vsel %vm6990_vm2, %v1039_v15, %v1040_v40  ;;  %v1054_v50 = vrot.slane %v7387_v41, 5  ;;  %v501_v57 = vshrl.u32 %v6997_v18, 16 }
  0x70   : > { %9280 = vst [vmem:[#allocation9_spill] sm:$0xff] %v7395_v54  ;;  %v1060_v35 = vrot.slane %v9281_v48, 4  ;;  %v504_v49 = vshll.u32 %v6997_v18, 16  ;;  %5247 = vst [vmem:[%s7017_s8 + $0x23c] sm:$0xf] %v1041_v34  ;;  %v1048_v61 = vsel %vm6990_vm2, %v1046_v5, %v1047_v47  ;;  %v1061_v56 = vrot.slane %v7395_v54, 5 }
  0x71   : > { %v510_v16 = vshll.u32 %v6999_v19, 16  ;;  %v514_v12 = vshrl.u32 %v6999_v19, 16  ;;  %5249 = vst [vmem:[%s7017_s8 + $0x254] sm:$0xf] %v1048_v61  ;;  %v1055_v15 = vsel %vm6990_vm2, %v1053_v29, %v1054_v50  ;;  %v503_v40 = vrot.slane %v501_v57, 4 }
  0x72   : > { %v506_v6 = vrot.slane %v504_v49, 5  ;;  %v520_v48 = vshll.u32 %v7257_v8, 16  ;;  %5251 = vst [vmem:[%s7017_s8 + $0x26c] sm:$0xf] %v1055_v15  ;;  %v1062_v18 = vsel %vm6990_vm2, %v1060_v35, %v1061_v56  ;;  %v525_v47 = vshrl.u32 %v7001_v20, 16 }
  0x73   : > { %v512_v34 = vrot.slane %v510_v16, 5  ;;  %v516_v5 = vrot.slane %v514_v12, 4  ;;  %5253 = vst [vmem:[%s7017_s8 + $0x284] sm:$0xf] %v1062_v18  ;;  %v528_v19 = vshll.u32 %v7001_v20, 16  ;;  %v534_v61 = vshll.u32 %v7006_v24, 16 }
  0x74   : > { %v507_v54 = vor.u32 %v506_v6, %v503_v40  ;;  %v522_v33 = vrot.slane %v520_v48, 5  ;;  %v9282_v29 = vmov 0  ;;  %v527_v14 = vrot.slane %v525_v47, 4 }
  0x75   : > { %v9283_v29 = vsel %vm7424_vm5, 4294967295, %v9282_v29  ;;  %v517_v8 = vor.u32 %v516_v5, %v512_v34  ;;  %v538_v35 = vshrl.u32 %v7006_v24, 16  ;;  %v544_v50 = vshll.u32 %v7271_v36, 16 }
  0x76   : > { %9284 = vst [vmem:[#allocation10_spill] sm:$0xff] %v9283_v29  ;;  %v508_v57 = vrot.slane %v507_v54, 4  ;;  %v530_v49 = vrot.slane %v528_v19, 5  ;;  %v536_v56 = vrot.slane %v534_v61, 5  ;;  %v549_v20 = vshrl.u32 %v7008_v25, 16 }
  0x77   : > { %v518_v16 = vrot.slane %v517_v8, 4  ;;  %v540_v12 = vrot.slane %v538_v35, 4  ;;  %v546_v15 = vrot.slane %v544_v50, 5  ;;  %v552_v40 = vshll.u32 %v7008_v25, 16 }
  0x78   : > { %v513_v6 = vsel %vm7424_vm5, %v508_v57, %v512_v34  ;;  %v531_v48 = vor.u32 %v530_v49, %v527_v14  ;;  %v551_v18 = vrot.slane %v549_v20, 4  ;;  %v558_v24 = vshll.u32 %v7010_v26, 16 }
  0x79   : > { %5174 = vst [vmem:[%s7017_s8 + $0x1c] sm:$0xf] %v513_v6  ;;  %v523_v36 = vsel %vm7424_vm5, %v518_v16, %v522_v33  ;;  %v541_v54 = vor.u32 %v540_v12, %v536_v56  ;;  %v554_v5 = vrot.slane %v552_v40, 5  ;;  %v562_v47 = vshrl.u32 %v7010_v26, 16 }
  0x7a   : > { %5175 = vst [vmem:[%s7017_s8 + $0x28] sm:$0xf] %v523_v36  ;;  %v532_v19 = vrot.slane %v531_v48, 4  ;;  %v560_v61 = vrot.slane %v558_v24, 5  ;;  %v568_v25 = vshll.u32 %v7283_v62, 16  ;;  %v573_v34 = vshrl.u32 %v7025_v30, 16 }
  0x7b   : > { %v542_v8 = vrot.slane %v541_v54, 4  ;;  %v555_v14 = vor.u32 %v554_v5, %v551_v18  ;;  %v564_v35 = vrot.slane %v562_v47, 4  ;;  %v576_v50 = vshll.u32 %v7025_v30, 16 }
  0x7c   : > { %v537_v33 = vsel %vm7424_vm5, %v532_v19, %v536_v56  ;;  %v570_v57 = vrot.slane %v568_v25, 5  ;;  %v575_v49 = vrot.slane %v573_v34, 4  ;;  %v582_v26 = vshll.u32 %v7027_v31, 16 }
  0x7d   : > { %5176 = vst [vmem:[%s7017_s8 + $0x34] sm:$0xf] %v537_v33  ;;  %v547_v20 = vsel %vm7424_vm5, %v542_v8, %v546_v15  ;;  %v556_v62 = vrot.slane %v555_v14, 4  ;;  %v565_v16 = vor.u32 %v564_v35, %v560_v61  ;;  %v578_v12 = vrot.slane %v576_v50, 5 }
  0x7e   : > { %5177 = vst [vmem:[%s7017_s8 + $0x40] sm:$0xf] %v547_v20  ;;  %v584_v40 = vrot.slane %v582_v26, 5  ;;  %v586_v6 = vshrl.u32 %v7027_v31, 16  ;;  %v592_v30 = vshll.u32 %v7290_v23, 16  ;;  %v597_v56 = vshrl.u32 %v7029_v32, 16 }
  0x7f   : > { %v561_v48 = vsel %vm7424_vm5, %v556_v62, %v560_v61  ;;  %v566_v18 = vrot.slane %v565_v16, 4  ;;  %v579_v24 = vor.u32 %v578_v12, %v575_v49  ;;  %v600_v36 = vshll.u32 %v7029_v32, 16 }
  0x80   : > { %5178 = vst [vmem:[%s7017_s8 + $0x4c] sm:$0xf] %v561_v48  ;;  %v588_v15 = vrot.slane %v586_v6, 4  ;;  %v594_v54 = vrot.slane %v592_v30, 5  ;;  %v599_v5 = vrot.slane %v597_v56, 4  ;;  %v606_v47 = vshll.u32 %v7041_v37, 16 }
  0x81   : > { %v571_v31 = vsel %vm7424_vm5, %v566_v18, %v570_v57  ;;  %v580_v23 = vrot.slane %v579_v24, 4  ;;  %v602_v19 = vrot.slane %v600_v36, 5  ;;  %v610_v25 = vshrl.u32 %v7041_v37, 16 }
  0x82   : > { %5179 = vst [vmem:[%s7017_s8 + $0x58] sm:$0xf] %v571_v31  ;;  %v589_v61 = vor.u32 %v588_v15, %v584_v40  ;;  %v608_v34 = vrot.slane %v606_v47, 5  ;;  %v616_v8 = vshll.u32 %v7298_v42, 16  ;;  %v621_v32 = vshrl.u32 %v7043_v38, 16 }
  0x83   : > { %v585_v14 = vsel %vm7424_vm5, %v580_v23, %v584_v40  ;;  %v603_v35 = vor.u32 %v602_v19, %v599_v5  ;;  %v612_v50 = vrot.slane %v610_v25, 4  ;;  %v624_v33 = vshll.u32 %v7043_v38, 16 }
  0x84   : > { %5180 = vst [vmem:[%s7017_s8 + $0x64] sm:$0xf] %v585_v14  ;;  %v590_v57 = vrot.slane %v589_v61, 4  ;;  %v618_v49 = vrot.slane %v616_v8, 5  ;;  %v623_v37 = vrot.slane %v621_v32, 4  ;;  %v630_v26 = vshll.u32 %v7045_v39, 16 }
  0x85   : > { %v604_v20 = vrot.slane %v603_v35, 4  ;;  %v613_v62 = vor.u32 %v612_v50, %v608_v34  ;;  %v626_v42 = vrot.slane %v624_v33, 5  ;;  %v634_v16 = vshrl.u32 %v7045_v39, 16 }
  0x86   : > { %v595_v12 = vsel %vm7424_vm5, %v590_v57, %v594_v54  ;;  %v632_v40 = vrot.slane %v630_v26, 5  ;;  %v640_v6 = vshll.u32 %v7307_v13, 16  ;;  %v645_v38 = vshrl.u32 %v7057_v44, 16 }
  0x87   : > { %5181 = vst [vmem:[%s7017_s8 + $0x70] sm:$0xf] %v595_v12  ;;  %v609_v30 = vsel %vm7424_vm5, %v604_v20, %v608_v34  ;;  %v614_v56 = vrot.slane %v613_v62, 4  ;;  %v627_v48 = vor.u32 %v626_v42, %v623_v37  ;;  %v636_v18 = vrot.slane %v634_v16, 4 }
  0x88   : > { %5182 = vst [vmem:[%s7017_s8 + $0x7c] sm:$0xf] %v609_v30  ;;  %v642_v24 = vrot.slane %v640_v6, 5  ;;  %v647_v36 = vrot.slane %v645_v38, 4  ;;  %v648_v39 = vshll.u32 %v7057_v44, 16  ;;  %v654_v15 = vshll.u32 %v7059_v45, 16 }
  0x89   : > { %v619_v13 = vsel %vm7424_vm5, %v614_v56, %v618_v49  ;;  %v628_v54 = vrot.slane %v627_v48, 4  ;;  %v637_v5 = vor.u32 %v636_v18, %v632_v40  ;;  %v658_v47 = vshrl.u32 %v7059_v45, 16 }
  0x8a   : > { %5183 = vst [vmem:[%s7017_s8 + $0x88] sm:$0xf] %v619_v13  ;;  %v650_v31 = vrot.slane %v648_v39, 5  ;;  %v656_v23 = vrot.slane %v654_v15, 5  ;;  %v664_v19 = vshll.u32 %v7316_v0, 16  ;;  %v669_v25 = vshrl.u32 %v7061_v46, 16 }
  0x8b   : > { %v633_v44 = vsel %vm7424_vm5, %v628_v54, %v632_v40  ;;  %v638_v61 = vrot.slane %v637_v5, 4  ;;  %v660_v34 = vrot.slane %v658_v47, 4  ;;  %v672_v8 = vshll.u32 %v7061_v46, 16 }
  0x8c   : > { %5184 = vst [vmem:[%s7017_s8 + $0x94] sm:$0xf] %v633_v44  ;;  %v651_v32 = vor.u32 %v650_v31, %v647_v36  ;;  %v666_v14 = vrot.slane %v664_v19, 5  ;;  %v671_v35 = vrot.slane %v669_v25, 4  ;;  %v678_v45 = vshll.u32 %v7073_v51, 16 }
  0x8d   : > { %v643_v50 = vsel %vm7424_vm5, %v638_v61, %v642_v24  ;;  %v661_v33 = vor.u32 %v660_v34, %v656_v23  ;;  %v674_v0 = vrot.slane %v672_v8, 5  ;;  %v682_v57 = vshrl.u32 %v7073_v51, 16 }
  0x8e   : > { %5185 = vst [vmem:[%s7017_s8 + $0xa0] sm:$0xf] %v643_v50  ;;  %v652_v49 = vrot.slane %v651_v32, 4  ;;  %v680_v37 = vrot.slane %v678_v45, 5  ;;  %v688_v46 = vshll.u32 %v7325_v28, 16  ;;  %v693_v26 = vshrl.u32 %v7075_v52, 16 }
  0x8f   : > { %v662_v20 = vrot.slane %v661_v33, 4  ;;  %v675_v62 = vor.u32 %v674_v0, %v671_v35  ;;  %v684_v42 = vrot.slane %v682_v57, 4  ;;  %v696_v16 = vshll.u32 %v7075_v52, 16 }
  0x90   : > { %v657_v12 = vsel %vm7424_vm5, %v652_v49, %v656_v23  ;;  %v690_v40 = vrot.slane %v688_v46, 5  ;;  %v695_v6 = vrot.slane %v693_v26, 4  ;;  %v702_v51 = vshll.u32 %v7077_v53, 16 }
  0x91   : > { %5186 = vst [vmem:[%s7017_s8 + $0xac] sm:$0xf] %v657_v12  ;;  %v667_v38 = vsel %vm7424_vm5, %v662_v20, %v666_v14  ;;  %v676_v28 = vrot.slane %v675_v62, 4  ;;  %v685_v30 = vor.u32 %v684_v42, %v680_v37  ;;  %v698_v56 = vrot.slane %v696_v16, 5 }
  0x92   : > { %5187 = vst [vmem:[%s7017_s8 + $0xb8] sm:$0xf] %v667_v38  ;;  %v704_v48 = vrot.slane %v702_v51, 5  ;;  %v706_v18 = vshrl.u32 %v7077_v53, 16  ;;  %v712_v52 = vshll.u32 %v7334_v27, 16  ;;  %v717_v24 = vshrl.u32 %v7092_v58, 16 }
  0x93   : > { %v681_v36 = vsel %vm7424_vm5, %v676_v28, %v680_v37  ;;  %v686_v39 = vrot.slane %v685_v30, 4  ;;  %v699_v15 = vor.u32 %v698_v56, %v695_v6  ;;  %v720_v13 = vshll.u32 %v7092_v58, 16 }
  0x94   : > { %5188 = vst [vmem:[%s7017_s8 + $0xc4] sm:$0xf] %v681_v36  ;;  %v708_v54 = vrot.slane %v706_v18, 4  ;;  %v714_v5 = vrot.slane %v712_v52, 5  ;;  %v719_v47 = vrot.slane %v717_v24, 4  ;;  %v726_v31 = vshll.u32 %v7094_v59, 16 }
  0x95   : > { %v691_v53 = vsel %vm7424_vm5, %v686_v39, %v690_v40  ;;  %v700_v27 = vrot.slane %v699_v15, 4  ;;  %v722_v23 = vrot.slane %v720_v13, 5  ;;  %v730_v19 = vshrl.u32 %v7094_v59, 16 }
  0x96   : > { %5189 = vst [vmem:[%s7017_s8 + $0xd0] sm:$0xf] %v691_v53  ;;  %v709_v25 = vor.u32 %v708_v54, %v704_v48  ;;  %v728_v44 = vrot.slane %v726_v31, 5  ;;  %v736_v61 = vshll.u32 %v7343_v43, 16  ;;  %v741_v58 = vshrl.u32 %v7096_v60, 16 }
  0x97   : > { %v705_v34 = vsel %vm7424_vm5, %v700_v27, %v704_v48  ;;  %v723_v8 = vor.u32 %v722_v23, %v719_v47  ;;  %v732_v32 = vrot.slane %v730_v19, 4  ;;  %v744_v14 = vshll.u32 %v7096_v60, 16 }
  0x98   : > { %5190 = vst [vmem:[%s7017_s8 + $0x1cc] sm:$0xf] %v705_v34  ;;  %v710_v35 = vrot.slane %v709_v25, 4  ;;  %v738_v45 = vrot.slane %v736_v61, 5  ;;  %v743_v59 = vrot.slane %v741_v58, 4  ;;  %v750_v50 = vshll.u32 %v7109_v2, 16 }
  0x99   : > { %v724_v33 = vrot.slane %v723_v8, 4  ;;  %v733_v0 = vor.u32 %v732_v32, %v728_v44  ;;  %v746_v43 = vrot.slane %v744_v14, 5  ;;  %v754_v57 = vshrl.u32 %v7109_v2, 16 }
  0x9a   : > { %v715_v49 = vsel %vm7424_vm5, %v710_v35, %v714_v5  ;;  %v752_v37 = vrot.slane %v750_v50, 5  ;;  %v760_v46 = vshll.u32 %v7352_v1, 16  ;;  %v765_v60 = vshrl.u32 %v7111_v3, 16 }
  0x9b   : > { %5191 = vst [vmem:[%s7017_s8 + $0x1d8] sm:$0xf] %v715_v49  ;;  %v729_v26 = vsel %vm7424_vm5, %v724_v33, %v728_v44  ;;  %v734_v20 = vrot.slane %v733_v0, 4  ;;  %v747_v62 = vor.u32 %v746_v43, %v743_v59  ;;  %v756_v42 = vrot.slane %v754_v57, 4 }
  0x9c   : > { %5192 = vst [vmem:[%s7017_s8 + $0x1e4] sm:$0xf] %v729_v26  ;;  %v762_v16 = vrot.slane %v760_v46, 5  ;;  %v767_v12 = vrot.slane %v765_v60, 4  ;;  %v768_v2 = vshll.u32 %v7111_v3, 16  ;;  %v774_v40 = vshll.u32 %v7113_v4, 16 }
  0x9d   : > { %v739_v1 = vsel %vm7424_vm5, %v734_v20, %v738_v45  ;;  %v748_v6 = vrot.slane %v747_v62, 4  ;;  %v757_v51 = vor.u32 %v756_v42, %v752_v37  ;;  %v778_v38 = vshrl.u32 %v7113_v4, 16  ;;  %v9285_v62 = vld [vmem:[#allocation7_spill] sm:$0xff] }
  0x9e   : > { %5193 = vst [vmem:[%s7017_s8 + $0x1f0] sm:$0xf] %v739_v1  ;;  %v770_v28 = vrot.slane %v768_v2, 5  ;;  %v776_v30 = vrot.slane %v774_v40, 5  ;;  %v784_v56 = vshll.u32 %v7361_v55, 16  ;;  %v789_v48 = vshrl.u32 %v7125_v9, 16 }
  0x9f   : > { %v753_v3 = vsel %vm7424_vm5, %v748_v6, %v752_v37  ;;  %v758_v18 = vrot.slane %v757_v51, 4  ;;  %v780_v52 = vrot.slane %v778_v38, 4  ;;  %v792_v24 = vshll.u32 %v7125_v9, 16  ;;  %v9286_v6 = vld [vmem:[#allocation8_spill] sm:$0xff] }
  0xa0   : > { %5194 = vst [vmem:[%s7017_s8 + $0x1fc] sm:$0xf] %v753_v3  ;;  %v771_v36 = vor.u32 %v770_v28, %v767_v12  ;;  %v786_v39 = vrot.slane %v784_v56, 5  ;;  %v791_v15 = vrot.slane %v789_v48, 4  ;;  %v798_v4 = vshll.u32 %v7127_v10, 16 }
  0xa1   : > { %v763_v13 = vsel %vm7424_vm5, %v758_v18, %v762_v16  ;;  %v781_v55 = vor.u32 %v780_v52, %v776_v30  ;;  %v794_v54 = vrot.slane %v792_v24, 5  ;;  %v802_v5 = vshrl.u32 %v7127_v10, 16  ;;  %v9287_v18 = vld [vmem:[#allocation9_spill] sm:$0xff] }
  0xa2   : > { %5195 = vst [vmem:[%s7017_s8 + $0x208] sm:$0xf] %v763_v13  ;;  %v772_v47 = vrot.slane %v771_v36, 4  ;;  %v800_v31 = vrot.slane %v798_v4, 5  ;;  %v808_v9 = vshll.u32 %v7370_v63, 16  ;;  %v813_v53 = vshrl.u32 %v7129_v11, 16 }
  0xa3   : > { %v782_v27 = vrot.slane %v781_v55, 4  ;;  %v795_v23 = vor.u32 %v794_v54, %v791_v15  ;;  %v804_v19 = vrot.slane %v802_v5, 4  ;;  %v816_v25 = vshll.u32 %v7129_v11, 16 }
  0xa4   : > { %v777_v44 = vsel %vm7424_vm5, %v772_v47, %v776_v30  ;;  %v815_v61 = vrot.slane %v813_v53, 4  ;;  %v822_v10 = vshll.u32 %v7144_v17, 16  ;;  %v810_v32 = vrot.slane %v808_v9, 5  ;;  %v7602_v9 = vld [vmem:[%s9258_s2] ss:$0 sm:$0xff] (%p131_p0) }
  0xa5   : > { %5196 = vst [vmem:[%s7017_s8 + $0x214] sm:$0xf] %v777_v44  ;;  %v787_v58 = vsel %vm7424_vm5, %v782_v27, %v786_v39  ;;  %v796_v34 = vrot.slane %v795_v23, 4  ;;  %v805_v63 = vor.u32 %v804_v19, %v800_v31  ;;  %v818_v8 = vrot.slane %v816_v25, 5 }
  0xa6   : > { %5197 = vst [vmem:[%s7017_s8 + $0x220] sm:$0xf] %v787_v58  ;;  %v824_v14 = vrot.slane %v822_v10, 5  ;;  %v826_v11 = vshrl.u32 %v7144_v17, 16  ;;  %v837_v35 = vshrl.u32 %v7146_v21, 16  ;;  %v840_v33 = vshll.u32 %v7146_v21, 16 }
  0xa7   : > { %v801_v45 = vsel %vm7424_vm5, %v796_v34, %v800_v31  ;;  %v806_v59 = vrot.slane %v805_v63, 4  ;;  %v819_v50 = vor.u32 %v818_v8, %v815_v61  ;;  %v832_v43 = vshll.u32 %v7379_v7, 16 }
  0xa8   : > { %5198 = vst [vmem:[%s7017_s8 + $0x22c] sm:$0xf] %v801_v45  ;;  %v828_v0 = vrot.slane %v826_v11, 4  ;;  %v839_v57 = vrot.slane %v837_v35, 4  ;;  %v846_v49 = vshll.u32 %v7148_v22, 16  ;;  %v842_v46 = vrot.slane %v840_v33, 5 }
  0xa9   : > { %v811_v17 = vsel %vm7424_vm5, %v806_v59, %v810_v32  ;;  %v820_v37 = vrot.slane %v819_v50, 4  ;;  %v850_v60 = vshrl.u32 %v7148_v22, 16  ;;  %v856_v21 = vshll.u32 %v7387_v41, 16 }
  0xaa   : > { %5199 = vst [vmem:[%s7017_s8 + $0x238] sm:$0xf] %v811_v17  ;;  %v829_v26 = vor.u32 %v828_v0, %v824_v14  ;;  %v848_v20 = vrot.slane %v846_v49, 5  ;;  %v861_v42 = vshrl.u32 %v9285_v62, 16  ;;  %v843_v16 = vor.u32 %v842_v46, %v839_v57 }
  0xab   : > { %v825_v7 = vsel %vm7424_vm5, %v820_v37, %v824_v14  ;;  %v852_v12 = vrot.slane %v850_v60, 4  ;;  %v864_v2 = vshll.u32 %v9285_v62, 16  ;;  %v834_v1 = vrot.slane %v832_v43, 5 }
  0xac   : > { %5200 = vst [vmem:[%s7017_s8 + $0x244] sm:$0xf] %v825_v7  ;;  %v830_v40 = vrot.slane %v829_v26, 4  ;;  %v863_v22 = vrot.slane %v861_v42, 4  ;;  %v870_v51 = vshll.u32 %v9286_v6, 16  ;;  %v844_v38 = vrot.slane %v843_v16, 4 }
  0xad   : > { %v853_v28 = vor.u32 %v852_v12, %v848_v20  ;;  %v866_v41 = vrot.slane %v864_v2, 5  ;;  %v874_v30 = vshrl.u32 %v9286_v6, 16  ;;  %v858_v48 = vrot.slane %v856_v21, 5 }
  0xae   : > { %v835_v56 = vsel %vm7424_vm5, %v830_v40, %v834_v1  ;;  %v872_v3 = vrot.slane %v870_v51, 5  ;;  %v880_v52 = vshll.u32 %v9287_v18, 16  ;;  %v849_v24 = vsel %vm7424_vm5, %v844_v38, %v848_v20 }
  0xaf   : > { %5201 = vst [vmem:[%s7017_s8 + $0x250] sm:$0xf] %v835_v56  ;;  %v854_v36 = vrot.slane %v853_v28, 4  ;;  %v867_v39 = vor.u32 %v866_v41, %v863_v22  ;;  %v876_v15 = vrot.slane %v874_v30, 4  ;;  %5202 = vst [vmem:[%s7017_s8 + $0x25c] sm:$0xf] %v849_v24 }
  0xb0   : > { %v882_v47 = vrot.slane %v880_v52, 5  ;;  %v7604_v53 = vmov (%p131_p0), 0.0   ;;  %v7606_v27 = vmov (%p131_p0), 0.0  }
  0xb1   : > { %v859_v4 = vsel %vm7424_vm5, %v854_v36, %v858_v48  ;;  %v868_v13 = vrot.slane %v867_v39, 4  ;;  %v877_v55 = vor.u32 %v876_v15, %v872_v3 }
  0xb2   : > { %5203 = vst [vmem:[%s7017_s8 + $0x268] sm:$0xf] %v859_v4  ;;  %133 = sbr.rel (!%p131_p0) target bundleno = 51 (0x33), region = 137 }
  0xb3   : > { %v873_v54 = vsel %vm7424_vm5, %v868_v13, %v872_v3  ;;  %v878_v5 = vrot.slane %v877_v55, 4 }
  0xb4   : > { %5204 = vst [vmem:[%s7017_s8 + $0x274] sm:$0xf] %v873_v54 }
  0xb5   : > { %v883_v31 = vsel %vm7424_vm5, %v878_v5, %v882_v47 }
  0xb6   : > { %5205 = vst [vmem:[%s7017_s8 + $0x280] sm:$0xf] %v883_v31 }
  0xb7 LB: > { %9288 = vst [vmem:[#allocation11_spill] sm:$0xff] %v6770_v53  ;;  %9289 = vst [vmem:[#allocation12_spill] sm:$0xff] %v6774_v27  ;;  %v6488_v23 = vld [vmem:[%s9257_s1 + $0x138] sm:$0xff]   ;;  %v6491_v44 = vld [vmem:[%s9257_s1 + $0x130] sm:$0xff]   ;;  %s5950_s20 = smul.u32 96, %s6778_s11  ;;  %vm2893_vm6 = vcmask 519168   ;;  %s6778_s11 = sphi %s7608_s11, %s1133_s11   ;;  %v6774_v27 = vphi %v7606_v27, %v9319_v27   ;;  %v6770_v53 = vphi %v7604_v53, %v9318_v53  }
  0xb8   : > { %v6489_v19 = vld [vmem:[%s9257_s1 + $0x178] sm:$0xff]   ;;  %6052 = vmatprep.subr.bf16.mxu0 %v6488_v23  ;;  %v6492_v61 = vld [vmem:[%s9257_s1 + $0x170] sm:$0xff]   ;;  %v6494_v58 = vld [vmem:[%s9257_s1 + $0x128] sm:$0xff]   ;;  %vm2910_vm7 = vcmask 523264  }
  0xb9   : > { %v6490_v25 = vld [vmem:[%s9257_s1 + $0xf8] sm:$0xff]   ;;  %6292 = vmatprep.subr.bf16.mxu1 %v6489_v19  ;;  %v6493_v10 = vld [vmem:[%s9257_s1 + $0xf0] sm:$0xff]   ;;  %v6495_v34 = vld [vmem:[%s9257_s1 + $0x168] sm:$0xff]   ;;  %s7689_s10 = scalar_lea.vmem [#allocation3], %s5950_s20 }
  0xba   : > { %6053 = vmatpush3.bf16.msra.mxu0 %v6490_v25  ;;  %6293 = vmatpush3.bf16.msra.mxu1 %v6489_v19  ;;  %v6496_v63 = vld [vmem:[%s9257_s1 + $0xe8] sm:$0xff]   ;;  %v6497_v8 = vld [vmem:[%s9257_s1 + $0x120] sm:$0xff]   ;;  %v6500_v11 = vld [vmem:[%s9257_s1 + $0x118] sm:$0xff]  }
  0xbb   : > { %6054 = vmatprep.subr.bf16.mxu0 %v6491_v44  ;;  %6294 = vmatprep.subr.bf16.mxu1 %v6492_v61  ;;  %v6498_v32 = vld [vmem:[%s9257_s1 + $0x160] sm:$0xff]   ;;  %v6501_v35 = vld [vmem:[%s9257_s1 + $0x158] sm:$0xff]   ;;  %v6503_v59 = vld [vmem:[%s9257_s1 + $0x110] sm:$0xff]  }
  0xbc   : > { %v6499_v14 = vld [vmem:[%s9257_s1 + $0xe0] sm:$0xff]   ;;  %v6502_v45 = vld [vmem:[%s9257_s1 + $0xd8] sm:$0xff]   ;;  %v6504_v50 = vld [vmem:[%s9257_s1 + $0x150] sm:$0xff]  }
  0xbd   : > { %v6505_v33 = vld [vmem:[%s9257_s1 + $0xd0] sm:$0xff]   ;;  %v6506_v0 = vld [vmem:[%s9257_s1 + $0x108] sm:$0xff]   ;;  %v6509_v49 = vld [vmem:[%s9257_s1 + $0x100] sm:$0xff]  }
  0xbe   : > { %6055 = vmatpush3.bf16.msra.mxu0 %v6493_v10  ;;  %6295 = vmatpush3.bf16.msra.mxu1 %v6492_v61  ;;  %v6507_v43 = vld [vmem:[%s9257_s1 + $0x148] sm:$0xff]   ;;  %v6510_v17 = vld [vmem:[%s9257_s1 + $0x140] sm:$0xff]   ;;  %v6517_v26 = vld [vmem:[%s9257_s1 + $0x78] sm:$0xff]  }
  0xbf   : > { %6056 = vmatprep.subr.bf16.mxu0 %v6494_v58  ;;  %6296 = vmatprep.subr.bf16.mxu1 %v6495_v34  ;;  %v6508_v57 = vld [vmem:[%s9257_s1 + $0xc8] sm:$0xff]   ;;  %v6511_v60 = vld [vmem:[%s9257_s1 + $0xc0] sm:$0xff]   ;;  %v6518_v21 = vld [vmem:[%s9257_s1 + $0xb8] sm:$0xff]  }
  0xc0   : > { %v7692_v37 = vld [vmem:[%s7689_s10 + $0x1c] ss:$12 sps:$4 sm:$0xff]   ;;  %v6515_v46 = vld [vmem:[%s7689_s10 + $0x20] ss:$12 sps:$4 sm:$0xff]   ;;  %v7703_v20 = vld [vmem:[%s7689_s10 + $0x18] ss:$12 sps:$4 sm:$0xff]  }
  0xc1   : > { %1609 = vmatprep.mubr.bf16.mxu0 %v7692_v37  ;;  %6308 = vmatprep.mubr.bf16.mxu1 %v6515_v46  ;;  %v6516_v62 = vld [vmem:[%s7689_s10 + $0x38] ss:$12 sps:$4 sm:$0xff]   ;;  %v6520_v7 = vld [vmem:[%s9257_s1 + $0x70] sm:$0xff]   ;;  %v6527_v40 = vld [vmem:[%s9257_s1 + $0x68] sm:$0xff]  }
  0xc2   : > { %6057 = vmatpush3.bf16.msra.mxu0 %v6496_v63  ;;  %6297 = vmatpush3.bf16.msra.mxu1 %v6495_v34  ;;  %v6519_v42 = vld [vmem:[%s9257_s1 + $0x38] sm:$0xff]   ;;  %v7716_v16 = vld [vmem:[%s7689_s10 + $0x34] ss:$12 sps:$4 sm:$0xff]   ;;  %v6529_v51 = vld [vmem:[%s9257_s1 + $0x28] sm:$0xff]  }
  0xc3   : > { %6058 = vmatprep.subr.bf16.mxu0 %v6497_v8  ;;  %6298 = vmatprep.subr.bf16.mxu1 %v6498_v32  ;;  %v6524_v12 = vld [vmem:[%s7689_s10 + $0x50] ss:$12 sps:$4 sm:$0xff]   ;;  %v6526_v6 = vld [vmem:[%s7689_s10 + $0x68] ss:$12 sps:$4 sm:$0xff]   ;;  %v6530_v38 = vld [vmem:[%s9257_s1 + $0x60] sm:$0xff]  }
  0xc4   : > { %v6521_v2 = vld [vmem:[%s9257_s1 + $0x30] sm:$0xff]   ;;  %v7741_v28 = vld [vmem:[%s7689_s10 + $0x4c] ss:$12 sps:$4 sm:$0xff]   ;;  %v6531_v30 = vld [vmem:[%s9257_s1 + $0x20] sm:$0xff]  }
  0xc5   : > { %v7728_v1 = vld [vmem:[%s7689_s10 + $0x30] ss:$12 sps:$4 sm:$0xff]   ;;  %v7753_v48 = vld [vmem:[%s7689_s10 + $0x48] ss:$12 sps:$4 sm:$0xff]   ;;  %v6544_v39 = vld [vmem:[%s7689_s10 + $0x200] ss:$12 sps:$4 sm:$0xff]  }
  0xc6   : > { %6059 = vmatpush3.bf16.msra.mxu0 %v6499_v14  ;;  %6299 = vmatpush3.bf16.msra.mxu1 %v6498_v32  ;;  %v6528_v22 = vld [vmem:[%s9257_s1 + $0xb0] sm:$0xff]   ;;  %v6537_v56 = vld [vmem:[%s9257_s1 + $0x58] sm:$0xff]   ;;  %v6538_v3 = vld [vmem:[%s9257_s1 + $0xa8] sm:$0xff]  }
  0xc7   : > { %6060 = vmatprep.subr.bf16.mxu0 %v6500_v11  ;;  %6300 = vmatprep.subr.bf16.mxu1 %v6501_v35  ;;  %v6534_v41 = vld [vmem:[%s7689_s10 + $0x1d0] ss:$12 sps:$4 sm:$0xff]   ;;  %v6536_v18 = vld [vmem:[%s7689_s10 + $0x1e8] ss:$12 sps:$4 sm:$0xff]   ;;  %v7775_v4 = vld [vmem:[%s7689_s10 + $0x60] ss:$12 sps:$4 sm:$0xff]  }
  0xc8   : > { %v6539_v52 = vld [vmem:[%s9257_s1 + $0x18] sm:$0xff]   ;;  %v6540_v24 = vld [vmem:[%s9257_s1 + $0x50] sm:$0xff]   ;;  %v6547_v13 = vld [vmem:[%s9257_s1 + $0x48] sm:$0xff]  }
  0xc9   : > { %v7766_v36 = vld [vmem:[%s7689_s10 + $0x64] ss:$12 sps:$4 sm:$0xff]   ;;  %v6549_v5 = vld [vmem:[%s9257_s1 + $0x8] sm:$0xff]   ;;  %v6558_v25 = vld [vmem:[%s9257_s1 + $0x98] sm:$0xff]  }
  0xca   : > { %6061 = vmatpush3.bf16.msra.mxu0 %v6502_v45  ;;  %6301 = vmatpush3.bf16.msra.mxu1 %v6501_v35  ;;  %v6541_v15 = vld [vmem:[%s9257_s1 + $0x10] sm:$0xff]   ;;  %v6548_v55 = vld [vmem:[%s9257_s1 + $0xa0] sm:$0xff]   ;;  %v7791_v31 = vld [vmem:[%s7689_s10 + $0x1cc] ss:$12 sps:$4 sm:$0xff]  }
  0xcb   : > { %6062 = vmatprep.subr.bf16.mxu0 %v6503_v59  ;;  %6302 = vmatprep.subr.bf16.mxu1 %v6504_v50  ;;  %v6546_v54 = vld [vmem:[%s7689_s10 + $0x218] ss:$12 sps:$4 sm:$0xff]   ;;  %v6554_v44 = vld [vmem:[%s7689_s10] ss:$12 sps:$4 sm:$0xff]   ;;  %v7804_v61 = vld [vmem:[%s7689_s10 + $0x1c8] ss:$12 sps:$4 sm:$0xff]  }
  0xcc   : > { %v6550_v47 = vld [vmem:[%s9257_s1 + $0x40] sm:$0xff]   ;;  %v6562_v10 = vld [vmem:[%s9257_s1 + $0x90] sm:$0xff]   ;;  %v6566_v34 = vld [vmem:[%s9257_s1 + $0x88] sm:$0xff]  }
  0xcd   : > { %v6551_v23 = vld [vmem:[%s9257_s1] sm:$0xff]   ;;  %v6571_v63 = vld [vmem:[%s9257_s1 + $0x238] sm:$0xff]   ;;  %v6581_v35 = vld [vmem:[%s9257_s1 + $0x230] sm:$0xff]  }
  0xce   : > { %6063 = vmatpush3.bf16.msra.mxu0 %v6505_v33  ;;  %6303 = vmatpush3.bf16.msra.mxu1 %v6504_v50  ;;  %v6556_v19 = vld [vmem:[%s7689_s10 + $0x4] ss:$12 sps:$4 sm:$0xff]   ;;  %v7825_v32 = vld [vmem:[%s7689_s10 + $0x1e0] ss:$12 sps:$4 sm:$0xff]   ;;  %v7828_v14 = vld [vmem:[%s7689_s10 + $0x1fc] ss:$12 sps:$4 sm:$0xff]  }
  0xcf   : > { %6064 = vmatprep.subr.bf16.mxu0 %v6506_v0  ;;  %6304 = vmatprep.subr.bf16.mxu1 %v6507_v43  ;;  %v7810_v58 = vld [vmem:[%s7689_s10 + $0x1e4] ss:$12 sps:$4 sm:$0xff]   ;;  %v6577_v11 = vld [vmem:[%s9257_s1 + $0x1f8] sm:$0xff]   ;;  %v7844_v59 = vld [vmem:[%s7689_s10 + $0x214] ss:$12 sps:$4 sm:$0xff]  }
  0xd0   : > { %v6570_v8 = vld [vmem:[%s9257_s1 + $0x80] sm:$0xff]   ;;  %v6586_v50 = vld [vmem:[%s9257_s1 + $0x228] sm:$0xff]   ;;  %v7857_v0 = vld [vmem:[%s7689_s10 + $0x210] ss:$12 sps:$4 sm:$0xff]  }
  0xd1   : > { %v7841_v45 = vld [vmem:[%s7689_s10 + $0x1f8] ss:$12 sps:$4 sm:$0xff]   ;;  %v6576_v46 = vld [vmem:[%s7689_s10 + $0x20] ss:$12 sps:$4 sm:$0xff]  }
  0xd2   : > { %6065 = vmatpush3.bf16.msra.mxu0 %v6508_v57  ;;  %6305 = vmatpush3.bf16.msra.mxu1 %v6507_v43  ;;  %v6589_v33 = vld [vmem:[%s9257_s1 + $0x220] sm:$0xff]   ;;  %v6574_v57 = vld [vmem:[%s7689_s10 + $0x8] ss:$12 sps:$4 sm:$0xff]  }
  0xd3   : > { %6066 = vmatprep.subr.bf16.mxu0 %v6509_v49  ;;  %6306 = vmatprep.subr.bf16.mxu1 %v6510_v17  ;;  %v6572_v43 = vld [vmem:[%s7689_s10 + $0x1b4] ss:$12 sps:$4 sm:$0xff]   ;;  %v6594_v49 = vld [vmem:[%s9257_s1 + $0x218] sm:$0xff]  }
  0xd6   : > { %6067 = vmatpush3.bf16.msra.mxu0 %v6511_v60  ;;  %6307 = vmatpush3.bf16.msra.mxu1 %v6510_v17  ;;  %v6575_v17 = vld [vmem:[%s7689_s10 + $0x1b0] ss:$12 sps:$4 sm:$0xff]  }
  0xd7   : > { %6132 = vmatprep.subr.bf16.mxu1 %v6517_v26  ;;  %6324 = vmatprep.subr.bf16.mxu0 %v6518_v21  ;;  %v6578_v60 = vld [vmem:[%s9257_s1 + $0x1b8] sm:$0xff]   ;;  %v6579_v26 = vld [vmem:[%s9257_s1 + $0x1f0] sm:$0xff]  }
  0xd9   : > { %1610 = vmatmul.mubr.bf16.vlgmr.msra.gmra.mxu0 %v7703_v20  ;;  %6309 = vmatmul.mubr.bf16.vlgmr.msra.gmra.mxu1 %v6516_v62  ;;  %v6580_v62 = vld [vmem:[%s9257_s1 + $0x1b0] sm:$0xff]  }
  0xda   : > { %6133 = vmatpush3.bf16.msra.mxu1 %v6519_v42  ;;  %6325 = vmatpush3.bf16.msra.mxu0 %v6518_v21  ;;  %v6602_v21 = vld [vmem:[%s9257_s1 + $0x208] sm:$0xff]  }
  0xdb   : > { %6134 = vmatprep.subr.bf16.mxu1 %v6520_v7  ;;  %1617 = vmatprep.mubr.bf16.mxu0 %v7716_v16  ;;  %v6584_v42 = vld [vmem:[%s9257_s1 + $0x1e8] sm:$0xff]   ;;  %v6605_v7 = vld [vmem:[%s9257_s1 + $0x200] sm:$0xff]  }
  0xdc   : > { %6312 = vmatprep.mubr.bf16.mxu1 %v6524_v12  ;;  %6326 = vmatprep.subr.bf16.mxu0 %v6528_v22  ;;  %v6583_v12 = vld [vmem:[%s7689_s10 + $0x50] ss:$12 sps:$4 sm:$0xff]  }
  0xde   : > { %6135 = vmatpush3.bf16.msra.mxu1 %v6521_v2  ;;  %6327 = vmatpush3.bf16.msra.mxu0 %v6528_v22  ;;  %v6585_v2 = vld [vmem:[%s9257_s1 + $0x1a8] sm:$0xff]   ;;  %v6590_v22 = vld [vmem:[%s7689_s10 + $0x1b8] ss:$12 sps:$4 sm:$0xff]  }
  0xdf   : > { %6136 = vmatprep.subr.bf16.mxu1 %v6527_v40  ;;  %6328 = vmatprep.subr.bf16.mxu0 %v6538_v3  ;;  %v6587_v40 = vld [vmem:[%s9257_s1 + $0x1e0] sm:$0xff]  }
  0xe1   : > { %1618 = vmatmul.mubr.bf16.gmra.mxu0 %v7728_v1  ;;  %6313 = vmatmul.mubr.bf16.gmra.mxu1 %v6526_v6  ;;  %v6588_v6 = vld [vmem:[%s9257_s1 + $0x1a0] sm:$0xff]  }
  0xe2   : > { %6137 = vmatpush3.bf16.msra.mxu1 %v6529_v51  ;;  %1625 = vmatprep.mubr.bf16.mxu0 %v7741_v28  ;;  %v6592_v51 = vld [vmem:[%s9257_s1 + $0x1d8] sm:$0xff]  }
  0xe3   : > { %6138 = vmatprep.subr.bf16.mxu1 %v6530_v38  ;;  %6316 = vmatprep.mubr.bf16.mxu1 %v6534_v41  ;;  %v6591_v38 = vld [vmem:[%s7689_s10 + $0x1d0] ss:$12 sps:$4 sm:$0xff]  }
  0xe4   : > { %6329 = vmatpush3.bf16.msra.mxu0 %v6538_v3  ;;  %v6593_v41 = vld [vmem:[%s9257_s1 + $0x198] sm:$0xff]   ;;  %v6596_v3 = vld [vmem:[%s9257_s1 + $0x190] sm:$0xff]  }
  0xe5   : > { %6330 = vmatprep.subr.bf16.mxu0 %v6548_v55 }
  0xe6   : > { %6139 = vmatpush3.bf16.msra.mxu1 %v6531_v30  ;;  %v6595_v30 = vld [vmem:[%s9257_s1 + $0x1d0] sm:$0xff]  }
  0xe7   : > { %6140 = vmatprep.subr.bf16.mxu1 %v6537_v56  ;;  %v6598_v56 = vld [vmem:[%s7689_s10 + $0x1e8] ss:$12 sps:$4 sm:$0xff]  }
  0xe8   : > { %6331 = vmatpush3.bf16.msra.mxu0 %v6548_v55  ;;  %v6607_v55 = vld [vmem:[%s7689_s10 + $0x50] ss:$12 sps:$4 sm:$0xff]  }
  0xe9   : > { %1626 = vmatmul.mubr.bf16.gmra.mxu0 %v7753_v48  ;;  %6317 = vmatmul.mubr.bf16.gmra.mxu1 %v6536_v18  ;;  %v6600_v18 = vld [vmem:[%s9257_s1 + $0x1c8] sm:$0xff]  }
  0xea   : > { %6141 = vmatpush3.bf16.msra.mxu1 %v6539_v52  ;;  %1633 = vmatprep.mubr.bf16.mxu0 %v7766_v36  ;;  %v6599_v52 = vld [vmem:[%s7689_s10 + $0x200] ss:$12 sps:$4 sm:$0xff]  }
  0xeb   : > { %6142 = vmatprep.subr.bf16.mxu1 %v6540_v24  ;;  %6320 = vmatprep.mubr.bf16.mxu1 %v6544_v39  ;;  %v6601_v24 = vld [vmem:[%s9257_s1 + $0x188] sm:$0xff]   ;;  %v6603_v39 = vld [vmem:[%s9257_s1 + $0x1c0] sm:$0xff]  }
  0xec   : > { %6332 = vmatprep.subr.bf16.mxu0 %v6558_v25 }
  0xed   : > { %6333 = vmatpush3.bf16.msra.mxu0 %v6558_v25 }
  0xee   : > { %6143 = vmatpush3.bf16.msra.mxu1 %v6541_v15  ;;  %6334 = vmatprep.subr.bf16.mxu0 %v6562_v10  ;;  %v6606_v15 = vld [vmem:[%s7689_s10 + $0x38] ss:$12 sps:$4 sm:$0xff]  }
  0xef   : > { %6144 = vmatprep.subr.bf16.mxu1 %v6547_v13  ;;  %v6604_v13 = vld [vmem:[%s9257_s1 + $0x180] sm:$0xff]  }
  0xf1   : > { %1634 = vmatmul.mubr.bf16.gmra.mxu0 %v7775_v4  ;;  %6321 = vmatmul.mubr.bf16.gmra.mxu1 %v6546_v54  ;;  %v6608_v54 = vld [vmem:[%s7689_s10 + $0x68] ss:$12 sps:$4 sm:$0xff]  }
  0xf2   : > { %6145 = vmatpush3.bf16.msra.mxu1 %v6549_v5  ;;  %1641 = vmatprep.mubr.bf16.mxu0 %v7791_v31  ;;  %v6609_v5 = vld [vmem:[%s7689_s10 + $0x80] ss:$12 sps:$4 sm:$0xff]  }
  0xf3   : > { %6146 = vmatprep.subr.bf16.mxu1 %v6550_v47  ;;  %2075 = vmatprep.mubr.bf16.mxu1 %v6556_v19  ;;  %v6613_v47 = vld [vmem:[%s7689_s10 + $0x1e8] ss:$12 sps:$4 sm:$0xff]  }
  0xf4   : > { %6335 = vmatpush3.bf16.msra.mxu0 %v6562_v10 }
  0xf5   : > { %6336 = vmatprep.subr.bf16.mxu0 %v6566_v34 }
  0xf6   : > { %6147 = vmatpush3.bf16.msra.mxu1 %v6551_v23  ;;  %v6615_v23 = vld [vmem:[%s7689_s10 + $0x218] ss:$12 sps:$4 sm:$0xff]  }
  0xf7   : > { %6356 = vmatprep.subr.bf16.mxu1 %v6571_v63 }
  0xf8   : > { %6337 = vmatpush3.bf16.msra.mxu0 %v6566_v34 }
  0xf9   : > { %1642 = vmatmul.mubr.bf16.gmra.mxu0 %v7804_v61  ;;  %2076 = vmatmul.mubr.bf16.vlgmr.msra.gmra.mxu1 %v6554_v44 }
  0xfa   : > { %1649 = vmatprep.mubr.bf16.mxu0 %v7810_v58  ;;  %2083 = vmatprep.mubr.bf16.mxu1 %v7692_v37  ;;  %v6597_v37 = vld [vmem:[%s9257_s1 + $0x210] sm:$0xff]  }
  0xfb   : > { %6357 = vmatpush3.bf16.msra.mxu1 %v6571_v63  ;;  %6338 = vmatprep.subr.bf16.mxu0 %v6570_v8 }
  0xfc   : > { %6339 = vmatpush3.bf16.msra.mxu0 %v6570_v8  ;;  %6358 = vmatprep.subr.bf16.mxu1 %v6581_v35 }
  0xfd   : > { %6212 = vmatprep.subr.bf16.mxu0 %v6577_v11 }
  0xff   : > { %6359 = vmatpush3.bf16.msra.mxu1 %v6581_v35 }
 0x100   : > { %6360 = vmatprep.subr.bf16.mxu1 %v6586_v50 }
 0x101   : > { %1650 = vmatmul.mubr.bf16.gmra.mxu0 %v7825_v32  ;;  %2084 = vmatmul.mubr.bf16.gmra.mxu1 %v7703_v20  ;;  %v6582_v20 = vld [vmem:[%s7689_s10 + $0x38] ss:$12 sps:$4 sm:$0xff]  }
 0x102   : > { %1657 = vmatprep.mubr.bf16.mxu0 %v7828_v14  ;;  %2091 = vmatprep.mubr.bf16.mxu1 %v7716_v16 }
 0x103   : > { %6361 = vmatpush3.bf16.msra.mxu1 %v6586_v50 }
 0x104   : > { %6362 = vmatprep.subr.bf16.mxu1 %v6589_v33 }
 0x107   : > { %6363 = vmatpush3.bf16.msra.mxu1 %v6589_v33 }
 0x108   : > { %6364 = vmatprep.subr.bf16.mxu1 %v6594_v49 }
 0x109   : > { %1658 = vmatmul.mubr.bf16.gmra.mxu0 %v7841_v45  ;;  %2092 = vmatmul.mubr.bf16.gmra.mxu1 %v7728_v1 }
 0x10a   : > { %1665 = vmatprep.mubr.bf16.mxu0 %v7844_v59  ;;  %2099 = vmatprep.mubr.bf16.mxu1 %v7741_v28 }
 0x10b   : > { %6365 = vmatpush3.bf16.msra.mxu1 %v6594_v49 }
 0x10c   : > { %6366 = vmatprep.subr.bf16.mxu1 %v6597_v37 }
 0x10f   : > { %6367 = vmatpush3.bf16.msra.mxu1 %v6597_v37 }
 0x110   : > { %6368 = vmatprep.subr.bf16.mxu1 %v6602_v21 }
 0x111   : > { %1666 = vmatmul.mubr.bf16.gmra.mxu0 %v7857_v0  ;;  %2100 = vmatmul.mubr.bf16.gmra.mxu1 %v7753_v48 }
 0x112   : > { %2107 = vmatprep.mubr.bf16.mxu1 %v6572_v43  ;;  %6340 = vmatprep.mubr.bf16.mxu0 %v6574_v57 }
 0x113   : > { %6369 = vmatpush3.bf16.msra.mxu1 %v6602_v21 }
 0x114   : > { %6370 = vmatprep.subr.bf16.mxu1 %v6605_v7 }
 0x117   : > { %6371 = vmatpush3.bf16.msra.mxu1 %v6605_v7 }
 0x119   : > { %2108 = vmatmul.mubr.bf16.gmra.mxu1 %v6575_v17  ;;  %6341 = vmatmul.mubr.bf16.vlgmr.msra.gmra.mxu0 %v6576_v46 }
 0x11a   : > { %6213 = vmatpush3.bf16.msra.mxu0 %v6578_v60  ;;  %2115 = vmatprep.mubr.bf16.mxu1 %v7791_v31  ;;  %v6610_v31 = vld [vmem:[%s7689_s10 + $0x7c] ss:$12 sps:$4 sm:$0xff]  }
 0x11b   : > { %6214 = vmatprep.subr.bf16.mxu0 %v6579_v26  ;;  %6344 = vmatprep.mubr.bf16.mxu0 %v6582_v20 }
 0x11e   : > { %6215 = vmatpush3.bf16.msra.mxu0 %v6580_v62 }
 0x11f   : > { %6216 = vmatprep.subr.bf16.mxu0 %v6584_v42 }
 0x121   : > { %2116 = vmatmul.mubr.bf16.gmra.mxu1 %v7804_v61  ;;  %6345 = vmatmul.mubr.bf16.gmra.mxu0 %v6583_v12 }
 0x122   : > { %6217 = vmatpush3.bf16.msra.mxu0 %v6585_v2  ;;  %2123 = vmatprep.mubr.bf16.mxu1 %v7810_v58 }
 0x123   : > { %6218 = vmatprep.subr.bf16.mxu0 %v6587_v40  ;;  %6348 = vmatprep.mubr.bf16.mxu0 %v6590_v22 }
 0x126   : > { %6219 = vmatpush3.bf16.msra.mxu0 %v6588_v6 }
 0x127   : > { %6220 = vmatprep.subr.bf16.mxu0 %v6592_v51 }
 0x129   : > { %2124 = vmatmul.mubr.bf16.gmra.mxu1 %v7825_v32  ;;  %6349 = vmatmul.mubr.bf16.gmra.mxu0 %v6591_v38 }
 0x12a   : > { %6221 = vmatpush3.bf16.msra.mxu0 %v6593_v41  ;;  %2131 = vmatprep.mubr.bf16.mxu1 %v7828_v14 }
 0x12b   : > { %6222 = vmatprep.subr.bf16.mxu0 %v6595_v30  ;;  %6352 = vmatprep.mubr.bf16.mxu0 %v6598_v56 }
 0x12e   : > { %6223 = vmatpush3.bf16.msra.mxu0 %v6596_v3 }
 0x12f   : > { %6224 = vmatprep.subr.bf16.mxu0 %v6600_v18 }
 0x131   : > { %2132 = vmatmul.mubr.bf16.gmra.mxu1 %v7841_v45  ;;  %6353 = vmatmul.mubr.bf16.gmra.mxu0 %v6599_v52 }
 0x132   : > { %6225 = vmatpush3.bf16.msra.mxu0 %v6601_v24  ;;  %2626 = vmatprep.mubr.bf16.mxu0 %v7716_v16  ;;  %v6614_v16 = vld [vmem:[%s7689_s10 + $0x200] ss:$12 sps:$4 sm:$0xff]  }
 0x133   : > { %6226 = vmatprep.subr.bf16.mxu0 %v6603_v39  ;;  %6372 = vmatprep.mubr.bf16.mxu1 %v6606_v15 }
 0x136   : > { %6227 = vmatpush3.bf16.msra.mxu0 %v6604_v13 }
 0x139   : > { %2627 = vmatmul.mubr.bf16.vlgmr.msra.gmra.mxu0 %v7728_v1  ;;  %6373 = vmatmul.mubr.bf16.vlgmr.msra.gmra.mxu1 %v6607_v55  ;;  %v6612_v1 = vld [vmem:[%s7689_s10 + $0x78] ss:$12 sps:$4 sm:$0xff]  }
 0x13a   : > { %2634 = vmatprep.mubr.bf16.mxu0 %v7741_v28  ;;  %6376 = vmatprep.mubr.bf16.mxu1 %v6608_v54  ;;  %v6616_v28 = vld [vmem:[%s7689_s10 + $0x230] ss:$12 sps:$4 sm:$0xff]  }
 0x141   : > { %2635 = vmatmul.mubr.bf16.gmra.mxu0 %v7753_v48  ;;  %6377 = vmatmul.mubr.bf16.gmra.mxu1 %v6609_v5  ;;  %v6617_v48 = vld [vmem:[%s7689_s10 + $0x22c] ss:$12 sps:$4 sm:$0xff]  }
 0x142   : > { %2642 = vmatprep.mubr.bf16.mxu0 %v7766_v36  ;;  %6380 = vmatprep.mubr.bf16.mxu1 %v6613_v47  ;;  %v6619_v36 = vld [vmem:[%s7689_s10 + $0x228] ss:$12 sps:$4 sm:$0xff]   ;;  %s5968_s10 = sshll.u32 %s6778_s11, 5  ;;  %s1133_s11 = sadd.s32 1, %s6778_s11  }
 0x143   : > { %s8086_s16 = scalar_lea.vmem [#allocation4], %s5968_s10  ;;  %p1130_p1 = scmp.ge.s32.totalorder %s1133_s11, 4  }
 0x144   :  { %vm3016_vm8 = vcmask (%p1130_p1), 1043456   ;;  %vm3017_vm9 = vcmask (%p1130_p1), 523268   ;;  %s8253_s19 = smov (%p1130_p1), 0  }
 0x145   :  { %vm3018_vm10 = vmor (%p1130_p1), %vm3017_vm9, %vm3016_vm8 }
 0x149   : > { %2643 = vmatmul.mubr.bf16.gmra.mxu0 %v7775_v4  ;;  %6381 = vmatmul.mubr.bf16.gmra.mxu1 %v6614_v16 }
 0x14a   : > { %2650 = vmatprep.mubr.bf16.mxu0 %v6610_v31  ;;  %6384 = vmatprep.mubr.bf16.mxu1 %v6615_v23 }
 0x151   : > { %2651 = vmatmul.mubr.bf16.gmra.mxu0 %v6612_v1  ;;  %6385 = vmatmul.mubr.bf16.gmra.mxu1 %v6616_v28 }
 0x152   : > { %2658 = vmatprep.mubr.bf16.mxu0 %v7810_v58 }
 0x159   : > { %2659 = vmatmul.mubr.bf16.gmra.mxu0 %v7825_v32 }
 0x15a   : > { %2666 = vmatprep.mubr.bf16.mxu0 %v7828_v14 }
 0x161   : > { %2667 = vmatmul.mubr.bf16.gmra.mxu0 %v7841_v45 }
 0x162   : > { %2674 = vmatprep.mubr.bf16.mxu0 %v7844_v59 }
 0x169   : > { %2675 = vmatmul.mubr.bf16.gmra.mxu0 %v7857_v0 }
 0x16a   : > { %2682 = vmatprep.mubr.bf16.mxu0 %v6617_v48 }
 0x171   : > { %2683 = vmatmul.mubr.bf16.gmra.mxu0 %v6619_v36 }
 0x199   : > { %v6068_v4 = vpop.f32.mrf.mxu0  ;;  %v6310_v19 = vpop.f32.mrf.mxu1 }
 0x19b   : > { %v6069_v25 = vpop.f32.mrf.mxu0  ;;  %v1708_v44 = vpop.f32.mrf.mxu1 }
 0x19c   : > { %v6070_v61 = vadd.f32 %v6069_v25, %v6068_v4 }
 0x19d   : > { %v6071_v10 = vpop.f32.mrf.mxu0  ;;  %v6311_v58 = vpop.f32.mrf.mxu1 }
 0x19e   : > { %v7958_v34 = vadd.f32 %v6070_v61, %v1708_v44 }
 0x19f   : > { %v6072_v63 = vpop.f32.mrf.mxu0  ;;  %v1711_v8 = vpop.f32.mrf.mxu1 }
 0x1a0   : > { %v6073_v32 = vadd.f32 %v6072_v63, %v6071_v10 }
 0x1a1   : > { %v6074_v14 = vpop.f32.mrf.mxu0  ;;  %v6314_v11 = vpop.f32.mrf.mxu1 }
 0x1a2   : > { %v7960_v35 = vadd.f32 %v6073_v32, %v1711_v8 }
 0x1a3   : > { %v6075_v45 = vpop.f32.mrf.mxu0  ;;  %v1724_v59 = vpop.f32.mrf.mxu1 }
 0x1a4   : > { %v6076_v50 = vadd.f32 %v6075_v45, %v6074_v14 }
 0x1a5   : > { %v6077_v33 = vpop.f32.mrf.mxu0  ;;  %v6315_v0 = vpop.f32.mrf.mxu1 }
 0x1a6   : > { %v7962_v43 = vadd.f32 %v6310_v19, %v6076_v50 }
 0x1a7   : > { %v6078_v57 = vpop.f32.mrf.mxu0  ;;  %v1727_v49 = vpop.f32.mrf.mxu1 }
 0x1a8   : > { %v6079_v17 = vadd.f32 %v6078_v57, %v6077_v33 }
 0x1a9   : > { %v6080_v37 = vpop.f32.mrf.mxu0  ;;  %v6318_v46 = vpop.f32.mrf.mxu1 }
 0x1aa   : > { %v7964_v60 = vadd.f32 %v6311_v58, %v6079_v17 }
 0x1ab   : > { %v6081_v26 = vpop.f32.mrf.mxu0  ;;  %v1740_v20 = vpop.f32.mrf.mxu1 }
 0x1ac   : > { %v6082_v21 = vadd.f32 %v6081_v26, %v6080_v37 }
 0x1ad   : > { %v6083_v62 = vpop.f32.mrf.mxu0  ;;  %v6319_v42 = vpop.f32.mrf.mxu1 }
 0x1ae   : > { %v7966_v7 = vadd.f32 %v6082_v21, %v1724_v59 }
 0x1af   : > { %v6084_v12 = vpop.f32.mrf.mxu0  ;;  %v1743_v2 = vpop.f32.mrf.mxu1 }
 0x1b0   : > { %v6085_v40 = vadd.f32 %v6084_v12, %v6083_v62 }
 0x1b1   : > { %v6086_v22 = vpop.f32.mrf.mxu0  ;;  %v6322_v6 = vpop.f32.mrf.mxu1 }
 0x1b2   : > { %v7968_v51 = vadd.f32 %v6085_v40, %v1727_v49 }
 0x1b3   : > { %v6087_v38 = vpop.f32.mrf.mxu0  ;;  %v1756_v41 = vpop.f32.mrf.mxu1 }
 0x1b4   : > { %v6088_v30 = vadd.f32 %v6087_v38, %v6086_v22 }
 0x1b5   : > { %v6089_v56 = vpop.f32.mrf.mxu0  ;;  %v6323_v3 = vpop.f32.mrf.mxu1 }
 0x1b6   : > { %v7970_v18 = vadd.f32 %v6314_v11, %v6088_v30 }
 0x1b7   : > { %v6090_v52 = vpop.f32.mrf.mxu0  ;;  %v1759_v24 = vpop.f32.mrf.mxu1 }
 0x1b8   : > { %v6091_v39 = vadd.f32 %v6090_v52, %v6089_v56 }
 0x1b9   : > { %v6092_v15 = vpop.f32.mrf.mxu0  ;;  %v7972_v13 = vpop.f32.mrf.mxu1 }
 0x1ba   : > { %v7974_v55 = vadd.f32 %v6315_v0, %v6091_v39 }
 0x1bb   : > { %v6093_v54 = vpop.f32.mrf.mxu0  ;;  %v7976_v5 = vpop.f32.mrf.mxu1 }
 0x1bc   : > { %v6094_v47 = vadd.f32 %v6093_v54, %v6092_v15 }
 0x1bd   : > { %v6095_v16 = vpop.f32.mrf.mxu0  ;;  %v7978_v31 = vpop.f32.mrf.mxu1 }
 0x1be   : > { %v7980_v23 = vadd.f32 %v6094_v47, %v1740_v20 }
 0x1bf   : > { %v6096_v1 = vpop.f32.mrf.mxu0  ;;  %v7982_v28 = vpop.f32.mrf.mxu1 }
 0x1c0   : > { %v6097_v48 = vadd.f32 %v6096_v1, %v6095_v16 }
 0x1c1   : > { %v6098_v36 = vpop.f32.mrf.mxu0  ;;  %v7984_v4 = vpop.f32.mrf.mxu1 }
 0x1c2   : > { %v7986_v19 = vadd.f32 %v6097_v48, %v1743_v2 }
 0x1c3   : > { %v6099_v25 = vpop.f32.mrf.mxu0  ;;  %v7988_v44 = vpop.f32.mrf.mxu1 }
 0x1c4   : > { %v6100_v61 = vadd.f32 %v6099_v25, %v6098_v36 }
 0x1c5   : > { %v6101_v10 = vpop.f32.mrf.mxu0  ;;  %v7990_v58 = vpop.f32.mrf.mxu1 }
 0x1c6   : > { %v7992_v63 = vadd.f32 %v6318_v46, %v6100_v61 }
 0x1c7   : > { %v6102_v8 = vpop.f32.mrf.mxu0  ;;  %v7994_v32 = vpop.f32.mrf.mxu1 }
 0x1c8   : > { %v6103_v14 = vadd.f32 %v6102_v8, %v6101_v10 }
 0x1c9   : > { %v6104_v11 = vpop.f32.mrf.mxu0  ;;  %v7996_v45 = vpop.f32.mrf.mxu1 }
 0x1ca   : > { %v7998_v59 = vadd.f32 %v6319_v42, %v6103_v14 }
 0x1cb   : > { %v6105_v50 = vpop.f32.mrf.mxu0  ;;  %v8000_v33 = vpop.f32.mrf.mxu1 }
 0x1cc   : > { %9290 = vst [vmem:[#allocation13_spill] sm:$0xff] %v7998_v59  ;;  %v6106_v0 = vadd.f32 %v6105_v50, %v6104_v11 }
 0x1cd   : > { %v6107_v57 = vpop.f32.mrf.mxu0  ;;  %v8002_v49 = vpop.f32.mrf.mxu1 }
 0x1ce   : > { %v8004_v17 = vadd.f32 %v6106_v0, %v1756_v41 }
 0x1cf   : > { %v6108_v37 = vpop.f32.mrf.mxu0  ;;  %v8006_v46 = vpop.f32.mrf.mxu1 }
 0x1d0   : > { %9291 = vst [vmem:[#allocation14_spill] sm:$0xff] %v8004_v17  ;;  %v6109_v26 = vadd.f32 %v6108_v37, %v6107_v57 }
 0x1d1   : > { %v6110_v20 = vpop.f32.mrf.mxu0  ;;  %v8008_v21 = vpop.f32.mrf.mxu1 }
 0x1d2   : > { %v8010_v62 = vadd.f32 %v6109_v26, %v1759_v24 }
 0x1d3   : > { %v6111_v42 = vpop.f32.mrf.mxu0  ;;  %v8012_v12 = vpop.f32.mrf.mxu1 }
 0x1d4   : > { %9292 = vst [vmem:[#allocation15_spill] sm:$0xff] %v8010_v62  ;;  %v6112_v2 = vadd.f32 %v6111_v42, %v6110_v20 }
 0x1d5   : > { %v6113_v40 = vpop.f32.mrf.mxu0  ;;  %v8014_v22 = vpop.f32.mrf.mxu1 }
 0x1d6   : > { %v1765_v38 = vadd.f32 %v6322_v6, %v6112_v2 }
 0x1d7   : > { %v6114_v30 = vpop.f32.mrf.mxu0  ;;  %v8016_v41 = vpop.f32.mrf.mxu1 }
 0x1d8   : > { %v6115_v56 = vadd.f32 %v6114_v30, %v6113_v40 }
 0x1d9   : > { %v8018_v52 = vpop.f32.mrf.mxu1  ;;  %v8020_v39 = vpop.f32.mrf.mxu0 }
 0x1da   : > { %v1768_v15 = vadd.f32 %v6323_v3, %v6115_v56 }
 0x1db   : > { %v8022_v54 = vpop.f32.mrf.mxu1  ;;  %v2174_v24 = vpop.f32.mrf.mxu0 }
 0x1dd   : > { %v8024_v47 = vpop.f32.mrf.mxu1  ;;  %v8026_v16 = vpop.f32.mrf.mxu0 }
 0x1df   : > { %v8028_v1 = vpop.f32.mrf.mxu1  ;;  %v2177_v48 = vpop.f32.mrf.mxu0 }
 0x1e1   : > { %v8030_v6 = vpop.f32.mrf.mxu1  ;;  %v8032_v36 = vpop.f32.mrf.mxu0 }
 0x1e3   : > { %v8034_v25 = vpop.f32.mrf.mxu1  ;;  %v8036_v61 = vpop.f32.mrf.mxu0 }
 0x1e5   : > { %v8038_v10 = vpop.f32.mrf.mxu1  ;;  %v8040_v3 = vpop.f32.mrf.mxu0 }
 0x1e6   : > { %9293 = vst [vmem:[#allocation16_spill] sm:$0xff] %v8038_v10 }
 0x1e7   : > { %v8042_v8 = vpop.f32.mrf.mxu1  ;;  %v8044_v14 = vpop.f32.mrf.mxu0 }
 0x1e8   : > { %9294 = vst [vmem:[#allocation17_spill] sm:$0xff] %v8042_v8 }
 0x1e9   : > { %v8046_v11 = vpop.f32.mrf.mxu1  ;;  %v8048_v50 = vpop.f32.mrf.mxu0 }
 0x1ea   : > { %9295 = vst [vmem:[#allocation18_spill] sm:$0xff] %v8046_v11  ;;  %9296 = vst [vmem:[#allocation19_spill] sm:$0xff] %v8048_v50 }
 0x1eb   : > { %v8050_v0 = vpop.f32.mrf.mxu1  ;;  %v8052_v57 = vpop.f32.mrf.mxu0 }
 0x1ec   : > { %9297 = vst [vmem:[#allocation20_spill] sm:$0xff] %v8050_v0 }
 0x1ed   : > { %v8054_v37 = vpop.f32.mrf.mxu1  ;;  %v8056_v26 = vpop.f32.mrf.mxu0 }
 0x1ee   : > { %9298 = vst [vmem:[#allocation21_spill] sm:$0xff] %v8054_v37  ;;  %9299 = vst [vmem:[#allocation22_spill] sm:$0xff] %v8056_v26  ;;  %v6150_v37 = vadd.f32 %v7976_v5, %v7972_v13 }
 0x1ef   : > { %v8058_v20 = vpop.f32.mrf.mxu1  ;;  %v8060_v42 = vpop.f32.mrf.mxu0 }
 0x1f0   : > { %9300 = vst [vmem:[#allocation23_spill] sm:$0xff] %v8058_v20 }
 0x1f1   : > { %v6190_v2 = vpop.f32.mrf.mxu1  ;;  %v6354_v40 = vpop.f32.mrf.mxu0 }
 0x1f3   : > { %v6191_v30 = vpop.f32.mrf.mxu1  ;;  %v8062_v56 = vpop.f32.mrf.mxu0 }
 0x1f4   : > { %9301 = vst [vmem:[#allocation24_spill] sm:$0xff] %v8062_v56  ;;  %v6192_v29 = vadd.f32 %v6191_v30, %v6190_v2  ;;  %v6153_v2 = vadd.f32 %v7982_v28, %v7978_v31 }
 0x1f5   : > { %v6193_v53 = vpop.f32.mrf.mxu1  ;;  %v6355_v27 = vpop.f32.mrf.mxu0 }
 0x1f6   : > { %v2134_v62 = vadd.f32 %v6192_v29, %v1765_v38  ;;  %v2078_v29 = vadd.f32 %v6150_v37, %v7958_v34 }
 0x1f7   : > { %v6194_v17 = vpop.f32.mrf.mxu1  ;;  %v8064_v59 = vpop.f32.mrf.mxu0 }
 0x1f8   : > { %9302 = vst [vmem:[#allocation25_spill] sm:$0xff] %v8064_v59  ;;  %v8068_v26 = vadd.f32 %v6354_v40, %v2134_v62  ;;  %v6195_v20 = vadd.f32 %v6194_v17, %v6193_v53  ;;  %v2175_v13 = vadd.f32 %v2174_v24, %v2078_v29  ;;  %v2081_v17 = vadd.f32 %v6153_v2, %v7960_v35 }
 0x1f9   : > { %v6228_v0 = vpop.f32.mrf.mxu0  ;;  %v6374_v11 = vpop.f32.mrf.mxu1 }
 0x1fa   : > { %v2137_v50 = vadd.f32 %v6195_v20, %v1768_v15  ;;  %v6156_v20 = vadd.f32 %v7988_v44, %v7984_v4  ;;  %v2178_v34 = vadd.f32 %v2177_v48, %v2081_v17 }
 0x1fb   : > { %v6229_v8 = vpop.f32.mrf.mxu0  ;;  %v2725_v10 = vpop.f32.mrf.mxu1 }
 0x1fc   : > { %v8073_v38 = vadd.f32 %v6355_v27, %v2137_v50  ;;  %v6230_v30 = vadd.f32 %v6229_v8, %v6228_v0  ;;  %v6159_v27 = vadd.f32 %v7994_v32, %v7990_v58  ;;  %v6162_v32 = vadd.f32 %v8000_v33, %v7996_v45 }
 0x1fd   : > { %v6231_v59 = vpop.f32.mrf.mxu0  ;;  %v6375_v56 = vpop.f32.mrf.mxu1 }
 0x1fe   : > { %v2726_v5 = vadd.f32 %v6230_v30, %v2725_v10  ;;  %v2089_v4 = vadd.f32 %v6159_v27, %v7964_v60  ;;  %v2094_v27 = vadd.f32 %v6162_v32, %v7966_v7 }
 0x1ff   : > { %v6232_v62 = vpop.f32.mrf.mxu0  ;;  %v2728_v53 = vpop.f32.mrf.mxu1 }
 0x200   : > { %v2788_v40 = vadd.f32 %v2726_v5, %v2175_v13  ;;  %v6233_v15 = vadd.f32 %v6232_v62, %v6231_v59  ;;  %v2086_v59 = vadd.f32 %v6156_v20, %v7962_v43  ;;  %v2191_v7 = vadd.f32 %v8036_v61, %v2094_v27 }
 0x201   : > { %v6234_v31 = vpop.f32.mrf.mxu0  ;;  %v8082_v35 = vpop.f32.mrf.mxu1 }
 0x202   : > { %v2810_v28 = vadd.f32 %v7602_v9, %v2788_v40  ;;  %v2729_v8 = vadd.f32 %v6233_v15, %v2728_v53  ;;  %v2183_v48 = vadd.f32 %v8020_v39, %v2086_v59  ;;  %v2186_v15 = vadd.f32 %v8026_v16, %v2089_v4 }
 0x203   : > { %v6235_v24 = vpop.f32.mrf.mxu0  ;;  %v2741_v62 = vpop.f32.mrf.mxu1  ;;  %v6165_v16 = vadd.f32 %v8006_v46, %v8002_v49  ;;  %v6168_v4 = vadd.f32 %v8012_v12, %v8008_v21 }
 0x204   : > { %v5951_v10 = vpack.c.bf16 %v2810_v28, %v2810_v28  ;;  %v2789_v50 = vadd.f32 %v2729_v8, %v2178_v34  ;;  %v6236_v0 = vadd.f32 %v6235_v24, %v6234_v31  ;;  %v2949_v44 = vmul.f32 %v2810_v28, %v2810_v28 }
 0x205   : > { %v6237_v37 = vpop.f32.mrf.mxu0  ;;  %v2911_v43 = vsel %vm2910_vm7, %v2810_v28, 0.0  ;;  %v6379_v8 = vpop.f32.mrf.mxu1 }
 0x206   : > { %2894 = vst.msk [vmem:[%s8086_s16] sm:$0xf] %vm2893_vm6, %v5951_v10  ;;  %v2811_v58 = vadd.f32 %v7602_v9, %v2789_v50  ;;  %v2734_v2 = vadd.f32 %v6374_v11, %v6236_v0  ;;  %v2965_v20 = vsel %vm2910_vm7, %v2949_v44, 0.0 }
 0x207   : > { %v6238_v29 = vpop.f32.mrf.mxu0 }
 0x208   : > { %v5952_v30 = vpack.c.bf16 %v2811_v58, %v2811_v58  ;;  %v2912_v60 = vsel %vm2910_vm7, %v2811_v58, 0.0  ;;  %v2950_v13 = vmul.f32 %v2811_v58, %v2811_v58  ;;  %v6239_v5 = vadd.f32 %v6238_v29, %v6237_v37 }
 0x209   : > { %v2913_v53 = vadd.f32 %v2912_v60, %v2911_v43  ;;  %v2790_v17 = vadd.f32 %v2734_v2, %v2183_v48  ;;  %v6240_v40 = vpop.f32.mrf.mxu0  ;;  %v2744_v43 = vpop.f32.mrf.mxu1  ;;  %v2097_v2 = vadd.f32 %v6165_v16, %v7968_v51  ;;  %v6171_v51 = vadd.f32 %v8016_v41, %v8014_v22 }
 0x20a   : > { %2895 = vst.msk [vmem:[%s8086_s16 + $0x4] sm:$0xf] %vm2893_vm6, %v5952_v30  ;;  %v2966_v45 = vsel %vm2910_vm7, %v2950_v13, 0.0  ;;  %v2737_v33 = vadd.f32 %v6375_v56, %v6239_v5 }
 0x20b   : > { %v2967_v39 = vadd.f32 %v2966_v45, %v2965_v20  ;;  %v2812_v11 = vadd.f32 %v7602_v9, %v2790_v17  ;;  %v6241_v31 = vpop.f32.mrf.mxu0  ;;  %v2194_v12 = vadd.f32 %v8044_v14, %v2097_v2  ;;  %v8120_v17 = vpop.f32.mrf.mxu1 }
 0x20c   : > { %v2791_v34 = vadd.f32 %v2737_v33, %v2186_v15  ;;  %v6242_v28 = vadd.f32 %v6241_v31, %v6240_v40  ;;  %v2102_v40 = vadd.f32 %v6168_v4, %v7970_v18 }
 0x20d   : > { %v5953_v24 = vpack.c.bf16 %v2812_v11, %v2812_v11  ;;  %v2914_v10 = vsel %vm2910_vm7, %v2812_v11, 0.0  ;;  %v2951_v50 = vmul.f32 %v2812_v11, %v2812_v11  ;;  %v6243_v59 = vpop.f32.mrf.mxu0  ;;  %v2757_v18 = vpop.f32.mrf.mxu1 }
 0x20e   : > { %v2915_v0 = vadd.f32 %v2914_v10, %v2913_v53  ;;  %v2813_v56 = vadd.f32 %v7602_v9, %v2791_v34  ;;  %v2742_v37 = vadd.f32 %v6242_v28, %v2741_v62  ;;  %v2199_v11 = vadd.f32 %v8032_v36, %v2102_v40 }
 0x20f   : > { %2896 = vst.msk [vmem:[%s8086_s16 + $0x8] sm:$0xf] %vm2893_vm6, %v5953_v24  ;;  %v2968_v44 = vsel %vm2910_vm7, %v2951_v50, 0.0  ;;  %v6244_v49 = vpop.f32.mrf.mxu0  ;;  %v2105_v28 = vadd.f32 %v6171_v51, %v7974_v55  ;;  %v6174_v36 = vadd.f32 %v8022_v54, %v8018_v52  ;;  %v8143_v54 = vpop.f32.mrf.mxu1 }
 0x210   : > { %v2969_v46 = vadd.f32 %v2968_v44, %v2967_v39  ;;  %v5954_v58 = vpack.c.bf16 %v2813_v56, %v2813_v56  ;;  %v2916_v32 = vsel %vm2910_vm7, %v2813_v56, 0.0  ;;  %v2952_v48 = vmul.f32 %v2813_v56, %v2813_v56 }
 0x211   : > { %v2792_v29 = vadd.f32 %v2742_v37, %v2191_v7  ;;  %v2917_v30 = vadd.f32 %v2916_v32, %v2915_v0  ;;  %v6245_v60 = vadd.f32 %v6244_v49, %v6243_v59  ;;  %v6246_v13 = vpop.f32.mrf.mxu0  ;;  %v6177_v7 = vadd.f32 %v8028_v1, %v8024_v47 }
 0x212   : > { %2897 = vst.msk [vmem:[%s8086_s16 + $0xc] sm:$0xf] %vm2893_vm6, %v5954_v58  ;;  %v2970_v21 = vsel %vm2910_vm7, %v2952_v48, 0.0  ;;  %v2202_v55 = vadd.f32 %v8040_v3, %v2105_v28 }
 0x213   : > { %v2814_v61 = vadd.f32 %v7602_v9, %v2792_v29  ;;  %v2971_v5 = vadd.f32 %v2970_v21, %v2969_v46  ;;  %v2745_v62 = vadd.f32 %v6245_v60, %v2744_v43  ;;  %v6247_v53 = vpop.f32.mrf.mxu0  ;;  %v2760_v21 = vpop.f32.mrf.mxu1 }
 0x214   : > { %v6248_v15 = vadd.f32 %v6247_v53, %v6246_v13 }
 0x215   : > { %v5955_v20 = vpack.c.bf16 %v2814_v61, %v2814_v61  ;;  %v2918_v45 = vsel %vm2910_vm7, %v2814_v61, 0.0  ;;  %v2953_v33 = vmul.f32 %v2814_v61, %v2814_v61  ;;  %v2793_v39 = vadd.f32 %v2745_v62, %v2194_v12  ;;  %v6249_v14 = vpop.f32.mrf.mxu0 }
 0x216   : > { %v2919_v31 = vadd.f32 %v2918_v45, %v2917_v30  ;;  %v2750_v27 = vadd.f32 %v8082_v35, %v6248_v15  ;;  %v2113_v12 = vadd.f32 %v6177_v7, %v7986_v19 }
 0x217   : > { %2898 = vst.msk [vmem:[%s8086_s16 + $0x10] sm:$0xf] %vm2893_vm6, %v5955_v20  ;;  %v2972_v34 = vsel %vm2910_vm7, %v2953_v33, 0.0  ;;  %v2815_v22 = vadd.f32 %v7602_v9, %v2793_v39  ;;  %v6250_v41 = vpop.f32.mrf.mxu0 }
 0x218   : > { %v2973_v16 = vadd.f32 %v2972_v34, %v2971_v5  ;;  %v2794_v24 = vadd.f32 %v2750_v27, %v2199_v11  ;;  %v6251_v10 = vadd.f32 %v6250_v41, %v6249_v14  ;;  %v9303_v11 = vld [vmem:[#allocation16_spill] sm:$0xff] }
 0x219   : > { %v5956_v50 = vpack.c.bf16 %v2815_v22, %v2815_v22  ;;  %v2920_v35 = vsel %vm2910_vm7, %v2815_v22, 0.0  ;;  %v2954_v59 = vmul.f32 %v2815_v22, %v2815_v22  ;;  %v6252_v0 = vpop.f32.mrf.mxu0 }
 0x21a   : > { %v2921_v56 = vadd.f32 %v2920_v35, %v2919_v31  ;;  %v2816_v37 = vadd.f32 %v7602_v9, %v2794_v24  ;;  %v2753_v4 = vadd.f32 %v6379_v8, %v6251_v10  ;;  %v2110_v8 = vadd.f32 %v6174_v36, %v7980_v23  ;;  %v9304_v31 = vld [vmem:[#allocation17_spill] sm:$0xff]  ;;  %v9305_v10 = vld [vmem:[#allocation19_spill] sm:$0xff]  ;;  %v9306_v36 = vld [vmem:[#allocation18_spill] sm:$0xff] }
 0x21b   : > { %2899 = vst.msk [vmem:[%s8086_s16 + $0x14] sm:$0xf] %vm2893_vm6, %v5956_v50  ;;  %v2974_v44 = vsel %vm2910_vm7, %v2954_v59, 0.0  ;;  %v6253_v52 = vpop.f32.mrf.mxu0  ;;  %v6180_v23 = vadd.f32 %v8034_v25, %v8030_v6  ;;  %v6183_v27 = vadd.f32 %v9304_v31, %v9303_v11  ;;  %v9307_v50 = vld [vmem:[#allocation20_spill] sm:$0xff] }
 0x21c   : > { %v2975_v49 = vadd.f32 %v2974_v44, %v2973_v16  ;;  %v5957_v46 = vpack.c.bf16 %v2816_v37, %v2816_v37  ;;  %v2922_v58 = vsel %vm2910_vm7, %v2816_v37, 0.0  ;;  %v2955_v32 = vmul.f32 %v2816_v37, %v2816_v37 }
 0x21d   : > { %v2923_v48 = vadd.f32 %v2922_v58, %v2921_v56  ;;  %v2795_v43 = vadd.f32 %v2753_v4, %v2202_v55  ;;  %v6254_v2 = vadd.f32 %v6253_v52, %v6252_v0  ;;  %v6255_v47 = vpop.f32.mrf.mxu0  ;;  %v2207_v3 = vadd.f32 %v8052_v57, %v2110_v8  ;;  %v9308_v55 = vld [vmem:[#allocation13_spill] sm:$0xff]  ;;  %v9309_v8 = vld [vmem:[#allocation22_spill] sm:$0xff] }
 0x21e   : > { %2900 = vst.msk [vmem:[%s8086_s16 + $0x18] sm:$0xf] %vm2893_vm6, %v5957_v46  ;;  %v2976_v1 = vsel %vm2910_vm7, %v2955_v32, 0.0  ;;  %v2210_v57 = vadd.f32 %v8060_v42, %v2113_v12  ;;  %v2118_v19 = vadd.f32 %v6180_v23, %v7992_v63  ;;  %v6186_v35 = vadd.f32 %v9307_v50, %v9306_v36 }
 0x21f   : > { %v2977_v29 = vadd.f32 %v2976_v1, %v2975_v49  ;;  %v2817_v30 = vadd.f32 %v7602_v9, %v2795_v43  ;;  %v2758_v60 = vadd.f32 %v6254_v2, %v2757_v18  ;;  %v6256_v13 = vpop.f32.mrf.mxu0  ;;  %v8165_v18 = vpop.f32.mrf.mxu1  ;;  %v2121_v44 = vadd.f32 %v6183_v27, %v9308_v55 }
 0x220   : > { %v6257_v61 = vadd.f32 %v6256_v13, %v6255_v47  ;;  %v2215_v63 = vadd.f32 %v9305_v10, %v2118_v19 }
 0x221   : > { %v5958_v5 = vpack.c.bf16 %v2817_v30, %v2817_v30  ;;  %v2924_v62 = vsel %vm2910_vm7, %v2817_v30, 0.0  ;;  %v2956_v53 = vmul.f32 %v2817_v30, %v2817_v30  ;;  %v2796_v51 = vadd.f32 %v2758_v60, %v2207_v3  ;;  %v6258_v40 = vpop.f32.mrf.mxu0  ;;  %v2773_v58 = vpop.f32.mrf.mxu1  ;;  %v9310_v3 = vld [vmem:[#allocation21_spill] sm:$0xff]  ;;  %v9312_v60 = vld [vmem:[#allocation14_spill] sm:$0xff] }
 0x222   : > { %v2925_v15 = vadd.f32 %v2924_v62, %v2923_v48  ;;  %v2761_v20 = vadd.f32 %v6257_v61, %v2760_v21  ;;  %v2218_v48 = vadd.f32 %v9309_v8, %v2121_v44  ;;  %v2126_v13 = vadd.f32 %v6186_v35, %v9312_v60 }
 0x223   : > { %2901 = vst.msk [vmem:[%s8086_s16 + $0x1c] sm:$0xf] %vm2893_vm6, %v5958_v5  ;;  %v2978_v45 = vsel %vm2910_vm7, %v2956_v53, 0.0  ;;  %v2818_v33 = vadd.f32 %v7602_v9, %v2796_v51  ;;  %v6259_v6 = vpop.f32.mrf.mxu0  ;;  %v6387_v53 = vpop.f32.mrf.mxu1  ;;  %v9313_v51 = vld [vmem:[#allocation24_spill] sm:$0xff] }
 0x224   : > { %v2979_v25 = vadd.f32 %v2978_v45, %v2977_v29  ;;  %v2797_v39 = vadd.f32 %v2761_v20, %v2210_v57  ;;  %v6260_v14 = vadd.f32 %v6259_v6, %v6258_v40  ;;  %v9311_v29 = vld [vmem:[#allocation23_spill] sm:$0xff]  ;;  %v2223_v40 = vadd.f32 %v9313_v51, %v2126_v13 }
 0x225   : > { %v5959_v34 = vpack.c.bf16 %v2818_v33, %v2818_v33  ;;  %v2926_v42 = vsel %vm2910_vm7, %v2818_v33, 0.0  ;;  %v2957_v22 = vmul.f32 %v2818_v33, %v2818_v33  ;;  %v6261_v41 = vpop.f32.mrf.mxu0  ;;  %v6189_v30 = vadd.f32 %v9311_v29, %v9310_v3  ;;  %v2776_v27 = vpop.f32.mrf.mxu1 }
 0x226   : > { %v2927_v28 = vadd.f32 %v2926_v42, %v2925_v15  ;;  %v2819_v16 = vadd.f32 %v7602_v9, %v2797_v39  ;;  %v2766_v24 = vadd.f32 %v8120_v17, %v6260_v14 }
 0x227   : > { %2902 = vst.msk [vmem:[%s8086_s16 + $0x80] sm:$0xf] %vm2893_vm6, %v5959_v34  ;;  %v2980_v59 = vsel %vm2910_vm7, %v2957_v22, 0.0  ;;  %v6262_v0 = vpop.f32.mrf.mxu0 }
 0x228   : > { %v2981_v56 = vadd.f32 %v2980_v59, %v2979_v25  ;;  %v5960_v37 = vpack.c.bf16 %v2819_v16, %v2819_v16  ;;  %v2928_v4 = vsel %vm2910_vm7, %v2819_v16, 0.0  ;;  %v2958_v7 = vmul.f32 %v2819_v16, %v2819_v16  ;;  %v9314_v25 = vld [vmem:[#allocation15_spill] sm:$0xff] }
 0x229   : > { %v2929_v52 = vadd.f32 %v2928_v4, %v2927_v28  ;;  %v2798_v17 = vadd.f32 %v2766_v24, %v2215_v63  ;;  %v6263_v49 = vadd.f32 %v6262_v0, %v6261_v41  ;;  %v6264_v46 = vpop.f32.mrf.mxu0  ;;  %v2129_v39 = vadd.f32 %v6189_v30, %v9314_v25  ;;  %v9315_v28 = vld [vmem:[#allocation25_spill] sm:$0xff] }
 0x22a   : > { %2903 = vst.msk [vmem:[%s8086_s16 + $0x84] sm:$0xf] %vm2893_vm6, %v5960_v37  ;;  %v2982_v32 = vsel %vm2910_vm7, %v2958_v7, 0.0 }
 0x22b   : > { %v2983_v43 = vadd.f32 %v2982_v32, %v2981_v56  ;;  %v2820_v2 = vadd.f32 %v7602_v9, %v2798_v17  ;;  %v2769_v47 = vadd.f32 %v8143_v54, %v6263_v49  ;;  %v6265_v1 = vpop.f32.mrf.mxu0  ;;  %v2226_v16 = vadd.f32 %v9315_v28, %v2129_v39  ;;  %v3011_v28 = vld [vmem:[%s9259_s3] sm:$0x1] (%p1130_p1) }
 0x22c   : > { %v6266_v21 = vadd.f32 %v6265_v1, %v6264_v46 }
 0x22d   : > { %v5961_v23 = vpack.c.bf16 %v2820_v2, %v2820_v2  ;;  %v2930_v12 = vsel %vm2910_vm7, %v2820_v2, 0.0  ;;  %v2959_v61 = vmul.f32 %v2820_v2, %v2820_v2  ;;  %v2799_v5 = vadd.f32 %v2769_v47, %v2218_v48  ;;  %v6267_v62 = vpop.f32.mrf.mxu0 }
 0x22e   : > { %v2931_v57 = vadd.f32 %v2930_v12, %v2929_v52  ;;  %v2774_v15 = vadd.f32 %v6266_v21, %v2773_v58 }
 0x22f   : > { %2904 = vst.msk [vmem:[%s8086_s16 + $0x88] sm:$0xf] %vm2893_vm6, %v5961_v23  ;;  %v2984_v54 = vsel %vm2910_vm7, %v2959_v61, 0.0  ;;  %v2821_v20 = vadd.f32 %v7602_v9, %v2799_v5  ;;  %v6268_v45 = vpop.f32.mrf.mxu0 }
 0x230   : > { %v2985_v33 = vadd.f32 %v2984_v54, %v2983_v43  ;;  %v2800_v6 = vadd.f32 %v2774_v15, %v2223_v40  ;;  %v6269_v19 = vadd.f32 %v6268_v45, %v6267_v62 }
 0x231   : > { %v5962_v14 = vpack.c.bf16 %v2821_v20, %v2821_v20  ;;  %v2932_v11 = vsel %vm2910_vm7, %v2821_v20, 0.0  ;;  %v2960_v31 = vmul.f32 %v2821_v20, %v2821_v20  ;;  %v6270_v34 = vpop.f32.mrf.mxu0 }
 0x232   : > { %v2822_v42 = vadd.f32 %v7602_v9, %v2800_v6  ;;  %v2933_v22 = vadd.f32 %v2932_v11, %v2931_v57  ;;  %v2777_v41 = vadd.f32 %v6269_v19, %v2776_v27  ;;  %v9316_v19 = vld [vmem:[#allocation12_spill] sm:$0xff] }
 0x233   : > { %2905 = vst.msk [vmem:[%s8086_s16 + $0x8c] sm:$0xf] %vm2893_vm6, %v5962_v14  ;;  %v2986_v24 = vsel %vm2910_vm7, %v2960_v31, 0.0  ;;  %v6271_v10 = vpop.f32.mrf.mxu0  ;;  %v9317_v14 = vld [vmem:[#allocation11_spill] sm:$0xff] }
 0x234   : > { %v5963_v63 = vpack.c.bf16 %v2822_v42, %v2822_v42  ;;  %v2934_v36 = vsel %vm2910_vm7, %v2822_v42, 0.0  ;;  %v2961_v50 = vmul.f32 %v2822_v42, %v2822_v42  ;;  %v2987_v35 = vadd.f32 %v2986_v24, %v2985_v33 }
 0x235   : > { %v2935_v59 = vadd.f32 %v2934_v36, %v2933_v22  ;;  %v2801_v0 = vadd.f32 %v2777_v41, %v2226_v16  ;;  %v6272_v56 = vadd.f32 %v6271_v10, %v6270_v34  ;;  %v6273_v37 = vpop.f32.mrf.mxu0  ;;  %v9320_v42 = vmov (%p1130_p1), 0   ;;  %v8246_v10 = vld [vmem:[%s9260_s4] sm:$0x1] (%p1130_p1) }
 0x236   : > { %2906 = vst.msk [vmem:[%s8086_s16 + $0x90] sm:$0xf] %vm2893_vm6, %v5963_v63  ;;  %v2988_v4 = vsel %vm2910_vm7, %v2961_v50, 0.0 }
 0x237   : > { %v2989_v7 = vadd.f32 %v2988_v4, %v2987_v35  ;;  %v2823_v55 = vadd.f32 %v7602_v9, %v2801_v0  ;;  %v2782_v44 = vadd.f32 %v8165_v18, %v6272_v56  ;;  %v6274_v52 = vpop.f32.mrf.mxu0  ;;  %3019 = vst.msk [vmem:[#allocation5] sm:$0xff] (%p1130_p1), %vm3018_vm10, %v9320_v42  ;;  %3020 = vst.msk [vmem:[#allocation5 + $0x8] sm:$0xff] (%p1130_p1), %vm3018_vm10, %v9320_v42 }
 0x238   : > { %v6275_v17 = vadd.f32 %v6274_v52, %v6273_v37  ;;  %3021 = vst.msk [vmem:[#allocation5 + $0x120] sm:$0xff] (%p1130_p1), %vm3018_vm10, %v9320_v42  ;;  %3022 = vst.msk [vmem:[#allocation5 + $0x128] sm:$0xff] (%p1130_p1), %vm3018_vm10, %v9320_v42 }
 0x239   : > { %v5964_v49 = vpack.c.bf16 %v2823_v55, %v2823_v55  ;;  %v2936_v46 = vsel %vm2910_vm7, %v2823_v55, 0.0  ;;  %v2962_v58 = vmul.f32 %v2823_v55, %v2823_v55  ;;  %v2802_v32 = vadd.f32 %v2782_v44, %v8068_v26  ;;  %3024 = vst.msk [vmem:[#allocation5 + $0x110] sm:$0xff] (%p1130_p1), %vm3018_vm10, %v9320_v42  ;;  %3025 = vst.msk [vmem:[#allocation5 + $0x118] sm:$0xff] (%p1130_p1), %vm3018_vm10, %v9320_v42 }
 0x23a   : > { %v2937_v8 = vadd.f32 %v2936_v46, %v2935_v59  ;;  %v2785_v48 = vadd.f32 %v6387_v53, %v6275_v17  ;;  %3026 = vst.msk [vmem:[#allocation5 + $0x230] sm:$0xff] (%p1130_p1), %vm3018_vm10, %v9320_v42  ;;  %3027 = vst.msk [vmem:[#allocation5 + $0x238] sm:$0xff] (%p1130_p1), %vm3018_vm10, %v9320_v42 }
 0x23b   : > { %2907 = vst.msk [vmem:[%s8086_s16 + $0x94] sm:$0xf] %vm2893_vm6, %v5964_v49  ;;  %v2990_v43 = vsel %vm2910_vm7, %v2962_v58, 0.0  ;;  %v2824_v2 = vadd.f32 %v7602_v9, %v2802_v32 }
 0x23c   : > { %v2991_v47 = vadd.f32 %v2990_v43, %v2989_v7  ;;  %v2803_v18 = vadd.f32 %v2785_v48, %v8073_v38 }
 0x23d   : > { %v5965_v1 = vpack.c.bf16 %v2824_v2, %v2824_v2  ;;  %v2938_v3 = vsel %vm2910_vm7, %v2824_v2, 0.0  ;;  %v2963_v29 = vmul.f32 %v2824_v2, %v2824_v2 }
 0x23e   : > { %v2939_v30 = vadd.f32 %v2938_v3, %v2937_v8  ;;  %v2825_v60 = vadd.f32 %v7602_v9, %v2803_v18 }
 0x23f   : > { %2908 = vst.msk [vmem:[%s8086_s16 + $0x98] sm:$0xf] %vm2893_vm6, %v5965_v1  ;;  %v2992_v26 = vsel %vm2910_vm7, %v2963_v29, 0.0 }
 0x240   : > { %v2993_v13 = vadd.f32 %v2992_v26, %v2991_v47  ;;  %v5966_v21 = vpack.c.bf16 %v2825_v60, %v2825_v60  ;;  %v2940_v23 = vsel %vm2910_vm7, %v2825_v60, 0.0  ;;  %v2964_v12 = vmul.f32 %v2825_v60, %v2825_v60 }
 0x241   : > { %v2941_v61 = vadd.f32 %v2940_v23, %v2939_v30 }
 0x242   : > { %2909 = vst.msk [vmem:[%s8086_s16 + $0x9c] sm:$0xf] %vm2893_vm6, %v5966_v21  ;;  %v2994_v38 = vsel %vm2910_vm7, %v2964_v12, 0.0 }
 0x243   : > { %v2942_v5 = vrot.slane %v2941_v61, 4  ;;  %v2995_v62 = vadd.f32 %v2994_v38, %v2993_v13 }
 0x245   : > { %v2943_v53 = vadd.f32 %v2942_v5, %v2941_v61  ;;  %v2996_v51 = vrot.slane %v2995_v62, 4 }
 0x247   : > { %v2944_v40 = vrot.slane %v2943_v53, 2  ;;  %v2997_v57 = vadd.f32 %v2996_v51, %v2995_v62 }
 0x249   : > { %v2945_v15 = vadd.f32 %v2944_v40, %v2943_v53  ;;  %v2998_v54 = vrot.slane %v2997_v57, 2 }
 0x24b   : > { %v2946_v20 = vrot.slane %v2945_v15, 1  ;;  %v2999_v45 = vadd.f32 %v2998_v54, %v2997_v57 }
 0x24d   : > { %v2947_v33 = vadd.f32 %v2946_v20, %v2945_v15  ;;  %v3000_v6 = vrot.slane %v2999_v45, 1 }
 0x24f   : > { %v2948_v25 = vadd.f32 %v9316_v19, %v2947_v33   ;;  %v3001_v39 = vadd.f32 %v3000_v6, %v2999_v45  ;;  %1132 = sbr.rel (!%p1130_p1) target bundleno = 183 (0xb7), region = 148 }
 0x251   : > { %v3002_v11 = vadd.f32 %v9317_v14, %v3001_v39   ;;  %v9319_v27 = vmov %v2948_v25  ;;  %v3004_v31 = vmul.f32 (%p1130_p1), 0.001953125, %v2948_v25 }
 0x253   : > { %v9318_v53 = vmov %v3002_v11  ;;  %v3005_v27 = vmul.f32 (%p1130_p1), 0.001953125, %v3002_v11  ;;  %v3006_v34 = vmul.f32 (%p1130_p1), %v3004_v31, %v3004_v31 }
 0x255   :  { %v3007_v9 = vsub.f32 %v3005_v27, %v3006_v34 }
 0x257   :  { %v3008_v22 = vmax.f32 %v3007_v9, 0.0 }
 0x259   :  { %v3009_v41 = vadd.f32 0.8, %v3008_v22 }
 0x25b   :  { %6620 = vrsqrt.f32 %v3009_v41 }
 0x268   :  { %v6621_v16 = vpop.eup %6620 }
 0x269   :  { %v8241_v24 = vmul.f32 %v6621_v16, %v3011_v28 }
 0x26b   :  { %v8249_v63 = vmul.f32 %v8241_v24, %v3004_v31 }
 0x26d   :  { %v3015_v36 = vsub.f32 %v8246_v10, %v8249_v63 }
 0x26e LB: > { %v3070_v50 = vlaneseq  ;;  %s5970_s3 = sshll.u32 %s6782_s19, 5  ;;  %s6802_s4 = smov 64   ;;  %vm3610_vm9 = vcmask 519171   ;;  %vm3611_vm10 = vsmask.f32 7950  ;;  %s6782_s19 = sphi %s8253_s19, %s3033_s19  }
 0x26f   : > { %s3037_s20 = scalar_lea.vmem [#allocation4], %s5970_s3  ;;  %s5987_s21 = sshll.u32 %s6782_s19, 6 }
 0x270   : > { %v3071_v35 = vshrl.u32 %v3070_v50, 7  ;;  %v8259_v59 = vld [vmem:[%s3037_s20 + $0x10] sm:$0xff]   ;;  %v8261_v56 = vld [vmem:[%s3037_s20] sm:$0xff]   ;;  %v8263_v37 = vld [vmem:[%s3037_s20 + $0x18] sm:$0xff]   ;;  %s8426_s22 = scalar_lea.vmem [#allocation5], %s5987_s21  ;;  %s3033_s19 = sadd.s32 1, %s6782_s19  }
 0x271   : > { %v6020_v4 = vunpack.c.l.bf16 %v8259_v59  ;;  %v6012_v7 = vunpack.c.l.bf16 %v8261_v56  ;;  %v6024_v55 = vunpack.c.l.bf16 %v8263_v37  ;;  %v8268_v44 = vld [vmem:[%s3037_s20 + $0x8] sm:$0xff]   ;;  %v8272_v17 = vld [vmem:[%s3037_s20 + $0x80] sm:$0xff]   ;;  %v6013_v49 = vunpack.c.h.bf16 %v8261_v56  ;;  %v8285_v48 = vld [vmem:[%s3037_s20 + $0x98] sm:$0xff]   ;;  %p3030_p2 = scmp.ge.s32.totalorder %s3033_s19, 4  }
 0x272   : > { %v3072_v0 = vsub.s32 0, %v3071_v35  ;;  %v8270_v52 = vld [vmem:[%s3037_s20 + $0x88] sm:$0xff]   ;;  %v6016_v32 = vunpack.c.l.bf16 %v8268_v44  ;;  %v8287_v43 = vld [vmem:[%s3037_s20 + $0x90] sm:$0xff]   ;;  %v6028_v2 = vunpack.c.l.bf16 %v8272_v17  ;;  %v6040_v47 = vunpack.c.l.bf16 %v8285_v48  ;;  %s8759_s25 = smov (%p3030_p2), 0  }
 0x273   : > { %v6032_v8 = vunpack.c.l.bf16 %v8270_v52  ;;  %v6036_v18 = vunpack.c.l.bf16 %v8287_v43  ;;  %v6017_v1 = vunpack.c.h.bf16 %v8268_v44 }
 0x274   : > { %v8276_v46 = vrot.slane %v8241_v24, %v3072_v0  ;;  %v8281_v58 = vrot.slane %v3015_v36, %v3072_v0 }
 0x276   : > { %v3078_v3 = vmul.f32 %v6020_v4, %v8276_v46  ;;  %v3074_v29 = vmul.f32 %v6012_v7, %v8276_v46  ;;  %v3080_v30 = vmul.f32 %v6024_v55, %v8276_v46  ;;  %v3076_v60 = vmul.f32 %v6016_v32, %v8276_v46 }
 0x277   : > { %v3084_v26 = vmul.f32 %v6032_v8, %v8276_v46  ;;  %v3082_v13 = vmul.f32 %v6028_v2, %v8276_v46  ;;  %v3088_v21 = vmul.f32 %v6040_v47, %v8276_v46  ;;  %v3086_v23 = vmul.f32 %v6036_v18, %v8276_v46 }
 0x278   : > { %v3100_v12 = vadd.f32 %v8281_v58, %v3078_v3  ;;  %v3096_v61 = vadd.f32 %v8281_v58, %v3074_v29  ;;  %v3102_v38 = vadd.f32 %v8281_v58, %v3080_v30  ;;  %v3098_v5 = vadd.f32 %v8281_v58, %v3076_v60 }
 0x279   : > { %v3106_v62 = vadd.f32 %v8281_v58, %v3084_v26  ;;  %v8307_v53 = vadd.f32 %v8281_v58, %v3082_v13  ;;  %v8310_v51 = vadd.f32 %v8281_v58, %v3088_v21  ;;  %v8313_v40 = vadd.f32 %v8281_v58, %v3086_v23 }
 0x27a   : > { %vm3116_vm11 = vcmp.ge.f32.partialorder %v3100_v12, 0.0  ;;  %v3132_v57 = vmul.f32 0.2, %v3100_v12  ;;  %vm3112_vm12 = vcmp.ge.f32.partialorder %v3096_v61, 0.0  ;;  %v3128_v15 = vmul.f32 0.2, %v3096_v61 }
 0x27b   : > { %vm3118_vm13 = vcmp.ge.f32.partialorder %v3102_v38, 0.0  ;;  %v3134_v54 = vmul.f32 0.2, %v3102_v38  ;;  %vm3114_vm14 = vcmp.ge.f32.partialorder %v3098_v5, 0.0  ;;  %v3130_v20 = vmul.f32 0.2, %v3098_v5 }
 0x27c   : > { %v3148_v45 = vsel %vm3116_vm11, %v3100_v12, %v3132_v57  ;;  %v3144_v33 = vsel %vm3112_vm12, %v3096_v61, %v3128_v15  ;;  %vm3122_vm15 = vcmp.ge.f32.partialorder %v3106_v62, 0.0  ;;  %v3138_v6 = vmul.f32 0.2, %v3106_v62 }
 0x27d   : > { %v5975_v19 = vpack.c.bf16 %v3148_v45, %v3148_v45  ;;  %v5971_v25 = vpack.c.bf16 %v3144_v33, %v3144_v33  ;;  %v3150_v39 = vsel %vm3118_vm13, %v3102_v38, %v3134_v54  ;;  %v3146_v14 = vsel %vm3114_vm14, %v3098_v5, %v3130_v20  ;;  %vm8422_vm13 = vmand %vm2893_vm6, %vm497_vm3 }
 0x27e   : > { %v5977_v11 = vpack.c.bf16 %v3150_v39, %v3150_v39  ;;  %v5973_v31 = vpack.c.bf16 %v3146_v14, %v3146_v14  ;;  %v3154_v27 = vsel %vm3122_vm15, %v3106_v62, %v3138_v6  ;;  %vm3120_vm0 = vcmp.ge.f32.partialorder %v8307_v53, 0.0 }
 0x27f   : > { %3217 = vrot.lane.b32.xlu1 %v5975_v19, %s6802_s4  ;;  %v3313_v34 = vshrl.u32 %v5975_v19, 16  ;;  %v3316_v42 = vshll.u32 %v5975_v19, 16  ;;  %3209 = vrot.lane.b32.xlu0 %v5971_v25, %s6802_s4  ;;  %v3281_v9 = vshrl.u32 %v5971_v25, 16  ;;  %v3284_v22 = vshll.u32 %v5971_v25, 16 }
 0x280   : > { %v3329_v41 = vshrl.u32 %v5977_v11, 16  ;;  %v3332_v28 = vshll.u32 %v5977_v11, 16  ;;  %v3297_v16 = vshrl.u32 %v5973_v31, 16  ;;  %v3300_v50 = vshll.u32 %v5973_v31, 16 }
 0x281   : > { %v8318_v35 = vrot.slane %v3313_v34, 7  ;;  %v3507_v0 = vrot.slane %v3313_v34, 4  ;;  %v3508_v4 = vrot.slane %v3316_v42, 5  ;;  %v8320_v7 = vrot.slane %v3281_v9, 7 }
 0x282   : > { %v3489_v55 = vrot.slane %v3281_v9, 4  ;;  %v3490_v32 = vrot.slane %v3284_v22, 5  ;;  %v8322_v8 = vrot.slane %v3329_v41, 7  ;;  %v3516_v2 = vrot.slane %v3329_v41, 4 }
 0x283   : > { %v8325_v47 = vor.u32 %v3316_v42, %v8318_v35  ;;  %v3509_v18 = vor.u32 %v3508_v4, %v3507_v0  ;;  %v8328_v3 = vor.u32 %v3284_v22, %v8320_v7  ;;  %v3517_v29 = vrot.slane %v3332_v28, 5  ;;  %3221 = vrot.lane.b32.xlu1 %v5977_v11, %s6802_s4  ;;  %3213 = vrot.lane.b32.xlu0 %v5973_v31, %s6802_s4 }
 0x284   : > { %v3491_v30 = vor.u32 %v3490_v32, %v3489_v55  ;;  %v8333_v60 = vor.u32 %v3332_v28, %v8322_v8  ;;  %v8335_v26 = vrot.slane %v3297_v16, 7  ;;  %v3498_v13 = vrot.slane %v3297_v16, 4 }
 0x285   : > { %v8337_v21 = vrot.slane %v3509_v18, 4  ;;  %v3518_v23 = vor.u32 %v3517_v29, %v3516_v2  ;;  %v3499_v12 = vrot.slane %v3300_v50, 5  ;;  %v5981_v61 = vpack.c.bf16 %v3154_v27, %v3154_v27 }
 0x286   : > { %v8339_v38 = vrot.slane %v3491_v30, 4  ;;  %v8342_v5 = vor.u32 %v3300_v50, %v8335_v26  ;;  %v3136_v62 = vmul.f32 0.2, %v8307_v53  ;;  %vm3126_vm1 = vcmp.ge.f32.partialorder %v8310_v51, 0.0 }
 0x287   : > { %v8346_v57 = vrot.slane %v3518_v23, 4  ;;  %v3500_v15 = vor.u32 %v3499_v12, %v3498_v13  ;;  %v3361_v54 = vshrl.u32 %v5981_v61, 16  ;;  %v3364_v20 = vshll.u32 %v5981_v61, 16  ;;  %3229 = vrot.lane.b32.xlu1 %v5981_v61, %s6802_s4 }
 0x288   : > { %v3152_v45 = vsel %vm3120_vm0, %v8307_v53, %v3136_v62  ;;  %v3142_v33 = vmul.f32 0.2, %v8310_v51  ;;  %vm3124_vm2 = vcmp.ge.f32.partialorder %v8313_v40, 0.0  ;;  %v3140_v6 = vmul.f32 0.2, %v8313_v40 }
 0x289   : > { %v8355_v19 = vrot.slane %v3500_v15, 4  ;;  %v8357_v25 = vrot.slane %v3361_v54, 7  ;;  %v3534_v39 = vrot.slane %v3361_v54, 4  ;;  %v3535_v14 = vrot.slane %v3364_v20, 5 }
 0x28a   : > { %v5979_v11 = vpack.c.bf16 %v3152_v45, %v3152_v45  ;;  %v3158_v31 = vsel %vm3126_vm1, %v8310_v51, %v3142_v33  ;;  %v3156_v27 = vsel %vm3124_vm2, %v8313_v40, %v3140_v6  ;;  %v3077_v53 = vmul.f32 %v6017_v1, %v8276_v46  ;;  %vm8461_vm1 = vmand %vm3610_vm9, %vm3611_vm10 }
 0x28b   : > { %v8365_v34 = vor.u32 %v3364_v20, %v8357_v25  ;;  %v3536_v42 = vor.u32 %v3535_v14, %v3534_v39  ;;  %v5985_v9 = vpack.c.bf16 %v3158_v31, %v3158_v31  ;;  %v5983_v22 = vpack.c.bf16 %v3156_v27, %v3156_v27 }
 0x28c   : > { %v3345_v41 = vshrl.u32 %v5979_v11, 16  ;;  %v3348_v28 = vshll.u32 %v5979_v11, 16  ;;  %3225 = vrot.lane.b32.xlu0 %v5979_v11, %s6802_s4  ;;  %v3099_v16 = vadd.f32 %v8281_v58, %v3077_v53  ;;  %v3075_v51 = vmul.f32 %v6013_v49, %v8276_v46 }
 0x28d   : > { %v8372_v40 = vrot.slane %v3536_v42, 4  ;;  %v3393_v44 = vshrl.u32 %v5985_v9, 16  ;;  %v3396_v1 = vshll.u32 %v5985_v9, 16  ;;  %3237 = vrot.lane.b32.xlu1 %v5985_v9, %s6802_s4  ;;  %v3377_v50 = vshrl.u32 %v5983_v22, 16 }
 0x28e   : > { %v8375_v0 = vrot.slane %v3345_v41, 7  ;;  %v3525_v4 = vrot.slane %v3345_v41, 4  ;;  %v3526_v55 = vrot.slane %v3348_v28, 5  ;;  %v3380_v32 = vshll.u32 %v5983_v22, 16 }
 0x28f   : > { %v8377_v2 = vrot.slane %v3393_v44, 7  ;;  %v3552_v18 = vrot.slane %v3393_v44, 4  ;;  %v3553_v29 = vrot.slane %v3396_v1, 5  ;;  %v8379_v30 = vrot.slane %v3377_v50, 7 }
 0x290   : > { %v8382_v56 = vor.u32 %v3348_v28, %v8375_v0  ;;  %v3527_v49 = vor.u32 %v3526_v55, %v3525_v4  ;;  %v3543_v13 = vrot.slane %v3377_v50, 4  ;;  %v3544_v23 = vrot.slane %v3380_v32, 5  ;;  %3233 = vrot.lane.b32.xlu0 %v5983_v22, %s6802_s4 }
 0x291   : > { %v8386_v12 = vor.u32 %v3396_v1, %v8377_v2  ;;  %v3554_v61 = vor.u32 %v3553_v29, %v3552_v18  ;;  %v8389_v62 = vor.u32 %v3380_v32, %v8379_v30  ;;  %vm3115_vm4 = vcmp.ge.f32.partialorder %v3099_v16, 0.0 }
 0x292   : > { %v8391_v15 = vrot.slane %v3527_v49, 4  ;;  %v3545_v54 = vor.u32 %v3544_v23, %v3543_v13  ;;  %v3131_v20 = vmul.f32 0.2, %v3099_v16  ;;  %v3097_v45 = vadd.f32 %v8281_v58, %v3075_v51 }
 0x293   : > { %v8394_v33 = vrot.slane %v3554_v61, 4  ;;  %v6025_v6 = vunpack.c.h.bf16 %v8263_v37  ;;  %v6021_v39 = vunpack.c.h.bf16 %v8259_v59  ;;  %v6033_v14 = vunpack.c.h.bf16 %v8270_v52 }
 0x294   : > { %v8399_v11 = vrot.slane %v3545_v54, 4  ;;  %v3147_v31 = vsel %vm3115_vm4, %v3099_v16, %v3131_v20  ;;  %vm3113_vm8 = vcmp.ge.f32.partialorder %v3097_v45, 0.0  ;;  %v3129_v27 = vmul.f32 0.2, %v3097_v45 }
 0x295   : > { %v5974_v53 = vpack.c.bf16 %v3147_v31, %v3147_v31  ;;  %v3081_v42 = vmul.f32 %v6025_v6, %v8276_v46  ;;  %v3079_v9 = vmul.f32 %v6021_v39, %v8276_v46  ;;  %v3085_v22 = vmul.f32 %v6033_v14, %v8276_v46  ;;  %v5665_v6 = vld [vmem:[%s8426_s22 + $0x2c] sm:$0xf] }
 0x296   : > { %v3145_v41 = vsel %vm3113_vm8, %v3097_v45, %v3129_v27  ;;  %v6029_v37 = vunpack.c.h.bf16 %v8272_v17  ;;  %v6041_v59 = vunpack.c.h.bf16 %v8285_v48  ;;  %v6037_v52 = vunpack.c.h.bf16 %v8287_v43 }
 0x297   : > { %3215 = vrot.lane.b32.xlu1 %v5974_v53, %s6802_s4  ;;  %v3305_v28 = vshrl.u32 %v5974_v53, 16  ;;  %v3308_v16 = vshll.u32 %v5974_v53, 16  ;;  %v5972_v51 = vpack.c.bf16 %v3145_v41, %v3145_v41  ;;  %v3103_v44 = vadd.f32 %v8281_v58, %v3081_v42 }
 0x298   : > { %v3101_v1 = vadd.f32 %v8281_v58, %v3079_v9  ;;  %v3107_v50 = vadd.f32 %v8281_v58, %v3085_v22  ;;  %v3083_v4 = vmul.f32 %v6029_v37, %v8276_v46  ;;  %v3089_v17 = vmul.f32 %v6041_v59, %v8276_v46 }
 0x299   : > { %v3307_v55 = vrot.slane %v3305_v28, 7  ;;  %v3502_v48 = vrot.slane %v3308_v16, 5  ;;  %v3504_v32 = vrot.slane %v3305_v28, 4  ;;  %v3289_v18 = vshrl.u32 %v5972_v51, 16  ;;  %3211 = vrot.lane.b32.xlu0 %v5972_v51, %s6802_s4  ;;  %v5662_v28 = vld [vmem:[%s8426_s22 + $0x1c] sm:$0xf] }
 0x29a   : > { %v3292_v29 = vshll.u32 %v5972_v51, 16  ;;  %vm3119_vm11 = vcmp.ge.f32.partialorder %v3103_v44, 0.0  ;;  %v3135_v49 = vmul.f32 0.2, %v3103_v44  ;;  %vm3117_vm12 = vcmp.ge.f32.partialorder %v3101_v1, 0.0 }
 0x29b   : > { %v8415_v13 = vor.u32 %v3308_v16, %v3307_v55  ;;  %v3503_v61 = vsel %vm7424_vm5, %v8355_v19, %v3502_v48  ;;  %v3505_v54 = vor.u32 %v3504_v32, %v3502_v48  ;;  %v3291_v20 = vrot.slane %v3289_v18, 7 }
 0x29c   : > { %5664 = vst.msk [vmem:[%s8426_s22 + $0x24] sm:$0xf] %vm2893_vm6, %v3503_v61  ;;  %v3493_v39 = vrot.slane %v3292_v29, 5  ;;  %v3495_v14 = vrot.slane %v3289_v18, 4  ;;  %v3151_v19 = vsel %vm3119_vm11, %v3103_v44, %v3135_v49  ;;  %v3133_v31 = vmul.f32 0.2, %v3101_v1 }
 0x29d   : > { %v3506_v27 = vrot.slane %v3505_v54, 4  ;;  %v8431_v53 = vor.u32 %v3292_v29, %v3291_v20  ;;  %v5978_v42 = vpack.c.bf16 %v3151_v19, %v3151_v19  ;;  %vm3123_vm14 = vcmp.ge.f32.partialorder %v3107_v50, 0.0 }
 0x29e   : > { %v3496_v9 = vor.u32 %v3495_v14, %v3493_v39  ;;  %v3494_v22 = vsel %vm7424_vm5, %v8339_v38, %v3493_v39  ;;  %v3149_v41 = vsel %vm3117_vm12, %v3101_v1, %v3133_v31  ;;  %v3139_v37 = vmul.f32 0.2, %v3107_v50  ;;  %v5671_v39 = vld [vmem:[%s8426_s22 + $0x4c] sm:$0xf] }
 0x29f   : > { %v3584_v59 = vsel %vm8422_vm13, %v3506_v27, %v5665_v6  ;;  %5661 = vst.msk [vmem:[%s8426_s22 + $0x14] sm:$0xf] %vm2893_vm6, %v3494_v22  ;;  %v3337_v16 = vshrl.u32 %v5978_v42, 16  ;;  %v3340_v51 = vshll.u32 %v5978_v42, 16  ;;  %3223 = vrot.lane.b32.xlu1 %v5978_v42, %s6802_s4  ;;  %v5976_v44 = vpack.c.bf16 %v3149_v41, %v3149_v41 }
 0x2a0   : > { %5666 = vst [vmem:[%s8426_s22 + $0x2c] sm:$0xf] %v3584_v59  ;;  %v3497_v55 = vrot.slane %v3496_v9, 4  ;;  %v3155_v48 = vsel %vm3123_vm14, %v3107_v50, %v3139_v37  ;;  %v3105_v38 = vadd.f32 %v8281_v58, %v3083_v4  ;;  %v3111_v1 = vadd.f32 %v8281_v58, %v3089_v17  ;;  %v5668_v59 = vld [vmem:[%s8426_s22 + $0x3c] sm:$0xf] }
 0x2a1   : > { %v3339_v32 = vrot.slane %v3337_v16, 7  ;;  %v3520_v18 = vrot.slane %v3340_v51, 5  ;;  %v3522_v29 = vrot.slane %v3337_v16, 4  ;;  %v3321_v49 = vshrl.u32 %v5976_v44, 16  ;;  %3219 = vrot.lane.b32.xlu0 %v5976_v44, %s6802_s4 }
 0x2a2   : > { %v3580_v61 = vsel %vm8422_vm13, %v3497_v55, %v5662_v28  ;;  %v3324_v54 = vshll.u32 %v5976_v44, 16  ;;  %v5982_v20 = vpack.c.bf16 %v3155_v48, %v3155_v48  ;;  %vm3121_vm15 = vcmp.ge.f32.partialorder %v3105_v38, 0.0 }
 0x2a3   : > { %vm3277_vm0 = vsmask.f32 256  ;;  %5663 = vst [vmem:[%s8426_s22 + $0x1c] sm:$0xf] %v3580_v61  ;;  %v8450_v50 = vor.u32 %v3340_v51, %v3339_v32  ;;  %v3521_v4 = vsel %vm7424_vm5, %v8346_v57, %v3520_v18  ;;  %v3523_v17 = vor.u32 %v3522_v29, %v3520_v18 }
 0x2a4   : > { %v3323_v6 = vrot.slane %v3321_v49, 7  ;;  %5670 = vst.msk [vmem:[%s8426_s22 + $0x44] sm:$0xf] %vm2893_vm6, %v3521_v4  ;;  %v3511_v14 = vrot.slane %v3324_v54, 5  ;;  %v3513_v19 = vrot.slane %v3321_v49, 4  ;;  %v3369_v31 = vshrl.u32 %v5982_v20, 16  ;;  %3231 = vrot.lane.b32.xlu1 %v5982_v20, %s6802_s4 }
 0x2a5   : > { %v3372_v27 = vshll.u32 %v5982_v20, 16  ;;  %v3524_v57 = vrot.slane %v3523_v17, 4  ;;  %v3137_v22 = vmul.f32 0.2, %v3105_v38  ;;  %vm3127_vm2 = vcmp.ge.f32.partialorder %v3111_v1, 0.0 }
 0x2a6   : > { %v8465_v9 = vor.u32 %v3324_v54, %v3323_v6  ;;  %v3512_v41 = vsel %vm7424_vm5, %v8337_v21, %v3511_v14  ;;  %v3514_v37 = vor.u32 %v3513_v19, %v3511_v14  ;;  %v3371_v28 = vrot.slane %v3369_v31, 7  ;;  %v5677_v54 = vld [vmem:[%s8426_s22 + $0x14c] sm:$0xf] }
 0x2a7   : > { %v3538_v16 = vrot.slane %v3372_v27, 5  ;;  %v5687_v51 = vld [vmem:[%s8426_s22 + $0x2c] sm:$0x8]  ;;  %v3592_v44 = vsel %vm8422_vm13, %v3524_v57, %v5671_v39  ;;  %5667 = vst.msk [vmem:[%s8426_s22 + $0x34] sm:$0xf] %vm2893_vm6, %v3512_v41  ;;  %v3540_v55 = vrot.slane %v3369_v31, 4  ;;  %v3153_v48 = vsel %vm3121_vm15, %v3105_v38, %v3137_v22 }
 0x2a8   : > { %v3143_v32 = vmul.f32 0.2, %v3111_v1  ;;  %v3617_v21 = vsel %vm8461_vm1, 0, %v5687_v51  ;;  %5672 = vst [vmem:[%s8426_s22 + $0x4c] sm:$0xf] %v3592_v44  ;;  %v3515_v18 = vrot.slane %v3514_v37, 4  ;;  %v8480_v29 = vor.u32 %v3372_v27, %v3371_v28 }
 0x2a9   : > { %v3539_v49 = vsel %vm7424_vm5, %v8372_v40, %v3538_v16  ;;  %5688 = vst [vmem:[%s8426_s22 + $0x2c] sm:$0x8] %v3617_v21  ;;  %v3541_v61 = vor.u32 %v3540_v55, %v3538_v16  ;;  %v5980_v38 = vpack.c.bf16 %v3153_v48, %v3153_v48  ;;  %v3087_v4 = vmul.f32 %v6037_v52, %v8276_v46 }
 0x2aa   : > { %5676 = vst.msk [vmem:[%s8426_s22 + $0x144] sm:$0xf] %vm2893_vm6, %v3539_v49  ;;  %v3159_v20 = vsel %vm3127_vm2, %v3111_v1, %v3143_v32  ;;  %v5685_v17 = vld [vmem:[%s8426_s22 + $0x1c] sm:$0x8]  ;;  %v3588_v6 = vsel %vm8422_vm13, %v3515_v18, %v5668_v59  ;;  %vm3278_vm4 = vsmask.f32 4368 }
 0x2ab   : > { %v5986_v39 = vpack.c.bf16 %v3159_v20, %v3159_v20  ;;  %v3303_v40 = vrot.slane %v8335_v26, 4  ;;  %v3614_v14 = vsel %vm8461_vm1, 0, %v5685_v17  ;;  %5669 = vst [vmem:[%s8426_s22 + $0x3c] sm:$0xf] %v3588_v6  ;;  %v3542_v19 = vrot.slane %v3541_v61, 4  ;;  %3227 = vrot.lane.b32.xlu0 %v5980_v38, %s6802_s4  ;;  %vm8502_vm8 = vmor %vm3277_vm0, %vm3278_vm4 }
 0x2ac   : > { %v3353_v31 = vshrl.u32 %v5980_v38, 16  ;;  %v3356_v1 = vshll.u32 %v5980_v38, 16  ;;  %5686 = vst [vmem:[%s8426_s22 + $0x1c] sm:$0x8] %v3614_v14  ;;  %v3109_v26 = vadd.f32 %v8281_v58, %v3087_v4  ;;  %v5674_v32 = vld [vmem:[%s8426_s22 + $0x13c] sm:$0xf] }
 0x2ad   : > { %v3401_v43 = vshrl.u32 %v5986_v39, 16  ;;  %v3404_v52 = vshll.u32 %v5986_v39, 16  ;;  %3239 = vrot.lane.b32.xlu1 %v5986_v39, %s6802_s4  ;;  %v8512_v27 = vsel %vm8502_vm8, %v3303_v40, %v8415_v13  ;;  %v3600_v57 = vsel %vm8422_vm13, %v3542_v19, %v5677_v54 }
 0x2ae   : > { %v3355_v22 = vrot.slane %v3353_v31, 7  ;;  %v3529_v41 = vrot.slane %v3356_v1, 5  ;;  %v3531_v37 = vrot.slane %v3353_v31, 4  ;;  %5678 = vst [vmem:[%s8426_s22 + $0x14c] sm:$0xf] %v3600_v57  ;;  %vm3125_vm9 = vcmp.ge.f32.partialorder %v3109_v26, 0.0 }
 0x2af   : > { %v3403_v59 = vrot.slane %v3401_v43, 7  ;;  %v3556_v28 = vrot.slane %v3404_v52, 5  ;;  %v3558_v16 = vrot.slane %v3401_v43, 4  ;;  %v5691_v58 = vld [vmem:[%s8426_s22 + $0x4c] sm:$0x8]  ;;  %v3287_v38 = vrot.slane %v8320_v7, 4 }
 0x2b0   : > { %v3358_v51 = vor.u32 %v3356_v1, %v3355_v22  ;;  %v3530_v13 = vsel %vm7424_vm5, %v8391_v15, %v3529_v41  ;;  %v3532_v44 = vor.u32 %v3531_v37, %v3529_v41  ;;  %v3141_v55 = vmul.f32 0.2, %v3109_v26  ;;  %v5683_v15 = vld [vmem:[%s8426_s22 + $0x16c] sm:$0xf]  ;;  %v5680_v37 = vld [vmem:[%s8426_s22 + $0x15c] sm:$0xf] }
 0x2b1   : > { %v3623_v48 = vsel %vm8461_vm1, 0, %v5691_v58  ;;  %5673 = vst.msk [vmem:[%s8426_s22 + $0x134] sm:$0xf] %vm2893_vm6, %v3530_v13  ;;  %v3406_v21 = vor.u32 %v3404_v52, %v3403_v59  ;;  %v3557_v18 = vsel %vm7424_vm5, %v8394_v33, %v3556_v28  ;;  %v3559_v49 = vor.u32 %v3558_v16, %v3556_v28 }
 0x2b2   : > { %5692 = vst [vmem:[%s8426_s22 + $0x4c] sm:$0x8] %v3623_v48  ;;  %v3533_v61 = vrot.slane %v3532_v44, 4  ;;  %5682 = vst.msk [vmem:[%s8426_s22 + $0x164] sm:$0xf] %vm2893_vm6, %v3557_v18  ;;  %v3157_v54 = vsel %vm3125_vm9, %v3109_v26, %v3141_v55  ;;  %v3335_v20 = vrot.slane %v8322_v8, 4  ;;  %v8546_v7 = vsel %vm8502_vm8, %v3287_v38, %v8431_v53 }
 0x2b3   : > { %v5689_v4 = vld [vmem:[%s8426_s22 + $0x3c] sm:$0x8]  ;;  %v3560_v17 = vrot.slane %v3559_v49, 4  ;;  %v5984_v6 = vpack.c.bf16 %v3157_v54, %v3157_v54  ;;  %v3319_v33 = vrot.slane %v8318_v35, 4  ;;  %v3367_v39 = vrot.slane %v8357_v25, 4 }
 0x2b4   : > { %v3620_v40 = vsel %vm8461_vm1, 0, %v5689_v4  ;;  %v3596_v14 = vsel %vm8422_vm13, %v3533_v61, %v5674_v32  ;;  %v8551_v8 = vsel %vm8502_vm8, %v3335_v20, %v8450_v50  ;;  %v3351_v1 = vrot.slane %v8375_v0, 4 }
 0x2b5   : > { %5690 = vst [vmem:[%s8426_s22 + $0x3c] sm:$0x8] %v3620_v40  ;;  %5675 = vst [vmem:[%s8426_s22 + $0x13c] sm:$0xf] %v3596_v14  ;;  %v3608_v35 = vsel %vm8422_vm13, %v3560_v17, %v5683_v15  ;;  %v3385_v25 = vshrl.u32 %v5984_v6, 16  ;;  %v3388_v19 = vshll.u32 %v5984_v6, 16  ;;  %3235 = vrot.lane.b32.xlu0 %v5984_v6, %s6802_s4  ;;  %v8561_v53 = vsel %vm8502_vm8, %v3319_v33, %v8465_v9 }
 0x2b6   : > { %v5695_v31 = vld [vmem:[%s8426_s22 + $0x14c] sm:$0x8]  ;;  %5684 = vst [vmem:[%s8426_s22 + $0x16c] sm:$0xf] %v3608_v35  ;;  %v8568_v50 = vsel %vm8502_vm8, %v3367_v39, %v8480_v29  ;;  %v3399_v43 = vrot.slane %v8377_v2, 4  ;;  %v3383_v52 = vrot.slane %v8379_v30, 4  ;;  %v8578_v29 = vsel %vm8502_vm8, %v3351_v1, %v3358_v51 }
 0x2b7   : > { %v3629_v9 = vsel %vm8461_vm1, 0, %v5695_v31  ;;  %v3387_v26 = vrot.slane %v3385_v25, 7  ;;  %v3547_v57 = vrot.slane %v3388_v19, 5  ;;  %v3549_v22 = vrot.slane %v3385_v25, 4 }
 0x2b8   : > { %5696 = vst [vmem:[%s8426_s22 + $0x14c] sm:$0x8] %v3629_v9  ;;  %v8582_v0 = vsel %vm8502_vm8, %v3399_v43, %v3406_v21  ;;  %vm3260_vm10 = vcmask 1043968   ;;  %vm3425_vm11 = vsmask.f32 7938 }
 0x2b9   : > { %v3390_v2 = vor.u32 %v3388_v19, %v3387_v26  ;;  %v3548_v30 = vsel %vm7424_vm5, %v8399_v11, %v3547_v57  ;;  %v3550_v41 = vor.u32 %v3549_v22, %v3547_v57  ;;  %vm8618_vm12 = vmand %vm2893_vm6, %vm3425_vm11 }
 0x2ba   : > { %5679 = vst.msk [vmem:[%s8426_s22 + $0x154] sm:$0xf] %vm2893_vm6, %v3548_v30 }
 0x2bb   : > { %v3551_v59 = vrot.slane %v3550_v41, 4  ;;  %v8592_v28 = vsel %vm8502_vm8, %v3383_v52, %v3390_v2 }
 0x2bc   : > { %v5693_v16 = vld [vmem:[%s8426_s22 + $0x13c] sm:$0x8] }
 0x2bd   : > { %v3626_v58 = vsel %vm8461_vm1, 0, %v5693_v16  ;;  %v5699_v51 = vld [vmem:[%s8426_s22 + $0x16c] sm:$0x8]  ;;  %v3604_v11 = vsel %vm8422_vm13, %v3551_v59, %v5680_v37  ;;  %vm3460_vm13 = vcmask 516096  }
 0x2be   : > { %5694 = vst [vmem:[%s8426_s22 + $0x13c] sm:$0x8] %v3626_v58  ;;  %v3635_v13 = vsel %vm8461_vm1, 0, %v5699_v51  ;;  %5681 = vst [vmem:[%s8426_s22 + $0x15c] sm:$0xf] %v3604_v11 }
 0x2bf   : > { %5700 = vst [vmem:[%s8426_s22 + $0x16c] sm:$0x8] %v3635_v13  ;;  %vm8647_vm14 = vmand %vm3460_vm13, %vm3277_vm0 }
 0x2c5   : > { %v5697_v46 = vld [vmem:[%s8426_s22 + $0x15c] sm:$0x8] }
 0x2c6   : > { %v3632_v44 = vsel %vm8461_vm1, 0, %v5697_v46 }
 0x2c7   : > { %5698 = vst [vmem:[%s8426_s22 + $0x15c] sm:$0x8] %v3632_v44 }
 0x2f1   : > { %v3218_v55 = vpop.permute.xlu1 %3217  ;;  %v3210_v45 = vpop.permute.xlu0 %3209 }
 0x2f2   : > { %5609 = vst.msk [vmem:[%s8426_s22 + $0x30] sm:$0xf] %vm3260_vm10, %v3218_v55  ;;  %5605 = vst.msk [vmem:[%s8426_s22 + $0x10] sm:$0xf] %vm3260_vm10, %v3210_v45 }
 0x2f5   : > { %v3222_v48 = vpop.permute.xlu1 %3221  ;;  %v3214_v32 = vpop.permute.xlu0 %3213 }
 0x2f6   : > { %5611 = vst.msk [vmem:[%s8426_s22 + $0x40] sm:$0xf] %vm3260_vm10, %v3222_v48  ;;  %5607 = vst.msk [vmem:[%s8426_s22 + $0x20] sm:$0xf] %vm3260_vm10, %v3214_v32 }
 0x2f9   : > { %v5627_v21 = vld [vmem:[%s8426_s22 + $0x30] sm:$0xf]  ;;  %v3230_v49 = vpop.permute.xlu1 %3229 }
 0x2fa   : > { %v5621_v18 = vld [vmem:[%s8426_s22 + $0x10] sm:$0xf]  ;;  %v3437_v61 = vsel %vm8618_vm12, %v8325_v47, %v5627_v21  ;;  %5615 = vst.msk [vmem:[%s8426_s22 + $0x140] sm:$0xf] %vm3260_vm10, %v3230_v49 }
 0x2fb   : > { %v3428_v15 = vsel %vm8618_vm12, %v8328_v3, %v5621_v18  ;;  %5628 = vst [vmem:[%s8426_s22 + $0x30] sm:$0xf] %v3437_v61 }
 0x2fc   : > { %5622 = vst [vmem:[%s8426_s22 + $0x10] sm:$0xf] %v3428_v15 }
 0x2fd   : > { %v5630_v54 = vld [vmem:[%s8426_s22 + $0x40] sm:$0xf] }
 0x2fe   : > { %v5624_v38 = vld [vmem:[%s8426_s22 + $0x20] sm:$0xf]  ;;  %v3441_v20 = vsel %vm8618_vm12, %v8333_v60, %v5630_v54  ;;  %v3226_v3 = vpop.permute.xlu0 %3225 }
 0x2ff   : > { %v3433_v47 = vsel %vm8618_vm12, %v8342_v5, %v5624_v38  ;;  %5631 = vst [vmem:[%s8426_s22 + $0x40] sm:$0xf] %v3441_v20  ;;  %5613 = vst.msk [vmem:[%s8426_s22 + $0x130] sm:$0xf] %vm3260_vm10, %v3226_v3  ;;  %v3238_v4 = vpop.permute.xlu1 %3237 }
 0x300   : > { %5625 = vst [vmem:[%s8426_s22 + $0x20] sm:$0xf] %v3433_v47  ;;  %5619 = vst.msk [vmem:[%s8426_s22 + $0x160] sm:$0xf] %vm3260_vm10, %v3238_v4 }
 0x301   : > { %v5636_v5 = vld [vmem:[%s8426_s22 + $0x140] sm:$0xf] }
 0x302   : > { %v5649_v17 = vld [vmem:[%s8426_s22 + $0x30] sm:$0x1]  ;;  %v3449_v33 = vsel %vm8618_vm12, %v8365_v34, %v5636_v5  ;;  %v3234_v39 = vpop.permute.xlu0 %3233 }
 0x303   : > { %v5645_v6 = vld [vmem:[%s8426_s22 + $0x10] sm:$0x1]  ;;  %v3469_v40 = vsel %vm8647_vm14, 0, %v5649_v17  ;;  %5637 = vst [vmem:[%s8426_s22 + $0x140] sm:$0xf] %v3449_v33 }
 0x304   : > { %v3463_v14 = vsel %vm8647_vm14, 0, %v5645_v6  ;;  %5617 = vst.msk [vmem:[%s8426_s22 + $0x150] sm:$0xf] %vm3260_vm10, %v3234_v39  ;;  %5650 = vst [vmem:[%s8426_s22 + $0x30] sm:$0x1] %v3469_v40 }
 0x305   : > { %5646 = vst [vmem:[%s8426_s22 + $0x10] sm:$0x1] %v3463_v14 }
 0x306   : > { %v5651_v35 = vld [vmem:[%s8426_s22 + $0x40] sm:$0x1]  ;;  %v5633_v25 = vld [vmem:[%s8426_s22 + $0x130] sm:$0xf] }
 0x307   : > { %v5647_v34 = vld [vmem:[%s8426_s22 + $0x20] sm:$0x1]  ;;  %v3472_v19 = vsel %vm8647_vm14, 0, %v5651_v35  ;;  %v3445_v1 = vsel %vm8618_vm12, %v8382_v56, %v5633_v25 }
 0x308   : > { %v3466_v31 = vsel %vm8647_vm14, 0, %v5647_v34  ;;  %v5642_v43 = vld [vmem:[%s8426_s22 + $0x160] sm:$0xf]  ;;  %5652 = vst [vmem:[%s8426_s22 + $0x40] sm:$0x1] %v3472_v19 }
 0x309   : > { %5648 = vst [vmem:[%s8426_s22 + $0x20] sm:$0x1] %v3466_v31  ;;  %5634 = vst [vmem:[%s8426_s22 + $0x130] sm:$0xf] %v3445_v1  ;;  %v3457_v52 = vsel %vm8618_vm12, %v8386_v12, %v5642_v43  ;;  %v3216_v9 = vpop.permute.xlu1 %3215 }
 0x30a   : > { %5643 = vst [vmem:[%s8426_s22 + $0x160] sm:$0xf] %v3457_v52  ;;  %v5655_v26 = vld [vmem:[%s8426_s22 + $0x140] sm:$0x1]  ;;  %5608 = vst.msk [vmem:[%s8426_s22 + $0x28] sm:$0xf] %vm3260_vm10, %v3216_v9 }
 0x30b   : > { %v5639_v57 = vld [vmem:[%s8426_s22 + $0x150] sm:$0xf]  ;;  %v3478_v56 = vsel %vm8647_vm14, 0, %v5655_v26  ;;  %5626 = vst.msk [vmem:[%s8426_s22 + $0x28] sm:$0xf] %vm2893_vm6, %v8512_v27  ;;  %v3212_v12 = vpop.permute.xlu0 %3211 }
 0x30c   : > { %v3453_v22 = vsel %vm8618_vm12, %v8389_v62, %v5639_v57  ;;  %5656 = vst [vmem:[%s8426_s22 + $0x140] sm:$0x1] %v3478_v56  ;;  %5606 = vst.msk [vmem:[%s8426_s22 + $0x18] sm:$0xf] %vm3260_vm10, %v3212_v12 }
 0x30d   : > { %5640 = vst [vmem:[%s8426_s22 + $0x150] sm:$0xf] %v3453_v22  ;;  %5623 = vst.msk [vmem:[%s8426_s22 + $0x18] sm:$0xf] %vm2893_vm6, %v8546_v7 }
 0x310   : > { %v5653_v2 = vld [vmem:[%s8426_s22 + $0x130] sm:$0x1] }
 0x311   : > { %v3475_v62 = vsel %vm8647_vm14, 0, %v5653_v2  ;;  %v5659_v30 = vld [vmem:[%s8426_s22 + $0x160] sm:$0x1]  ;;  %v3224_v41 = vpop.permute.xlu1 %3223 }
 0x312   : > { %5654 = vst [vmem:[%s8426_s22 + $0x130] sm:$0x1] %v3475_v62  ;;  %v3484_v27 = vsel %vm8647_vm14, 0, %v5659_v30  ;;  %5612 = vst.msk [vmem:[%s8426_s22 + $0x48] sm:$0xf] %vm3260_vm10, %v3224_v41 }
 0x313   : > { %5660 = vst [vmem:[%s8426_s22 + $0x160] sm:$0x1] %v3484_v27  ;;  %5632 = vst.msk [vmem:[%s8426_s22 + $0x48] sm:$0xf] %vm2893_vm6, %v8551_v8  ;;  %v3220_v37 = vpop.permute.xlu0 %3219 }
 0x314   : > { %v5657_v7 = vld [vmem:[%s8426_s22 + $0x150] sm:$0x1]  ;;  %5610 = vst.msk [vmem:[%s8426_s22 + $0x38] sm:$0xf] %vm3260_vm10, %v3220_v37 }
 0x315   : > { %v3481_v59 = vsel %vm8647_vm14, 0, %v5657_v7  ;;  %5629 = vst.msk [vmem:[%s8426_s22 + $0x38] sm:$0xf] %vm2893_vm6, %v8561_v53  ;;  %v8753_v53 = vld [vmem:[%s9262_s6] ss:$0 sm:$0xff] (%p3030_p2) }
 0x316   : > { %5658 = vst [vmem:[%s8426_s22 + $0x150] sm:$0x1] %v3481_v59  ;;  %v3232_v16 = vpop.permute.xlu1 %3231 }
 0x317   : > { %5616 = vst.msk [vmem:[%s8426_s22 + $0x148] sm:$0xf] %vm3260_vm10, %v3232_v16 }
 0x318   : > { %5638 = vst.msk [vmem:[%s8426_s22 + $0x148] sm:$0xf] %vm2893_vm6, %v8568_v50  ;;  %v8755_v50 = vmov (%p3030_p2), 0.0  }
 0x31d   : > { %v3228_v58 = vpop.permute.xlu0 %3227 }
 0x31e   : > { %5614 = vst.msk [vmem:[%s8426_s22 + $0x138] sm:$0xf] %vm3260_vm10, %v3228_v58 }
 0x31f   : > { %v3240_v8 = vpop.permute.xlu1 %3239  ;;  %5635 = vst.msk [vmem:[%s8426_s22 + $0x138] sm:$0xf] %vm2893_vm6, %v8578_v29  ;;  %v8757_v29 = vmov (%p3030_p2), 0.0  }
 0x320   : > { %5620 = vst.msk [vmem:[%s8426_s22 + $0x168] sm:$0xf] %vm3260_vm10, %v3240_v8 }
 0x321   : > { %5644 = vst.msk [vmem:[%s8426_s22 + $0x168] sm:$0xf] %vm2893_vm6, %v8582_v0 }
 0x325   :  { %3032 = sbr.rel (!%p3030_p2) target bundleno = 622 (0x26e), region = 159 }
 0x327   : > { %v3236_v51 = vpop.permute.xlu0 %3235 }
 0x328   : > { %5618 = vst.msk [vmem:[%s8426_s22 + $0x158] sm:$0xf] %vm3260_vm10, %v3236_v51 }
 0x329   : > { %5641 = vst.msk [vmem:[%s8426_s22 + $0x158] sm:$0xf] %vm2893_vm6, %v8592_v28 }
 0x32a LB: > { %v6622_v24 = vld [vmem:[%s9261_s5 + $0x98] sm:$0xff]   ;;  %v6803_v10 = vmov 0   ;;  %v6624_v36 = vld [vmem:[%s9261_s5 + $0x90] sm:$0xff]   ;;  %v6626_v0 = vld [vmem:[%s9261_s5 + $0x88] sm:$0xff]   ;;  %s5989_s21 = sshll.u32 %s6794_s25, 6  ;;  %s3643_s25 = sadd.s32 1, %s6794_s25   ;;  %s6794_s25 = sphi %s8759_s25, %s3643_s25   ;;  %v6790_v29 = vphi %v8757_v29, %v9333_v29   ;;  %v6786_v50 = vphi %v8755_v50, %v9332_v50  }
 0x32b   : > { %3904 = vmatprep.subr.bf16.mxu0 %v6803_v10  ;;  %4169 = vmatprep.subr.bf16.mxu1 %v6803_v10  ;;  %v6623_v63 = vld [vmem:[%s9261_s5 + $0x38] sm:$0xff]   ;;  %v6625_v23 = vld [vmem:[%s9261_s5 + $0x30] sm:$0xff]   ;;  %v6627_v28 = vld [vmem:[%s9261_s5 + $0x28] sm:$0xff]   ;;  %s8829_s6 = scalar_lea.vmem [#allocation5], %s5989_s21  ;;  %p3640_p3 = scmp.ge.s32.totalorder %s3643_s25, 4  }
 0x32c   : > { %3905 = vmatpush1.bf16.msra.mxu0 %v6622_v24  ;;  %4170 = vmatpush1.bf16.msra.mxu1 %v6623_v63  ;;  %v6628_v11 = vld [vmem:[%s9261_s5 + $0x80] sm:$0xff]   ;;  %v6630_v46 = vld [vmem:[%s9261_s5 + $0x78] sm:$0xff]   ;;  %v6632_v55 = vld [vmem:[%s9261_s5 + $0x70] sm:$0xff]  }
 0x32d   : > { %3906 = vmatprep.subr.bf16.mxu0 %v6803_v10  ;;  %4171 = vmatprep.subr.bf16.mxu1 %v6803_v10  ;;  %v6629_v13 = vld [vmem:[%s9261_s5 + $0x20] sm:$0xff]   ;;  %v6631_v44 = vld [vmem:[%s9261_s5 + $0x18] sm:$0xff]   ;;  %v6633_v45 = vld [vmem:[%s9261_s5 + $0x10] sm:$0xff]  }
 0x32e   : > { %v6634_v48 = vld [vmem:[%s9261_s5 + $0x68] sm:$0xff]   ;;  %v6636_v21 = vld [vmem:[%s9261_s5 + $0x60] sm:$0xff]   ;;  %v6638_v61 = vld [vmem:[%s9261_s5 + $0xb8] sm:$0xff]  }
 0x32f   : > { %v6635_v32 = vld [vmem:[%s9261_s5 + $0x8] sm:$0xff]   ;;  %v6637_v49 = vld [vmem:[%s9261_s5] sm:$0xff]   ;;  %v6639_v15 = vld [vmem:[%s9261_s5 + $0x58] sm:$0xff]  }
 0x330   : > { %3907 = vmatpush1.bf16.msra.mxu0 %v6624_v36  ;;  %4172 = vmatpush1.bf16.msra.mxu1 %v6625_v23  ;;  %v6648_v42 = vld [vmem:[%s8829_s6 + $0x14] ss:$8 sps:$4 sm:$0xff]   ;;  %v6651_v18 = vld [vmem:[%s8829_s6 + $0x4] ss:$8 sps:$4 sm:$0xff]   ;;  %v6646_v60 = vld [vmem:[%s8829_s6 + $0x10] ss:$8 sps:$4 sm:$0xff]  }
 0x331   : > { %3908 = vmatprep.subr.bf16.mxu0 %v6803_v10  ;;  %4173 = vmatprep.subr.bf16.mxu1 %v6803_v10  ;;  %v6640_v54 = vld [vmem:[%s9261_s5 + $0xb0] sm:$0xff]   ;;  %v6642_v20 = vld [vmem:[%s9261_s5 + $0xa8] sm:$0xff]   ;;  %v6644_v3 = vld [vmem:[%s9261_s5 + $0xa0] sm:$0xff]  }
 0x332   : > { %5774 = vmatprep.mubr.msk.bf16.mxu0 %vm2910_vm7, %v6648_v42  ;;  %5810 = vmatprep.mubr.msk.bf16.mxu1 %vm2910_vm7, %v6651_v18  ;;  %v6641_v38 = vld [vmem:[%s9261_s5 + $0x50] sm:$0xff]   ;;  %v6643_v47 = vld [vmem:[%s9261_s5 + $0x48] sm:$0xff]   ;;  %v6645_v4 = vld [vmem:[%s9261_s5 + $0x40] sm:$0xff]  }
 0x333   : > { %v6649_v5 = vld [vmem:[%s8829_s6] ss:$8 sps:$4 sm:$0xff]   ;;  %v6652_v17 = vld [vmem:[%s9261_s5 + $0xf8] sm:$0xff]   ;;  %v8882_v6 = vld [vmem:[%s8829_s6 + $0x24] ss:$8 sps:$4 sm:$0xff]  }
 0x334   : > { %3909 = vmatpush1.bf16.msra.mxu0 %v6626_v0  ;;  %4174 = vmatpush1.bf16.msra.mxu1 %v6627_v28  ;;  %v6655_v33 = vld [vmem:[%s9261_s5 + $0xf0] sm:$0xff]   ;;  %v8893_v39 = vld [vmem:[%s8829_s6 + $0x20] ss:$8 sps:$4 sm:$0xff]   ;;  %v8918_v25 = vld [vmem:[%s8829_s6 + $0x44] ss:$8 sps:$4 sm:$0xff]  }
 0x335   : > { %3910 = vmatprep.subr.bf16.mxu0 %v6803_v10  ;;  %4175 = vmatprep.subr.bf16.mxu1 %v6803_v10  ;;  %v6657_v40 = vld [vmem:[%s9261_s5 + $0xe8] sm:$0xff]   ;;  %v8901_v14 = vld [vmem:[%s8829_s6 + $0x34] ss:$8 sps:$4 sm:$0xff]   ;;  %v6661_v35 = vld [vmem:[%s9261_s5 + $0xe0] sm:$0xff]  }
 0x336   : > { %v8914_v34 = vld [vmem:[%s8829_s6 + $0x30] ss:$8 sps:$4 sm:$0xff]   ;;  %v8936_v1 = vld [vmem:[%s8829_s6 + $0x40] ss:$8 sps:$4 sm:$0xff]   ;;  %v6667_v43 = vld [vmem:[%s8829_s6 + $0x134] ss:$8 sps:$4 sm:$0xff]  }
 0x337   : > { %v6664_v19 = vld [vmem:[%s9261_s5 + $0xd8] sm:$0xff]   ;;  %v6666_v31 = vld [vmem:[%s9261_s5 + $0xd0] sm:$0xff]   ;;  %v6669_v52 = vld [vmem:[%s8829_s6 + $0x124] ss:$8 sps:$4 sm:$0xff]  }
 0x338   : > { %3911 = vmatpush1.bf16.msra.mxu0 %v6628_v11  ;;  %4176 = vmatpush1.bf16.msra.mxu1 %v6629_v13  ;;  %v6673_v9 = vld [vmem:[%s9261_s5 + $0xc8] sm:$0xff]   ;;  %v6676_v26 = vld [vmem:[%s9261_s5 + $0xc0] sm:$0xff]   ;;  %v6671_v57 = vld [vmem:[%s8829_s6 + $0x130] ss:$8 sps:$4 sm:$0xff]  }
 0x339   : > { %3912 = vmatprep.subr.bf16.mxu0 %v6803_v10  ;;  %4177 = vmatprep.subr.bf16.mxu1 %v6803_v10  ;;  %v6672_v56 = vld [vmem:[%s8829_s6 + $0x120] ss:$8 sps:$4 sm:$0xff]   ;;  %v6674_v22 = vld [vmem:[%s8829_s6 + $0x144] ss:$8 sps:$4 sm:$0xff]   ;;  %v6678_v12 = vld [vmem:[%s9261_s5 + $0x118] sm:$0xff]  }
 0x33a   : > { %v6682_v2 = vld [vmem:[%s9261_s5 + $0x110] sm:$0xff]   ;;  %v6677_v62 = vld [vmem:[%s8829_s6 + $0x140] ss:$8 sps:$4 sm:$0xff]   ;;  %v6683_v37 = vld [vmem:[%s8829_s6 + $0x164] ss:$8 sps:$4 sm:$0xff]  }
 0x33b   : > { %v6679_v30 = vld [vmem:[%s8829_s6 + $0x154] ss:$8 sps:$4 sm:$0xff]   ;;  %v6685_v27 = vld [vmem:[%s9261_s5 + $0x108] sm:$0xff]   ;;  %v6687_v41 = vld [vmem:[%s9261_s5 + $0x100] sm:$0xff]  }
 0x33c   : > { %3913 = vmatpush1.bf16.msra.mxu0 %v6630_v46  ;;  %4178 = vmatpush1.bf16.msra.mxu1 %v6631_v44  ;;  %v6681_v7 = vld [vmem:[%s8829_s6 + $0x150] ss:$8 sps:$4 sm:$0xff]   ;;  %v6686_v59 = vld [vmem:[%s8829_s6 + $0x160] ss:$8 sps:$4 sm:$0xff]   ;;  %v6688_v16 = vld [vmem:[%s8829_s6 + $0x54] ss:$8 sps:$4 sm:$0xff]  }
 0x33d   : > { %3914 = vmatprep.subr.bf16.mxu0 %v6803_v10  ;;  %4179 = vmatprep.subr.bf16.mxu1 %v6803_v10  ;;  %v6690_v58 = vld [vmem:[%s8829_s6 + $0x174] ss:$8 sps:$4 sm:$0xff]   ;;  %v6692_v8 = vld [vmem:[%s8829_s6 + $0x50] ss:$8 sps:$4 sm:$0xff]  }
 0x33e   : > { %v6693_v51 = vld [vmem:[%s8829_s6 + $0x170] ss:$8 sps:$4 sm:$0xff]   ;;  %s9074_s6 = scalar_lea.vmem [#allocation6], %s5989_s21  ;;  %s9145_s21 = smov (%p3640_p3), 0  }
 0x340   : > { %3915 = vmatpush1.bf16.msra.mxu0 %v6632_v55  ;;  %4180 = vmatpush1.bf16.msra.mxu1 %v6633_v45 }
 0x341   : > { %3916 = vmatprep.subr.bf16.mxu0 %v6803_v10  ;;  %4181 = vmatprep.subr.bf16.mxu1 %v6803_v10 }
 0x344   : > { %3917 = vmatpush1.bf16.msra.mxu0 %v6634_v48  ;;  %4182 = vmatpush1.bf16.msra.mxu1 %v6635_v32 }
 0x345   : > { %3918 = vmatprep.subr.bf16.mxu0 %v6803_v10  ;;  %4183 = vmatprep.subr.bf16.mxu1 %v6803_v10 }
 0x348   : > { %3919 = vmatpush1.bf16.msra.mxu0 %v6636_v21  ;;  %4184 = vmatpush1.bf16.msra.mxu1 %v6637_v49 }
 0x349   : > { %3928 = vmatprep.subr.bf16.mxu0 %v6803_v10  ;;  %4193 = vmatprep.subr.bf16.mxu1 %v6803_v10 }
 0x34c   : > { %3929 = vmatpush2.bf16.msra.mxu0 %v6638_v61  ;;  %4194 = vmatpush2.bf16.msra.mxu1 %v6639_v15 }
 0x34d   : > { %3930 = vmatprep.subr.bf16.mxu0 %v6803_v10  ;;  %4195 = vmatprep.subr.bf16.mxu1 %v6803_v10 }
 0x350   : > { %3931 = vmatpush2.bf16.msra.mxu0 %v6640_v54  ;;  %4196 = vmatpush2.bf16.msra.mxu1 %v6641_v38 }
 0x351   : > { %3932 = vmatprep.subr.bf16.mxu0 %v6803_v10  ;;  %4197 = vmatprep.subr.bf16.mxu1 %v6803_v10 }
 0x354   : > { %3933 = vmatpush2.bf16.msra.mxu0 %v6642_v20  ;;  %4198 = vmatpush2.bf16.msra.mxu1 %v6643_v47 }
 0x355   : > { %3934 = vmatprep.subr.bf16.mxu0 %v6803_v10  ;;  %4199 = vmatprep.subr.bf16.mxu1 %v6803_v10 }
 0x358   : > { %3935 = vmatpush2.bf16.msra.mxu0 %v6644_v3  ;;  %4200 = vmatpush2.bf16.msra.mxu1 %v6645_v4 }
 0x359   : > { %4479 = vmatprep.subr.bf16.mxu0 %v6803_v10  ;;  %6388 = vmatprep.subr.bf16.mxu1 %v6803_v10 }
 0x35b   : > { %3937 = vmatmul.mubr.bf16.vlgmr.msra.gmra.mxu0 %v6646_v60  ;;  %4202 = vmatmul.mubr.bf16.vlgmr.msra.gmra.mxu1 %v6649_v5 }
 0x35c   : > { %4480 = vmatpush1.bf16.msra.mxu0 %v6652_v17  ;;  %5775 = vmatprep.mubr.msk.bf16.mxu0 %vm2910_vm7, %v8882_v6 }
 0x35d   : > { %4481 = vmatprep.subr.bf16.mxu0 %v6803_v10  ;;  %5811 = vmatprep.mubr.msk.bf16.mxu1 %vm2910_vm7, %v6648_v42 }
 0x35e   : > { %6400 = vmatpush1.bf16.msra.mxu1 %v6652_v17 }
 0x35f   : > { %6389 = vmatprep.subr.bf16.mxu1 %v6803_v10 }
 0x360   : > { %4482 = vmatpush1.bf16.msra.mxu0 %v6655_v33 }
 0x361   : > { %4483 = vmatprep.subr.bf16.mxu0 %v6803_v10 }
 0x362   : > { %6401 = vmatpush1.bf16.msra.mxu1 %v6655_v33 }
 0x363   : > { %3945 = vmatmul.mubr.bf16.gmra.mxu0 %v8893_v39  ;;  %6390 = vmatprep.subr.bf16.mxu1 %v6803_v10 }
 0x364   : > { %4210 = vmatmul.mubr.bf16.gmra.mxu1 %v6646_v60  ;;  %4484 = vmatpush1.bf16.msra.mxu0 %v6657_v40 }
 0x365   : > { %5776 = vmatprep.mubr.msk.bf16.mxu0 %vm2910_vm7, %v8901_v14  ;;  %5812 = vmatprep.mubr.msk.bf16.mxu1 %vm2910_vm7, %v8882_v6 }
 0x366   : > { %4485 = vmatprep.subr.bf16.mxu0 %v6803_v10  ;;  %6402 = vmatpush1.bf16.msra.mxu1 %v6657_v40 }
 0x367   : > { %6391 = vmatprep.subr.bf16.mxu1 %v6803_v10 }
 0x368   : > { %4486 = vmatpush1.bf16.msra.mxu0 %v6661_v35 }
 0x369   : > { %4487 = vmatprep.subr.bf16.mxu0 %v6803_v10 }
 0x36a   : > { %6403 = vmatpush1.bf16.msra.mxu1 %v6661_v35 }
 0x36b   : > { %3953 = vmatmul.mubr.bf16.gmra.mxu0 %v8914_v34  ;;  %6392 = vmatprep.subr.bf16.mxu1 %v6803_v10 }
 0x36c   : > { %4218 = vmatmul.mubr.bf16.gmra.mxu1 %v8893_v39  ;;  %5777 = vmatprep.mubr.msk.bf16.mxu0 %vm2910_vm7, %v8918_v25 }
 0x36d   : > { %5813 = vmatprep.mubr.msk.bf16.mxu1 %vm2910_vm7, %v8901_v14  ;;  %4488 = vmatpush1.bf16.msra.mxu0 %v6664_v19 }
 0x36e   : > { %4489 = vmatprep.subr.bf16.mxu0 %v6803_v10  ;;  %6404 = vmatpush1.bf16.msra.mxu1 %v6664_v19 }
 0x36f   : > { %6393 = vmatprep.subr.bf16.mxu1 %v6803_v10 }
 0x371   : > { %4490 = vmatpush1.bf16.msra.mxu0 %v6666_v31 }
 0x372   : > { %4491 = vmatprep.subr.bf16.mxu0 %v6803_v10  ;;  %6405 = vmatpush1.bf16.msra.mxu1 %v6666_v31 }
 0x373   : > { %3961 = vmatmul.mubr.bf16.gmra.mxu0 %v8936_v1  ;;  %6394 = vmatprep.subr.bf16.mxu1 %v6803_v10 }
 0x374   : > { %4226 = vmatmul.mubr.bf16.gmra.mxu1 %v8914_v34  ;;  %5778 = vmatprep.mubr.msk.bf16.mxu0 %vm2910_vm7, %v6667_v43 }
 0x375   : > { %5814 = vmatprep.mubr.msk.bf16.mxu1 %vm2910_vm7, %v6669_v52  ;;  %4492 = vmatpush1.bf16.msra.mxu0 %v6673_v9 }
 0x376   : > { %4493 = vmatprep.subr.bf16.mxu0 %v6803_v10  ;;  %6406 = vmatpush1.bf16.msra.mxu1 %v6673_v9 }
 0x377   : > { %6395 = vmatprep.subr.bf16.mxu1 %v6803_v10 }
 0x379   : > { %4494 = vmatpush1.bf16.msra.mxu0 %v6676_v26 }
 0x37a   : > { %4503 = vmatprep.subr.bf16.mxu0 %v6803_v10  ;;  %6407 = vmatpush1.bf16.msra.mxu1 %v6676_v26 }
 0x37b   : > { %3969 = vmatmul.mubr.bf16.gmra.mxu0 %v6671_v57  ;;  %6396 = vmatprep.subr.bf16.mxu1 %v6803_v10 }
 0x37c   : > { %4234 = vmatmul.mubr.bf16.gmra.mxu1 %v6672_v56  ;;  %5779 = vmatprep.mubr.msk.bf16.mxu0 %vm2910_vm7, %v6674_v22 }
 0x37d   : > { %5815 = vmatprep.mubr.msk.bf16.mxu1 %vm2910_vm7, %v6667_v43  ;;  %4504 = vmatpush2.bf16.msra.mxu0 %v6678_v12 }
 0x37e   : > { %4505 = vmatprep.subr.bf16.mxu0 %v6803_v10  ;;  %6408 = vmatpush2.bf16.msra.mxu1 %v6678_v12 }
 0x37f   : > { %6397 = vmatprep.subr.bf16.mxu1 %v6803_v10 }
 0x381   : > { %4506 = vmatpush2.bf16.msra.mxu0 %v6682_v2 }
 0x382   : > { %6409 = vmatpush2.bf16.msra.mxu1 %v6682_v2  ;;  %4507 = vmatprep.subr.bf16.mxu0 %v6803_v10 }
 0x383   : > { %3977 = vmatmul.mubr.bf16.gmra.mxu0 %v6677_v62  ;;  %6398 = vmatprep.subr.bf16.mxu1 %v6803_v10 }
 0x384   : > { %4242 = vmatmul.mubr.bf16.gmra.mxu1 %v6671_v57  ;;  %5780 = vmatprep.mubr.msk.bf16.mxu0 %vm2910_vm7, %v6679_v30 }
 0x385   : > { %5816 = vmatprep.mubr.msk.bf16.mxu1 %vm2910_vm7, %v6674_v22  ;;  %4508 = vmatpush2.bf16.msra.mxu0 %v6685_v27 }
 0x386   : > { %6410 = vmatpush2.bf16.msra.mxu1 %v6685_v27  ;;  %4509 = vmatprep.subr.bf16.mxu0 %v6803_v10 }
 0x387   : > { %6399 = vmatprep.subr.bf16.mxu1 %v6803_v10 }
 0x389   : > { %4510 = vmatpush2.bf16.msra.mxu0 %v6687_v41 }
 0x38a   : > { %6411 = vmatpush2.bf16.msra.mxu1 %v6687_v41 }
 0x38b   : > { %3985 = vmatmul.mubr.bf16.gmra.mxu0 %v6681_v7 }
 0x38c   : > { %4250 = vmatmul.mubr.bf16.gmra.mxu1 %v6677_v62  ;;  %5781 = vmatprep.mubr.msk.bf16.mxu0 %vm2910_vm7, %v6683_v37 }
 0x38d   : > { %5817 = vmatprep.mubr.msk.bf16.mxu1 %vm2910_vm7, %v6679_v30 }
 0x393   : > { %3993 = vmatmul.mubr.bf16.gmra.mxu0 %v6686_v59 }
 0x394   : > { %4258 = vmatmul.mubr.bf16.gmra.mxu1 %v6681_v7  ;;  %5888 = vmatprep.mubr.msk.bf16.mxu0 %vm2910_vm7, %v8882_v6 }
 0x395   : > { %5892 = vmatprep.mubr.msk.bf16.mxu1 %vm2910_vm7, %v6674_v22 }
 0x39b   : > { %4512 = vmatmul.mubr.bf16.vlgmr.msra.gmra.mxu0 %v8893_v39 }
 0x39c   : > { %4544 = vmatmul.mubr.bf16.vlgmr.msra.gmra.mxu1 %v6677_v62  ;;  %5889 = vmatprep.mubr.msk.bf16.mxu0 %vm2910_vm7, %v8901_v14 }
 0x39d   : > { %5893 = vmatprep.mubr.msk.bf16.mxu1 %vm2910_vm7, %v6679_v30 }
 0x3a3   : > { %4520 = vmatmul.mubr.bf16.gmra.mxu0 %v8914_v34 }
 0x3a4   : > { %4552 = vmatmul.mubr.bf16.gmra.mxu1 %v6681_v7  ;;  %5890 = vmatprep.mubr.msk.bf16.mxu0 %vm2910_vm7, %v8918_v25 }
 0x3a5   : > { %5894 = vmatprep.mubr.msk.bf16.mxu1 %vm2910_vm7, %v6683_v37 }
 0x3ab   : > { %4528 = vmatmul.mubr.bf16.gmra.mxu0 %v8936_v1 }
 0x3ac   : > { %4560 = vmatmul.mubr.bf16.gmra.mxu1 %v6686_v59  ;;  %5891 = vmatprep.mubr.msk.bf16.mxu0 %vm2910_vm7, %v6688_v16 }
 0x3ad   : > { %5895 = vmatprep.mubr.msk.bf16.mxu1 %vm2910_vm7, %v6690_v58 }
 0x3b3   : > { %4536 = vmatmul.mubr.bf16.gmra.mxu0 %v6692_v8 }
 0x3b4   : > { %4568 = vmatmul.mubr.bf16.gmra.mxu1 %v6693_v51 }
 0x41b   : > { %v9007_v24 = vpop.f32.mrf.mxu0  ;;  %v4203_v10 = vpop.f32.mrf.mxu1 }
 0x41d   : > { %v3940_v63 = vpop.f32.mrf.mxu0  ;;  %v4205_v36 = vpop.f32.mrf.mxu1 }
 0x41f   : > { %v9009_v23 = vpop.f32.mrf.mxu0  ;;  %v9011_v0 = vpop.f32.mrf.mxu1 }
 0x421   : > { %v3943_v28 = vpop.f32.mrf.mxu0  ;;  %v4208_v11 = vpop.f32.mrf.mxu1 }
 0x422   : > { %v4204_v28 = vadd.f32 %v4203_v10, %v9007_v24 }
 0x423   : > { %v9013_v13 = vpop.f32.mrf.mxu0 }
 0x424   : > { %v9015_v46 = vpop.f32.mrf.mxu1 }
 0x425   : > { %v3948_v44 = vpop.f32.mrf.mxu0 }
 0x426   : > { %v4213_v55 = vpop.f32.mrf.mxu1 }
 0x427   : > { %v9017_v45 = vpop.f32.mrf.mxu0 }
 0x428   : > { %v9019_v48 = vpop.f32.mrf.mxu1 }
 0x429   : > { %v3951_v32 = vpop.f32.mrf.mxu0 }
 0x42a   : > { %v4216_v42 = vpop.f32.mrf.mxu1 }
 0x42b   : > { %v9021_v21 = vpop.f32.mrf.mxu0 }
 0x42c   : > { %v9023_v18 = vpop.f32.mrf.mxu1 }
 0x42d   : > { %v3956_v49 = vpop.f32.mrf.mxu0 }
 0x42e   : > { %v4221_v61 = vpop.f32.mrf.mxu1 }
 0x42f   : > { %v9025_v15 = vpop.f32.mrf.mxu0 }
 0x430   : > { %v9027_v54 = vpop.f32.mrf.mxu1 }
 0x431   : > { %v3959_v38 = vpop.f32.mrf.mxu0 }
 0x432   : > { %v4224_v20 = vpop.f32.mrf.mxu1  ;;  %v4207_v38 = vadd.f32 %v9011_v0, %v9009_v23 }
 0x433   : > { %v9029_v47 = vpop.f32.mrf.mxu0 }
 0x434   : > { %v9031_v3 = vpop.f32.mrf.mxu1 }
 0x435   : > { %v3964_v4 = vpop.f32.mrf.mxu0 }
 0x436   : > { %v4229_v60 = vpop.f32.mrf.mxu1 }
 0x437   : > { %v9033_v5 = vpop.f32.mrf.mxu0 }
 0x438   : > { %v9035_v17 = vpop.f32.mrf.mxu1 }
 0x439   : > { %v3967_v6 = vpop.f32.mrf.mxu0 }
 0x43a   : > { %v4232_v33 = vpop.f32.mrf.mxu1 }
 0x43b   : > { %v3970_v39 = vpop.f32.mrf.mxu0 }
 0x43c   : > { %v4235_v40 = vpop.f32.mrf.mxu1 }
 0x43d   : > { %v3972_v14 = vpop.f32.mrf.mxu0  ;;  %v4236_v44 = vadd.f32 %v4235_v40, %v3970_v39  ;;  %v4212_v40 = vadd.f32 %v9015_v46, %v9013_v13 }
 0x43e   : > { %v4237_v35 = vpop.f32.mrf.mxu1 }
 0x43f   : > { %v3973_v34 = vpop.f32.mrf.mxu0 }
 0x440   : > { %v4238_v25 = vpop.f32.mrf.mxu1 }
 0x441   : > { %v3975_v19 = vpop.f32.mrf.mxu0  ;;  %v4239_v60 = vadd.f32 %v4238_v25, %v3973_v34 }
 0x442   : > { %v4240_v31 = vpop.f32.mrf.mxu1 }
 0x443   : > { %v3978_v1 = vpop.f32.mrf.mxu0 }
 0x444   : > { %v4243_v43 = vpop.f32.mrf.mxu1 }
 0x445   : > { %v3980_v52 = vpop.f32.mrf.mxu0  ;;  %v4244_v23 = vadd.f32 %v4243_v43, %v3978_v1 }
 0x446   : > { %v4245_v9 = vpop.f32.mrf.mxu1 }
 0x447   : > { %v3981_v26 = vpop.f32.mrf.mxu0 }
 0x448   : > { %v4246_v57 = vpop.f32.mrf.mxu1 }
 0x449   : > { %v3983_v56 = vpop.f32.mrf.mxu0  ;;  %v4247_v13 = vadd.f32 %v4246_v57, %v3981_v26 }
 0x44a   : > { %v4248_v22 = vpop.f32.mrf.mxu1  ;;  %v4215_v56 = vadd.f32 %v9019_v48, %v9017_v45 }
 0x44b   : > { %v3986_v12 = vpop.f32.mrf.mxu0 }
 0x44c   : > { %v4251_v2 = vpop.f32.mrf.mxu1 }
 0x44d   : > { %v3988_v62 = vpop.f32.mrf.mxu0  ;;  %v4252_v48 = vadd.f32 %v4251_v2, %v3986_v12 }
 0x44e   : > { %v4253_v30 = vpop.f32.mrf.mxu1 }
 0x44f   : > { %v9037_v27 = vpop.f32.mrf.mxu0 }
 0x450   : > { %v9039_v41 = vpop.f32.mrf.mxu1 }
 0x451   : > { %v3991_v7 = vpop.f32.mrf.mxu0  ;;  %v4255_v2 = vadd.f32 %v9039_v41, %v9037_v27 }
 0x452   : > { %v4256_v37 = vpop.f32.mrf.mxu1 }
 0x453   : > { %v9041_v59 = vpop.f32.mrf.mxu0 }
 0x454   : > { %v9043_v16 = vpop.f32.mrf.mxu1 }
 0x455   : > { %v3996_v58 = vpop.f32.mrf.mxu0 }
 0x456   : > { %v4261_v8 = vpop.f32.mrf.mxu1  ;;  %v4220_v58 = vadd.f32 %v9023_v18, %v9021_v21  ;;  %v4223_v21 = vadd.f32 %v9027_v54, %v9025_v15 }
 0x457   : > { %v9045_v51 = vpop.f32.mrf.mxu0 }
 0x458   : > { %v9047_v63 = vpop.f32.mrf.mxu1 }
 0x459   : > { %v3999_v36 = vpop.f32.mrf.mxu0 }
 0x45a   : > { %v4264_v11 = vpop.f32.mrf.mxu1 }
 0x45b   : > { %v4513_v55 = vpop.f32.mrf.mxu0 }
 0x45c   : > { %v4576_v32 = vadd.f32 %v4513_v55, %v4204_v28  ;;  %v4545_v42 = vpop.f32.mrf.mxu1 }
 0x45d   : > { %v4584_v49 = vadd.f32 %v4545_v42, %v4236_v44  ;;  %v4515_v61 = vpop.f32.mrf.mxu0 }
 0x45e   : > { %v4598_v20 = vadd.f32 %v8753_v53, %v4576_v32  ;;  %v4547_v4 = vpop.f32.mrf.mxu1 }
 0x45f   : > { %v4606_v6 = vadd.f32 %v8753_v53, %v4584_v49  ;;  %v4516_v33 = vpop.f32.mrf.mxu0 }
 0x460   : > { %6694 = vtanh.f32 %v4598_v20  ;;  %v4577_v14 = vadd.f32 %v4516_v33, %v4207_v38  ;;  %v4548_v24 = vpop.f32.mrf.mxu1 }
 0x461   : > { %6696 = vtanh.f32 %v4606_v6  ;;  %v4585_v10 = vadd.f32 %v4548_v24, %v4239_v60  ;;  %v4518_v39 = vpop.f32.mrf.mxu0  ;;  %v4228_v60 = vadd.f32 %v9031_v3, %v9029_v47  ;;  %v4260_v6 = vadd.f32 %v9043_v16, %v9041_v59 }
 0x462   : > { %v4599_v35 = vadd.f32 %v8753_v53, %v4577_v14  ;;  %v4550_v19 = vpop.f32.mrf.mxu1 }
 0x463   : > { %v4607_v0 = vadd.f32 %v8753_v53, %v4585_v10  ;;  %v4521_v31 = vpop.f32.mrf.mxu0  ;;  %v4263_v19 = vadd.f32 %v9047_v63, %v9045_v51 }
 0x464   : > { %6698 = vtanh.f32 %v4599_v35  ;;  %v4578_v34 = vadd.f32 %v4521_v31, %v4212_v40  ;;  %v4553_v25 = vpop.f32.mrf.mxu1  ;;  %v4231_v35 = vadd.f32 %v9035_v17, %v9033_v5 }
 0x465   : > { %6700 = vtanh.f32 %v4607_v0  ;;  %v4586_v52 = vadd.f32 %v4553_v25, %v4244_v23  ;;  %v4523_v9 = vpop.f32.mrf.mxu0 }
 0x466   : > { %v4600_v22 = vadd.f32 %v8753_v53, %v4578_v34  ;;  %v4555_v62 = vpop.f32.mrf.mxu1 }
 0x467   : > { %v4608_v46 = vadd.f32 %v8753_v53, %v4586_v52  ;;  %v4524_v30 = vpop.f32.mrf.mxu0 }
 0x468   : > { %6702 = vtanh.f32 %v4600_v22  ;;  %v4579_v1 = vadd.f32 %v4524_v30, %v4215_v56  ;;  %v4556_v43 = vpop.f32.mrf.mxu1 }
 0x469   : > { %6704 = vtanh.f32 %v4608_v46  ;;  %v4587_v7 = vadd.f32 %v4556_v43, %v4247_v13  ;;  %v4526_v37 = vpop.f32.mrf.mxu0 }
 0x46a   : > { %v4601_v8 = vadd.f32 %v8753_v53, %v4579_v1  ;;  %v4558_v45 = vpop.f32.mrf.mxu1 }
 0x46b   : > { %v4609_v36 = vadd.f32 %v8753_v53, %v4587_v7  ;;  %v4529_v26 = vpop.f32.mrf.mxu0 }
 0x46c   : > { %6706 = vtanh.f32 %v4601_v8  ;;  %v4580_v57 = vadd.f32 %v4529_v26, %v4220_v58  ;;  %v4561_v28 = vpop.f32.mrf.mxu1 }
 0x46d   : > { %v9066_v11 = vpop.eup %6694  ;;  %6708 = vtanh.f32 %v4609_v36  ;;  %v4588_v44 = vadd.f32 %v4561_v28, %v4252_v48  ;;  %v4531_v55 = vpop.f32.mrf.mxu0 }
 0x46e   : > { %v9068_v32 = vpop.eup %6696  ;;  %4632 = vst [vmem:[%s9074_s6] sm:$0xff] %v9066_v11  ;;  %v4602_v18 = vadd.f32 %v8753_v53, %v4580_v57  ;;  %v4563_v12 = vpop.f32.mrf.mxu1  ;;  %v4670_v13 = vmul.f32 %v9066_v11, %v9066_v11 }
 0x46f   : > { %4640 = vst [vmem:[%s9074_s6 + $0x100] sm:$0xff] %v9068_v32  ;;  %v4610_v42 = vadd.f32 %v8753_v53, %v4588_v44  ;;  %v4532_v15 = vpop.f32.mrf.mxu0 }
 0x470   : > { %6710 = vtanh.f32 %v4602_v18  ;;  %v4581_v54 = vadd.f32 %v4532_v15, %v4223_v21  ;;  %v4564_v49 = vpop.f32.mrf.mxu1 }
 0x471   : > { %v6699_v61 = vpop.eup %6698  ;;  %6712 = vtanh.f32 %v4610_v42  ;;  %v4589_v38 = vadd.f32 %v4564_v49, %v4255_v2  ;;  %v4534_v20 = vpop.f32.mrf.mxu0 }
 0x472   : > { %v9084_v4 = vpop.eup %6700  ;;  %4633 = vst [vmem:[%s9074_s6 + $0x8] sm:$0xff] %v6699_v61  ;;  %v4603_v27 = vadd.f32 %v8753_v53, %v4581_v54  ;;  %v4566_v41 = vpop.f32.mrf.mxu1  ;;  %v4671_v63 = vmul.f32 %v6699_v61, %v6699_v61  ;;  %v4648_v46 = vadd.f32 %v6699_v61, %v9066_v11  ;;  %v4678_v61 = vmul.f32 %v9068_v32, %v9068_v32 }
 0x473   : > { %4641 = vst [vmem:[%s9074_s6 + $0x108] sm:$0xff] %v9084_v4  ;;  %v4611_v33 = vadd.f32 %v8753_v53, %v4589_v38  ;;  %v4537_v14 = vpop.f32.mrf.mxu0 }
 0x474   : > { %6714 = vtanh.f32 %v4603_v27  ;;  %v4582_v24 = vadd.f32 %v4537_v14, %v4228_v60  ;;  %v4569_v10 = vpop.f32.mrf.mxu1  ;;  %v4686_v1 = vadd.f32 %v4671_v63, %v4670_v13  ;;  %v4679_v60 = vmul.f32 %v9084_v4, %v9084_v4 }
 0x475   : > { %v6703_v39 = vpop.eup %6702  ;;  %6716 = vtanh.f32 %v4611_v33  ;;  %v4590_v47 = vadd.f32 %v4569_v10, %v4260_v6  ;;  %v4539_v3 = vpop.f32.mrf.mxu0 }
 0x476   : > { %v9095_v40 = vpop.eup %6704  ;;  %4634 = vst [vmem:[%s9074_s6 + $0x10] sm:$0xff] %v6703_v39  ;;  %v4604_v59 = vadd.f32 %v8753_v53, %v4582_v24  ;;  %v4571_v16 = vpop.f32.mrf.mxu1  ;;  %v4672_v30 = vmul.f32 %v6703_v39, %v6703_v39  ;;  %v4649_v43 = vadd.f32 %v6703_v39, %v4648_v46 }
 0x477   : > { %4642 = vst [vmem:[%s9074_s6 + $0x110] sm:$0xff] %v9095_v40  ;;  %v4612_v23 = vadd.f32 %v8753_v53, %v4590_v47  ;;  %v4540_v0 = vpop.f32.mrf.mxu0  ;;  %v4680_v6 = vmul.f32 %v9095_v40, %v9095_v40 }
 0x478   : > { %6718 = vtanh.f32 %v4604_v59  ;;  %v4583_v31 = vadd.f32 %v4540_v0, %v4231_v35  ;;  %v4572_v34 = vpop.f32.mrf.mxu1  ;;  %v4687_v8 = vadd.f32 %v4686_v1, %v4672_v30 }
 0x479   : > { %v6707_v25 = vpop.eup %6706  ;;  %6720 = vtanh.f32 %v4612_v23  ;;  %v4591_v5 = vadd.f32 %v4572_v34, %v4263_v19  ;;  %v4542_v17 = vpop.f32.mrf.mxu0 }
 0x47a   : > { %v6709_v52 = vpop.eup %6708  ;;  %4635 = vst [vmem:[%s9074_s6 + $0x18] sm:$0xff] %v6707_v25  ;;  %v4605_v9 = vadd.f32 %v8753_v53, %v4583_v31  ;;  %v4574_v56 = vpop.f32.mrf.mxu1  ;;  %v4673_v7 = vmul.f32 %v6707_v25, %v6707_v25  ;;  %v4650_v45 = vadd.f32 %v6707_v25, %v4649_v43 }
 0x47b   : > { %4643 = vst [vmem:[%s9074_s6 + $0x118] sm:$0xff] %v6709_v52  ;;  %v4613_v51 = vadd.f32 %v8753_v53, %v4591_v5  ;;  %v4681_v24 = vmul.f32 %v6709_v52, %v6709_v52 }
 0x47c   : > { %6722 = vtanh.f32 %v4605_v9  ;;  %v4688_v36 = vadd.f32 %v4687_v8, %v4673_v7 }
 0x47d   : > { %v6711_v22 = vpop.eup %6710  ;;  %6724 = vtanh.f32 %v4613_v51 }
 0x47e   : > { %v6713_v62 = vpop.eup %6712  ;;  %4636 = vst [vmem:[%s9074_s6 + $0x20] sm:$0xff] %v6711_v22  ;;  %v4674_v48 = vmul.f32 %v6711_v22, %v6711_v22  ;;  %v4651_v26 = vadd.f32 %v6711_v22, %v4650_v45 }
 0x47f   : > { %4644 = vst [vmem:[%s9074_s6 + $0x120] sm:$0xff] %v6713_v62  ;;  %v4682_v47 = vmul.f32 %v6713_v62, %v6713_v62 }
 0x480   : > { %v4689_v44 = vadd.f32 %v4688_v36, %v4674_v48 }
 0x481   : > { %v6715_v37 = vpop.eup %6714 }
 0x482   : > { %v6717_v58 = vpop.eup %6716  ;;  %4637 = vst [vmem:[%s9074_s6 + $0x28] sm:$0xff] %v6715_v37  ;;  %v4675_v57 = vmul.f32 %v6715_v37, %v6715_v37  ;;  %v4652_v55 = vadd.f32 %v6715_v37, %v4651_v26 }
 0x483   : > { %4645 = vst [vmem:[%s9074_s6 + $0x128] sm:$0xff] %v6717_v58 }
 0x484   : > { %v4690_v18 = vadd.f32 %v4689_v44, %v4675_v57 }
 0x485   : > { %v6719_v28 = vpop.eup %6718 }
 0x486   : > { %v6721_v11 = vpop.eup %6720  ;;  %4638 = vst [vmem:[%s9074_s6 + $0x30] sm:$0xff] %v6719_v28  ;;  %v4676_v21 = vmul.f32 %v6719_v28, %v6719_v28  ;;  %v4653_v12 = vadd.f32 %v6719_v28, %v4652_v55 }
 0x487   : > { %4646 = vst [vmem:[%s9074_s6 + $0x130] sm:$0xff] %v6721_v11  ;;  %v4684_v19 = vmul.f32 %v6721_v11, %v6721_v11 }
 0x488   : > { %v4691_v15 = vadd.f32 %v4690_v18, %v4676_v21 }
 0x489   : > { %v6723_v2 = vpop.eup %6722 }
 0x48a   : > { %v6725_v42 = vpop.eup %6724  ;;  %4639 = vst [vmem:[%s9074_s6 + $0x38] sm:$0xff] %v6723_v2  ;;  %v4654_v54 = vadd.f32 %v6723_v2, %v4653_v12  ;;  %v4677_v49 = vmul.f32 %v6723_v2, %v6723_v2 }
 0x48b   : > { %4647 = vst [vmem:[%s9074_s6 + $0x138] sm:$0xff] %v6725_v42  ;;  %v4685_v31 = vmul.f32 %v6725_v42, %v6725_v42 }
 0x48c   : > { %v4655_v38 = vadd.f32 %v9068_v32, %v4654_v54  ;;  %v4692_v20 = vadd.f32 %v4691_v15, %v4677_v49  ;;  %v4683_v32 = vmul.f32 %v6717_v58, %v6717_v58 }
 0x48e   : > { %v4656_v27 = vadd.f32 %v9084_v4, %v4655_v38  ;;  %v4693_v41 = vadd.f32 %v4692_v20, %v4678_v61 }
 0x490   : > { %v4657_v33 = vadd.f32 %v9095_v40, %v4656_v27  ;;  %v4694_v14 = vadd.f32 %v4693_v41, %v4679_v60 }
 0x492   : > { %v4695_v10 = vadd.f32 %v4694_v14, %v4680_v6  ;;  %v4658_v39 = vadd.f32 %v6709_v52, %v4657_v33 }
 0x494   : > { %v4659_v3 = vadd.f32 %v6713_v62, %v4658_v39  ;;  %v4696_v35 = vadd.f32 %v4695_v10, %v4681_v24 }
 0x496   : > { %v4660_v59 = vadd.f32 %v6717_v58, %v4659_v3  ;;  %v4697_v16 = vadd.f32 %v4696_v35, %v4682_v47 }
 0x498   : > { %v4661_v23 = vadd.f32 %v6721_v11, %v4660_v59  ;;  %v4698_v0 = vadd.f32 %v4697_v16, %v4683_v32 }
 0x49a   : > { %v4662_v4 = vadd.f32 %v6725_v42, %v4661_v23  ;;  %v4699_v34 = vadd.f32 %v4698_v0, %v4684_v19 }
 0x49c   : > { %v4663_v25 = vrot.slane %v4662_v4, 4  ;;  %v4700_v5 = vadd.f32 %v4699_v34, %v4685_v31 }
 0x49e   : > { %v4664_v17 = vadd.f32 %v4663_v25, %v4662_v4  ;;  %v4701_v40 = vrot.slane %v4700_v5, 4 }
 0x4a0   : > { %v4665_v9 = vrot.slane %v4664_v17, 2  ;;  %v4702_v56 = vadd.f32 %v4701_v40, %v4700_v5 }
 0x4a2   : > { %v4666_v51 = vadd.f32 %v4665_v9, %v4664_v17  ;;  %v4703_v52 = vrot.slane %v4702_v56, 2 }
 0x4a4   : > { %v4667_v63 = vrot.slane %v4666_v51, 1  ;;  %v4704_v22 = vadd.f32 %v4703_v52, %v4702_v56 }
 0x4a6   : > { %v4668_v62 = vadd.f32 %v4667_v63, %v4666_v51  ;;  %v4705_v13 = vrot.slane %v4704_v22, 1 }
 0x4a8   : > { %v4669_v46 = vadd.f32 %v6790_v29, %v4668_v62   ;;  %v4706_v30 = vadd.f32 %v4705_v13, %v4704_v22  ;;  %3642 = sbr.rel (!%p3640_p3) target bundleno = 810 (0x32a), region = 170 }
 0x4aa   : > { %v4707_v1 = vadd.f32 %v6786_v50, %v4706_v30   ;;  %v9333_v29 = vmov %v4669_v46  ;;  %v9139_v43 = vmul.f32 (%p3640_p3), 0.001953125, %v4669_v46 }
 0x4ac   : > { %v9332_v50 = vmov %v4707_v1  ;;  %v4709_v7 = vmul.f32 (%p3640_p3), 0.001953125, %v4707_v1  ;;  %v4710_v37 = vmul.f32 (%p3640_p3), %v9139_v43, %v9139_v43 }
 0x4ae   :  { %v4711_v29 = vsub.f32 %v4709_v7, %v4710_v37 }
 0x4b0   :  { %v4712_v58 = vmax.f32 %v4711_v29, 0.0 }
 0x4b2   :  { %v4713_v8 = vadd.f32 1e-05, %v4712_v58 }
 0x4b4   :  { %6726 = vrsqrt.f32 %v4713_v8 }
 0x4c1   :  { %v9143_v45 = vpop.eup %6726 }
 0x4c2 LB: > { %s5898_s5 = sshll.u32 %s6798_s21, 8  ;;  %s5993_s19 = sshll.u32 %s6798_s21, 3  ;;  %s6798_s21 = sphi %s9145_s21, %s4720_s21  }
 0x4c3   : > { %s9151_s25 = scalar_lea.vmem [#allocation6], %s5898_s5  ;;  %s4889_s4 = scalar_lea.vmem %s9263_s7, %s5993_s19 }
 0x4c4   : > { %v4739_v53 = vld [vmem:[%s9151_s25 + $0x80] sm:$0xff]  ;;  %v4740_v48 = vld [vmem:[%s9151_s25 + $0x88] sm:$0xff]  ;;  %v4741_v11 = vld [vmem:[%s9151_s25 + $0x90] sm:$0xff]  ;;  %s4720_s21 = sadd.s32 1, %s6798_s21  }
 0x4c5   : > { %v4723_v50 = vld [vmem:[%s9151_s25] sm:$0xff]  ;;  %v4771_v36 = vsub.f32 %v4739_v53, %v9139_v43  ;;  %v4772_v57 = vsub.f32 %v4740_v48, %v9139_v43  ;;  %v4724_v28 = vld [vmem:[%s9151_s25 + $0x8] sm:$0xff]  ;;  %v4725_v55 = vld [vmem:[%s9151_s25 + $0x10] sm:$0xff]  ;;  %v4773_v12 = vsub.f32 %v4741_v11, %v9139_v43  ;;  %p4717_p4 = scmp.ge.s32.totalorder %s4720_s21, 2  }
 0x4c6   : > { %v4755_v26 = vsub.f32 %v4723_v50, %v9139_v43  ;;  %v4756_v44 = vsub.f32 %v4724_v28, %v9139_v43  ;;  %v4757_v15 = vsub.f32 %v4725_v55, %v9139_v43  ;;  %v4742_v54 = vld [vmem:[%s9151_s25 + $0x98] sm:$0xff]  ;;  %v4743_v27 = vld [vmem:[%s9151_s25 + $0xa0] sm:$0xff]  ;;  %v4744_v10 = vld [vmem:[%s9151_s25 + $0xa8] sm:$0xff] }
 0x4c7   : > { %v4803_v21 = vmul.f32 %v9143_v45, %v4771_v36  ;;  %v4804_v2 = vmul.f32 %v9143_v45, %v4772_v57  ;;  %v4726_v49 = vld [vmem:[%s9151_s25 + $0x18] sm:$0xff]  ;;  %v4774_v61 = vsub.f32 %v4742_v54, %v9139_v43  ;;  %v4805_v38 = vmul.f32 %v9143_v45, %v4773_v12  ;;  %v4727_v41 = vld [vmem:[%s9151_s25 + $0x20] sm:$0xff]  ;;  %v4728_v39 = vld [vmem:[%s9151_s25 + $0x28] sm:$0xff] }
 0x4c8   : > { %v4787_v18 = vmul.f32 %v9143_v45, %v4755_v26  ;;  %v4788_v42 = vmul.f32 %v9143_v45, %v4756_v44  ;;  %v4789_v20 = vmul.f32 %v9143_v45, %v4757_v15  ;;  %v4758_v60 = vsub.f32 %v4726_v49, %v9139_v43  ;;  %v4745_v59 = vld [vmem:[%s9151_s25 + $0xb0] sm:$0xff]  ;;  %v4746_v31 = vld [vmem:[%s9151_s25 + $0xb8] sm:$0xff]  ;;  %v4747_v9 = vld [vmem:[%s9151_s25 + $0xc0] sm:$0xff] }
 0x4c9   : > { %4851 = vxpose.xlu1.b32.start [1/16] (narrow) %v4803_v21, 8  ;;  %v4806_v6 = vmul.f32 %v9143_v45, %v4774_v61  ;;  %v4775_v14 = vsub.f32 %v4743_v27, %v9139_v43  ;;  %v4759_v24 = vsub.f32 %v4727_v41, %v9139_v43  ;;  %v4776_v47 = vsub.f32 %v4744_v10, %v9139_v43  ;;  %v4729_v16 = vld [vmem:[%s9151_s25 + $0x30] sm:$0xff]  ;;  %v4730_v34 = vld [vmem:[%s9151_s25 + $0x38] sm:$0xff]  ;;  %v4731_v56 = vld [vmem:[%s9151_s25 + $0x40] sm:$0xff] }
 0x4ca   : > { %4819 = vxpose.xlu0.b32.start [1/16] (narrow) %v4787_v18, 8  ;;  %v4790_v33 = vmul.f32 %v9143_v45, %v4758_v60  ;;  %v4760_v32 = vsub.f32 %v4728_v39, %v9139_v43  ;;  %v4777_v19 = vsub.f32 %v4745_v59, %v9139_v43  ;;  %v4761_v4 = vsub.f32 %v4729_v16, %v9139_v43  ;;  %v4748_v62 = vld [vmem:[%s9151_s25 + $0xc8] sm:$0xff]  ;;  %v4749_v37 = vld [vmem:[%s9151_s25 + $0xd0] sm:$0xff]  ;;  %v4750_v48 = vld [vmem:[%s9151_s25 + $0xd8] sm:$0xff] }
 0x4cb   : > { %v4807_v3 = vmul.f32 %v9143_v45, %v4775_v14  ;;  %v4791_v35 = vmul.f32 %v9143_v45, %v4759_v24  ;;  %v4808_v23 = vmul.f32 %v9143_v45, %v4776_v47  ;;  %v4778_v25 = vsub.f32 %v4746_v31, %v9139_v43  ;;  %v4732_v13 = vld [vmem:[%s9151_s25 + $0x48] sm:$0xff]  ;;  %v4733_v29 = vld [vmem:[%s9151_s25 + $0x50] sm:$0xff]  ;;  %v4734_v36 = vld [vmem:[%s9151_s25 + $0x58] sm:$0xff] }
 0x4cc   : > { %v4792_v0 = vmul.f32 %v9143_v45, %v4760_v32  ;;  %v4809_v5 = vmul.f32 %v9143_v45, %v4777_v19  ;;  %v4793_v17 = vmul.f32 %v9143_v45, %v4761_v4  ;;  %v4762_v40 = vsub.f32 %v4730_v34, %v9139_v43  ;;  %v4751_v44 = vld [vmem:[%s9151_s25 + $0xe0] sm:$0xff]  ;;  %v4736_v15 = vld [vmem:[%s9151_s25 + $0x68] sm:$0xff]  ;;  %v4737_v60 = vld [vmem:[%s9151_s25 + $0x70] sm:$0xff] }
 0x4cd   : > { %4852 = vxpose.xlu1.b32.cont [2/16] (narrow) %v4804_v2, 8  ;;  %v4810_v51 = vmul.f32 %v9143_v45, %v4778_v25  ;;  %v4779_v63 = vsub.f32 %v4747_v9, %v9139_v43  ;;  %v4763_v22 = vsub.f32 %v4731_v56, %v9139_v43  ;;  %v4780_v46 = vsub.f32 %v4748_v62, %v9139_v43  ;;  %v4735_v55 = vld [vmem:[%s9151_s25 + $0x60] sm:$0xff]  ;;  %v4754_v14 = vld [vmem:[%s9151_s25 + $0xf8] sm:$0xff] }
 0x4ce   : > { %4820 = vxpose.xlu0.b32.cont [2/16] (narrow) %v4788_v42, 8  ;;  %v4794_v52 = vmul.f32 %v9143_v45, %v4762_v40  ;;  %v4764_v7 = vsub.f32 %v4732_v13, %v9139_v43  ;;  %v4781_v58 = vsub.f32 %v4749_v37, %v9139_v43  ;;  %v4765_v50 = vsub.f32 %v4733_v29, %v9139_v43  ;;  %v4752_v42 = vld [vmem:[%s9151_s25 + $0xe8] sm:$0xff]  ;;  %v4738_v24 = vld [vmem:[%s9151_s25 + $0x78] sm:$0xff] }
 0x4cf   : > { %v4811_v30 = vmul.f32 %v9143_v45, %v4779_v63  ;;  %v4795_v1 = vmul.f32 %v9143_v45, %v4763_v22  ;;  %v4812_v8 = vmul.f32 %v9143_v45, %v4780_v46  ;;  %v4782_v26 = vsub.f32 %v4750_v48, %v9139_v43 }
 0x4d0   : > { %v4796_v53 = vmul.f32 %v9143_v45, %v4764_v7  ;;  %v4813_v57 = vmul.f32 %v9143_v45, %v4781_v58  ;;  %v4797_v28 = vmul.f32 %v9143_v45, %v4765_v50  ;;  %v4766_v11 = vsub.f32 %v4734_v36, %v9139_v43 }
 0x4d1   : > { %4853 = vxpose.xlu1.b32.cont [3/16] (narrow) %v4805_v38, 8  ;;  %v4814_v21 = vmul.f32 %v9143_v45, %v4782_v26  ;;  %v4783_v12 = vsub.f32 %v4751_v44, %v9139_v43  ;;  %v4767_v2 = vsub.f32 %v4735_v55, %v9139_v43  ;;  %v4784_v54 = vsub.f32 %v4752_v42, %v9139_v43 }
 0x4d2   : > { %4821 = vxpose.xlu0.b32.cont [3/16] (narrow) %v4789_v20, 8  ;;  %v4798_v18 = vmul.f32 %v9143_v45, %v4766_v11  ;;  %v4768_v38 = vsub.f32 %v4736_v15, %v9139_v43  ;;  %v4753_v20 = vld [vmem:[%s9151_s25 + $0xf0] sm:$0xff]  ;;  %v4786_v10 = vsub.f32 %v4754_v14, %v9139_v43 }
 0x4d3   : > { %v4815_v49 = vmul.f32 %v9143_v45, %v4783_v12  ;;  %v4799_v61 = vmul.f32 %v9143_v45, %v4767_v2  ;;  %v4785_v27 = vsub.f32 %v4753_v20, %v9139_v43  ;;  %v4816_v41 = vmul.f32 %v9143_v45, %v4784_v54 }
 0x4d5   : > { %4854 = vxpose.xlu1.b32.cont [4/16] (narrow) %v4806_v6, 8  ;;  %v4800_v6 = vmul.f32 %v9143_v45, %v4768_v38  ;;  %v4817_v39 = vmul.f32 %v9143_v45, %v4785_v27 }
 0x4d6   : > { %4822 = vxpose.xlu0.b32.cont [4/16] (narrow) %v4790_v33, 8  ;;  %v4769_v33 = vsub.f32 %v4737_v60, %v9139_v43 }
 0x4d8   : > { %v4801_v47 = vmul.f32 %v9143_v45, %v4769_v33 }
 0x4d9   : > { %4855 = vxpose.xlu1.b32.cont [5/16] (narrow) %v4807_v3, 8  ;;  %v4770_v3 = vsub.f32 %v4738_v24, %v9139_v43 }
 0x4da   : > { %4823 = vxpose.xlu0.b32.cont [5/16] (narrow) %v4791_v35, 8  ;;  %v4818_v35 = vmul.f32 %v9143_v45, %v4786_v10 }
 0x4db   : > { %v4802_v32 = vmul.f32 %v9143_v45, %v4770_v3 }
 0x4dd   : > { %4856 = vxpose.xlu1.b32.cont [6/16] (narrow) %v4808_v23, 8 }
 0x4de   : > { %4824 = vxpose.xlu0.b32.cont [6/16] (narrow) %v4792_v0, 8 }
 0x4e1   : > { %4857 = vxpose.xlu1.b32.cont [7/16] (narrow) %v4809_v5, 8 }
 0x4e2   : > { %4825 = vxpose.xlu0.b32.cont [7/16] (narrow) %v4793_v17, 8 }
 0x4e5   : > { %4858 = vxpose.xlu1.b32.cont [8/16] (narrow) %v4810_v51, 8 }
 0x4e6   : > { %4826 = vxpose.xlu0.b32.cont [8/16] (narrow) %v4794_v52, 8 }
 0x4e9   : > { %4859 = vxpose.xlu1.b32.cont [9/16] (narrow) %v4811_v30, 8 }
 0x4ea   : > { %4827 = vxpose.xlu0.b32.cont [9/16] (narrow) %v4795_v1, 8 }
 0x4ed   : > { %4860 = vxpose.xlu1.b32.cont [10/16] (narrow) %v4812_v8, 8 }
 0x4ee   : > { %4828 = vxpose.xlu0.b32.cont [10/16] (narrow) %v4796_v53, 8 }
 0x4f1   : > { %4861 = vxpose.xlu1.b32.cont [11/16] (narrow) %v4813_v57, 8 }
 0x4f2   : > { %4829 = vxpose.xlu0.b32.cont [11/16] (narrow) %v4797_v28, 8 }
 0x4f5   : > { %4862 = vxpose.xlu1.b32.cont [12/16] (narrow) %v4814_v21, 8 }
 0x4f6   : > { %4830 = vxpose.xlu0.b32.cont [12/16] (narrow) %v4798_v18, 8 }
 0x4f9   : > { %4863 = vxpose.xlu1.b32.cont [13/16] (narrow) %v4815_v49, 8 }
 0x4fa   : > { %4831 = vxpose.xlu0.b32.cont [13/16] (narrow) %v4799_v61, 8 }
 0x4fd   : > { %4864 = vxpose.xlu1.b32.cont [14/16] (narrow) %v4816_v41, 8 }
 0x4fe   : > { %4832 = vxpose.xlu0.b32.cont [14/16] (narrow) %v4800_v6, 8 }
 0x501   : > { %4865 = vxpose.xlu1.b32.cont [15/16] (narrow) %v4817_v39, 8 }
 0x502   : > { %4833 = vxpose.xlu0.b32.cont [15/16] (narrow) %v4801_v47, 8 }
 0x505   : > { %4866 = vxpose.xlu1.b32.end [16/16] (narrow) %v4818_v35, 8 }
 0x506   : > { %4834 = vxpose.xlu0.b32.end [16/16] (narrow) %v4802_v32, 8 }
 0x545   : > { %v4867_v59 = vpop.trf.xlu1  ;;  %4719 = sbr.rel (!%p4717_p4) target bundleno = 1218 (0x4c2), region = 181 }
 0x546   : > { %v4835_v16 = vpop.trf.xlu0 }
 0x547   : > { %v4885_v19 = vcombine.low %v4835_v16, %v4867_v59 }
 0x549   : > { %4890 = vst [vmem:[%s4889_s4] sm:$0x77] %v4885_v19 }

</bundles_post_ra>
